<compile_context>
chip_gen: v7x
topology: tpu7x:2x2x1
jax: 0.10.0
libtpu: 0.0.40
codegen_flags: <defaults>
</compile_context>

<pallas_src>
import jax
import jax.numpy as jnp
from jax.experimental import pallas as pl
from jax.experimental.pallas import tpu as pltpu

_IN_FEATURES = 64 * 64   # 4096
_HIDDEN = 1200
_TK = 2048               # K tile for layer 1 (4096 / 2048 = 2 steps)


def _round_up(x, m):
    return (x + m - 1) // m * m


def _fused_mlp_kernel(x_ref, w1_ref, b1_ref, w2_ref, b2_ref, w3_ref, b3_ref,
                      o_ref, acc_ref):
    """Grid = (batch tiles, K tiles of layer 1).  Layer-1 partial products are
    accumulated in f32 in acc_ref; at the last K step, bias+ReLU and layers
    2 and 3 run entirely in VMEM and the result is written to o_ref."""
    k = pl.program_id(1)

    @pl.when(k == 0)
    def _():
        acc_ref[...] = jnp.zeros_like(acc_ref)

    # Layer 1 partial matmul: bf16 operands, f32 accumulation on the MXU.
    acc_ref[...] += jnp.dot(
        x_ref[...], w1_ref[...], preferred_element_type=jnp.float32
    )

    @pl.when(k == pl.num_programs(1) - 1)
    def _():
        h1 = jnp.maximum(acc_ref[...] + b1_ref[...], 0.0)            # (tb, H1) f32
        h2 = jnp.dot(h1.astype(jnp.bfloat16), w2_ref[...],
                     preferred_element_type=jnp.float32) + b2_ref[...]
        h2 = jnp.maximum(h2, 0.0)                                     # (tb, H1) f32
        z = jnp.dot(h2.astype(jnp.bfloat16), w3_ref[...],
                    preferred_element_type=jnp.float32) + b3_ref[...]
        o_ref[...] = z.astype(o_ref.dtype)                            # (tb, OD)


def fused_mlp(x, w1, b1, w2, b2, w3, b3, *, tb, tk=_TK):
    """x: (Bp, 4096) bf16; w*: bf16 (in, out) padded; b*: f32 (1, out) padded.
    All dims already padded: Bp % tb == 0, tb % 16 == 0, out dims % 128 == 0,
    K % tk == 0.  Returns (Bp, OD) f32."""
    Bp, K = x.shape
    H1 = w1.shape[1]
    OD = w3.shape[1]
    assert K % tk == 0 and Bp % tb == 0
    nb = Bp // tb
    nk = K // tk

    return pl.pallas_call(
        _fused_mlp_kernel,
        out_shape=jax.ShapeDtypeStruct((Bp, OD), jnp.float32),
        grid_spec=pltpu.PrefetchScalarGridSpec(
            num_scalar_prefetch=0,
            grid=(nb, nk),
            in_specs=[
                pl.BlockSpec((tb, tk), lambda b, k: (b, k)),   # x tile
                pl.BlockSpec((tk, H1), lambda b, k: (k, 0)),   # w1 tile (streamed)
                pl.BlockSpec((1, H1), lambda b, k: (0, 0)),    # b1 (resident)
                pl.BlockSpec((H1, H1), lambda b, k: (0, 0)),   # w2 (resident)
                pl.BlockSpec((1, H1), lambda b, k: (0, 0)),    # b2 (resident)
                pl.BlockSpec((H1, OD), lambda b, k: (0, 0)),   # w3 (resident)
                pl.BlockSpec((1, OD), lambda b, k: (0, 0)),    # b3 (resident)
            ],
            out_specs=pl.BlockSpec((tb, OD), lambda b, k: (b, 0)),
            scratch_shapes=[pltpu.VMEM((tb, H1), jnp.float32)],
        ),
        compiler_params=pltpu.CompilerParams(
            # Batch axis is independent -> "parallel" (megacore-shardable on
            # v7x); K axis carries the layer-1 accumulator -> "arbitrary".
            dimension_semantics=("parallel", "arbitrary"),
            vmem_limit_bytes=32 << 20,
        ),
    )(x, w1, b1, w2, b2, w3, b3)


def init_params(key, output_dim):
    """Deterministic synthetic parameters (PyTorch-style uniform fan-in init).
    Weights kept in (in, out) layout (transposed vs. nn.Linear.weight), f32
    masters."""
    ks = jax.random.split(key, 6)

    def lin(kw, kb, fan_in, fan_out):
        bound = 1.0 / jnp.sqrt(fan_in)
        w = jax.random.uniform(kw, (fan_in, fan_out), jnp.float32, -bound, bound)
        b = jax.random.uniform(kb, (fan_out,), jnp.float32, -bound, bound)
        return w, b

    w1, b1 = lin(ks[0], ks[1], _IN_FEATURES, _HIDDEN)
    w2, b2 = lin(ks[2], ks[3], _HIDDEN, _HIDDEN)
    w3, b3 = lin(ks[4], ks[5], _HIDDEN, output_dim)
    return dict(w1=w1, b1=b1, w2=w2, b2=b2, w3=w3, b3=b3)


def prepare_params(params, output_dim):
    """ONE-TIME kernel-side parameter prep: pad to TPU-friendly shapes and cast
    weights to bf16.  Zero-padding is exact (padded rows/cols/biases are zero,
    relu(0) == 0, and the final slice discards padded lanes).  Call this once;
    do NOT call it per forward pass."""
    H1 = _round_up(_HIDDEN, 128)          # 1280
    OD = _round_up(output_dim, 128)       # e.g. 128

    w1 = jnp.pad(params["w1"].astype(jnp.bfloat16), ((0, 0), (0, H1 - _HIDDEN)))
    b1 = jnp.pad(params["b1"].astype(jnp.float32),
                 (0, H1 - _HIDDEN)).reshape(1, H1)
    w2 = jnp.pad(params["w2"].astype(jnp.bfloat16),
                 ((0, H1 - _HIDDEN), (0, H1 - _HIDDEN)))
    b2 = jnp.pad(params["b2"].astype(jnp.float32),
                 (0, H1 - _HIDDEN)).reshape(1, H1)
    w3 = jnp.pad(params["w3"].astype(jnp.bfloat16),
                 ((0, H1 - _HIDDEN), (0, OD - output_dim)))
    b3 = jnp.pad(params["b3"].astype(jnp.float32),
                 (0, OD - output_dim)).reshape(1, OD)

    prepped = dict(w1=w1, b1=b1, w2=w2, b2=b2, w3=w3, b3=b3,
                   output_dim=output_dim)
    # Materialize once so no per-call lazy work remains.
    return jax.tree_util.tree_map(
        lambda a: jax.block_until_ready(a) if hasattr(a, "block_until_ready") else a,
        prepped)


def mlp_encoder_forward(x, prepped):
    """x: any shape whose per-sample size is exactly 64*64 = 4096
    (e.g. NCHW (B, 1, 64, 64)).  Returns z: (B, output_dim) float32."""
    output_dim = prepped["output_dim"]
    B = x.shape[0]
    per_sample = 1
    for d in x.shape[1:]:
        per_sample *= d
    if per_sample != _IN_FEATURES:
        raise ValueError(
            f"MLPEncoder expects {_IN_FEATURES} elements per sample "
            f"(got shape {x.shape}); view(-1, 4096) would not preserve batch.")

    h = x.reshape(B, _IN_FEATURES)  # == view(-1, 64*64) given the check above

    # Pad only the (tiny) activation.  Batch tile <= 128 rows bounds vreg/VMEM
    # pressure for large B and feeds the "parallel" megacore axis on v7x.
    tb = min(128, _round_up(max(B, 1), 16))   # bf16 sublane packing -> mult of 16
    Bp = _round_up(max(B, 1), tb)
    h = jnp.pad(h.astype(jnp.float32), ((0, Bp - B), (0, 0))).astype(jnp.bfloat16)

    z = fused_mlp(h, prepped["w1"], prepped["b1"], prepped["w2"], prepped["b2"],
                  prepped["w3"], prepped["b3"], tb=tb, tk=_TK)  # (Bp, OD) f32
    return z[:B, :output_dim]


def reference_forward_f32(x, params, output_dim):
    B = x.shape[0]
    h = x.reshape(-1, _IN_FEATURES).astype(jnp.float32)
    h = jnp.maximum(h @ params["w1"] + params["b1"], 0.0)
    h = jnp.maximum(h @ params["w2"] + params["b2"], 0.0)
    h = h @ params["w3"] + params["b3"]
    return h.reshape(B, output_dim)


def reference_forward_bf16(x, params, output_dim):
    """Same numerics as the kernel: bf16 matmul operands, f32 accumulation."""
    B = x.shape[0]

    def mm(a, w):
        return jnp.dot(a.astype(jnp.bfloat16), w.astype(jnp.bfloat16),
                       preferred_element_type=jnp.float32)

    h = x.reshape(-1, _IN_FEATURES).astype(jnp.float32)
    h = jnp.maximum(mm(h, params["w1"]) + params["b1"], 0.0)
    h = jnp.maximum(mm(h, params["w2"]) + params["b2"], 0.0)
    h = mm(h, params["w3"]) + params["b3"]
    return h.reshape(B, output_dim)


if __name__ == "__main__":
    output_dim = 32
    key = jax.random.PRNGKey(0)
    kx, kp = jax.random.split(key)

    # NCHW input, flattens to (B, 64*64) = (B, 4096) per sample.
    x = jax.random.normal(kx, (2, 1, 64, 64), dtype=jnp.float32)
    params = init_params(kp, output_dim)

    # One-time weight prep (padding + bf16 cast) -- NOT on the per-call path.
    prepped = prepare_params(params, output_dim)

    z = mlp_encoder_forward(x, prepped)
    z = jax.block_until_ready(z)
    assert z.shape == (2, output_dim), z.shape

    # Tight check against a bf16-operand / f32-accumulate reference
    # (matches the kernel's numerics).
    z_ref_bf16 = reference_forward_bf16(x, params, output_dim)
    assert jnp.allclose(z, z_ref_bf16, atol=1e-2, rtol=1e-2), (
        float(jnp.max(jnp.abs(z - z_ref_bf16)))
    )

    # Loose sanity check against the full-precision f32 reference.
    z_ref_f32 = reference_forward_f32(x, params, output_dim)
    assert jnp.allclose(z, z_ref_f32, atol=5e-2, rtol=5e-2), (
        float(jnp.max(jnp.abs(z - z_ref_f32)))
    )

    print("KERNEL_OK")
</pallas_src>

<mosaic_0001>
module attributes {stable_mosaic.version = 11 : i64} {
  func.func @_fused_mlp_kernel(%arg0: i32, %arg1: i32, %arg2: memref<16x2048xbf16, #tpu.memory_space<vmem>>, %arg3: memref<2048x1280xbf16, #tpu.memory_space<vmem>>, %arg4: memref<1x1280xf32, #tpu.memory_space<vmem>>, %arg5: memref<1280x1280xbf16, #tpu.memory_space<vmem>>, %arg6: memref<1x1280xf32, #tpu.memory_space<vmem>>, %arg7: memref<1280x128xbf16, #tpu.memory_space<vmem>>, %arg8: memref<1x128xf32, #tpu.memory_space<vmem>>, %arg9: memref<16x128xf32, #tpu.memory_space<vmem>>, %arg10: memref<16x1280xf32, #tpu.memory_space<vmem>>) attributes {dimension_semantics = [#tpu.dimension_semantics<parallel>, #tpu.dimension_semantics<arbitrary>], iteration_bounds = array<i64: 1, 2>, scalar_prefetch = 0 : i64, scratch_operands = 1 : i64, tpu.core_type = #tpu.core_type<tc>, window_params = [{transform_indices = @transform_0, window_bounds = array<i64: 16, 2048>}, {transform_indices = @transform_1, window_bounds = array<i64: 2048, 1280>}, {pipeline_mode = #tpu.pipeline_mode<synchronous>, transform_indices = @transform_2, window_bounds = array<i64: 1, 1280>}, {pipeline_mode = #tpu.pipeline_mode<synchronous>, transform_indices = @transform_3, window_bounds = array<i64: 1280, 1280>}, {pipeline_mode = #tpu.pipeline_mode<synchronous>, transform_indices = @transform_4, window_bounds = array<i64: 1, 1280>}, {pipeline_mode = #tpu.pipeline_mode<synchronous>, transform_indices = @transform_5, window_bounds = array<i64: 1280, 128>}, {pipeline_mode = #tpu.pipeline_mode<synchronous>, transform_indices = @transform_6, window_bounds = array<i64: 1, 128>}, {transform_indices = @transform_7, window_bounds = array<i64: 16, 128>}]} {
    %c0_i32 = arith.constant 0 : i32
    %0 = arith.cmpi eq, %arg1, %c0_i32 : i32
    %1 = arith.extui %0 : i1 to i32
    %c0_i32_0 = arith.constant 0 : i32
    %2 = arith.cmpi ne, %1, %c0_i32_0 : i32
    scf.if %2 {
      %cst_9 = arith.constant 0.000000e+00 : f32
      %12 = vector.broadcast %cst_9 : f32 to vector<16x1280xf32>
      %c0_10 = arith.constant 0 : index
      %c0_11 = arith.constant 0 : index
      %13 = vector.load %arg10[%c0_10, %c0_11] : memref<16x1280xf32, #tpu.memory_space<vmem>>, vector<16x1280xf32>
      tpu.vector_store %arg10[%c0_10, %c0_11], %12 {strides = array<i32>} : memref<16x1280xf32, #tpu.memory_space<vmem>>, vector<16x1280xf32>,
    } else {
    }
    %c0 = arith.constant 0 : index
    %c0_1 = arith.constant 0 : index
    %3 = vector.load %arg10[%c0, %c0_1] : memref<16x1280xf32, #tpu.memory_space<vmem>>, vector<16x1280xf32>
    %c0_2 = arith.constant 0 : index
    %c0_3 = arith.constant 0 : index
    %4 = vector.load %arg2[%c0_2, %c0_3] : memref<16x2048xbf16, #tpu.memory_space<vmem>>, vector<16x2048xbf16>
    %c0_4 = arith.constant 0 : index
    %c0_5 = arith.constant 0 : index
    %5 = vector.load %arg3[%c0_4, %c0_5] : memref<2048x1280xbf16, #tpu.memory_space<vmem>>, vector<2048x1280xbf16>
    %cst = arith.constant dense<0.000000e+00> : vector<16x1280xf32>
    %6 = tpu.matmul %4, %5, %cst {dimension_numbers = #tpu.dot_dimension_numbers<[1], [0], [0], [1], [0, 0, 1, 1], [], []>} : vector<16x2048xbf16>, vector<2048x1280xbf16>, vector<16x1280xf32> -> vector<16x1280xf32>
    %7 = arith.addf %3, %6 : vector<16x1280xf32>
    %c0_6 = arith.constant 0 : index
    %c0_7 = arith.constant 0 : index
    %8 = vector.load %arg10[%c0_6, %c0_7] : memref<16x1280xf32, #tpu.memory_space<vmem>>, vector<16x1280xf32>
    tpu.vector_store %arg10[%c0_6, %c0_7], %7 {strides = array<i32>} : memref<16x1280xf32, #tpu.memory_space<vmem>>, vector<16x1280xf32>,
    %c1_i32 = arith.constant 1 : i32
    %9 = arith.cmpi eq, %arg1, %c1_i32 : i32
    %10 = arith.extui %9 : i1 to i32
    %c0_i32_8 = arith.constant 0 : i32
    %11 = arith.cmpi ne, %10, %c0_i32_8 : i32
    scf.if %11 {
      %c0_9 = arith.constant 0 : index
      %c0_10 = arith.constant 0 : index
      %12 = vector.load %arg10[%c0_9, %c0_10] : memref<16x1280xf32, #tpu.memory_space<vmem>>, vector<16x1280xf32>
      %c0_11 = arith.constant 0 : index
      %c0_12 = arith.constant 0 : index
      %13 = vector.load %arg4[%c0_11, %c0_12] : memref<1x1280xf32, #tpu.memory_space<vmem>>, vector<1x1280xf32>
      %14 = vector.broadcast %13 : vector<1x1280xf32> to vector<16x1280xf32>
      %15 = arith.addf %12, %14 : vector<16x1280xf32>
      %cst_13 = arith.constant 0.000000e+00 : f32
      %16 = vector.broadcast %cst_13 : f32 to vector<16x1280xf32>
      %17 = arith.maximumf %15, %16 : vector<16x1280xf32>
      %18 = arith.truncf %17 : vector<16x1280xf32> to vector<16x1280xbf16>
      %c0_14 = arith.constant 0 : index
      %c0_15 = arith.constant 0 : index
      %19 = vector.load %arg5[%c0_14, %c0_15] : memref<1280x1280xbf16, #tpu.memory_space<vmem>>, vector<1280x1280xbf16>
      %cst_16 = arith.constant dense<0.000000e+00> : vector<16x1280xf32>
      %20 = tpu.matmul %18, %19, %cst_16 {dimension_numbers = #tpu.dot_dimension_numbers<[1], [0], [0], [1], [0, 0, 1, 1], [], []>} : vector<16x1280xbf16>, vector<1280x1280xbf16>, vector<16x1280xf32> -> vector<16x1280xf32>
      %c0_17 = arith.constant 0 : index
      %c0_18 = arith.constant 0 : index
      %21 = vector.load %arg6[%c0_17, %c0_18] : memref<1x1280xf32, #tpu.memory_space<vmem>>, vector<1x1280xf32>
      %22 = vector.broadcast %21 : vector<1x1280xf32> to vector<16x1280xf32>
      %23 = arith.addf %20, %22 : vector<16x1280xf32>
      %cst_19 = arith.constant 0.000000e+00 : f32
      %24 = vector.broadcast %cst_19 : f32 to vector<16x1280xf32>
      %25 = arith.maximumf %23, %24 : vector<16x1280xf32>
      %26 = arith.truncf %25 : vector<16x1280xf32> to vector<16x1280xbf16>
      %c0_20 = arith.constant 0 : index
      %c0_21 = arith.constant 0 : index
      %27 = vector.load %arg7[%c0_20, %c0_21] : memref<1280x128xbf16, #tpu.memory_space<vmem>>, vector<1280x128xbf16>
      %cst_22 = arith.constant dense<0.000000e+00> : vector<16x128xf32>
      %28 = tpu.matmul %26, %27, %cst_22 {dimension_numbers = #tpu.dot_dimension_numbers<[1], [0], [0], [1], [0, 0, 1, 1], [], []>} : vector<16x1280xbf16>, vector<1280x128xbf16>, vector<16x128xf32> -> vector<16x128xf32>
      %c0_23 = arith.constant 0 : index
      %c0_24 = arith.constant 0 : index
      %29 = vector.load %arg8[%c0_23, %c0_24] : memref<1x128xf32, #tpu.memory_space<vmem>>, vector<1x128xf32>
      %30 = vector.broadcast %29 : vector<1x128xf32> to vector<16x128xf32>
      %31 = arith.addf %28, %30 : vector<16x128xf32>
      %c0_25 = arith.constant 0 : index
      %c0_26 = arith.constant 0 : index
      %32 = vector.load %arg9[%c0_25, %c0_26] : memref<16x128xf32, #tpu.memory_space<vmem>>, vector<16x128xf32>
      tpu.vector_store %arg9[%c0_25, %c0_26], %31 {strides = array<i32>} : memref<16x128xf32, #tpu.memory_space<vmem>>, vector<16x128xf32>,
    } else {
    }
    return
  }
  func.func @transform_0(%arg0: i32, %arg1: i32) -> (i32, i32) {
    %c0_i32 = arith.constant 0 : i32
    return %arg0, %arg1 : i32, i32
  }
  func.func @transform_1(%arg0: i32, %arg1: i32) -> (i32, i32) {
    %c0_i32 = arith.constant 0 : i32
    %c0_i32_0 = arith.constant 0 : i32
    return %arg1, %c0_i32 : i32, i32
  }
  func.func @transform_2(%arg0: i32, %arg1: i32) -> (i32, i32) {
    %c0_i32 = arith.constant 0 : i32
    %c0_i32_0 = arith.constant 0 : i32
    %c0_i32_1 = arith.constant 0 : i32
    return %c0_i32, %c0_i32_0 : i32, i32
  }
  func.func @transform_3(%arg0: i32, %arg1: i32) -> (i32, i32) {
    %c0_i32 = arith.constant 0 : i32
    %c0_i32_0 = arith.constant 0 : i32
    %c0_i32_1 = arith.constant 0 : i32
    return %c0_i32, %c0_i32_0 : i32, i32
  }
  func.func @transform_4(%arg0: i32, %arg1: i32) -> (i32, i32) {
    %c0_i32 = arith.constant 0 : i32
    %c0_i32_0 = arith.constant 0 : i32
    %c0_i32_1 = arith.constant 0 : i32
    return %c0_i32, %c0_i32_0 : i32, i32
  }
  func.func @transform_5(%arg0: i32, %arg1: i32) -> (i32, i32) {
    %c0_i32 = arith.constant 0 : i32
    %c0_i32_0 = arith.constant 0 : i32
    %c0_i32_1 = arith.constant 0 : i32
    return %c0_i32, %c0_i32_0 : i32, i32
  }
  func.func @transform_6(%arg0: i32, %arg1: i32) -> (i32, i32) {
    %c0_i32 = arith.constant 0 : i32
    %c0_i32_0 = arith.constant 0 : i32
    %c0_i32_1 = arith.constant 0 : i32
    return %c0_i32, %c0_i32_0 : i32, i32
  }
  func.func @transform_7(%arg0: i32, %arg1: i32) -> (i32, i32) {
    %c0_i32 = arith.constant 0 : i32
    %c0_i32_0 = arith.constant 0 : i32
    return %arg0, %c0_i32 : i32, i32
  }
}

</mosaic_0001>

<bundles_post_ra>
// kernel: tpu_custom_call.1
= control target key start
LH: loop header
LB: loop body
LE: loop exit
PB: predicated region body
PF: predicated region fallthrough
CT: control target
= control target key end

     0   :  { %s25285_s0 = inlined_call_operand.hbm [shape: bf16[16,4096], index: 0, kind: input, shape index: {}]   ;;  %s25286_s1 = inlined_call_operand.hbm [shape: bf16[4096,1280], index: 1, kind: input, shape index: {}]   ;;  %s25287_s2 = inlined_call_operand.hbm [shape: f32[1,1280], index: 2, kind: input, shape index: {}]   ;;  %s25288_s3 = inlined_call_operand.hbm [shape: bf16[1280,1280], index: 3, kind: input, shape index: {}]   ;;  %s25289_s4 = inlined_call_operand.hbm [shape: f32[1,1280], index: 4, kind: input, shape index: {}]   ;;  %s25290_s5 = inlined_call_operand.hbm [shape: bf16[1280,128], index: 5, kind: input, shape index: {}]   ;;  %s25291_s6 = inlined_call_operand.hbm [shape: f32[1,128], index: 6, kind: input, shape index: {}]   ;;  %s25292_s7 = inlined_call_operand.hbm [shape: f32[16,128], index: 7, kind: output, shape index: {}]  }
   0x1   :  { %25299 = sst [smem:[#allocation22_spill]] %s25285_s0 }
   0x2   :  { %25300 = sst [smem:[#allocation23_spill]] %s25287_s2 }
   0x3   :  { %25301 = sst [smem:[#allocation24_spill]] %s25288_s3 }
   0x4   :  { %25302 = sst [smem:[#allocation25_spill]] %s25289_s4 }
   0x5   :  { %25303 = sst [smem:[#allocation26_spill]] %s25292_s7 }
   0x6   :  { %12 = vsyncpa [#allocation4], 0 }
   0x7   :  { %14 = vsyncpa [#allocation4 + $0x1], 0 }
   0x8   :  { %15 = vsyncpa [#allocation7], 0 }
   0x9   :  { %17 = vsyncpa [#allocation7 + $0x1], 0 }
   0xa   :  { %18 = vsyncpa [#allocation10], 0 }
   0xb   :  { %19 = vsyncpa [#allocation13], 0 }
   0xc   :  { %20 = vsyncpa [#allocation5], 0  ;;  %s23328_s24 = smov 0   ;;  %s23330_s25 = smov 0  }
   0xd   :  { %s23332_s26 = smov 0   ;;  %s23334_s27 = smov 0  }
   0xe   :  { %s23336_s28 = smov 0   ;;  %s23338_s29 = smov 0  }
   0xf LB: > { %s23357_s30 = sadd.s32 4294967295, %s23269_s29   ;;  %p60_p0 = scmp.ne.s32.totalorder %s23253_s25, %s23249_s24  ;;  %s23269_s29 = sphi %s23338_s29, %s26_s29   ;;  %s23265_s28 = sphi %s23336_s28, %s25328_s28   ;;  %s23261_s27 = sphi %s23334_s27, %s25327_s27   ;;  %s23257_s26 = sphi %s23332_s26, %s25326_s26   ;;  %s23253_s25 = sphi %s23330_s25, %s25325_s25   ;;  %s23249_s24 = sphi %s23328_s24, %s25324_s24  }
  0x10   : > { %p25293_p1 = scmp.eq.s32.totalorder %s23357_s30, 0  ;;  %p17087_p2 = scmp.ge.s32.totalorder %s23269_s29, 1 }
  0x11   : > { %p228_p3 = scmp.lt.s32.totalorder %s23269_s29, 3  ;;  %s23271_s10 = smov [#allocation8]  }
  0x12   : > { %p23365_p4 = por %p25293_p1, %p60_p0  ;;  %s241_s11 = sshll.u32 %s23271_s10, 4  ;;  %s242_s11 = int_to_ptr.vmem [resolvable:$true] %s241_s11 }
  0x13   : > { %p23369_p5 = pnand %p17087_p2, %p228_p3  ;;  %s23272_s12 = smov [#allocation9]  }
  0x14   : > { %s25304_s8 = scalar_select %p23365_p4, 1, 0 }
  0x15   : > { %s25305_s9 = scalar_select %p23369_p5, 1, 0 }
  0x16   : > { %p19672_p6 = pneg %p23369_p5  ;;  %s251_s13 = sshll.u32 %s23272_s12, 4  ;;  %s23381_s13 = int_to_ptr.vmem [resolvable:$true] %s251_s13 }
  0x17   : > { %s23273_s15 = smov [#allocation12]   ;;  %s25307_s2 = sld [smem:[#allocation23_spill]] }
  0x18   : > { %p23377_p7 = pnand %p19672_p6, %p25293_p1  ;;  %s23383_s16 = sshll.u32 %s23273_s15, 4  ;;  %s276_s16 = int_to_ptr.vmem [resolvable:$true] %s23383_s16 }
  0x1a   : > { %p23393_p9 = pneg %p23377_p7 }
  0x1d   : > { %s22973_s19 = scalar_lea.hbm %s25307_s2, 160 }
  0x1e   : > { %p22974_p8 = scmp.ne.s32.totalorder %s25307_s2, %s22973_s19  ;;  %p22980_p12 = scmp.lt.u32.totalorder %s22973_s19, %s25307_s2 }
  0x20   : > { %p22976_p10 = pnand %p23393_p9, %p22974_p8 }
  0x22   : > { %p22977_p11 = pneg %p22976_p10 }
  0x24   : > { %p22982_p13 = pnand %p22980_p12, %p22977_p11 }
  0x26   : > { %22985 = shalt.err (!%p22982_p13)
}
  0x27   : > { %s22986_s10 = scalar_lea.vmem %s242_s11, 160  ;;  %p22994_p6 = scmp.lt.s32.totalorder %s242_s11, %s242_s11 }
  0x28   : > { %p22987_p0 = scmp.ne.s32.totalorder %s242_s11, %s22986_s10  ;;  %p22995_p1 = scmp.lt.s32.totalorder %s22986_s10, %s22986_s10 }
  0x2a   : > { %p22989_p2 = pnand %p22987_p0, %p23393_p9  ;;  %p22996_p4 = por %p22995_p1, %p22994_p6 }
  0x2c   : > { %p22990_p3 = pneg %p22989_p2 }
  0x2e   : > { %p22997_p5 = pnand %p22996_p4, %p22990_p3 }
  0x30   : > { %23000 = shalt.err (!%p22997_p5)
}
  0x31   : > { %19675 = dma.hbm_to_vmem [thread:$0]  (!%p23377_p7), %s25307_s2, 160, %s242_s11, [#allocation7]  }
  0x32   : > { %s25309_s3 = sld [smem:[#allocation24_spill]] }
  0x38   : > { %s23001_s19 = scalar_lea.hbm %s25309_s3, 102400 }
  0x39   : > { %p23002_p8 = scmp.ne.s32.totalorder %s25309_s3, %s23001_s19  ;;  %p23008_p4 = scmp.lt.u32.totalorder %s23001_s19, %s25309_s3 }
  0x3b   : > { %p23004_p10 = pnand %p23002_p8, %p23393_p9 }
  0x3d   : > { %p23005_p1 = pneg %p23004_p10 }
  0x3f   : > { %p23010_p5 = pnand %p23008_p4, %p23005_p1 }
  0x41   : > { %23013 = shalt.err (!%p23010_p5)
}
  0x42   : > { %s23014_s11 = scalar_lea.vmem %s23381_s13, 102400  ;;  %p23022_p0 = scmp.lt.s32.totalorder %s23381_s13, %s23381_s13 }
  0x43   : > { %p23015_p11 = scmp.ne.s32.totalorder %s23381_s13, %s23014_s11  ;;  %p23023_p2 = scmp.lt.s32.totalorder %s23014_s11, %s23014_s11 }
  0x45   : > { %p23017_p12 = pnand %p23015_p11, %p23393_p9  ;;  %p23024_p3 = por %p23023_p2, %p23022_p0 }
  0x47   : > { %p23018_p13 = pneg %p23017_p12 }
  0x49   : > { %p23025_p6 = pnand %p23024_p3, %p23018_p13 }
  0x4b   : > { %23028 = shalt.err (!%p23025_p6)
}
  0x4c   : > { %s25296_s10 = smov 640   ;;  %s25297_s12 = smov 40  }
  0x4d   : > { %19678 = dma.hbm_to_vmem [thread:$0]  (!%p23377_p7), %s25309_s3, 102400, %s23381_s13, [#allocation10], %s25296_s10, %s25296_s10, %s25297_s12  }
  0x4e   : > { %s23029_s20 = scalar_lea.hbm %s25290_s5, 10240 }
  0x4f   : > { %p23030_p8 = scmp.ne.s32.totalorder %s25290_s5, %s23029_s20  ;;  %p23036_p4 = scmp.lt.u32.totalorder %s23029_s20, %s25290_s5 }
  0x51   : > { %p23032_p10 = pnand %p23030_p8, %p23393_p9 }
  0x53   : > { %p23033_p1 = pneg %p23032_p10 }
  0x55   : > { %p23038_p5 = pnand %p23036_p4, %p23033_p1 }
  0x57   : > { %23041 = shalt.err (!%p23038_p5)
}
  0x58   : > { %s23042_s15 = scalar_lea.vmem %s276_s16, 10240  ;;  %p23050_p0 = scmp.lt.s32.totalorder %s276_s16, %s276_s16 }
  0x59   : > { %p23043_p11 = scmp.ne.s32.totalorder %s276_s16, %s23042_s15  ;;  %p23051_p2 = scmp.lt.s32.totalorder %s23042_s15, %s23042_s15 }
  0x5b   : > { %p23045_p12 = pnand %p23043_p11, %p23393_p9  ;;  %p23052_p3 = por %p23051_p2, %p23050_p0 }
  0x5d   : > { %p23046_p13 = pneg %p23045_p12 }
  0x5f   : > { %p23053_p6 = pnand %p23052_p3, %p23046_p13 }
  0x61   : > { %23056 = shalt.err (!%p23053_p6)
}
  0x62   : > { %s23276_s13 = smov 64   ;;  %s23277_s17 = smov 4  }
  0x63   : > { %19684 = dma.hbm_to_vmem [thread:$0]  (!%p23377_p7), %s25290_s5, 10240, %s276_s16, [#allocation13], %s23276_s13, %s23276_s13, %s23277_s17  }
  0x64   : > { %s23278_s20 = smov [#allocation11]   ;;  %s23279_s23 = smov [#allocation14]  }
  0x65   : > { %s265_s21 = sshll.u32 %s23278_s20, 4  ;;  %s289_s24 = sshll.u32 %s23279_s23, 4  ;;  %s266_s21 = int_to_ptr.vmem [resolvable:$true] %s265_s21  ;;  %s290_s24 = int_to_ptr.vmem [resolvable:$true] %s289_s24 }
  0x66   : > { %s25310_s4 = sld [smem:[#allocation25_spill]] }
  0x6c   : > { %s23057_s10 = scalar_lea.hbm %s25310_s4, 160 }
  0x6d   : > { %p23058_p8 = scmp.ne.s32.totalorder %s25310_s4, %s23057_s10  ;;  %p23064_p4 = scmp.lt.u32.totalorder %s23057_s10, %s25310_s4 }
  0x6f   : > { %p23060_p10 = pnand %p23058_p8, %p23393_p9 }
  0x71   : > { %p23061_p1 = pneg %p23060_p10 }
  0x73   : > { %p23066_p5 = pnand %p23064_p4, %p23061_p1 }
  0x75   : > { %23069 = shalt.err (!%p23066_p5)
}
  0x76   : > { %s23070_s16 = scalar_lea.vmem %s266_s21, 160  ;;  %p23078_p0 = scmp.lt.s32.totalorder %s266_s21, %s266_s21 }
  0x77   : > { %p23071_p11 = scmp.ne.s32.totalorder %s266_s21, %s23070_s16  ;;  %p23079_p2 = scmp.lt.s32.totalorder %s23070_s16, %s23070_s16 }
  0x79   : > { %p23073_p12 = pnand %p23071_p11, %p23393_p9  ;;  %p23080_p3 = por %p23079_p2, %p23078_p0 }
  0x7b   : > { %p23074_p13 = pneg %p23073_p12 }
  0x7d   : > { %p23081_p6 = pnand %p23080_p3, %p23074_p13 }
  0x7f   : > { %23084 = shalt.err (!%p23081_p6)
}
  0x80   : > { %19681 = dma.hbm_to_vmem [thread:$0]  (!%p23377_p7), %s25310_s4, 160, %s266_s21, [#allocation10]  }
  0x81   : > { %s23085_s10 = scalar_lea.hbm %s25291_s6, 16 }
  0x82   : > { %p23086_p8 = scmp.ne.s32.totalorder %s25291_s6, %s23085_s10  ;;  %p23092_p4 = scmp.lt.u32.totalorder %s23085_s10, %s25291_s6 }
  0x84   : > { %p23088_p10 = pnand %p23086_p8, %p23393_p9 }
  0x86   : > { %p23089_p1 = pneg %p23088_p10 }
  0x88   : > { %p23094_p5 = pnand %p23092_p4, %p23089_p1 }
  0x8a   : > { %23097 = shalt.err (!%p23094_p5)
}
  0x8b   : > { %s23098_s23 = scalar_lea.vmem %s290_s24, 16  ;;  %s23105_s21 = scalar_lea.vmem %s290_s24, 32 }
  0x8c   : > { %p23099_p11 = scmp.ne.s32.totalorder %s290_s24, %s23098_s23  ;;  %p23106_p0 = scmp.lt.s32.totalorder %s290_s24, %s290_s24 }
  0x8d   : > { %p23107_p2 = scmp.lt.s32.totalorder %s23105_s21, %s23098_s23 }
  0x8e   : > { %p23101_p12 = pnand %p23099_p11, %p23393_p9 }
  0x8f   : > { %p23108_p3 = por %p23107_p2, %p23106_p0 }
  0x90   : > { %p23102_p13 = pneg %p23101_p12 }
  0x92   : > { %p23109_p6 = pnand %p23108_p3, %p23102_p13 }
  0x94   : > { %23112 = shalt.err (!%p23109_p6)
}
  0x95   : > { %19687 = dma.hbm_to_vmem [thread:$0]  (!%p23377_p7), %s25291_s6, 16, %s290_s24, [#allocation13]  }
  0x96   : > { %s47_s22 = sadd.s32 1, %s23257_s26  ;;  %s35_s16 = sadd.s32 1, %s23265_s28 }
  0x97   : > { %p54_p9 = scmp.ne.s32.totalorder %s23257_s26, %s23253_s25  ;;  %p36_p8 = scmp.ge.s32.totalorder %s35_s16, 2 }
  0x98   : > { %p55_p10 = scmp.eq.s32.totalorder %s23269_s29, 0  ;;  %p19700_p1 = scmp.lt.s32.totalorder %s23269_s29, 2 }
  0x99   : > { %s23499_s14 = sand.u32 1, %s23257_s26   ;;  %s25330_s16 = smov (%p36_p8, %s35_s16), 0 }
  0x9a   : > { %p56_p4 = por %p55_p10, %p54_p9  ;;  %s43_s2 = ssub.s32 %s23265_s28, %s25330_s16 }
  0x9b   : > { %s17094_s12 = sshll.u32 %s23499_s14, 7  ;;  %p45_p7 = scmp.eq.s32.totalorder %s43_s2, 0 }
  0x9c   : > { %s19290_s24 = sshll.u32 %s23265_s28, 10  ;;  %s304_s3 = scalar_lea.vmem [#allocation3], %s17094_s12 }
  0x9d   : > { %s314_s7 = sshll.u32 %s304_s3, 4  ;;  %s25311_s0 = sld [smem:[#allocation22_spill]]  ;;  %s23515_s7 = int_to_ptr.vmem [resolvable:$true] %s314_s7 }
  0x9e   : > { %s23508_s10 = scalar_select %p45_p7, %s23257_s26, %s47_s22  }
  0x9f   : > { %p23519_p5 = pnand %p19700_p1, %p56_p4  ;;  %s324_s23 = sand.u32 1, %s23269_s29  }
  0xa0   : > { %s301_s21 = scalar_lea.sflag [#allocation4], %s23499_s14 }
  0xa1   : > { %p23115_p12 = pneg %p23519_p5 }
  0xa3   : > { %s23513_s19 = scalar_lea.hbm %s25311_s0, %s19290_s24  ;;  %s23118_s2 = scalar_lea.hbm %s25311_s0, 4096 }
  0xa4   : > { %s23113_s11 = scalar_lea.hbm %s23513_s19, 2048  ;;  %p23119_p2 = scmp.lt.u32.totalorder %s23513_s19, %s25311_s0 }
  0xa5   : > { %p23114_p11 = scmp.ne.s32.totalorder %s23513_s19, %s23113_s11  ;;  %p23120_p3 = scmp.lt.u32.totalorder %s23118_s2, %s23113_s11 }
  0xa6   : > { %p23122_p9 = scmp.lt.u32.totalorder %s23113_s11, %s23513_s19 }
  0xa7   : > { %p23116_p13 = pnand %p23115_p12, %p23114_p11  ;;  %p23121_p6 = por %p23120_p3, %p23119_p2 }
  0xa9   : > { %p23117_p0 = pneg %p23116_p13  ;;  %p23123_p8 = por %p23122_p9, %p23121_p6 }
  0xab   : > { %p23124_p10 = pnand %p23123_p8, %p23117_p0 }
  0xad   : > { %23127 = shalt.err (!%p23124_p10)
}
  0xae   : > { %s23128_s3 = scalar_lea.vmem %s23515_s7, 2048  ;;  %s23280_s17 = smov [#allocation3]  }
  0xaf   : > { %p23129_p1 = scmp.ne.s32.totalorder %s23515_s7, %s23128_s3  ;;  %s23133_s18 = sshll.u32 %s23280_s17, 4  ;;  %s23134_s18 = int_to_ptr.vmem [resolvable:$false] %s23133_s18 }
  0xb0   : > { %s23135_s15 = scalar_lea.vmem %s23134_s18, 4096  ;;  %p23136_p11 = scmp.lt.s32.totalorder %s23515_s7, %s23134_s18 }
  0xb1   : > { %p23131_p4 = pnand %p23129_p1, %p23115_p12  ;;  %p23137_p13 = scmp.lt.s32.totalorder %s23135_s15, %s23128_s3 }
  0xb3   : > { %p23132_p7 = pneg %p23131_p4  ;;  %p23138_p2 = por %p23137_p13, %p23136_p11 }
  0xb5   : > { %p23139_p3 = pnand %p23138_p2, %p23132_p7 }
  0xb7   : > { %23142 = shalt.err (!%p23139_p3)
}
  0xb8   : > { %s23281_s11 = smov 2048   ;;  %s23282_s22 = smov 1024  }
  0xb9   : > { %19691 = dma.hbm_to_vmem [thread:$0]  (!%p23519_p5), %s23513_s19, 2048, %s23515_s7, %s301_s21, %s23281_s11, %s23282_s22, %s23276_s13  }
  0xba   : > { %s19641_s2 = smul.u32 10240, %s23499_s14  ;;  %s23564_s0 = scalar_lea.sflag [#allocation7], %s324_s23 }
  0xbb   : > { %s19642_s12 = smul.u32 163840, %s23265_s28  ;;  %s23148_s7 = scalar_lea.hbm %s25286_s1, 327680 }
  0xbc   : > { %s328_s18 = scalar_lea.vmem [#allocation6], %s19641_s2 }
  0xbd   : > { %s23558_s17 = scalar_lea.hbm %s25286_s1, %s19642_s12  ;;  %s336_s15 = sshll.u32 %s328_s18, 4  ;;  %s23560_s15 = int_to_ptr.vmem [resolvable:$true] %s336_s15 }
  0xbe   : > { %s23143_s4 = scalar_lea.hbm %s23558_s17, 163840  ;;  %p23149_p8 = scmp.lt.u32.totalorder %s23558_s17, %s25286_s1 }
  0xbf   : > { %p23144_p0 = scmp.ne.s32.totalorder %s23558_s17, %s23143_s4  ;;  %p23150_p10 = scmp.lt.u32.totalorder %s23148_s7, %s23143_s4 }
  0xc0   : > { %p23152_p4 = scmp.lt.u32.totalorder %s23143_s4, %s23558_s17 }
  0xc1   : > { %p23146_p6 = pnand %p23144_p0, %p23115_p12  ;;  %p23151_p1 = por %p23150_p10, %p23149_p8 }
  0xc3   : > { %p23147_p9 = pneg %p23146_p6  ;;  %p23153_p7 = por %p23152_p4, %p23151_p1 }
  0xc5   : > { %p23154_p11 = pnand %p23153_p7, %p23147_p9 }
  0xc7   : > { %23157 = shalt.err (!%p23154_p11)
}
  0xc8   : > { %s23158_s23 = scalar_lea.vmem %s23560_s15, 163840  ;;  %s23283_s11 = smov [#allocation6]  }
  0xc9   : > { %p23159_p13 = scmp.ne.s32.totalorder %s23560_s15, %s23158_s23  ;;  %s23163_s22 = sshll.u32 %s23283_s11, 4  ;;  %s23164_s22 = int_to_ptr.vmem [resolvable:$false] %s23163_s22 }
  0xca   : > { %s23165_s2 = scalar_lea.vmem %s23164_s22, 327680  ;;  %p23166_p0 = scmp.lt.s32.totalorder %s23560_s15, %s23164_s22 }
  0xcb   : > { %p23161_p2 = pnand %p23159_p13, %p23115_p12  ;;  %p23167_p6 = scmp.lt.s32.totalorder %s23165_s2, %s23158_s23 }
  0xcd   : > { %p23162_p3 = pneg %p23161_p2  ;;  %p23168_p8 = por %p23167_p6, %p23166_p0 }
  0xcf   : > { %p23169_p10 = pnand %p23168_p8, %p23162_p3 }
  0xd1   : > { %23172 = shalt.err (!%p23169_p10)
}
  0xd2   : > { %s25313_s4 = smov 40   ;;  %s25314_s12 = smov 640  }
  0xd3   : > { %19694 = dma.hbm_to_vmem [thread:$0]  (!%p23519_p5), %s23558_s17, 163840, %s23560_s15, %s23564_s0, %s25314_s12, %s25314_s12, %s25313_s4  }
  0xd4   : > { %p25315_p12 = scmp.ne.s32.totalorder %s25305_s9, 0 }
  0xd5   : > { %s350_s24 = sand.u32 (!%p25315_p12), 1, %s23253_s25   ;;  %p25316_p9 = scmp.ne.s32.totalorder (!%p25315_p12), %s25304_s8, 0 }
  0xd6   : > { %348 = sbr.rel (%p25315_p12) target bundleno = 3076 (0xc04), region = 48  ;;  %s17101_s3 = sshll.u32 (!%p25315_p12), %s350_s24, 7 }
  0xd7   : > { %s351_s18 = scalar_lea.sflag (!%p25315_p12), [#allocation4], %s350_s24  ;;  %s23596_s13 = scalar_lea.vmem (!%p25315_p12), [#allocation3], %s17101_s3 }
  0xdd   : > { %23224 = dma.done.wait (%p25316_p9), %s351_s18, 2048  }
  0xde   : > { %23226 = vsyncadd (%p25316_p9), %s351_s18, 4294965248  ;;  %s359_s20 = sand.u32 1, %s23357_s30   ;;  %s19643_s14 = smul.u32 10240, %s350_s24 }
  0xdf   : > { %s360_s0 = scalar_lea.sflag [#allocation7], %s359_s20 }
  0xe0   : > { %s23603_s17 = scalar_lea.vmem [#allocation6], %s19643_s14 }
  0xe1   : > { %23228 = dma.done.wait (%p25316_p9), %s360_s0, 163840  }
  0xe2   : > { %23230 = vsyncadd (%p25316_p9), %s360_s0, 4294803456  ;;  %p25317_p5 = scmp.eq.s32.totalorder %s23357_s30, 0 }
  0xe4   : > { %23232 = dma.done.wait (%p25317_p5), [#allocation7], 160   ;;  %p25318_p1 = pmov %p25317_p5 }
  0xe6   : > { %23234 = vsyncadd (%p25318_p1), [#allocation7], 4294967136  ;;  %p25319_p4 = pmov %p25318_p1 }
  0xe7   : > { %p25320_p7 = pmov %p25318_p1 }
  0xe8   : > { %23236 = dma.done.wait (%p25319_p4), [#allocation10], 102560  }
  0xe9   : > { %23238 = vsyncadd (%p25320_p7), [#allocation10], 4294864736  ;;  %p25321_p11 = pmov %p25318_p1 }
  0xea   : > { %p25322_p13 = pmov %p25318_p1 }
  0xeb   : > { %23240 = dma.done.wait (%p25321_p11), [#allocation13], 10256  }
  0xec   : > { %23242 = vsyncadd (%p25322_p13), [#allocation13], 4294957040  ;;  %p17107_p2 = scmp.ne.s32.totalorder %s23261_s27, 0 }
  0xed   : > { %v23284_v0 = vmov (!%p17107_p2), 0.0  }
  0xee   : > { %422 = sbr.rel (%p17107_p2) target bundleno = 248 (0xf8), region = 80  ;;  %423 = vst [vmem:[#allocation2] sm:$0xff] (!%p17107_p2), %v23284_v0  ;;  %424 = vst [vmem:[#allocation2 + $0x8] sm:$0xff] (!%p17107_p2), %v23284_v0 }
  0xef   : > { %425 = vst [vmem:[#allocation2 + $0x10] sm:$0xff] (!%p17107_p2), %v23284_v0  ;;  %426 = vst [vmem:[#allocation2 + $0x18] sm:$0xff] (!%p17107_p2), %v23284_v0 }
  0xf0   : > { %427 = vst [vmem:[#allocation2 + $0x20] sm:$0xff] (!%p17107_p2), %v23284_v0  ;;  %428 = vst [vmem:[#allocation2 + $0x28] sm:$0xff] (!%p17107_p2), %v23284_v0 }
  0xf1   : > { %429 = vst [vmem:[#allocation2 + $0x30] sm:$0xff] (!%p17107_p2), %v23284_v0  ;;  %430 = vst [vmem:[#allocation2 + $0x38] sm:$0xff] (!%p17107_p2), %v23284_v0 }
  0xf2   : > { %431 = vst [vmem:[#allocation2 + $0x40] sm:$0xff] (!%p17107_p2), %v23284_v0  ;;  %432 = vst [vmem:[#allocation2 + $0x48] sm:$0xff] (!%p17107_p2), %v23284_v0 }
  0xf3   : > { %433 = vst [vmem:[#allocation2 + $0x50] sm:$0xff] (!%p17107_p2), %v23284_v0  ;;  %434 = vst [vmem:[#allocation2 + $0x58] sm:$0xff] (!%p17107_p2), %v23284_v0 }
  0xf4   : > { %435 = vst [vmem:[#allocation2 + $0x60] sm:$0xff] (!%p17107_p2), %v23284_v0  ;;  %436 = vst [vmem:[#allocation2 + $0x68] sm:$0xff] (!%p17107_p2), %v23284_v0 }
  0xf5   : > { %437 = vst [vmem:[#allocation2 + $0x70] sm:$0xff] %v23284_v0  ;;  %438 = vst [vmem:[#allocation2 + $0x78] sm:$0xff] %v23284_v0 }
  0xf6   : > { %439 = vst [vmem:[#allocation2 + $0x80] sm:$0xff] %v23284_v0  ;;  %440 = vst [vmem:[#allocation2 + $0x88] sm:$0xff] %v23284_v0 }
  0xf7   : > { %441 = vst [vmem:[#allocation2 + $0x90] sm:$0xff] %v23284_v0  ;;  %442 = vst [vmem:[#allocation2 + $0x98] sm:$0xff] %v23284_v0 }
  0xf8 PF: > { %v19771_v1 = vld [vmem:[%s23603_s17 + $0x4] ss:$40 sps:$4 sm:$0xff]   ;;  %v19775_v3 = vld [vmem:[%s23603_s17] ss:$40 sps:$4 sm:$0xff]   ;;  %v19777_v5 = vld [vmem:[%s23603_s17 + $0x54] ss:$40 sps:$4 sm:$0xff]  }
  0xf9   : > { %v19773_v2 = vld [vmem:[%s23603_s17 + $0x1404] ss:$40 sps:$4 sm:$0xff]   ;;  %8239 = vmatprep.subr.bf16.mxu1 %v19771_v1  ;;  %v19776_v4 = vld [vmem:[%s23603_s17 + $0x1400] ss:$40 sps:$4 sm:$0xff]   ;;  %v19779_v6 = vld [vmem:[%s23603_s17 + $0x1454] ss:$40 sps:$4 sm:$0xff]  }
  0xfa   : > { %8411 = vmatprep.subr.bf16.mxu0 %v19773_v2  ;;  %8240 = vmatpush1.bf16.msra.mxu1 %v19775_v3  ;;  %v19781_v7 = vld [vmem:[%s23603_s17 + $0x50] ss:$40 sps:$4 sm:$0xff]   ;;  %v19783_v9 = vld [vmem:[%s23603_s17 + $0xa4] ss:$40 sps:$4 sm:$0xff]   ;;  %v19787_v11 = vld [vmem:[%s23603_s17 + $0xa0] ss:$40 sps:$4 sm:$0xff]  }
  0xfb   : > { %8412 = vmatpush1.bf16.msra.mxu0 %v19776_v4  ;;  %8241 = vmatprep.subr.bf16.mxu1 %v19777_v5  ;;  %v19782_v8 = vld [vmem:[%s23603_s17 + $0x1450] ss:$40 sps:$4 sm:$0xff]   ;;  %v19785_v10 = vld [vmem:[%s23603_s17 + $0x14a4] ss:$40 sps:$4 sm:$0xff]   ;;  %v19788_v12 = vld [vmem:[%s23603_s17 + $0x14a0] ss:$40 sps:$4 sm:$0xff]  }
  0xfc   : > { %8413 = vmatprep.subr.bf16.mxu0 %v19779_v6  ;;  %v19789_v13 = vld [vmem:[%s23603_s17 + $0xf4] ss:$40 sps:$4 sm:$0xff]   ;;  %v19793_v15 = vld [vmem:[%s23603_s17 + $0xf0] ss:$40 sps:$4 sm:$0xff]   ;;  %v19795_v17 = vld [vmem:[%s23603_s17 + $0x144] ss:$40 sps:$4 sm:$0xff]  }
  0xfd   : > { %v19791_v14 = vld [vmem:[%s23603_s17 + $0x14f4] ss:$40 sps:$4 sm:$0xff]   ;;  %v19794_v16 = vld [vmem:[%s23603_s17 + $0x14f0] ss:$40 sps:$4 sm:$0xff]   ;;  %v19797_v18 = vld [vmem:[%s23603_s17 + $0x1544] ss:$40 sps:$4 sm:$0xff]  }
  0xfe   : > { %8242 = vmatpush1.bf16.msra.mxu1 %v19781_v7  ;;  %v19799_v19 = vld [vmem:[%s23603_s17 + $0x140] ss:$40 sps:$4 sm:$0xff]   ;;  %v19801_v21 = vld [vmem:[%s23603_s17 + $0x194] ss:$40 sps:$4 sm:$0xff]   ;;  %v19805_v23 = vld [vmem:[%s23603_s17 + $0x190] ss:$40 sps:$4 sm:$0xff]  }
  0xff   : > { %8414 = vmatpush1.bf16.msra.mxu0 %v19782_v8  ;;  %8243 = vmatprep.subr.bf16.mxu1 %v19783_v9  ;;  %v19800_v20 = vld [vmem:[%s23603_s17 + $0x1540] ss:$40 sps:$4 sm:$0xff]   ;;  %v19803_v22 = vld [vmem:[%s23603_s17 + $0x1594] ss:$40 sps:$4 sm:$0xff]   ;;  %v19806_v24 = vld [vmem:[%s23603_s17 + $0x1590] ss:$40 sps:$4 sm:$0xff]  }
 0x100   : > { %8415 = vmatprep.subr.bf16.mxu0 %v19785_v10  ;;  %v19807_v25 = vld [vmem:[%s23603_s17 + $0x1e4] ss:$40 sps:$4 sm:$0xff]   ;;  %v19811_v27 = vld [vmem:[%s23603_s17 + $0x1e0] ss:$40 sps:$4 sm:$0xff]   ;;  %v19813_v29 = vld [vmem:[%s23603_s17 + $0x234] ss:$40 sps:$4 sm:$0xff]  }
 0x101   : > { %v19809_v26 = vld [vmem:[%s23603_s17 + $0x15e4] ss:$40 sps:$4 sm:$0xff]   ;;  %v19812_v28 = vld [vmem:[%s23603_s17 + $0x15e0] ss:$40 sps:$4 sm:$0xff]   ;;  %v19815_v30 = vld [vmem:[%s23603_s17 + $0x1634] ss:$40 sps:$4 sm:$0xff]  }
 0x102   : > { %8244 = vmatpush1.bf16.msra.mxu1 %v19787_v11  ;;  %v19817_v31 = vld [vmem:[%s23603_s17 + $0x230] ss:$40 sps:$4 sm:$0xff]   ;;  %v19819_v33 = vld [vmem:[%s23603_s17 + $0x284] ss:$40 sps:$4 sm:$0xff]   ;;  %v19823_v35 = vld [vmem:[%s23603_s17 + $0x280] ss:$40 sps:$4 sm:$0xff]  }
 0x103   : > { %8416 = vmatpush1.bf16.msra.mxu0 %v19788_v12  ;;  %8245 = vmatprep.subr.bf16.mxu1 %v19789_v13  ;;  %v19818_v32 = vld [vmem:[%s23603_s17 + $0x1630] ss:$40 sps:$4 sm:$0xff]   ;;  %v19821_v34 = vld [vmem:[%s23603_s17 + $0x1684] ss:$40 sps:$4 sm:$0xff]   ;;  %v19824_v36 = vld [vmem:[%s23603_s17 + $0x1680] ss:$40 sps:$4 sm:$0xff]  }
 0x104   : > { %8417 = vmatprep.subr.bf16.mxu0 %v19791_v14  ;;  %v19825_v37 = vld [vmem:[%s23603_s17 + $0x2d4] ss:$40 sps:$4 sm:$0xff]   ;;  %v19829_v39 = vld [vmem:[%s23603_s17 + $0x2d0] ss:$40 sps:$4 sm:$0xff]   ;;  %v19831_v41 = vld [vmem:[%s23603_s17 + $0x324] ss:$40 sps:$4 sm:$0xff]  }
 0x105   : > { %v19827_v38 = vld [vmem:[%s23603_s17 + $0x16d4] ss:$40 sps:$4 sm:$0xff]   ;;  %v19830_v40 = vld [vmem:[%s23603_s17 + $0x16d0] ss:$40 sps:$4 sm:$0xff]   ;;  %v19833_v42 = vld [vmem:[%s23603_s17 + $0x1724] ss:$40 sps:$4 sm:$0xff]  }
 0x106   : > { %8246 = vmatpush1.bf16.msra.mxu1 %v19793_v15  ;;  %v19835_v43 = vld [vmem:[%s23603_s17 + $0x320] ss:$40 sps:$4 sm:$0xff]   ;;  %v19837_v45 = vld [vmem:[%s23603_s17 + $0x374] ss:$40 sps:$4 sm:$0xff]   ;;  %v19841_v47 = vld [vmem:[%s23603_s17 + $0x370] ss:$40 sps:$4 sm:$0xff]  }
 0x107   : > { %8418 = vmatpush1.bf16.msra.mxu0 %v19794_v16  ;;  %8247 = vmatprep.subr.bf16.mxu1 %v19795_v17  ;;  %v19836_v44 = vld [vmem:[%s23603_s17 + $0x1720] ss:$40 sps:$4 sm:$0xff]   ;;  %v19839_v46 = vld [vmem:[%s23603_s17 + $0x1774] ss:$40 sps:$4 sm:$0xff]   ;;  %v19842_v48 = vld [vmem:[%s23603_s17 + $0x1770] ss:$40 sps:$4 sm:$0xff]  }
 0x108   : > { %8419 = vmatprep.subr.bf16.mxu0 %v19797_v18  ;;  %v463_v49 = vld [vmem:[%s23596_s13] sm:$0xff]  ;;  %v19849_v59 = vld [vmem:[%s23603_s17 + $0x414] ss:$40 sps:$4 sm:$0xff]   ;;  %v19853_v61 = vld [vmem:[%s23603_s17 + $0x410] ss:$40 sps:$4 sm:$0xff]   ;;  %p18404_p3 = scmp.ne.s32.totalorder %s23261_s27, 1 }
 0x109   : > { %v471_v50 = vld [vmem:[%s23596_s13 + $0x40] sm:$0xff]  ;;  %v19851_v60 = vld [vmem:[%s23603_s17 + $0x1814] ss:$40 sps:$4 sm:$0xff]   ;;  %v19854_v62 = vld [vmem:[%s23603_s17 + $0x1810] ss:$40 sps:$4 sm:$0xff]  }
 0x10a   : > { %8248 = vmatpush1.bf16.msra.mxu1 %v19799_v19  ;;  %v19843_v51 = vld [vmem:[%s23603_s17 + $0x3c4] ss:$40 sps:$4 sm:$0xff]   ;;  %v23674_v53 = vcombine.high %v463_v49, %v471_v50  ;;  %v19847_v57 = vld [vmem:[%s23603_s17 + $0x3c0] ss:$40 sps:$4 sm:$0xff]   ;;  %v19861_v3 = vld [vmem:[%s23603_s17 + $0x4b4] ss:$40 sps:$4 sm:$0xff]   ;;  %v23700_v11 = vcombine.low %v463_v49, %v471_v50 }
 0x10b   : > { %8420 = vmatpush1.bf16.msra.mxu0 %v19800_v20  ;;  %8249 = vmatprep.subr.bf16.mxu1 %v19801_v21  ;;  %v19845_v52 = vld [vmem:[%s23603_s17 + $0x17c4] ss:$40 sps:$4 sm:$0xff]   ;;  %v19848_v58 = vld [vmem:[%s23603_s17 + $0x17c0] ss:$40 sps:$4 sm:$0xff]   ;;  %v19863_v4 = vld [vmem:[%s23603_s17 + $0x18b4] ss:$40 sps:$4 sm:$0xff]  }
 0x10c   : > { %8421 = vmatprep.subr.bf16.mxu0 %v19803_v22  ;;  %v467_v54 = vld [vmem:[%s23596_s13 + $0x20] sm:$0xff]  ;;  %8271 = vmatprep.mubr.bf16.mxu1 %v23674_v53  ;;  %v19865_v5 = vld [vmem:[%s23603_s17 + $0x4b0] ss:$40 sps:$4 sm:$0xff]   ;;  %v19875_v13 = vld [vmem:[%s23603_s17 + $0x554] ss:$40 sps:$4 sm:$0xff]  }
 0x10d   : > { %v475_v55 = vld [vmem:[%s23596_s13 + $0x60] sm:$0xff]  ;;  %v19866_v6 = vld [vmem:[%s23603_s17 + $0x18b0] ss:$40 sps:$4 sm:$0xff]   ;;  %v19878_v14 = vld [vmem:[%s23603_s17 + $0x1954] ss:$40 sps:$4 sm:$0xff]  }
 0x10e   : > { %8250 = vmatpush1.bf16.msra.mxu1 %v19805_v23  ;;  %v23679_v56 = vcombine.high %v467_v54, %v475_v55  ;;  %v19855_v63 = vld [vmem:[%s23603_s17 + $0x464] ss:$40 sps:$4 sm:$0xff]   ;;  %v19859_v1 = vld [vmem:[%s23603_s17 + $0x460] ss:$40 sps:$4 sm:$0xff]   ;;  %v23702_v12 = vcombine.low %v467_v54, %v475_v55  ;;  %v19873_v15 = vld [vmem:[%s23603_s17 + $0x550] ss:$40 sps:$4 sm:$0xff]  }
 0x10f   : > { %8422 = vmatpush1.bf16.msra.mxu0 %v19806_v24  ;;  %8251 = vmatprep.subr.bf16.mxu1 %v19807_v25  ;;  %v19857_v0 = vld [vmem:[%s23603_s17 + $0x1864] ss:$40 sps:$4 sm:$0xff]   ;;  %v19860_v2 = vld [vmem:[%s23603_s17 + $0x1860] ss:$40 sps:$4 sm:$0xff]   ;;  %v19876_v16 = vld [vmem:[%s23603_s17 + $0x1950] ss:$40 sps:$4 sm:$0xff]  }
 0x110   : > { %8423 = vmatprep.subr.bf16.mxu0 %v19809_v26  ;;  %8443 = vmatprep.mubr.bf16.mxu0 %v23679_v56  ;;  %v19869_v7 = vld [vmem:[%s23603_s17 + $0x504] ss:$40 sps:$4 sm:$0xff]   ;;  %v19867_v9 = vld [vmem:[%s23603_s17 + $0x500] ss:$40 sps:$4 sm:$0xff]   ;;  %v19887_v21 = vld [vmem:[%s23603_s17 + $0x5f4] ss:$40 sps:$4 sm:$0xff]  }
 0x111   : > { %v19872_v8 = vld [vmem:[%s23603_s17 + $0x1904] ss:$40 sps:$4 sm:$0xff]   ;;  %v19870_v10 = vld [vmem:[%s23603_s17 + $0x1900] ss:$40 sps:$4 sm:$0xff]   ;;  %v19890_v22 = vld [vmem:[%s23603_s17 + $0x19f4] ss:$40 sps:$4 sm:$0xff]  }
 0x112   : > { %8252 = vmatpush1.bf16.msra.mxu1 %v19811_v27  ;;  %v19881_v17 = vld [vmem:[%s23603_s17 + $0x5a4] ss:$40 sps:$4 sm:$0xff]   ;;  %v19879_v19 = vld [vmem:[%s23603_s17 + $0x5a0] ss:$40 sps:$4 sm:$0xff]   ;;  %v19885_v23 = vld [vmem:[%s23603_s17 + $0x5f0] ss:$40 sps:$4 sm:$0xff]  }
 0x113   : > { %8424 = vmatpush1.bf16.msra.mxu0 %v19812_v28  ;;  %8253 = vmatprep.subr.bf16.mxu1 %v19813_v29  ;;  %v19884_v18 = vld [vmem:[%s23603_s17 + $0x19a4] ss:$40 sps:$4 sm:$0xff]   ;;  %v19882_v20 = vld [vmem:[%s23603_s17 + $0x19a0] ss:$40 sps:$4 sm:$0xff]   ;;  %v19888_v24 = vld [vmem:[%s23603_s17 + $0x19f0] ss:$40 sps:$4 sm:$0xff]  }
 0x114   : > { %8425 = vmatprep.subr.bf16.mxu0 %v19815_v30  ;;  %v19893_v25 = vld [vmem:[%s23603_s17 + $0x644] ss:$40 sps:$4 sm:$0xff]   ;;  %v19891_v27 = vld [vmem:[%s23603_s17 + $0x640] ss:$40 sps:$4 sm:$0xff]   ;;  %v19899_v29 = vld [vmem:[%s23603_s17 + $0x694] ss:$40 sps:$4 sm:$0xff]  }
 0x115   : > { %v19896_v26 = vld [vmem:[%s23603_s17 + $0x1a44] ss:$40 sps:$4 sm:$0xff]   ;;  %v19894_v28 = vld [vmem:[%s23603_s17 + $0x1a40] ss:$40 sps:$4 sm:$0xff]   ;;  %v19902_v30 = vld [vmem:[%s23603_s17 + $0x1a94] ss:$40 sps:$4 sm:$0xff]  }
 0x116   : > { %8254 = vmatpush1.bf16.msra.mxu1 %v19817_v31  ;;  %v19897_v31 = vld [vmem:[%s23603_s17 + $0x690] ss:$40 sps:$4 sm:$0xff]   ;;  %v19915_v49 = vld [vmem:[%s23603_s17 + $0x780] ss:$40 sps:$4 sm:$0xff]  }
 0x117   : > { %8426 = vmatpush1.bf16.msra.mxu0 %v19818_v32  ;;  %8255 = vmatprep.subr.bf16.mxu1 %v19819_v33  ;;  %v19900_v32 = vld [vmem:[%s23603_s17 + $0x1a90] ss:$40 sps:$4 sm:$0xff]   ;;  %v19905_v33 = vld [vmem:[%s23603_s17 + $0x6e4] ss:$40 sps:$4 sm:$0xff]   ;;  %v19918_v50 = vld [vmem:[%s23603_s17 + $0x1b80] ss:$40 sps:$4 sm:$0xff]  }
 0x118   : > { %8427 = vmatprep.subr.bf16.mxu0 %v19821_v34  ;;  %v19908_v34 = vld [vmem:[%s23603_s17 + $0x1ae4] ss:$40 sps:$4 sm:$0xff]   ;;  %v19921_v54 = vld [vmem:[%s23603_s17 + $0x7d0] ss:$40 sps:$4 sm:$0xff]  }
 0x119   : > { %v19924_v55 = vld [vmem:[%s23603_s17 + $0x1bd0] ss:$40 sps:$4 sm:$0xff]  }
 0x11a   : > { %8256 = vmatpush1.bf16.msra.mxu1 %v19823_v35  ;;  %v19903_v35 = vld [vmem:[%s23603_s17 + $0x6e0] ss:$40 sps:$4 sm:$0xff]  }
 0x11b   : > { %8428 = vmatpush1.bf16.msra.mxu0 %v19824_v36  ;;  %8257 = vmatprep.subr.bf16.mxu1 %v19825_v37  ;;  %v19906_v36 = vld [vmem:[%s23603_s17 + $0x1ae0] ss:$40 sps:$4 sm:$0xff]  }
 0x11c   : > { %8429 = vmatprep.subr.bf16.mxu0 %v19827_v38  ;;  %v23731_v37 = vld [vmem:[%s23596_s13 + $0x8] sm:$0xff] }
 0x11d   : > { %v23734_v38 = vld [vmem:[%s23596_s13 + $0x48] sm:$0xff] }
 0x11e   : > { %8258 = vmatpush1.bf16.msra.mxu1 %v19829_v39  ;;  %v19911_v39 = vld [vmem:[%s23603_s17 + $0x734] ss:$40 sps:$4 sm:$0xff]  }
 0x11f   : > { %8430 = vmatpush1.bf16.msra.mxu0 %v19830_v40  ;;  %8259 = vmatprep.subr.bf16.mxu1 %v19831_v41  ;;  %v19914_v40 = vld [vmem:[%s23603_s17 + $0x1b34] ss:$40 sps:$4 sm:$0xff]   ;;  %v23740_v41 = vcombine.high %v23731_v37, %v23734_v38 }
 0x120   : > { %8431 = vmatprep.subr.bf16.mxu0 %v19833_v42  ;;  %v23743_v42 = vld [vmem:[%s23596_s13 + $0x28] sm:$0xff] }
 0x122   : > { %8260 = vmatpush1.bf16.msra.mxu1 %v19835_v43  ;;  %v23746_v43 = vld [vmem:[%s23596_s13 + $0x68] sm:$0xff] }
 0x123   : > { %8432 = vmatpush1.bf16.msra.mxu0 %v19836_v44  ;;  %8261 = vmatprep.subr.bf16.mxu1 %v19837_v45  ;;  %v23751_v44 = vcombine.high %v23743_v42, %v23746_v43  ;;  %v19909_v45 = vld [vmem:[%s23603_s17 + $0x730] ss:$40 sps:$4 sm:$0xff]  }
 0x124   : > { %8433 = vmatprep.subr.bf16.mxu0 %v19839_v46  ;;  %v19912_v46 = vld [vmem:[%s23603_s17 + $0x1b30] ss:$40 sps:$4 sm:$0xff]  }
 0x126   : > { %8262 = vmatpush1.bf16.msra.mxu1 %v19841_v47  ;;  %v19917_v47 = vld [vmem:[%s23603_s17 + $0x784] ss:$40 sps:$4 sm:$0xff]  }
 0x127   : > { %8434 = vmatpush1.bf16.msra.mxu0 %v19842_v48  ;;  %8263 = vmatprep.subr.bf16.mxu1 %v19843_v51  ;;  %v19920_v48 = vld [vmem:[%s23603_s17 + $0x1b84] ss:$40 sps:$4 sm:$0xff]   ;;  %v19923_v51 = vld [vmem:[%s23603_s17 + $0x7d4] ss:$40 sps:$4 sm:$0xff]  }
 0x128   : > { %8435 = vmatprep.subr.bf16.mxu0 %v19845_v52  ;;  %v19926_v52 = vld [vmem:[%s23603_s17 + $0x1bd4] ss:$40 sps:$4 sm:$0xff]  }
 0x12a   : > { %8264 = vmatpush1.bf16.msra.mxu1 %v19847_v57  ;;  %v19929_v57 = vld [vmem:[%s23603_s17 + $0x824] ss:$40 sps:$4 sm:$0xff]  }
 0x12b   : > { %8436 = vmatpush1.bf16.msra.mxu0 %v19848_v58  ;;  %8265 = vmatprep.subr.bf16.mxu1 %v19849_v59  ;;  %v19932_v58 = vld [vmem:[%s23603_s17 + $0x1c24] ss:$40 sps:$4 sm:$0xff]   ;;  %v19927_v59 = vld [vmem:[%s23603_s17 + $0x820] ss:$40 sps:$4 sm:$0xff]  }
 0x12c   : > { %8437 = vmatprep.subr.bf16.mxu0 %v19851_v60  ;;  %v19930_v60 = vld [vmem:[%s23603_s17 + $0x1c20] ss:$40 sps:$4 sm:$0xff]  }
 0x12e   : > { %8266 = vmatpush1.bf16.msra.mxu1 %v19853_v61  ;;  %v19935_v61 = vld [vmem:[%s23603_s17 + $0x874] ss:$40 sps:$4 sm:$0xff]  }
 0x12f   : > { %8438 = vmatpush1.bf16.msra.mxu0 %v19854_v62  ;;  %8267 = vmatprep.subr.bf16.mxu1 %v19855_v63  ;;  %v19938_v62 = vld [vmem:[%s23603_s17 + $0x1c74] ss:$40 sps:$4 sm:$0xff]   ;;  %v19933_v63 = vld [vmem:[%s23603_s17 + $0x870] ss:$40 sps:$4 sm:$0xff]  }
 0x130   : > { %8439 = vmatprep.subr.bf16.mxu0 %v19857_v0  ;;  %v19936_v0 = vld [vmem:[%s23603_s17 + $0x1c70] ss:$40 sps:$4 sm:$0xff]  }
 0x132   : > { %8268 = vmatpush1.bf16.msra.mxu1 %v19859_v1  ;;  %v19941_v1 = vld [vmem:[%s23603_s17 + $0x8c4] ss:$40 sps:$4 sm:$0xff]  }
 0x133   : > { %8440 = vmatpush1.bf16.msra.mxu0 %v19860_v2  ;;  %8269 = vmatprep.subr.bf16.mxu1 %v19861_v3  ;;  %v19944_v2 = vld [vmem:[%s23603_s17 + $0x1cc4] ss:$40 sps:$4 sm:$0xff]   ;;  %v19939_v3 = vld [vmem:[%s23603_s17 + $0x8c0] ss:$40 sps:$4 sm:$0xff]  }
 0x134   : > { %8441 = vmatprep.subr.bf16.mxu0 %v19863_v4  ;;  %v19942_v4 = vld [vmem:[%s23603_s17 + $0x1cc0] ss:$40 sps:$4 sm:$0xff]  }
 0x136   : > { %8270 = vmatpush1.bf16.msra.mxu1 %v19865_v5  ;;  %v19947_v5 = vld [vmem:[%s23603_s17 + $0x914] ss:$40 sps:$4 sm:$0xff]  }
 0x137   : > { %8442 = vmatpush1.bf16.msra.mxu0 %v19866_v6  ;;  %8282 = vmatprep.subr.bf16.mxu1 %v19869_v7  ;;  %v19950_v6 = vld [vmem:[%s23603_s17 + $0x1d14] ss:$40 sps:$4 sm:$0xff]   ;;  %v19945_v7 = vld [vmem:[%s23603_s17 + $0x910] ss:$40 sps:$4 sm:$0xff]  }
 0x138   : > { %8454 = vmatprep.subr.bf16.mxu0 %v19872_v8  ;;  %v19948_v8 = vld [vmem:[%s23603_s17 + $0x1d10] ss:$40 sps:$4 sm:$0xff]  }
 0x139   : > { %8272 = vmatmul.mubr.bf16.vlgmr.msra.gmra.mrb[0].mxu1 %v23700_v11 }
 0x13a   : > { %8444 = vmatmul.mubr.bf16.vlgmr.msra.gmra.mrb[0].mxu0 %v23702_v12  ;;  %8283 = vmatpush1.bf16.msra.mxu1 %v19867_v9  ;;  %v19953_v9 = vld [vmem:[%s23603_s17 + $0x964] ss:$40 sps:$4 sm:$0xff]  }
 0x13b   : > { %8455 = vmatpush1.bf16.msra.mxu0 %v19870_v10  ;;  %8284 = vmatprep.subr.bf16.mxu1 %v19875_v13  ;;  %v19956_v10 = vld [vmem:[%s23603_s17 + $0x1d64] ss:$40 sps:$4 sm:$0xff]   ;;  %v19951_v13 = vld [vmem:[%s23603_s17 + $0x960] ss:$40 sps:$4 sm:$0xff]  }
 0x13c   : > { %8456 = vmatprep.subr.bf16.mxu0 %v19878_v14  ;;  %8314 = vmatprep.mubr.bf16.mxu1 %v23740_v41  ;;  %v19954_v14 = vld [vmem:[%s23603_s17 + $0x1d60] ss:$40 sps:$4 sm:$0xff]  }
 0x13d   : > { %8486 = vmatprep.mubr.bf16.mxu0 %v23751_v44 }
 0x13e   : > { %8285 = vmatpush1.bf16.msra.mxu1 %v19873_v15  ;;  %v19959_v15 = vld [vmem:[%s23603_s17 + $0x9b4] ss:$40 sps:$4 sm:$0xff]  }
 0x13f   : > { %8457 = vmatpush1.bf16.msra.mxu0 %v19876_v16  ;;  %8286 = vmatprep.subr.bf16.mxu1 %v19881_v17  ;;  %v19962_v16 = vld [vmem:[%s23603_s17 + $0x1db4] ss:$40 sps:$4 sm:$0xff]   ;;  %v19957_v17 = vld [vmem:[%s23603_s17 + $0x9b0] ss:$40 sps:$4 sm:$0xff]  }
 0x140   : > { %8458 = vmatprep.subr.bf16.mxu0 %v19884_v18  ;;  %v19960_v18 = vld [vmem:[%s23603_s17 + $0x1db0] ss:$40 sps:$4 sm:$0xff]  }
 0x142   : > { %8287 = vmatpush1.bf16.msra.mxu1 %v19879_v19  ;;  %v19965_v19 = vld [vmem:[%s23603_s17 + $0xa04] ss:$40 sps:$4 sm:$0xff]  }
 0x143   : > { %8459 = vmatpush1.bf16.msra.mxu0 %v19882_v20  ;;  %8288 = vmatprep.subr.bf16.mxu1 %v19887_v21  ;;  %v19968_v20 = vld [vmem:[%s23603_s17 + $0x1e04] ss:$40 sps:$4 sm:$0xff]   ;;  %v19963_v21 = vld [vmem:[%s23603_s17 + $0xa00] ss:$40 sps:$4 sm:$0xff]  }
 0x144   : > { %8460 = vmatprep.subr.bf16.mxu0 %v19890_v22  ;;  %v19966_v22 = vld [vmem:[%s23603_s17 + $0x1e00] ss:$40 sps:$4 sm:$0xff]  }
 0x146   : > { %8289 = vmatpush1.bf16.msra.mxu1 %v19885_v23  ;;  %v23794_v23 = vcombine.low %v23731_v37, %v23734_v38  ;;  %v19975_v37 = vld [vmem:[%s23603_s17 + $0xaa0] ss:$40 sps:$4 sm:$0xff]  }
 0x147   : > { %8461 = vmatpush1.bf16.msra.mxu0 %v19888_v24  ;;  %8290 = vmatprep.subr.bf16.mxu1 %v19893_v25  ;;  %v23798_v24 = vcombine.low %v23743_v42, %v23746_v43  ;;  %v19971_v25 = vld [vmem:[%s23603_s17 + $0xa54] ss:$40 sps:$4 sm:$0xff]   ;;  %v19978_v38 = vld [vmem:[%s23603_s17 + $0x1ea0] ss:$40 sps:$4 sm:$0xff]   ;;  %v19981_v42 = vld [vmem:[%s23603_s17 + $0xaf0] ss:$40 sps:$4 sm:$0xff]  }
 0x148   : > { %8462 = vmatprep.subr.bf16.mxu0 %v19896_v26  ;;  %v19974_v26 = vld [vmem:[%s23603_s17 + $0x1e54] ss:$40 sps:$4 sm:$0xff]   ;;  %v19984_v43 = vld [vmem:[%s23603_s17 + $0x1ef0] ss:$40 sps:$4 sm:$0xff]  }
 0x14a   : > { %8291 = vmatpush1.bf16.msra.mxu1 %v19891_v27  ;;  %v19969_v27 = vld [vmem:[%s23603_s17 + $0xa50] ss:$40 sps:$4 sm:$0xff]  }
 0x14b   : > { %8463 = vmatpush1.bf16.msra.mxu0 %v19894_v28  ;;  %8292 = vmatprep.subr.bf16.mxu1 %v19899_v29  ;;  %v19972_v28 = vld [vmem:[%s23603_s17 + $0x1e50] ss:$40 sps:$4 sm:$0xff]  }
 0x14c   : > { %8464 = vmatprep.subr.bf16.mxu0 %v19902_v30  ;;  %v23805_v29 = vld [vmem:[%s23596_s13 + $0x10] sm:$0xff] }
 0x14d   : > { %v23810_v30 = vld [vmem:[%s23596_s13 + $0x50] sm:$0xff] }
 0x14e   : > { %8293 = vmatpush1.bf16.msra.mxu1 %v19897_v31  ;;  %v19977_v31 = vld [vmem:[%s23603_s17 + $0xaa4] ss:$40 sps:$4 sm:$0xff]  }
 0x14f   : > { %8465 = vmatpush1.bf16.msra.mxu0 %v19900_v32  ;;  %8294 = vmatprep.subr.bf16.mxu1 %v19905_v33  ;;  %v19980_v32 = vld [vmem:[%s23603_s17 + $0x1ea4] ss:$40 sps:$4 sm:$0xff]   ;;  %v23816_v33 = vcombine.high %v23805_v29, %v23810_v30 }
 0x150   : > { %8466 = vmatprep.subr.bf16.mxu0 %v19908_v34  ;;  %v23819_v34 = vld [vmem:[%s23596_s13 + $0x30] sm:$0xff] }
 0x152   : > { %8295 = vmatpush1.bf16.msra.mxu1 %v19903_v35  ;;  %v23822_v35 = vld [vmem:[%s23596_s13 + $0x70] sm:$0xff] }
 0x153   : > { %8467 = vmatpush1.bf16.msra.mxu0 %v19906_v36  ;;  %8296 = vmatprep.subr.bf16.mxu1 %v19911_v39  ;;  %v23827_v36 = vcombine.high %v23819_v34, %v23822_v35  ;;  %v19983_v39 = vld [vmem:[%s23603_s17 + $0xaf4] ss:$40 sps:$4 sm:$0xff]  }
 0x154   : > { %8468 = vmatprep.subr.bf16.mxu0 %v19914_v40  ;;  %v19986_v40 = vld [vmem:[%s23603_s17 + $0x1ef4] ss:$40 sps:$4 sm:$0xff]  }
 0x156   : > { %8297 = vmatpush1.bf16.msra.mxu1 %v19909_v45  ;;  %v19989_v45 = vld [vmem:[%s23603_s17 + $0xb44] ss:$40 sps:$4 sm:$0xff]  }
 0x157   : > { %8469 = vmatpush1.bf16.msra.mxu0 %v19912_v46  ;;  %8298 = vmatprep.subr.bf16.mxu1 %v19917_v47  ;;  %v19992_v46 = vld [vmem:[%s23603_s17 + $0x1f44] ss:$40 sps:$4 sm:$0xff]   ;;  %v19987_v47 = vld [vmem:[%s23603_s17 + $0xb40] ss:$40 sps:$4 sm:$0xff]  }
 0x158   : > { %8470 = vmatprep.subr.bf16.mxu0 %v19920_v48  ;;  %v19990_v48 = vld [vmem:[%s23603_s17 + $0x1f40] ss:$40 sps:$4 sm:$0xff]  }
 0x15a   : > { %8299 = vmatpush1.bf16.msra.mxu1 %v19915_v49  ;;  %v19995_v49 = vld [vmem:[%s23603_s17 + $0xb94] ss:$40 sps:$4 sm:$0xff]  }
 0x15b   : > { %8471 = vmatpush1.bf16.msra.mxu0 %v19918_v50  ;;  %8300 = vmatprep.subr.bf16.mxu1 %v19923_v51  ;;  %v19998_v50 = vld [vmem:[%s23603_s17 + $0x1f94] ss:$40 sps:$4 sm:$0xff]   ;;  %v19993_v51 = vld [vmem:[%s23603_s17 + $0xb90] ss:$40 sps:$4 sm:$0xff]  }
 0x15c   : > { %8472 = vmatprep.subr.bf16.mxu0 %v19926_v52  ;;  %v19996_v52 = vld [vmem:[%s23603_s17 + $0x1f90] ss:$40 sps:$4 sm:$0xff]  }
 0x15e   : > { %8301 = vmatpush1.bf16.msra.mxu1 %v19921_v54  ;;  %v20001_v54 = vld [vmem:[%s23603_s17 + $0xbe4] ss:$40 sps:$4 sm:$0xff]  }
 0x15f   : > { %8473 = vmatpush1.bf16.msra.mxu0 %v19924_v55  ;;  %8302 = vmatprep.subr.bf16.mxu1 %v19929_v57  ;;  %v20004_v55 = vld [vmem:[%s23603_s17 + $0x1fe4] ss:$40 sps:$4 sm:$0xff]   ;;  %v19999_v57 = vld [vmem:[%s23603_s17 + $0xbe0] ss:$40 sps:$4 sm:$0xff]  }
 0x160   : > { %8474 = vmatprep.subr.bf16.mxu0 %v19932_v58  ;;  %v20002_v58 = vld [vmem:[%s23603_s17 + $0x1fe0] ss:$40 sps:$4 sm:$0xff]  }
 0x162   : > { %8303 = vmatpush1.bf16.msra.mxu1 %v19927_v59  ;;  %v20007_v59 = vld [vmem:[%s23603_s17 + $0xc34] ss:$40 sps:$4 sm:$0xff]  }
 0x163   : > { %8475 = vmatpush1.bf16.msra.mxu0 %v19930_v60  ;;  %8304 = vmatprep.subr.bf16.mxu1 %v19935_v61  ;;  %v20010_v60 = vld [vmem:[%s23603_s17 + $0x2034] ss:$40 sps:$4 sm:$0xff]   ;;  %v20005_v61 = vld [vmem:[%s23603_s17 + $0xc30] ss:$40 sps:$4 sm:$0xff]  }
 0x164   : > { %8476 = vmatprep.subr.bf16.mxu0 %v19938_v62  ;;  %v20008_v62 = vld [vmem:[%s23603_s17 + $0x2030] ss:$40 sps:$4 sm:$0xff]  }
 0x166   : > { %8305 = vmatpush1.bf16.msra.mxu1 %v19933_v63  ;;  %v20013_v63 = vld [vmem:[%s23603_s17 + $0xc84] ss:$40 sps:$4 sm:$0xff]  }
 0x167   : > { %8477 = vmatpush1.bf16.msra.mxu0 %v19936_v0  ;;  %8306 = vmatprep.subr.bf16.mxu1 %v19941_v1  ;;  %v20016_v0 = vld [vmem:[%s23603_s17 + $0x2084] ss:$40 sps:$4 sm:$0xff]   ;;  %v20011_v1 = vld [vmem:[%s23603_s17 + $0xc80] ss:$40 sps:$4 sm:$0xff]  }
 0x168   : > { %8478 = vmatprep.subr.bf16.mxu0 %v19944_v2  ;;  %v20014_v2 = vld [vmem:[%s23603_s17 + $0x2080] ss:$40 sps:$4 sm:$0xff]  }
 0x16a   : > { %8307 = vmatpush1.bf16.msra.mxu1 %v19939_v3  ;;  %v20019_v3 = vld [vmem:[%s23603_s17 + $0xcd4] ss:$40 sps:$4 sm:$0xff]  }
 0x16b   : > { %8479 = vmatpush1.bf16.msra.mxu0 %v19942_v4  ;;  %8308 = vmatprep.subr.bf16.mxu1 %v19947_v5  ;;  %v20022_v4 = vld [vmem:[%s23603_s17 + $0x20d4] ss:$40 sps:$4 sm:$0xff]   ;;  %v20017_v5 = vld [vmem:[%s23603_s17 + $0xcd0] ss:$40 sps:$4 sm:$0xff]  }
 0x16c   : > { %8480 = vmatprep.subr.bf16.mxu0 %v19950_v6  ;;  %v20020_v6 = vld [vmem:[%s23603_s17 + $0x20d0] ss:$40 sps:$4 sm:$0xff]  }
 0x16e   : > { %8309 = vmatpush1.bf16.msra.mxu1 %v19945_v7  ;;  %v20025_v7 = vld [vmem:[%s23603_s17 + $0xd24] ss:$40 sps:$4 sm:$0xff]  }
 0x16f   : > { %8481 = vmatpush1.bf16.msra.mxu0 %v19948_v8  ;;  %8310 = vmatprep.subr.bf16.mxu1 %v19953_v9  ;;  %v20028_v8 = vld [vmem:[%s23603_s17 + $0x2124] ss:$40 sps:$4 sm:$0xff]   ;;  %v20023_v9 = vld [vmem:[%s23603_s17 + $0xd20] ss:$40 sps:$4 sm:$0xff]  }
 0x170   : > { %8482 = vmatprep.subr.bf16.mxu0 %v19956_v10  ;;  %v20026_v10 = vld [vmem:[%s23603_s17 + $0x2120] ss:$40 sps:$4 sm:$0xff]  }
 0x172   : > { %8311 = vmatpush1.bf16.msra.mxu1 %v19951_v13  ;;  %v20031_v13 = vld [vmem:[%s23603_s17 + $0xd74] ss:$40 sps:$4 sm:$0xff]  }
 0x173   : > { %8483 = vmatpush1.bf16.msra.mxu0 %v19954_v14  ;;  %8312 = vmatprep.subr.bf16.mxu1 %v19959_v15  ;;  %v20034_v14 = vld [vmem:[%s23603_s17 + $0x2174] ss:$40 sps:$4 sm:$0xff]   ;;  %v20029_v15 = vld [vmem:[%s23603_s17 + $0xd70] ss:$40 sps:$4 sm:$0xff]  }
 0x174   : > { %8484 = vmatprep.subr.bf16.mxu0 %v19962_v16  ;;  %v20032_v16 = vld [vmem:[%s23603_s17 + $0x2170] ss:$40 sps:$4 sm:$0xff]  }
 0x176   : > { %8313 = vmatpush1.bf16.msra.mxu1 %v19957_v17  ;;  %v20037_v17 = vld [vmem:[%s23603_s17 + $0xdc4] ss:$40 sps:$4 sm:$0xff]  }
 0x177   : > { %8485 = vmatpush1.bf16.msra.mxu0 %v19960_v18  ;;  %8325 = vmatprep.subr.bf16.mxu1 %v19965_v19  ;;  %v20040_v18 = vld [vmem:[%s23603_s17 + $0x21c4] ss:$40 sps:$4 sm:$0xff]   ;;  %v20035_v19 = vld [vmem:[%s23603_s17 + $0xdc0] ss:$40 sps:$4 sm:$0xff]  }
 0x178   : > { %8497 = vmatprep.subr.bf16.mxu0 %v19968_v20  ;;  %v20038_v20 = vld [vmem:[%s23603_s17 + $0x21c0] ss:$40 sps:$4 sm:$0xff]  }
 0x179   : > { %8315 = vmatmul.mubr.bf16.vlgmr.msra.gmra.mrb[0].mxu1 %v23794_v23 }
 0x17a   : > { %8487 = vmatmul.mubr.bf16.vlgmr.msra.gmra.mrb[0].mxu0 %v23798_v24  ;;  %8326 = vmatpush1.bf16.msra.mxu1 %v19963_v21  ;;  %v20043_v21 = vld [vmem:[%s23603_s17 + $0xe14] ss:$40 sps:$4 sm:$0xff]  }
 0x17b   : > { %8498 = vmatpush1.bf16.msra.mxu0 %v19966_v22  ;;  %8327 = vmatprep.subr.bf16.mxu1 %v19971_v25  ;;  %v20046_v22 = vld [vmem:[%s23603_s17 + $0x2214] ss:$40 sps:$4 sm:$0xff]   ;;  %v20041_v25 = vld [vmem:[%s23603_s17 + $0xe10] ss:$40 sps:$4 sm:$0xff]  }
 0x17c   : > { %8499 = vmatprep.subr.bf16.mxu0 %v19974_v26  ;;  %8357 = vmatprep.mubr.bf16.mxu1 %v23816_v33  ;;  %v20044_v26 = vld [vmem:[%s23603_s17 + $0x2210] ss:$40 sps:$4 sm:$0xff]  }
 0x17d   : > { %8529 = vmatprep.mubr.bf16.mxu0 %v23827_v36 }
 0x17e   : > { %8328 = vmatpush1.bf16.msra.mxu1 %v19969_v27  ;;  %v20049_v27 = vld [vmem:[%s23603_s17 + $0xe64] ss:$40 sps:$4 sm:$0xff]  }
 0x17f   : > { %8500 = vmatpush1.bf16.msra.mxu0 %v19972_v28  ;;  %8329 = vmatprep.subr.bf16.mxu1 %v19977_v31  ;;  %v20052_v28 = vld [vmem:[%s23603_s17 + $0x2264] ss:$40 sps:$4 sm:$0xff]   ;;  %v20047_v31 = vld [vmem:[%s23603_s17 + $0xe60] ss:$40 sps:$4 sm:$0xff]  }
 0x180   : > { %8501 = vmatprep.subr.bf16.mxu0 %v19980_v32  ;;  %v20050_v32 = vld [vmem:[%s23603_s17 + $0x2260] ss:$40 sps:$4 sm:$0xff]  }
 0x182   : > { %8330 = vmatpush1.bf16.msra.mxu1 %v19975_v37  ;;  %v20055_v37 = vld [vmem:[%s23603_s17 + $0xeb4] ss:$40 sps:$4 sm:$0xff]  }
 0x183   : > { %8502 = vmatpush1.bf16.msra.mxu0 %v19978_v38  ;;  %8331 = vmatprep.subr.bf16.mxu1 %v19983_v39  ;;  %v20058_v38 = vld [vmem:[%s23603_s17 + $0x22b4] ss:$40 sps:$4 sm:$0xff]   ;;  %v20053_v39 = vld [vmem:[%s23603_s17 + $0xeb0] ss:$40 sps:$4 sm:$0xff]  }
 0x184   : > { %8503 = vmatprep.subr.bf16.mxu0 %v19986_v40  ;;  %v20056_v40 = vld [vmem:[%s23603_s17 + $0x22b0] ss:$40 sps:$4 sm:$0xff]  }
 0x186   : > { %8332 = vmatpush1.bf16.msra.mxu1 %v19981_v42  ;;  %v20061_v42 = vld [vmem:[%s23603_s17 + $0xf04] ss:$40 sps:$4 sm:$0xff]  }
 0x187   : > { %8504 = vmatpush1.bf16.msra.mxu0 %v19984_v43  ;;  %8333 = vmatprep.subr.bf16.mxu1 %v19989_v45  ;;  %v20064_v43 = vld [vmem:[%s23603_s17 + $0x2304] ss:$40 sps:$4 sm:$0xff]   ;;  %v20059_v45 = vld [vmem:[%s23603_s17 + $0xf00] ss:$40 sps:$4 sm:$0xff]  }
 0x188   : > { %8505 = vmatprep.subr.bf16.mxu0 %v19992_v46  ;;  %v20062_v46 = vld [vmem:[%s23603_s17 + $0x2300] ss:$40 sps:$4 sm:$0xff]  }
 0x18a   : > { %8334 = vmatpush1.bf16.msra.mxu1 %v19987_v47  ;;  %v23889_v47 = vld [vmem:[%s23596_s13 + $0x18] sm:$0xff] }
 0x18b   : > { %8506 = vmatpush1.bf16.msra.mxu0 %v19990_v48  ;;  %8335 = vmatprep.subr.bf16.mxu1 %v19995_v49  ;;  %v23892_v48 = vld [vmem:[%s23596_s13 + $0x58] sm:$0xff]  ;;  %v23896_v49 = vcombine.low %v23805_v29, %v23810_v30 }
 0x18c   : > { %8507 = vmatprep.subr.bf16.mxu0 %v19998_v50  ;;  %v23900_v50 = vcombine.low %v23819_v34, %v23822_v35  ;;  %v23912_v29 = vcombine.high %v23889_v47, %v23892_v48  ;;  %v20065_v34 = vld [vmem:[%s23603_s17 + $0xf50] ss:$40 sps:$4 sm:$0xff]  }
 0x18d   : > { %v20068_v35 = vld [vmem:[%s23603_s17 + $0x2350] ss:$40 sps:$4 sm:$0xff]  }
 0x18e   : > { %8336 = vmatpush1.bf16.msra.mxu1 %v19993_v51  ;;  %v23903_v51 = vld [vmem:[%s23596_s13 + $0x38] sm:$0xff] }
 0x18f   : > { %8508 = vmatpush1.bf16.msra.mxu0 %v19996_v52  ;;  %8337 = vmatprep.subr.bf16.mxu1 %v20001_v54  ;;  %v23906_v52 = vld [vmem:[%s23596_s13 + $0x78] sm:$0xff] }
 0x190   : > { %8509 = vmatprep.subr.bf16.mxu0 %v20004_v55  ;;  %v20067_v54 = vld [vmem:[%s23603_s17 + $0xf54] ss:$40 sps:$4 sm:$0xff]   ;;  %v23916_v30 = vcombine.high %v23903_v51, %v23906_v52 }
 0x191   : > { %v20070_v55 = vld [vmem:[%s23603_s17 + $0x2354] ss:$40 sps:$4 sm:$0xff]  }
 0x192   : > { %8338 = vmatpush1.bf16.msra.mxu1 %v19999_v57  ;;  %v20073_v57 = vld [vmem:[%s23603_s17 + $0xfa4] ss:$40 sps:$4 sm:$0xff]  }
 0x193   : > { %8510 = vmatpush1.bf16.msra.mxu0 %v20002_v58  ;;  %8339 = vmatprep.subr.bf16.mxu1 %v20007_v59  ;;  %v20076_v58 = vld [vmem:[%s23603_s17 + $0x23a4] ss:$40 sps:$4 sm:$0xff]   ;;  %v20071_v59 = vld [vmem:[%s23603_s17 + $0xfa0] ss:$40 sps:$4 sm:$0xff]  }
 0x194   : > { %8511 = vmatprep.subr.bf16.mxu0 %v20010_v60  ;;  %v20074_v60 = vld [vmem:[%s23603_s17 + $0x23a0] ss:$40 sps:$4 sm:$0xff]  }
 0x196   : > { %8340 = vmatpush1.bf16.msra.mxu1 %v20005_v61  ;;  %v20079_v61 = vld [vmem:[%s23603_s17 + $0xff4] ss:$40 sps:$4 sm:$0xff]  }
 0x197   : > { %8512 = vmatpush1.bf16.msra.mxu0 %v20008_v62  ;;  %8341 = vmatprep.subr.bf16.mxu1 %v20013_v63  ;;  %v20082_v62 = vld [vmem:[%s23603_s17 + $0x23f4] ss:$40 sps:$4 sm:$0xff]   ;;  %v20077_v63 = vld [vmem:[%s23603_s17 + $0xff0] ss:$40 sps:$4 sm:$0xff]  }
 0x198   : > { %8513 = vmatprep.subr.bf16.mxu0 %v20016_v0  ;;  %v20080_v0 = vld [vmem:[%s23603_s17 + $0x23f0] ss:$40 sps:$4 sm:$0xff]  }
 0x19a   : > { %8342 = vmatpush1.bf16.msra.mxu1 %v20011_v1  ;;  %v20085_v1 = vld [vmem:[%s23603_s17 + $0x1044] ss:$40 sps:$4 sm:$0xff]  }
 0x19b   : > { %8514 = vmatpush1.bf16.msra.mxu0 %v20014_v2  ;;  %8343 = vmatprep.subr.bf16.mxu1 %v20019_v3  ;;  %v20088_v2 = vld [vmem:[%s23603_s17 + $0x2444] ss:$40 sps:$4 sm:$0xff]   ;;  %v20083_v3 = vld [vmem:[%s23603_s17 + $0x1040] ss:$40 sps:$4 sm:$0xff]  }
 0x19c   : > { %8515 = vmatprep.subr.bf16.mxu0 %v20022_v4  ;;  %v20086_v4 = vld [vmem:[%s23603_s17 + $0x2440] ss:$40 sps:$4 sm:$0xff]  }
 0x19e   : > { %8344 = vmatpush1.bf16.msra.mxu1 %v20017_v5  ;;  %v20091_v5 = vld [vmem:[%s23603_s17 + $0x1094] ss:$40 sps:$4 sm:$0xff]  }
 0x19f   : > { %8516 = vmatpush1.bf16.msra.mxu0 %v20020_v6  ;;  %8345 = vmatprep.subr.bf16.mxu1 %v20025_v7  ;;  %v20094_v6 = vld [vmem:[%s23603_s17 + $0x2494] ss:$40 sps:$4 sm:$0xff]   ;;  %v20089_v7 = vld [vmem:[%s23603_s17 + $0x1090] ss:$40 sps:$4 sm:$0xff]  }
 0x1a0   : > { %8517 = vmatprep.subr.bf16.mxu0 %v20028_v8  ;;  %v20092_v8 = vld [vmem:[%s23603_s17 + $0x2490] ss:$40 sps:$4 sm:$0xff]  }
 0x1a2   : > { %8346 = vmatpush1.bf16.msra.mxu1 %v20023_v9  ;;  %v20097_v9 = vld [vmem:[%s23603_s17 + $0x10e4] ss:$40 sps:$4 sm:$0xff]  }
 0x1a3   : > { %8518 = vmatpush1.bf16.msra.mxu0 %v20026_v10  ;;  %8347 = vmatprep.subr.bf16.mxu1 %v20031_v13  ;;  %v20100_v10 = vld [vmem:[%s23603_s17 + $0x24e4] ss:$40 sps:$4 sm:$0xff]   ;;  %v20095_v13 = vld [vmem:[%s23603_s17 + $0x10e0] ss:$40 sps:$4 sm:$0xff]  }
 0x1a4   : > { %8519 = vmatprep.subr.bf16.mxu0 %v20034_v14  ;;  %v20098_v14 = vld [vmem:[%s23603_s17 + $0x24e0] ss:$40 sps:$4 sm:$0xff]  }
 0x1a6   : > { %8348 = vmatpush1.bf16.msra.mxu1 %v20029_v15  ;;  %v20103_v15 = vld [vmem:[%s23603_s17 + $0x1134] ss:$40 sps:$4 sm:$0xff]  }
 0x1a7   : > { %8520 = vmatpush1.bf16.msra.mxu0 %v20032_v16  ;;  %8349 = vmatprep.subr.bf16.mxu1 %v20037_v17  ;;  %v20106_v16 = vld [vmem:[%s23603_s17 + $0x2534] ss:$40 sps:$4 sm:$0xff]   ;;  %v20101_v17 = vld [vmem:[%s23603_s17 + $0x1130] ss:$40 sps:$4 sm:$0xff]  }
 0x1a8   : > { %8521 = vmatprep.subr.bf16.mxu0 %v20040_v18  ;;  %v20104_v18 = vld [vmem:[%s23603_s17 + $0x2530] ss:$40 sps:$4 sm:$0xff]  }
 0x1aa   : > { %8350 = vmatpush1.bf16.msra.mxu1 %v20035_v19  ;;  %v20109_v19 = vld [vmem:[%s23603_s17 + $0x1184] ss:$40 sps:$4 sm:$0xff]  }
 0x1ab   : > { %8522 = vmatpush1.bf16.msra.mxu0 %v20038_v20  ;;  %8351 = vmatprep.subr.bf16.mxu1 %v20043_v21  ;;  %v20112_v20 = vld [vmem:[%s23603_s17 + $0x2584] ss:$40 sps:$4 sm:$0xff]   ;;  %v20107_v21 = vld [vmem:[%s23603_s17 + $0x1180] ss:$40 sps:$4 sm:$0xff]  }
 0x1ac   : > { %8523 = vmatprep.subr.bf16.mxu0 %v20046_v22  ;;  %v20110_v22 = vld [vmem:[%s23603_s17 + $0x2580] ss:$40 sps:$4 sm:$0xff]  }
 0x1ae   : > { %8352 = vmatpush1.bf16.msra.mxu1 %v20041_v25  ;;  %v20115_v25 = vld [vmem:[%s23603_s17 + $0x11d4] ss:$40 sps:$4 sm:$0xff]  }
 0x1af   : > { %8524 = vmatpush1.bf16.msra.mxu0 %v20044_v26  ;;  %8353 = vmatprep.subr.bf16.mxu1 %v20049_v27  ;;  %v20118_v26 = vld [vmem:[%s23603_s17 + $0x25d4] ss:$40 sps:$4 sm:$0xff]   ;;  %v20113_v27 = vld [vmem:[%s23603_s17 + $0x11d0] ss:$40 sps:$4 sm:$0xff]  }
 0x1b0   : > { %8525 = vmatprep.subr.bf16.mxu0 %v20052_v28  ;;  %v20116_v28 = vld [vmem:[%s23603_s17 + $0x25d0] ss:$40 sps:$4 sm:$0xff]  }
 0x1b2   : > { %8354 = vmatpush1.bf16.msra.mxu1 %v20047_v31  ;;  %v20121_v31 = vld [vmem:[%s23603_s17 + $0x1224] ss:$40 sps:$4 sm:$0xff]  }
 0x1b3   : > { %8526 = vmatpush1.bf16.msra.mxu0 %v20050_v32  ;;  %8355 = vmatprep.subr.bf16.mxu1 %v20055_v37  ;;  %v20124_v32 = vld [vmem:[%s23603_s17 + $0x2624] ss:$40 sps:$4 sm:$0xff]   ;;  %v20119_v37 = vld [vmem:[%s23603_s17 + $0x1220] ss:$40 sps:$4 sm:$0xff]  }
 0x1b4   : > { %8527 = vmatprep.subr.bf16.mxu0 %v20058_v38  ;;  %v20122_v38 = vld [vmem:[%s23603_s17 + $0x2620] ss:$40 sps:$4 sm:$0xff]  }
 0x1b6   : > { %8356 = vmatpush1.bf16.msra.mxu1 %v20053_v39  ;;  %v20127_v39 = vld [vmem:[%s23603_s17 + $0x1274] ss:$40 sps:$4 sm:$0xff]  }
 0x1b7   : > { %8528 = vmatpush1.bf16.msra.mxu0 %v20056_v40  ;;  %8368 = vmatprep.subr.bf16.mxu1 %v20061_v42  ;;  %v20130_v40 = vld [vmem:[%s23603_s17 + $0x2674] ss:$40 sps:$4 sm:$0xff]   ;;  %v20125_v42 = vld [vmem:[%s23603_s17 + $0x1270] ss:$40 sps:$4 sm:$0xff]  }
 0x1b8   : > { %8540 = vmatprep.subr.bf16.mxu0 %v20064_v43  ;;  %v20128_v43 = vld [vmem:[%s23603_s17 + $0x2670] ss:$40 sps:$4 sm:$0xff]  }
 0x1b9   : > { %8358 = vmatmul.mubr.bf16.vlgmr.msra.gmra.mrb[0].mxu1 %v23896_v49 }
 0x1ba   : > { %8530 = vmatmul.mubr.bf16.vlgmr.msra.gmra.mrb[0].mxu0 %v23900_v50  ;;  %8369 = vmatpush1.bf16.msra.mxu1 %v20059_v45  ;;  %v20133_v45 = vld [vmem:[%s23603_s17 + $0x12c4] ss:$40 sps:$4 sm:$0xff]  }
 0x1bb   : > { %8541 = vmatpush1.bf16.msra.mxu0 %v20062_v46  ;;  %8370 = vmatprep.subr.bf16.mxu1 %v20067_v54  ;;  %v20136_v46 = vld [vmem:[%s23603_s17 + $0x26c4] ss:$40 sps:$4 sm:$0xff]   ;;  %v20131_v54 = vld [vmem:[%s23603_s17 + $0x12c0] ss:$40 sps:$4 sm:$0xff]  }
 0x1bc   : > { %8542 = vmatprep.subr.bf16.mxu0 %v20070_v55  ;;  %8400 = vmatprep.mubr.bf16.mxu1 %v23912_v29  ;;  %v20134_v55 = vld [vmem:[%s23603_s17 + $0x26c0] ss:$40 sps:$4 sm:$0xff]  }
 0x1bd   : > { %8572 = vmatprep.mubr.bf16.mxu0 %v23916_v30 }
 0x1be   : > { %8371 = vmatpush1.bf16.msra.mxu1 %v20065_v34  ;;  %v20139_v34 = vld [vmem:[%s23603_s17 + $0x1314] ss:$40 sps:$4 sm:$0xff]  }
 0x1bf   : > { %8543 = vmatpush1.bf16.msra.mxu0 %v20068_v35  ;;  %8372 = vmatprep.subr.bf16.mxu1 %v20073_v57  ;;  %v20142_v35 = vld [vmem:[%s23603_s17 + $0x2714] ss:$40 sps:$4 sm:$0xff]   ;;  %v20137_v57 = vld [vmem:[%s23603_s17 + $0x1310] ss:$40 sps:$4 sm:$0xff]  }
 0x1c0   : > { %8544 = vmatprep.subr.bf16.mxu0 %v20076_v58  ;;  %v20140_v58 = vld [vmem:[%s23603_s17 + $0x2710] ss:$40 sps:$4 sm:$0xff]  }
 0x1c2   : > { %8373 = vmatpush1.bf16.msra.mxu1 %v20071_v59  ;;  %v20145_v59 = vld [vmem:[%s23603_s17 + $0x1364] ss:$40 sps:$4 sm:$0xff]  }
 0x1c3   : > { %8545 = vmatpush1.bf16.msra.mxu0 %v20074_v60  ;;  %8374 = vmatprep.subr.bf16.mxu1 %v20079_v61  ;;  %v20148_v60 = vld [vmem:[%s23603_s17 + $0x2764] ss:$40 sps:$4 sm:$0xff]   ;;  %v20143_v61 = vld [vmem:[%s23603_s17 + $0x1360] ss:$40 sps:$4 sm:$0xff]  }
 0x1c4   : > { %8546 = vmatprep.subr.bf16.mxu0 %v20082_v62  ;;  %v20146_v62 = vld [vmem:[%s23603_s17 + $0x2760] ss:$40 sps:$4 sm:$0xff]  }
 0x1c6   : > { %8375 = vmatpush1.bf16.msra.mxu1 %v20077_v63  ;;  %v20151_v63 = vld [vmem:[%s23603_s17 + $0x13b4] ss:$40 sps:$4 sm:$0xff]  }
 0x1c7   : > { %8547 = vmatpush1.bf16.msra.mxu0 %v20080_v0  ;;  %8376 = vmatprep.subr.bf16.mxu1 %v20085_v1  ;;  %v20154_v0 = vld [vmem:[%s23603_s17 + $0x27b4] ss:$40 sps:$4 sm:$0xff]   ;;  %v20149_v1 = vld [vmem:[%s23603_s17 + $0x13b0] ss:$40 sps:$4 sm:$0xff]  }
 0x1c8   : > { %8548 = vmatprep.subr.bf16.mxu0 %v20088_v2  ;;  %v20152_v2 = vld [vmem:[%s23603_s17 + $0x27b0] ss:$40 sps:$4 sm:$0xff]  }
 0x1ca   : > { %8377 = vmatpush1.bf16.msra.mxu1 %v20083_v3  ;;  %v20157_v3 = vld [vmem:[%s23603_s17 + $0xc] ss:$40 sps:$4 sm:$0xff]  }
 0x1cb   : > { %8549 = vmatpush1.bf16.msra.mxu0 %v20086_v4  ;;  %8378 = vmatprep.subr.bf16.mxu1 %v20091_v5  ;;  %v20160_v4 = vld [vmem:[%s23603_s17 + $0x14] ss:$40 sps:$4 sm:$0xff]   ;;  %v23984_v5 = vcombine.low %v23889_v47, %v23892_v48  ;;  %v20161_v47 = vld [vmem:[%s23603_s17 + $0x58] ss:$40 sps:$4 sm:$0xff]  }
 0x1cc   : > { %8550 = vmatprep.subr.bf16.mxu0 %v20094_v6  ;;  %v23988_v6 = vcombine.low %v23903_v51, %v23906_v52  ;;  %v20164_v48 = vld [vmem:[%s23603_s17 + $0x60] ss:$40 sps:$4 sm:$0xff]   ;;  %v20169_v51 = vld [vmem:[%s23603_s17 + $0xac] ss:$40 sps:$4 sm:$0xff]  }
 0x1cd   : > { %v20172_v52 = vld [vmem:[%s23603_s17 + $0xb4] ss:$40 sps:$4 sm:$0xff]  }
 0x1ce   : > { %8379 = vmatpush1.bf16.msra.mxu1 %v20089_v7  ;;  %v20155_v7 = vld [vmem:[%s23603_s17 + $0x8] ss:$40 sps:$4 sm:$0xff]  }
 0x1cf   : > { %8551 = vmatpush1.bf16.msra.mxu0 %v20092_v8  ;;  %8380 = vmatprep.subr.bf16.mxu1 %v20097_v9  ;;  %v20158_v8 = vld [vmem:[%s23603_s17 + $0x10] ss:$40 sps:$4 sm:$0xff]   ;;  %v20163_v9 = vld [vmem:[%s23603_s17 + $0x5c] ss:$40 sps:$4 sm:$0xff]  }
 0x1d0   : > { %8552 = vmatprep.subr.bf16.mxu0 %v20100_v10  ;;  %v20166_v10 = vld [vmem:[%s23603_s17 + $0x64] ss:$40 sps:$4 sm:$0xff]  }
 0x1d2   : > { %8381 = vmatpush1.bf16.msra.mxu1 %v20095_v13  ;;  %v20167_v13 = vld [vmem:[%s23603_s17 + $0xa8] ss:$40 sps:$4 sm:$0xff]  }
 0x1d3   : > { %8553 = vmatpush1.bf16.msra.mxu0 %v20098_v14  ;;  %8382 = vmatprep.subr.bf16.mxu1 %v20103_v15  ;;  %v20170_v14 = vld [vmem:[%s23603_s17 + $0xb0] ss:$40 sps:$4 sm:$0xff]   ;;  %v20175_v15 = vld [vmem:[%s23603_s17 + $0xfc] ss:$40 sps:$4 sm:$0xff]  }
 0x1d4   : > { %8554 = vmatprep.subr.bf16.mxu0 %v20106_v16  ;;  %v20178_v16 = vld [vmem:[%s23603_s17 + $0x104] ss:$40 sps:$4 sm:$0xff]  }
 0x1d6   : > { %8383 = vmatpush1.bf16.msra.mxu1 %v20101_v17  ;;  %v20173_v17 = vld [vmem:[%s23603_s17 + $0xf8] ss:$40 sps:$4 sm:$0xff]  }
 0x1d7   : > { %8555 = vmatpush1.bf16.msra.mxu0 %v20104_v18  ;;  %8384 = vmatprep.subr.bf16.mxu1 %v20109_v19  ;;  %v20176_v18 = vld [vmem:[%s23603_s17 + $0x100] ss:$40 sps:$4 sm:$0xff]   ;;  %v20181_v19 = vld [vmem:[%s23603_s17 + $0x14c] ss:$40 sps:$4 sm:$0xff]  }
 0x1d8   : > { %8556 = vmatprep.subr.bf16.mxu0 %v20112_v20  ;;  %v20184_v20 = vld [vmem:[%s23603_s17 + $0x154] ss:$40 sps:$4 sm:$0xff]  }
 0x1da   : > { %8385 = vmatpush1.bf16.msra.mxu1 %v20107_v21  ;;  %v20179_v21 = vld [vmem:[%s23603_s17 + $0x148] ss:$40 sps:$4 sm:$0xff]  }
 0x1db   : > { %8557 = vmatpush1.bf16.msra.mxu0 %v20110_v22  ;;  %8386 = vmatprep.subr.bf16.mxu1 %v20115_v25  ;;  %v20182_v22 = vld [vmem:[%s23603_s17 + $0x150] ss:$40 sps:$4 sm:$0xff]   ;;  %v20187_v25 = vld [vmem:[%s23603_s17 + $0x19c] ss:$40 sps:$4 sm:$0xff]  }
 0x1dc   : > { %8558 = vmatprep.subr.bf16.mxu0 %v20118_v26  ;;  %v20190_v26 = vld [vmem:[%s23603_s17 + $0x1a4] ss:$40 sps:$4 sm:$0xff]  }
 0x1de   : > { %8387 = vmatpush1.bf16.msra.mxu1 %v20113_v27  ;;  %v20185_v27 = vld [vmem:[%s23603_s17 + $0x198] ss:$40 sps:$4 sm:$0xff]  }
 0x1df   : > { %8559 = vmatpush1.bf16.msra.mxu0 %v20116_v28  ;;  %8388 = vmatprep.subr.bf16.mxu1 %v20121_v31  ;;  %v20188_v28 = vld [vmem:[%s23603_s17 + $0x1a0] ss:$40 sps:$4 sm:$0xff]   ;;  %v20193_v31 = vld [vmem:[%s23603_s17 + $0x1ec] ss:$40 sps:$4 sm:$0xff]  }
 0x1e0   : > { %8560 = vmatprep.subr.bf16.mxu0 %v20124_v32  ;;  %v20196_v32 = vld [vmem:[%s23603_s17 + $0x1f4] ss:$40 sps:$4 sm:$0xff]  }
 0x1e2   : > { %8389 = vmatpush1.bf16.msra.mxu1 %v20119_v37  ;;  %v20191_v37 = vld [vmem:[%s23603_s17 + $0x1e8] ss:$40 sps:$4 sm:$0xff]  }
 0x1e3   : > { %8561 = vmatpush1.bf16.msra.mxu0 %v20122_v38  ;;  %8390 = vmatprep.subr.bf16.mxu1 %v20127_v39  ;;  %v20194_v38 = vld [vmem:[%s23603_s17 + $0x1f0] ss:$40 sps:$4 sm:$0xff]   ;;  %v20199_v39 = vld [vmem:[%s23603_s17 + $0x23c] ss:$40 sps:$4 sm:$0xff]  }
 0x1e4   : > { %8562 = vmatprep.subr.bf16.mxu0 %v20130_v40  ;;  %v20202_v40 = vld [vmem:[%s23603_s17 + $0x244] ss:$40 sps:$4 sm:$0xff]  }
 0x1e6   : > { %8391 = vmatpush1.bf16.msra.mxu1 %v20125_v42  ;;  %v20197_v42 = vld [vmem:[%s23603_s17 + $0x238] ss:$40 sps:$4 sm:$0xff]  }
 0x1e7   : > { %8563 = vmatpush1.bf16.msra.mxu0 %v20128_v43  ;;  %8392 = vmatprep.subr.bf16.mxu1 %v20133_v45  ;;  %v20200_v43 = vld [vmem:[%s23603_s17 + $0x240] ss:$40 sps:$4 sm:$0xff]   ;;  %v20205_v45 = vld [vmem:[%s23603_s17 + $0x28c] ss:$40 sps:$4 sm:$0xff]  }
 0x1e8   : > { %8564 = vmatprep.subr.bf16.mxu0 %v20136_v46  ;;  %v20208_v46 = vld [vmem:[%s23603_s17 + $0x294] ss:$40 sps:$4 sm:$0xff]  }
 0x1ea   : > { %8393 = vmatpush1.bf16.msra.mxu1 %v20131_v54  ;;  %v20203_v54 = vld [vmem:[%s23603_s17 + $0x288] ss:$40 sps:$4 sm:$0xff]  }
 0x1eb   : > { %8565 = vmatpush1.bf16.msra.mxu0 %v20134_v55  ;;  %8394 = vmatprep.subr.bf16.mxu1 %v20139_v34  ;;  %v20206_v55 = vld [vmem:[%s23603_s17 + $0x290] ss:$40 sps:$4 sm:$0xff]   ;;  %v20211_v34 = vld [vmem:[%s23603_s17 + $0x2dc] ss:$40 sps:$4 sm:$0xff]  }
 0x1ec   : > { %8566 = vmatprep.subr.bf16.mxu0 %v20142_v35  ;;  %v20214_v35 = vld [vmem:[%s23603_s17 + $0x2e4] ss:$40 sps:$4 sm:$0xff]  }
 0x1ee   : > { %8395 = vmatpush1.bf16.msra.mxu1 %v20137_v57  ;;  %v20209_v57 = vld [vmem:[%s23603_s17 + $0x2d8] ss:$40 sps:$4 sm:$0xff]  }
 0x1ef   : > { %8567 = vmatpush1.bf16.msra.mxu0 %v20140_v58  ;;  %8396 = vmatprep.subr.bf16.mxu1 %v20145_v59  ;;  %v20212_v58 = vld [vmem:[%s23603_s17 + $0x2e0] ss:$40 sps:$4 sm:$0xff]   ;;  %v20217_v59 = vld [vmem:[%s23603_s17 + $0x32c] ss:$40 sps:$4 sm:$0xff]  }
 0x1f0   : > { %8568 = vmatprep.subr.bf16.mxu0 %v20148_v60  ;;  %v20220_v60 = vld [vmem:[%s23603_s17 + $0x334] ss:$40 sps:$4 sm:$0xff]  }
 0x1f2   : > { %8397 = vmatpush1.bf16.msra.mxu1 %v20143_v61  ;;  %v20215_v61 = vld [vmem:[%s23603_s17 + $0x328] ss:$40 sps:$4 sm:$0xff]  }
 0x1f3   : > { %8569 = vmatpush1.bf16.msra.mxu0 %v20146_v62  ;;  %8398 = vmatprep.subr.bf16.mxu1 %v20151_v63  ;;  %v20218_v62 = vld [vmem:[%s23603_s17 + $0x330] ss:$40 sps:$4 sm:$0xff]   ;;  %v20223_v63 = vld [vmem:[%s23603_s17 + $0x37c] ss:$40 sps:$4 sm:$0xff]  }
 0x1f4   : > { %8570 = vmatprep.subr.bf16.mxu0 %v20154_v0  ;;  %v20226_v0 = vld [vmem:[%s23603_s17 + $0x384] ss:$40 sps:$4 sm:$0xff]  }
 0x1f6   : > { %8399 = vmatpush1.bf16.msra.mxu1 %v20149_v1  ;;  %v20221_v1 = vld [vmem:[%s23603_s17 + $0x378] ss:$40 sps:$4 sm:$0xff]  }
 0x1f7   : > { %8571 = vmatpush1.bf16.msra.mxu0 %v20152_v2  ;;  %8583 = vmatprep.subr.bf16.mxu1 %v20157_v3  ;;  %v20224_v2 = vld [vmem:[%s23603_s17 + $0x380] ss:$40 sps:$4 sm:$0xff]   ;;  %v20229_v3 = vld [vmem:[%s23603_s17 + $0x3cc] ss:$40 sps:$4 sm:$0xff]  }
 0x1f8   : > { %8927 = vmatprep.subr.bf16.mxu0 %v20160_v4  ;;  %v20232_v4 = vld [vmem:[%s23603_s17 + $0x3d4] ss:$40 sps:$4 sm:$0xff]  }
 0x1f9   : > { %8401 = vmatmul.mubr.bf16.vlgmr.msra.gmra.mrb[0].mxu1 %v23984_v5 }
 0x1fa   : > { %8573 = vmatmul.mubr.bf16.vlgmr.msra.gmra.mrb[0].mxu0 %v23988_v6  ;;  %8584 = vmatpush1.bf16.msra.mxu1 %v20155_v7  ;;  %v20227_v7 = vld [vmem:[%s23603_s17 + $0x3c8] ss:$40 sps:$4 sm:$0xff]  }
 0x1fb   : > { %8928 = vmatpush1.bf16.msra.mxu0 %v20158_v8  ;;  %8585 = vmatprep.subr.bf16.mxu1 %v20163_v9  ;;  %v20230_v8 = vld [vmem:[%s23603_s17 + $0x3d0] ss:$40 sps:$4 sm:$0xff]   ;;  %v20235_v9 = vld [vmem:[%s23603_s17 + $0x41c] ss:$40 sps:$4 sm:$0xff]  }
 0x1fc   : > { %8929 = vmatprep.subr.bf16.mxu0 %v20166_v10  ;;  %8615 = vmatprep.mubr.bf16.mxu1 %v23674_v53  ;;  %v20238_v10 = vld [vmem:[%s23603_s17 + $0x424] ss:$40 sps:$4 sm:$0xff]  }
 0x1fd   : > { %8959 = vmatprep.mubr.bf16.mxu0 %v23674_v53 }
 0x1fe   : > { %8586 = vmatpush1.bf16.msra.mxu1 %v20161_v47  ;;  %v20233_v47 = vld [vmem:[%s23603_s17 + $0x418] ss:$40 sps:$4 sm:$0xff]  }
 0x1ff   : > { %8930 = vmatpush1.bf16.msra.mxu0 %v20164_v48  ;;  %8587 = vmatprep.subr.bf16.mxu1 %v20169_v51  ;;  %v20236_v48 = vld [vmem:[%s23603_s17 + $0x420] ss:$40 sps:$4 sm:$0xff]   ;;  %v20241_v51 = vld [vmem:[%s23603_s17 + $0x46c] ss:$40 sps:$4 sm:$0xff]  }
 0x200   : > { %8931 = vmatprep.subr.bf16.mxu0 %v20172_v52  ;;  %v20244_v52 = vld [vmem:[%s23603_s17 + $0x474] ss:$40 sps:$4 sm:$0xff]  }
 0x202   : > { %8588 = vmatpush1.bf16.msra.mxu1 %v20167_v13  ;;  %v20239_v13 = vld [vmem:[%s23603_s17 + $0x468] ss:$40 sps:$4 sm:$0xff]  }
 0x203   : > { %8932 = vmatpush1.bf16.msra.mxu0 %v20170_v14  ;;  %8589 = vmatprep.subr.bf16.mxu1 %v20175_v15  ;;  %v20242_v14 = vld [vmem:[%s23603_s17 + $0x470] ss:$40 sps:$4 sm:$0xff]   ;;  %v20247_v15 = vld [vmem:[%s23603_s17 + $0x4bc] ss:$40 sps:$4 sm:$0xff]  }
 0x204   : > { %8933 = vmatprep.subr.bf16.mxu0 %v20178_v16  ;;  %v20250_v16 = vld [vmem:[%s23603_s17 + $0x4c4] ss:$40 sps:$4 sm:$0xff]  }
 0x206   : > { %8590 = vmatpush1.bf16.msra.mxu1 %v20173_v17  ;;  %v20245_v17 = vld [vmem:[%s23603_s17 + $0x4b8] ss:$40 sps:$4 sm:$0xff]  }
 0x207   : > { %8934 = vmatpush1.bf16.msra.mxu0 %v20176_v18  ;;  %8591 = vmatprep.subr.bf16.mxu1 %v20181_v19  ;;  %v20248_v18 = vld [vmem:[%s23603_s17 + $0x4c0] ss:$40 sps:$4 sm:$0xff]   ;;  %v20253_v19 = vld [vmem:[%s23603_s17 + $0x50c] ss:$40 sps:$4 sm:$0xff]  }
 0x208   : > { %8935 = vmatprep.subr.bf16.mxu0 %v20184_v20  ;;  %v20256_v20 = vld [vmem:[%s23603_s17 + $0x514] ss:$40 sps:$4 sm:$0xff]  }
 0x20a   : > { %8592 = vmatpush1.bf16.msra.mxu1 %v20179_v21  ;;  %v20251_v21 = vld [vmem:[%s23603_s17 + $0x508] ss:$40 sps:$4 sm:$0xff]  }
 0x20b   : > { %8936 = vmatpush1.bf16.msra.mxu0 %v20182_v22  ;;  %8593 = vmatprep.subr.bf16.mxu1 %v20187_v25  ;;  %v20254_v22 = vld [vmem:[%s23603_s17 + $0x510] ss:$40 sps:$4 sm:$0xff]   ;;  %v20259_v25 = vld [vmem:[%s23603_s17 + $0x55c] ss:$40 sps:$4 sm:$0xff]  }
 0x20c   : > { %8937 = vmatprep.subr.bf16.mxu0 %v20190_v26  ;;  %v20262_v26 = vld [vmem:[%s23603_s17 + $0x564] ss:$40 sps:$4 sm:$0xff]  }
 0x20e   : > { %8594 = vmatpush1.bf16.msra.mxu1 %v20185_v27  ;;  %v20257_v27 = vld [vmem:[%s23603_s17 + $0x558] ss:$40 sps:$4 sm:$0xff]  }
 0x20f   : > { %8938 = vmatpush1.bf16.msra.mxu0 %v20188_v28  ;;  %8595 = vmatprep.subr.bf16.mxu1 %v20193_v31  ;;  %v20260_v28 = vld [vmem:[%s23603_s17 + $0x560] ss:$40 sps:$4 sm:$0xff]   ;;  %v20265_v31 = vld [vmem:[%s23603_s17 + $0x5ac] ss:$40 sps:$4 sm:$0xff]  }
 0x210   : > { %8939 = vmatprep.subr.bf16.mxu0 %v20196_v32  ;;  %v20268_v32 = vld [vmem:[%s23603_s17 + $0x5b4] ss:$40 sps:$4 sm:$0xff]  }
 0x212   : > { %8596 = vmatpush1.bf16.msra.mxu1 %v20191_v37  ;;  %v20263_v37 = vld [vmem:[%s23603_s17 + $0x5a8] ss:$40 sps:$4 sm:$0xff]  }
 0x213   : > { %8940 = vmatpush1.bf16.msra.mxu0 %v20194_v38  ;;  %8597 = vmatprep.subr.bf16.mxu1 %v20199_v39  ;;  %v20266_v38 = vld [vmem:[%s23603_s17 + $0x5b0] ss:$40 sps:$4 sm:$0xff]   ;;  %v20271_v39 = vld [vmem:[%s23603_s17 + $0x5fc] ss:$40 sps:$4 sm:$0xff]  }
 0x214   : > { %8941 = vmatprep.subr.bf16.mxu0 %v20202_v40  ;;  %v20274_v40 = vld [vmem:[%s23603_s17 + $0x604] ss:$40 sps:$4 sm:$0xff]  }
 0x216   : > { %8598 = vmatpush1.bf16.msra.mxu1 %v20197_v42  ;;  %v20269_v42 = vld [vmem:[%s23603_s17 + $0x5f8] ss:$40 sps:$4 sm:$0xff]  }
 0x217   : > { %8942 = vmatpush1.bf16.msra.mxu0 %v20200_v43  ;;  %8599 = vmatprep.subr.bf16.mxu1 %v20205_v45  ;;  %v20272_v43 = vld [vmem:[%s23603_s17 + $0x600] ss:$40 sps:$4 sm:$0xff]   ;;  %v20277_v45 = vld [vmem:[%s23603_s17 + $0x64c] ss:$40 sps:$4 sm:$0xff]  }
 0x218   : > { %8943 = vmatprep.subr.bf16.mxu0 %v20208_v46  ;;  %v20280_v46 = vld [vmem:[%s23603_s17 + $0x654] ss:$40 sps:$4 sm:$0xff]  }
 0x21a   : > { %8600 = vmatpush1.bf16.msra.mxu1 %v20203_v54  ;;  %v20275_v54 = vld [vmem:[%s23603_s17 + $0x648] ss:$40 sps:$4 sm:$0xff]  }
 0x21b   : > { %8944 = vmatpush1.bf16.msra.mxu0 %v20206_v55  ;;  %8601 = vmatprep.subr.bf16.mxu1 %v20211_v34  ;;  %v20278_v55 = vld [vmem:[%s23603_s17 + $0x650] ss:$40 sps:$4 sm:$0xff]   ;;  %v20283_v34 = vld [vmem:[%s23603_s17 + $0x69c] ss:$40 sps:$4 sm:$0xff]  }
 0x21c   : > { %8945 = vmatprep.subr.bf16.mxu0 %v20214_v35  ;;  %v20286_v35 = vld [vmem:[%s23603_s17 + $0x6a4] ss:$40 sps:$4 sm:$0xff]  }
 0x21e   : > { %8602 = vmatpush1.bf16.msra.mxu1 %v20209_v57  ;;  %v20281_v57 = vld [vmem:[%s23603_s17 + $0x698] ss:$40 sps:$4 sm:$0xff]  }
 0x21f   : > { %8946 = vmatpush1.bf16.msra.mxu0 %v20212_v58  ;;  %8603 = vmatprep.subr.bf16.mxu1 %v20217_v59  ;;  %v20284_v58 = vld [vmem:[%s23603_s17 + $0x6a0] ss:$40 sps:$4 sm:$0xff]   ;;  %v20289_v59 = vld [vmem:[%s23603_s17 + $0x6ec] ss:$40 sps:$4 sm:$0xff]  }
 0x220   : > { %8947 = vmatprep.subr.bf16.mxu0 %v20220_v60  ;;  %v20292_v60 = vld [vmem:[%s23603_s17 + $0x6f4] ss:$40 sps:$4 sm:$0xff]  }
 0x222   : > { %8604 = vmatpush1.bf16.msra.mxu1 %v20215_v61  ;;  %v20287_v61 = vld [vmem:[%s23603_s17 + $0x6e8] ss:$40 sps:$4 sm:$0xff]  }
 0x223   : > { %8948 = vmatpush1.bf16.msra.mxu0 %v20218_v62  ;;  %8605 = vmatprep.subr.bf16.mxu1 %v20223_v63  ;;  %v20290_v62 = vld [vmem:[%s23603_s17 + $0x6f0] ss:$40 sps:$4 sm:$0xff]   ;;  %v20295_v63 = vld [vmem:[%s23603_s17 + $0x73c] ss:$40 sps:$4 sm:$0xff]  }
 0x224   : > { %8949 = vmatprep.subr.bf16.mxu0 %v20226_v0  ;;  %v20298_v0 = vld [vmem:[%s23603_s17 + $0x744] ss:$40 sps:$4 sm:$0xff]  }
 0x226   : > { %8606 = vmatpush1.bf16.msra.mxu1 %v20221_v1  ;;  %v20293_v1 = vld [vmem:[%s23603_s17 + $0x738] ss:$40 sps:$4 sm:$0xff]  }
 0x227   : > { %8950 = vmatpush1.bf16.msra.mxu0 %v20224_v2  ;;  %8607 = vmatprep.subr.bf16.mxu1 %v20229_v3  ;;  %v20296_v2 = vld [vmem:[%s23603_s17 + $0x740] ss:$40 sps:$4 sm:$0xff]   ;;  %v20301_v3 = vld [vmem:[%s23603_s17 + $0x78c] ss:$40 sps:$4 sm:$0xff]  }
 0x228   : > { %8951 = vmatprep.subr.bf16.mxu0 %v20232_v4  ;;  %v20304_v4 = vld [vmem:[%s23603_s17 + $0x794] ss:$40 sps:$4 sm:$0xff]  }
 0x22a   : > { %8608 = vmatpush1.bf16.msra.mxu1 %v20227_v7  ;;  %v20299_v7 = vld [vmem:[%s23603_s17 + $0x788] ss:$40 sps:$4 sm:$0xff]  }
 0x22b   : > { %8952 = vmatpush1.bf16.msra.mxu0 %v20230_v8  ;;  %8609 = vmatprep.subr.bf16.mxu1 %v20235_v9  ;;  %v20302_v8 = vld [vmem:[%s23603_s17 + $0x790] ss:$40 sps:$4 sm:$0xff]   ;;  %v20307_v9 = vld [vmem:[%s23603_s17 + $0x7dc] ss:$40 sps:$4 sm:$0xff]  }
 0x22c   : > { %8953 = vmatprep.subr.bf16.mxu0 %v20238_v10  ;;  %v20310_v10 = vld [vmem:[%s23603_s17 + $0x7e4] ss:$40 sps:$4 sm:$0xff]  }
 0x22e   : > { %8610 = vmatpush1.bf16.msra.mxu1 %v20233_v47  ;;  %v20305_v47 = vld [vmem:[%s23603_s17 + $0x7d8] ss:$40 sps:$4 sm:$0xff]  }
 0x22f   : > { %8954 = vmatpush1.bf16.msra.mxu0 %v20236_v48  ;;  %8611 = vmatprep.subr.bf16.mxu1 %v20241_v51  ;;  %v20308_v48 = vld [vmem:[%s23603_s17 + $0x7e0] ss:$40 sps:$4 sm:$0xff]   ;;  %v20313_v51 = vld [vmem:[%s23603_s17 + $0x82c] ss:$40 sps:$4 sm:$0xff]  }
 0x230   : > { %8955 = vmatprep.subr.bf16.mxu0 %v20244_v52  ;;  %v20316_v52 = vld [vmem:[%s23603_s17 + $0x834] ss:$40 sps:$4 sm:$0xff]  }
 0x232   : > { %8612 = vmatpush1.bf16.msra.mxu1 %v20239_v13  ;;  %v20311_v13 = vld [vmem:[%s23603_s17 + $0x828] ss:$40 sps:$4 sm:$0xff]  }
 0x233   : > { %8956 = vmatpush1.bf16.msra.mxu0 %v20242_v14  ;;  %8613 = vmatprep.subr.bf16.mxu1 %v20247_v15  ;;  %v20314_v14 = vld [vmem:[%s23603_s17 + $0x830] ss:$40 sps:$4 sm:$0xff]   ;;  %v20319_v15 = vld [vmem:[%s23603_s17 + $0x87c] ss:$40 sps:$4 sm:$0xff]  }
 0x234   : > { %8957 = vmatprep.subr.bf16.mxu0 %v20250_v16  ;;  %v20322_v16 = vld [vmem:[%s23603_s17 + $0x884] ss:$40 sps:$4 sm:$0xff]  }
 0x236   : > { %8614 = vmatpush1.bf16.msra.mxu1 %v20245_v17  ;;  %v20317_v17 = vld [vmem:[%s23603_s17 + $0x878] ss:$40 sps:$4 sm:$0xff]  }
 0x237   : > { %8958 = vmatpush1.bf16.msra.mxu0 %v20248_v18  ;;  %8626 = vmatprep.subr.bf16.mxu1 %v20253_v19  ;;  %v20320_v18 = vld [vmem:[%s23603_s17 + $0x880] ss:$40 sps:$4 sm:$0xff]   ;;  %v20325_v19 = vld [vmem:[%s23603_s17 + $0x8cc] ss:$40 sps:$4 sm:$0xff]  }
 0x238   : > { %8970 = vmatprep.subr.bf16.mxu0 %v20256_v20  ;;  %v20328_v20 = vld [vmem:[%s23603_s17 + $0x8d4] ss:$40 sps:$4 sm:$0xff]  }
 0x239   : > { %8616 = vmatmul.mubr.bf16.vlgmr.msra.gmra.mrb[4].mxu1 %v23700_v11 }
 0x23a   : > { %8960 = vmatmul.mubr.bf16.vlgmr.msra.gmra.mrb[4].mxu0 %v23700_v11  ;;  %8627 = vmatpush1.bf16.msra.mxu1 %v20251_v21  ;;  %v20323_v21 = vld [vmem:[%s23603_s17 + $0x8c8] ss:$40 sps:$4 sm:$0xff]  }
 0x23b   : > { %8971 = vmatpush1.bf16.msra.mxu0 %v20254_v22  ;;  %8628 = vmatprep.subr.bf16.mxu1 %v20259_v25  ;;  %v20326_v22 = vld [vmem:[%s23603_s17 + $0x8d0] ss:$40 sps:$4 sm:$0xff]   ;;  %v20331_v25 = vld [vmem:[%s23603_s17 + $0x91c] ss:$40 sps:$4 sm:$0xff]  }
 0x23c   : > { %8972 = vmatprep.subr.bf16.mxu0 %v20262_v26  ;;  %8658 = vmatprep.mubr.bf16.mxu1 %v23740_v41  ;;  %v20334_v26 = vld [vmem:[%s23603_s17 + $0x924] ss:$40 sps:$4 sm:$0xff]  }
 0x23d   : > { %9002 = vmatprep.mubr.bf16.mxu0 %v23740_v41 }
 0x23e   : > { %8629 = vmatpush1.bf16.msra.mxu1 %v20257_v27  ;;  %v20329_v27 = vld [vmem:[%s23603_s17 + $0x918] ss:$40 sps:$4 sm:$0xff]  }
 0x23f   : > { %8973 = vmatpush1.bf16.msra.mxu0 %v20260_v28  ;;  %8630 = vmatprep.subr.bf16.mxu1 %v20265_v31  ;;  %v20332_v28 = vld [vmem:[%s23603_s17 + $0x920] ss:$40 sps:$4 sm:$0xff]   ;;  %v20337_v31 = vld [vmem:[%s23603_s17 + $0x96c] ss:$40 sps:$4 sm:$0xff]  }
 0x240   : > { %8974 = vmatprep.subr.bf16.mxu0 %v20268_v32  ;;  %v20340_v32 = vld [vmem:[%s23603_s17 + $0x974] ss:$40 sps:$4 sm:$0xff]  }
 0x242   : > { %8631 = vmatpush1.bf16.msra.mxu1 %v20263_v37  ;;  %v20335_v37 = vld [vmem:[%s23603_s17 + $0x968] ss:$40 sps:$4 sm:$0xff]  }
 0x243   : > { %8975 = vmatpush1.bf16.msra.mxu0 %v20266_v38  ;;  %8632 = vmatprep.subr.bf16.mxu1 %v20271_v39  ;;  %v20338_v38 = vld [vmem:[%s23603_s17 + $0x970] ss:$40 sps:$4 sm:$0xff]   ;;  %v20343_v39 = vld [vmem:[%s23603_s17 + $0x9bc] ss:$40 sps:$4 sm:$0xff]  }
 0x244   : > { %8976 = vmatprep.subr.bf16.mxu0 %v20274_v40  ;;  %v20346_v40 = vld [vmem:[%s23603_s17 + $0x9c4] ss:$40 sps:$4 sm:$0xff]  }
 0x246   : > { %8633 = vmatpush1.bf16.msra.mxu1 %v20269_v42  ;;  %v20341_v42 = vld [vmem:[%s23603_s17 + $0x9b8] ss:$40 sps:$4 sm:$0xff]  }
 0x247   : > { %8977 = vmatpush1.bf16.msra.mxu0 %v20272_v43  ;;  %8634 = vmatprep.subr.bf16.mxu1 %v20277_v45  ;;  %v20344_v43 = vld [vmem:[%s23603_s17 + $0x9c0] ss:$40 sps:$4 sm:$0xff]   ;;  %v20349_v45 = vld [vmem:[%s23603_s17 + $0xa0c] ss:$40 sps:$4 sm:$0xff]  }
 0x248   : > { %8978 = vmatprep.subr.bf16.mxu0 %v20280_v46  ;;  %v20352_v46 = vld [vmem:[%s23603_s17 + $0xa14] ss:$40 sps:$4 sm:$0xff]  }
 0x24a   : > { %8635 = vmatpush1.bf16.msra.mxu1 %v20275_v54  ;;  %v20347_v54 = vld [vmem:[%s23603_s17 + $0xa08] ss:$40 sps:$4 sm:$0xff]  }
 0x24b   : > { %8979 = vmatpush1.bf16.msra.mxu0 %v20278_v55  ;;  %8636 = vmatprep.subr.bf16.mxu1 %v20283_v34  ;;  %v20350_v55 = vld [vmem:[%s23603_s17 + $0xa10] ss:$40 sps:$4 sm:$0xff]   ;;  %v20355_v34 = vld [vmem:[%s23603_s17 + $0xa5c] ss:$40 sps:$4 sm:$0xff]  }
 0x24c   : > { %8980 = vmatprep.subr.bf16.mxu0 %v20286_v35  ;;  %v20358_v35 = vld [vmem:[%s23603_s17 + $0xa64] ss:$40 sps:$4 sm:$0xff]  }
 0x24e   : > { %8637 = vmatpush1.bf16.msra.mxu1 %v20281_v57  ;;  %v20353_v57 = vld [vmem:[%s23603_s17 + $0xa58] ss:$40 sps:$4 sm:$0xff]  }
 0x24f   : > { %8981 = vmatpush1.bf16.msra.mxu0 %v20284_v58  ;;  %8638 = vmatprep.subr.bf16.mxu1 %v20289_v59  ;;  %v20356_v58 = vld [vmem:[%s23603_s17 + $0xa60] ss:$40 sps:$4 sm:$0xff]   ;;  %v20361_v59 = vld [vmem:[%s23603_s17 + $0xaac] ss:$40 sps:$4 sm:$0xff]  }
 0x250   : > { %8982 = vmatprep.subr.bf16.mxu0 %v20292_v60  ;;  %v20364_v60 = vld [vmem:[%s23603_s17 + $0xab4] ss:$40 sps:$4 sm:$0xff]  }
 0x252   : > { %8639 = vmatpush1.bf16.msra.mxu1 %v20287_v61  ;;  %v20359_v61 = vld [vmem:[%s23603_s17 + $0xaa8] ss:$40 sps:$4 sm:$0xff]  }
 0x253   : > { %8983 = vmatpush1.bf16.msra.mxu0 %v20290_v62  ;;  %8640 = vmatprep.subr.bf16.mxu1 %v20295_v63  ;;  %v20362_v62 = vld [vmem:[%s23603_s17 + $0xab0] ss:$40 sps:$4 sm:$0xff]   ;;  %v20367_v63 = vld [vmem:[%s23603_s17 + $0xafc] ss:$40 sps:$4 sm:$0xff]  }
 0x254   : > { %8984 = vmatprep.subr.bf16.mxu0 %v20298_v0  ;;  %v20370_v0 = vld [vmem:[%s23603_s17 + $0xb04] ss:$40 sps:$4 sm:$0xff]  }
 0x256   : > { %8641 = vmatpush1.bf16.msra.mxu1 %v20293_v1  ;;  %v20365_v1 = vld [vmem:[%s23603_s17 + $0xaf8] ss:$40 sps:$4 sm:$0xff]  }
 0x257   : > { %8985 = vmatpush1.bf16.msra.mxu0 %v20296_v2  ;;  %8642 = vmatprep.subr.bf16.mxu1 %v20301_v3  ;;  %v20368_v2 = vld [vmem:[%s23603_s17 + $0xb00] ss:$40 sps:$4 sm:$0xff]   ;;  %v20373_v3 = vld [vmem:[%s23603_s17 + $0xb4c] ss:$40 sps:$4 sm:$0xff]  }
 0x258   : > { %8986 = vmatprep.subr.bf16.mxu0 %v20304_v4  ;;  %v20376_v4 = vld [vmem:[%s23603_s17 + $0xb54] ss:$40 sps:$4 sm:$0xff]  }
 0x25a   : > { %8643 = vmatpush1.bf16.msra.mxu1 %v20299_v7  ;;  %v20371_v7 = vld [vmem:[%s23603_s17 + $0xb48] ss:$40 sps:$4 sm:$0xff]  }
 0x25b   : > { %8987 = vmatpush1.bf16.msra.mxu0 %v20302_v8  ;;  %8644 = vmatprep.subr.bf16.mxu1 %v20307_v9  ;;  %v20374_v8 = vld [vmem:[%s23603_s17 + $0xb50] ss:$40 sps:$4 sm:$0xff]   ;;  %v20379_v9 = vld [vmem:[%s23603_s17 + $0xb9c] ss:$40 sps:$4 sm:$0xff]  }
 0x25c   : > { %8988 = vmatprep.subr.bf16.mxu0 %v20310_v10  ;;  %v20382_v10 = vld [vmem:[%s23603_s17 + $0xba4] ss:$40 sps:$4 sm:$0xff]  }
 0x25e   : > { %8645 = vmatpush1.bf16.msra.mxu1 %v20305_v47  ;;  %v20377_v47 = vld [vmem:[%s23603_s17 + $0xb98] ss:$40 sps:$4 sm:$0xff]  }
 0x25f   : > { %8989 = vmatpush1.bf16.msra.mxu0 %v20308_v48  ;;  %8646 = vmatprep.subr.bf16.mxu1 %v20313_v51  ;;  %v20380_v48 = vld [vmem:[%s23603_s17 + $0xba0] ss:$40 sps:$4 sm:$0xff]   ;;  %v20385_v51 = vld [vmem:[%s23603_s17 + $0xbec] ss:$40 sps:$4 sm:$0xff]  }
 0x260   : > { %8990 = vmatprep.subr.bf16.mxu0 %v20316_v52  ;;  %v20388_v52 = vld [vmem:[%s23603_s17 + $0xbf4] ss:$40 sps:$4 sm:$0xff]  }
 0x262   : > { %8647 = vmatpush1.bf16.msra.mxu1 %v20311_v13  ;;  %v20383_v13 = vld [vmem:[%s23603_s17 + $0xbe8] ss:$40 sps:$4 sm:$0xff]  }
 0x263   : > { %8991 = vmatpush1.bf16.msra.mxu0 %v20314_v14  ;;  %8648 = vmatprep.subr.bf16.mxu1 %v20319_v15  ;;  %v20386_v14 = vld [vmem:[%s23603_s17 + $0xbf0] ss:$40 sps:$4 sm:$0xff]   ;;  %v20391_v15 = vld [vmem:[%s23603_s17 + $0xc3c] ss:$40 sps:$4 sm:$0xff]  }
 0x264   : > { %8992 = vmatprep.subr.bf16.mxu0 %v20322_v16  ;;  %v20394_v16 = vld [vmem:[%s23603_s17 + $0xc44] ss:$40 sps:$4 sm:$0xff]  }
 0x266   : > { %8649 = vmatpush1.bf16.msra.mxu1 %v20317_v17  ;;  %v20389_v17 = vld [vmem:[%s23603_s17 + $0xc38] ss:$40 sps:$4 sm:$0xff]  }
 0x267   : > { %8993 = vmatpush1.bf16.msra.mxu0 %v20320_v18  ;;  %8650 = vmatprep.subr.bf16.mxu1 %v20325_v19  ;;  %v20392_v18 = vld [vmem:[%s23603_s17 + $0xc40] ss:$40 sps:$4 sm:$0xff]   ;;  %v20397_v19 = vld [vmem:[%s23603_s17 + $0xc8c] ss:$40 sps:$4 sm:$0xff]  }
 0x268   : > { %8994 = vmatprep.subr.bf16.mxu0 %v20328_v20  ;;  %v20400_v20 = vld [vmem:[%s23603_s17 + $0xc94] ss:$40 sps:$4 sm:$0xff]  }
 0x26a   : > { %8651 = vmatpush1.bf16.msra.mxu1 %v20323_v21  ;;  %v20395_v21 = vld [vmem:[%s23603_s17 + $0xc88] ss:$40 sps:$4 sm:$0xff]  }
 0x26b   : > { %8995 = vmatpush1.bf16.msra.mxu0 %v20326_v22  ;;  %8652 = vmatprep.subr.bf16.mxu1 %v20331_v25  ;;  %v20398_v22 = vld [vmem:[%s23603_s17 + $0xc90] ss:$40 sps:$4 sm:$0xff]   ;;  %v20403_v25 = vld [vmem:[%s23603_s17 + $0xcdc] ss:$40 sps:$4 sm:$0xff]  }
 0x26c   : > { %8996 = vmatprep.subr.bf16.mxu0 %v20334_v26  ;;  %v20406_v26 = vld [vmem:[%s23603_s17 + $0xce4] ss:$40 sps:$4 sm:$0xff]  }
 0x26e   : > { %8653 = vmatpush1.bf16.msra.mxu1 %v20329_v27  ;;  %v20401_v27 = vld [vmem:[%s23603_s17 + $0xcd8] ss:$40 sps:$4 sm:$0xff]  }
 0x26f   : > { %8997 = vmatpush1.bf16.msra.mxu0 %v20332_v28  ;;  %8654 = vmatprep.subr.bf16.mxu1 %v20337_v31  ;;  %v20404_v28 = vld [vmem:[%s23603_s17 + $0xce0] ss:$40 sps:$4 sm:$0xff]   ;;  %v20409_v31 = vld [vmem:[%s23603_s17 + $0xd2c] ss:$40 sps:$4 sm:$0xff]  }
 0x270   : > { %8998 = vmatprep.subr.bf16.mxu0 %v20340_v32  ;;  %v20412_v32 = vld [vmem:[%s23603_s17 + $0xd34] ss:$40 sps:$4 sm:$0xff]  }
 0x272   : > { %8655 = vmatpush1.bf16.msra.mxu1 %v20335_v37  ;;  %v20407_v37 = vld [vmem:[%s23603_s17 + $0xd28] ss:$40 sps:$4 sm:$0xff]  }
 0x273   : > { %8999 = vmatpush1.bf16.msra.mxu0 %v20338_v38  ;;  %8656 = vmatprep.subr.bf16.mxu1 %v20343_v39  ;;  %v20410_v38 = vld [vmem:[%s23603_s17 + $0xd30] ss:$40 sps:$4 sm:$0xff]   ;;  %v20415_v39 = vld [vmem:[%s23603_s17 + $0xd7c] ss:$40 sps:$4 sm:$0xff]  }
 0x274   : > { %9000 = vmatprep.subr.bf16.mxu0 %v20346_v40  ;;  %v20418_v40 = vld [vmem:[%s23603_s17 + $0xd84] ss:$40 sps:$4 sm:$0xff]  }
 0x276   : > { %8657 = vmatpush1.bf16.msra.mxu1 %v20341_v42  ;;  %v20413_v42 = vld [vmem:[%s23603_s17 + $0xd78] ss:$40 sps:$4 sm:$0xff]  }
 0x277   : > { %9001 = vmatpush1.bf16.msra.mxu0 %v20344_v43  ;;  %8669 = vmatprep.subr.bf16.mxu1 %v20349_v45  ;;  %v20416_v43 = vld [vmem:[%s23603_s17 + $0xd80] ss:$40 sps:$4 sm:$0xff]   ;;  %v20421_v45 = vld [vmem:[%s23603_s17 + $0xdcc] ss:$40 sps:$4 sm:$0xff]  }
 0x278   : > { %9013 = vmatprep.subr.bf16.mxu0 %v20352_v46  ;;  %v20424_v46 = vld [vmem:[%s23603_s17 + $0xdd4] ss:$40 sps:$4 sm:$0xff]  }
 0x279   : > { %8659 = vmatmul.mubr.bf16.vlgmr.msra.gmra.mrb[4].mxu1 %v23794_v23 }
 0x27a   : > { %9003 = vmatmul.mubr.bf16.vlgmr.msra.gmra.mrb[4].mxu0 %v23794_v23  ;;  %8670 = vmatpush1.bf16.msra.mxu1 %v20347_v54  ;;  %v20419_v54 = vld [vmem:[%s23603_s17 + $0xdc8] ss:$40 sps:$4 sm:$0xff]  }
 0x27b   : > { %9014 = vmatpush1.bf16.msra.mxu0 %v20350_v55  ;;  %8671 = vmatprep.subr.bf16.mxu1 %v20355_v34  ;;  %v20422_v55 = vld [vmem:[%s23603_s17 + $0xdd0] ss:$40 sps:$4 sm:$0xff]   ;;  %v20427_v34 = vld [vmem:[%s23603_s17 + $0xe1c] ss:$40 sps:$4 sm:$0xff]  }
 0x27c   : > { %9015 = vmatprep.subr.bf16.mxu0 %v20358_v35  ;;  %8701 = vmatprep.mubr.bf16.mxu1 %v23816_v33  ;;  %v20430_v35 = vld [vmem:[%s23603_s17 + $0xe24] ss:$40 sps:$4 sm:$0xff]  }
 0x27d   : > { %9045 = vmatprep.mubr.bf16.mxu0 %v23816_v33 }
 0x27e   : > { %8672 = vmatpush1.bf16.msra.mxu1 %v20353_v57  ;;  %v20425_v57 = vld [vmem:[%s23603_s17 + $0xe18] ss:$40 sps:$4 sm:$0xff]  }
 0x27f   : > { %9016 = vmatpush1.bf16.msra.mxu0 %v20356_v58  ;;  %8673 = vmatprep.subr.bf16.mxu1 %v20361_v59  ;;  %v20428_v58 = vld [vmem:[%s23603_s17 + $0xe20] ss:$40 sps:$4 sm:$0xff]   ;;  %v20433_v59 = vld [vmem:[%s23603_s17 + $0xe6c] ss:$40 sps:$4 sm:$0xff]  }
 0x280   : > { %9017 = vmatprep.subr.bf16.mxu0 %v20364_v60  ;;  %v20436_v60 = vld [vmem:[%s23603_s17 + $0xe74] ss:$40 sps:$4 sm:$0xff]  }
 0x282   : > { %8674 = vmatpush1.bf16.msra.mxu1 %v20359_v61  ;;  %v20431_v61 = vld [vmem:[%s23603_s17 + $0xe68] ss:$40 sps:$4 sm:$0xff]  }
 0x283   : > { %9018 = vmatpush1.bf16.msra.mxu0 %v20362_v62  ;;  %8675 = vmatprep.subr.bf16.mxu1 %v20367_v63  ;;  %v20434_v62 = vld [vmem:[%s23603_s17 + $0xe70] ss:$40 sps:$4 sm:$0xff]   ;;  %v20439_v63 = vld [vmem:[%s23603_s17 + $0xebc] ss:$40 sps:$4 sm:$0xff]  }
 0x284   : > { %9019 = vmatprep.subr.bf16.mxu0 %v20370_v0  ;;  %v20442_v0 = vld [vmem:[%s23603_s17 + $0xec4] ss:$40 sps:$4 sm:$0xff]  }
 0x286   : > { %8676 = vmatpush1.bf16.msra.mxu1 %v20365_v1  ;;  %v20437_v1 = vld [vmem:[%s23603_s17 + $0xeb8] ss:$40 sps:$4 sm:$0xff]  }
 0x287   : > { %9020 = vmatpush1.bf16.msra.mxu0 %v20368_v2  ;;  %8677 = vmatprep.subr.bf16.mxu1 %v20373_v3  ;;  %v20440_v2 = vld [vmem:[%s23603_s17 + $0xec0] ss:$40 sps:$4 sm:$0xff]   ;;  %v20445_v3 = vld [vmem:[%s23603_s17 + $0xf0c] ss:$40 sps:$4 sm:$0xff]  }
 0x288   : > { %9021 = vmatprep.subr.bf16.mxu0 %v20376_v4  ;;  %v20448_v4 = vld [vmem:[%s23603_s17 + $0xf14] ss:$40 sps:$4 sm:$0xff]  }
 0x28a   : > { %8678 = vmatpush1.bf16.msra.mxu1 %v20371_v7  ;;  %v20443_v7 = vld [vmem:[%s23603_s17 + $0xf08] ss:$40 sps:$4 sm:$0xff]  }
 0x28b   : > { %9022 = vmatpush1.bf16.msra.mxu0 %v20374_v8  ;;  %8679 = vmatprep.subr.bf16.mxu1 %v20379_v9  ;;  %v20446_v8 = vld [vmem:[%s23603_s17 + $0xf10] ss:$40 sps:$4 sm:$0xff]   ;;  %v20451_v9 = vld [vmem:[%s23603_s17 + $0xf5c] ss:$40 sps:$4 sm:$0xff]  }
 0x28c   : > { %9023 = vmatprep.subr.bf16.mxu0 %v20382_v10  ;;  %v20454_v10 = vld [vmem:[%s23603_s17 + $0xf64] ss:$40 sps:$4 sm:$0xff]  }
 0x28e   : > { %8680 = vmatpush1.bf16.msra.mxu1 %v20377_v47  ;;  %v20449_v47 = vld [vmem:[%s23603_s17 + $0xf58] ss:$40 sps:$4 sm:$0xff]  }
 0x28f   : > { %9024 = vmatpush1.bf16.msra.mxu0 %v20380_v48  ;;  %8681 = vmatprep.subr.bf16.mxu1 %v20385_v51  ;;  %v20452_v48 = vld [vmem:[%s23603_s17 + $0xf60] ss:$40 sps:$4 sm:$0xff]   ;;  %v20457_v51 = vld [vmem:[%s23603_s17 + $0xfac] ss:$40 sps:$4 sm:$0xff]  }
 0x290   : > { %9025 = vmatprep.subr.bf16.mxu0 %v20388_v52  ;;  %v20460_v52 = vld [vmem:[%s23603_s17 + $0xfb4] ss:$40 sps:$4 sm:$0xff]  }
 0x292   : > { %8682 = vmatpush1.bf16.msra.mxu1 %v20383_v13  ;;  %v20455_v13 = vld [vmem:[%s23603_s17 + $0xfa8] ss:$40 sps:$4 sm:$0xff]  }
 0x293   : > { %9026 = vmatpush1.bf16.msra.mxu0 %v20386_v14  ;;  %8683 = vmatprep.subr.bf16.mxu1 %v20391_v15  ;;  %v20458_v14 = vld [vmem:[%s23603_s17 + $0xfb0] ss:$40 sps:$4 sm:$0xff]   ;;  %v20463_v15 = vld [vmem:[%s23603_s17 + $0xffc] ss:$40 sps:$4 sm:$0xff]  }
 0x294   : > { %9027 = vmatprep.subr.bf16.mxu0 %v20394_v16  ;;  %v20466_v16 = vld [vmem:[%s23603_s17 + $0x1004] ss:$40 sps:$4 sm:$0xff]  }
 0x296   : > { %8684 = vmatpush1.bf16.msra.mxu1 %v20389_v17  ;;  %v20461_v17 = vld [vmem:[%s23603_s17 + $0xff8] ss:$40 sps:$4 sm:$0xff]  }
 0x297   : > { %9028 = vmatpush1.bf16.msra.mxu0 %v20392_v18  ;;  %8685 = vmatprep.subr.bf16.mxu1 %v20397_v19  ;;  %v20464_v18 = vld [vmem:[%s23603_s17 + $0x1000] ss:$40 sps:$4 sm:$0xff]   ;;  %v20469_v19 = vld [vmem:[%s23603_s17 + $0x104c] ss:$40 sps:$4 sm:$0xff]  }
 0x298   : > { %9029 = vmatprep.subr.bf16.mxu0 %v20400_v20  ;;  %v20472_v20 = vld [vmem:[%s23603_s17 + $0x1054] ss:$40 sps:$4 sm:$0xff]  }
 0x29a   : > { %8686 = vmatpush1.bf16.msra.mxu1 %v20395_v21  ;;  %v20467_v21 = vld [vmem:[%s23603_s17 + $0x1048] ss:$40 sps:$4 sm:$0xff]  }
 0x29b   : > { %9030 = vmatpush1.bf16.msra.mxu0 %v20398_v22  ;;  %8687 = vmatprep.subr.bf16.mxu1 %v20403_v25  ;;  %v20470_v22 = vld [vmem:[%s23603_s17 + $0x1050] ss:$40 sps:$4 sm:$0xff]   ;;  %v20475_v25 = vld [vmem:[%s23603_s17 + $0x109c] ss:$40 sps:$4 sm:$0xff]  }
 0x29c   : > { %9031 = vmatprep.subr.bf16.mxu0 %v20406_v26  ;;  %v20478_v26 = vld [vmem:[%s23603_s17 + $0x10a4] ss:$40 sps:$4 sm:$0xff]  }
 0x29e   : > { %8688 = vmatpush1.bf16.msra.mxu1 %v20401_v27  ;;  %v443_v27 = vld [vmem:[#allocation2] sm:$0xff] }
 0x29f   : > { %9032 = vmatpush1.bf16.msra.mxu0 %v20404_v28  ;;  %8689 = vmatprep.subr.bf16.mxu1 %v20409_v31  ;;  %v20473_v28 = vld [vmem:[%s23603_s17 + $0x1098] ss:$40 sps:$4 sm:$0xff]  }
 0x2a0   : > { %9033 = vmatprep.subr.bf16.mxu0 %v20412_v32  ;;  %v20476_v31 = vld [vmem:[%s23603_s17 + $0x10a0] ss:$40 sps:$4 sm:$0xff]  }
 0x2a1   : > { %v444_v32 = vld [vmem:[#allocation2 + $0x8] sm:$0xff] }
 0x2a2   : > { %8690 = vmatpush1.bf16.msra.mxu1 %v20407_v37  ;;  %v20481_v37 = vld [vmem:[%s23603_s17 + $0x10ec] ss:$40 sps:$4 sm:$0xff]  }
 0x2a3   : > { %9034 = vmatpush1.bf16.msra.mxu0 %v20410_v38  ;;  %8691 = vmatprep.subr.bf16.mxu1 %v20415_v39  ;;  %v20484_v38 = vld [vmem:[%s23603_s17 + $0x10f4] ss:$40 sps:$4 sm:$0xff]  }
 0x2a4   : > { %9035 = vmatprep.subr.bf16.mxu0 %v20418_v40 }
 0x2a6   : > { %8692 = vmatpush1.bf16.msra.mxu1 %v20413_v42  ;;  %v20479_v42 = vld [vmem:[%s23603_s17 + $0x10e8] ss:$40 sps:$4 sm:$0xff]  }
 0x2a7   : > { %9036 = vmatpush1.bf16.msra.mxu0 %v20416_v43  ;;  %8693 = vmatprep.subr.bf16.mxu1 %v20421_v45 }
 0x2a8   : > { %9037 = vmatprep.subr.bf16.mxu0 %v20424_v46 }
 0x2aa   : > { %8694 = vmatpush1.bf16.msra.mxu1 %v20419_v54 }
 0x2ab   : > { %9038 = vmatpush1.bf16.msra.mxu0 %v20422_v55  ;;  %8695 = vmatprep.subr.bf16.mxu1 %v20427_v34  ;;  %v453_v34 = vld [vmem:[#allocation2 + $0x50] sm:$0xff] }
 0x2ac   : > { %9039 = vmatprep.subr.bf16.mxu0 %v20430_v35 }
 0x2ae   : > { %8696 = vmatpush1.bf16.msra.mxu1 %v20425_v57  ;;  %v454_v57 = vld [vmem:[#allocation2 + $0x58] sm:$0xff] }
 0x2af   : > { %9040 = vmatpush1.bf16.msra.mxu0 %v20428_v58  ;;  %8697 = vmatprep.subr.bf16.mxu1 %v20433_v59  ;;  %v20482_v58 = vld [vmem:[%s23603_s17 + $0x10f0] ss:$40 sps:$4 sm:$0xff]  }
 0x2b0   : > { %9041 = vmatprep.subr.bf16.mxu0 %v20436_v60 }
 0x2b2   : > { %8698 = vmatpush1.bf16.msra.mxu1 %v20431_v61 }
 0x2b3   : > { %9042 = vmatpush1.bf16.msra.mxu0 %v20434_v62  ;;  %8699 = vmatprep.subr.bf16.mxu1 %v20439_v63  ;;  %v20487_v63 = vld [vmem:[%s23603_s17 + $0x113c] ss:$40 sps:$4 sm:$0xff]  }
 0x2b4   : > { %9043 = vmatprep.subr.bf16.mxu0 %v20442_v0  ;;  %v20490_v0 = vld [vmem:[%s23603_s17 + $0x1144] ss:$40 sps:$4 sm:$0xff]  }
 0x2b6   : > { %8700 = vmatpush1.bf16.msra.mxu1 %v20437_v1 }
 0x2b7   : > { %9044 = vmatpush1.bf16.msra.mxu0 %v20440_v2  ;;  %8712 = vmatprep.subr.bf16.mxu1 %v20445_v3 }
 0x2b8   : > { %9056 = vmatprep.subr.bf16.mxu0 %v20448_v4 }
 0x2b9   : > { %8702 = vmatmul.mubr.bf16.vlgmr.msra.gmra.mrb[4].mxu1 %v23896_v49 }
 0x2ba   : > { %9046 = vmatmul.mubr.bf16.vlgmr.msra.gmra.mrb[4].mxu0 %v23896_v49  ;;  %8713 = vmatpush1.bf16.msra.mxu1 %v20443_v7  ;;  %v20485_v7 = vld [vmem:[%s23603_s17 + $0x1138] ss:$40 sps:$4 sm:$0xff]  }
 0x2bb   : > { %9057 = vmatpush1.bf16.msra.mxu0 %v20446_v8  ;;  %8714 = vmatprep.subr.bf16.mxu1 %v20451_v9  ;;  %v20488_v8 = vld [vmem:[%s23603_s17 + $0x1140] ss:$40 sps:$4 sm:$0xff]   ;;  %v20493_v9 = vld [vmem:[%s23603_s17 + $0x118c] ss:$40 sps:$4 sm:$0xff]  }
 0x2bc   : > { %9058 = vmatprep.subr.bf16.mxu0 %v20454_v10  ;;  %8744 = vmatprep.mubr.bf16.mxu1 %v23912_v29  ;;  %v20496_v10 = vld [vmem:[%s23603_s17 + $0x1194] ss:$40 sps:$4 sm:$0xff]  }
 0x2bd   : > { %9088 = vmatprep.mubr.bf16.mxu0 %v23912_v29 }
 0x2be   : > { %8715 = vmatpush1.bf16.msra.mxu1 %v20449_v47  ;;  %v20491_v47 = vld [vmem:[%s23603_s17 + $0x1188] ss:$40 sps:$4 sm:$0xff]  }
 0x2bf   : > { %9059 = vmatpush1.bf16.msra.mxu0 %v20452_v48  ;;  %8716 = vmatprep.subr.bf16.mxu1 %v20457_v51  ;;  %v20494_v48 = vld [vmem:[%s23603_s17 + $0x1190] ss:$40 sps:$4 sm:$0xff]   ;;  %v20499_v51 = vld [vmem:[%s23603_s17 + $0x11dc] ss:$40 sps:$4 sm:$0xff]  }
 0x2c0   : > { %9060 = vmatprep.subr.bf16.mxu0 %v20460_v52  ;;  %v20502_v52 = vld [vmem:[%s23603_s17 + $0x11e4] ss:$40 sps:$4 sm:$0xff]  }
 0x2c2   : > { %8717 = vmatpush1.bf16.msra.mxu1 %v20455_v13  ;;  %v20497_v13 = vld [vmem:[%s23603_s17 + $0x11d8] ss:$40 sps:$4 sm:$0xff]  }
 0x2c3   : > { %9061 = vmatpush1.bf16.msra.mxu0 %v20458_v14  ;;  %8718 = vmatprep.subr.bf16.mxu1 %v20463_v15  ;;  %v20500_v14 = vld [vmem:[%s23603_s17 + $0x11e0] ss:$40 sps:$4 sm:$0xff]   ;;  %v20505_v15 = vld [vmem:[%s23603_s17 + $0x122c] ss:$40 sps:$4 sm:$0xff]  }
 0x2c4   : > { %9062 = vmatprep.subr.bf16.mxu0 %v20466_v16  ;;  %v20508_v16 = vld [vmem:[%s23603_s17 + $0x1234] ss:$40 sps:$4 sm:$0xff]  }
 0x2c6   : > { %8719 = vmatpush1.bf16.msra.mxu1 %v20461_v17  ;;  %v20503_v17 = vld [vmem:[%s23603_s17 + $0x1228] ss:$40 sps:$4 sm:$0xff]  }
 0x2c7   : > { %9063 = vmatpush1.bf16.msra.mxu0 %v20464_v18  ;;  %8720 = vmatprep.subr.bf16.mxu1 %v20469_v19  ;;  %v20506_v18 = vld [vmem:[%s23603_s17 + $0x1230] ss:$40 sps:$4 sm:$0xff]   ;;  %v20511_v19 = vld [vmem:[%s23603_s17 + $0x127c] ss:$40 sps:$4 sm:$0xff]  }
 0x2c8   : > { %9064 = vmatprep.subr.bf16.mxu0 %v20472_v20  ;;  %v20514_v20 = vld [vmem:[%s23603_s17 + $0x1284] ss:$40 sps:$4 sm:$0xff]  }
 0x2ca   : > { %8721 = vmatpush1.bf16.msra.mxu1 %v20467_v21  ;;  %v20509_v21 = vld [vmem:[%s23603_s17 + $0x1278] ss:$40 sps:$4 sm:$0xff]  }
 0x2cb   : > { %9065 = vmatpush1.bf16.msra.mxu0 %v20470_v22  ;;  %8722 = vmatprep.subr.bf16.mxu1 %v20475_v25  ;;  %v20512_v22 = vld [vmem:[%s23603_s17 + $0x1280] ss:$40 sps:$4 sm:$0xff]   ;;  %v20517_v25 = vld [vmem:[%s23603_s17 + $0x12cc] ss:$40 sps:$4 sm:$0xff]  }
 0x2cc   : > { %9066 = vmatprep.subr.bf16.mxu0 %v20478_v26  ;;  %v8402_v39 = vpop.f32.mrb[0].mxu1  ;;  %v20520_v26 = vld [vmem:[%s23603_s17 + $0x12d4] ss:$40 sps:$4 sm:$0xff]  }
 0x2cd   : > { %v8574_v40 = vpop.f32.mrb[0].mxu0  ;;  %v8404_v45 = vpop.f32.mrb[1].mxu1 }
 0x2ce   : > { %v19401_v43 = vadd.f32 %v8574_v40, %v8402_v39  ;;  %v8576_v46 = vpop.f32.mrb[1].mxu0  ;;  %v8406_v55 = vpop.f32.mrb[2].mxu1  ;;  %8723 = vmatpush1.bf16.msra.mxu1 %v20473_v28  ;;  %v20518_v28 = vld [vmem:[%s23603_s17 + $0x12d0] ss:$40 sps:$4 sm:$0xff]   ;;  %v20529_v39 = vld [vmem:[%s23603_s17 + $0x136c] ss:$40 sps:$4 sm:$0xff]  }
 0x2cf   : > { %v19402_v54 = vadd.f32 %v8576_v46, %v8404_v45  ;;  %v8578_v35 = vpop.f32.mrb[2].mxu0  ;;  %9067 = vmatpush1.bf16.msra.mxu0 %v20476_v31  ;;  %v8408_v61 = vpop.f32.mrb[3].mxu1  ;;  %8724 = vmatprep.subr.bf16.mxu1 %v20481_v37  ;;  %v20523_v31 = vld [vmem:[%s23603_s17 + $0x131c] ss:$40 sps:$4 sm:$0xff]   ;;  %v20521_v37 = vld [vmem:[%s23603_s17 + $0x1318] ss:$40 sps:$4 sm:$0xff]  }
 0x2d0   : > { %v9959_v59 = vadd.f32 %v19401_v43, %v443_v27  ;;  %v19403_v60 = vadd.f32 %v8578_v35, %v8406_v55  ;;  %v8580_v62 = vpop.f32.mrb[3].mxu0  ;;  %9068 = vmatprep.subr.bf16.mxu0 %v20484_v38  ;;  %v20515_v27 = vld [vmem:[%s23603_s17 + $0x12c8] ss:$40 sps:$4 sm:$0xff]   ;;  %v20532_v40 = vld [vmem:[%s23603_s17 + $0x1374] ss:$40 sps:$4 sm:$0xff]  }
 0x2d1   : > { %v9960_v1 = vadd.f32 %v19402_v54, %v444_v32  ;;  %v19404_v2 = vadd.f32 %v8580_v62, %v8408_v61  ;;  %v20526_v32 = vld [vmem:[%s23603_s17 + $0x1324] ss:$40 sps:$4 sm:$0xff]   ;;  %v20524_v38 = vld [vmem:[%s23603_s17 + $0x1320] ss:$40 sps:$4 sm:$0xff]   ;;  %v20530_v43 = vld [vmem:[%s23603_s17 + $0x1370] ss:$40 sps:$4 sm:$0xff]  }
 0x2d2   : > { %9979 = vst [vmem:[#allocation2] sm:$0xff] %v9959_v59  ;;  %v9969_v3 = vadd.f32 %v19403_v60, %v453_v34  ;;  %8725 = vmatpush1.bf16.msra.mxu1 %v20479_v42  ;;  %v20527_v42 = vld [vmem:[%s23603_s17 + $0x1368] ss:$40 sps:$4 sm:$0xff]   ;;  %v20535_v45 = vld [vmem:[%s23603_s17 + $0x13bc] ss:$40 sps:$4 sm:$0xff]  }
 0x2d3   : > { %9980 = vst [vmem:[#allocation2 + $0x8] sm:$0xff] %v9960_v1  ;;  %v9970_v4 = vadd.f32 %v19404_v2, %v454_v57  ;;  %9069 = vmatpush1.bf16.msra.mxu0 %v20482_v58  ;;  %8726 = vmatprep.subr.bf16.mxu1 %v20487_v63  ;;  %v20538_v46 = vld [vmem:[%s23603_s17 + $0x13c4] ss:$40 sps:$4 sm:$0xff]   ;;  %v20533_v54 = vld [vmem:[%s23603_s17 + $0x13b8] ss:$40 sps:$4 sm:$0xff]  }
 0x2d4   : > { %9989 = vst [vmem:[#allocation2 + $0x50] sm:$0xff] %v9969_v3  ;;  %9070 = vmatprep.subr.bf16.mxu0 %v20490_v0  ;;  %v20536_v55 = vld [vmem:[%s23603_s17 + $0x13c0] ss:$40 sps:$4 sm:$0xff]   ;;  %v20541_v34 = vld [vmem:[%s23603_s17 + $0x140c] ss:$40 sps:$4 sm:$0xff]  }
 0x2d5   : > { %9990 = vst [vmem:[#allocation2 + $0x58] sm:$0xff] %v9970_v4  ;;  %v20544_v35 = vld [vmem:[%s23603_s17 + $0x1414] ss:$40 sps:$4 sm:$0xff]   ;;  %v20539_v57 = vld [vmem:[%s23603_s17 + $0x1408] ss:$40 sps:$4 sm:$0xff]  }
 0x2d6   : > { %8727 = vmatpush1.bf16.msra.mxu1 %v20485_v7  ;;  %v20542_v58 = vld [vmem:[%s23603_s17 + $0x1410] ss:$40 sps:$4 sm:$0xff]   ;;  %v20547_v59 = vld [vmem:[%s23603_s17 + $0x145c] ss:$40 sps:$4 sm:$0xff]   ;;  %v20548_v62 = vld [vmem:[%s23603_s17 + $0x1460] ss:$40 sps:$4 sm:$0xff]  }
 0x2d7   : > { %9071 = vmatpush1.bf16.msra.mxu0 %v20488_v8  ;;  %8728 = vmatprep.subr.bf16.mxu1 %v20493_v9  ;;  %v20550_v60 = vld [vmem:[%s23603_s17 + $0x1464] ss:$40 sps:$4 sm:$0xff]   ;;  %v20545_v61 = vld [vmem:[%s23603_s17 + $0x1458] ss:$40 sps:$4 sm:$0xff]   ;;  %v20556_v0 = vld [vmem:[%s23603_s17 + $0x14b4] ss:$40 sps:$4 sm:$0xff]  }
 0x2d8   : > { %9072 = vmatprep.subr.bf16.mxu0 %v20496_v10  ;;  %v20553_v63 = vld [vmem:[%s23603_s17 + $0x14ac] ss:$40 sps:$4 sm:$0xff]   ;;  %v20551_v1 = vld [vmem:[%s23603_s17 + $0x14a8] ss:$40 sps:$4 sm:$0xff]   ;;  %v20559_v3 = vld [vmem:[%s23603_s17 + $0x14fc] ss:$40 sps:$4 sm:$0xff]  }
 0x2d9   : > { %v20554_v2 = vld [vmem:[%s23603_s17 + $0x14b0] ss:$40 sps:$4 sm:$0xff]   ;;  %v20562_v4 = vld [vmem:[%s23603_s17 + $0x1504] ss:$40 sps:$4 sm:$0xff]   ;;  %v20560_v8 = vld [vmem:[%s23603_s17 + $0x1500] ss:$40 sps:$4 sm:$0xff]  }
 0x2da   : > { %8729 = vmatpush1.bf16.msra.mxu1 %v20491_v47  ;;  %v20557_v7 = vld [vmem:[%s23603_s17 + $0x14f8] ss:$40 sps:$4 sm:$0xff]   ;;  %v20565_v9 = vld [vmem:[%s23603_s17 + $0x154c] ss:$40 sps:$4 sm:$0xff]   ;;  %v20563_v47 = vld [vmem:[%s23603_s17 + $0x1548] ss:$40 sps:$4 sm:$0xff]  }
 0x2db   : > { %9073 = vmatpush1.bf16.msra.mxu0 %v20494_v48  ;;  %8730 = vmatprep.subr.bf16.mxu1 %v20499_v51  ;;  %v20568_v10 = vld [vmem:[%s23603_s17 + $0x1554] ss:$40 sps:$4 sm:$0xff]   ;;  %v20566_v48 = vld [vmem:[%s23603_s17 + $0x1550] ss:$40 sps:$4 sm:$0xff]  }
 0x2dc   : > { %9074 = vmatprep.subr.bf16.mxu0 %v20502_v52  ;;  %v20571_v51 = vld [vmem:[%s23603_s17 + $0x159c] ss:$40 sps:$4 sm:$0xff]  }
 0x2dd   : > { %v20574_v52 = vld [vmem:[%s23603_s17 + $0x15a4] ss:$40 sps:$4 sm:$0xff]  }
 0x2de   : > { %8731 = vmatpush1.bf16.msra.mxu1 %v20497_v13  ;;  %v20569_v13 = vld [vmem:[%s23603_s17 + $0x1598] ss:$40 sps:$4 sm:$0xff]  }
 0x2df   : > { %9075 = vmatpush1.bf16.msra.mxu0 %v20500_v14  ;;  %8732 = vmatprep.subr.bf16.mxu1 %v20505_v15  ;;  %v20572_v14 = vld [vmem:[%s23603_s17 + $0x15a0] ss:$40 sps:$4 sm:$0xff]   ;;  %v20577_v15 = vld [vmem:[%s23603_s17 + $0x15ec] ss:$40 sps:$4 sm:$0xff]  }
 0x2e0   : > { %9076 = vmatprep.subr.bf16.mxu0 %v20508_v16  ;;  %v20580_v16 = vld [vmem:[%s23603_s17 + $0x15f4] ss:$40 sps:$4 sm:$0xff]  }
 0x2e2   : > { %8733 = vmatpush1.bf16.msra.mxu1 %v20503_v17  ;;  %v20575_v17 = vld [vmem:[%s23603_s17 + $0x15e8] ss:$40 sps:$4 sm:$0xff]  }
 0x2e3   : > { %9077 = vmatpush1.bf16.msra.mxu0 %v20506_v18  ;;  %8734 = vmatprep.subr.bf16.mxu1 %v20511_v19  ;;  %v20578_v18 = vld [vmem:[%s23603_s17 + $0x15f0] ss:$40 sps:$4 sm:$0xff]   ;;  %v20583_v19 = vld [vmem:[%s23603_s17 + $0x163c] ss:$40 sps:$4 sm:$0xff]  }
 0x2e4   : > { %9078 = vmatprep.subr.bf16.mxu0 %v20514_v20  ;;  %v20586_v20 = vld [vmem:[%s23603_s17 + $0x1644] ss:$40 sps:$4 sm:$0xff]  }
 0x2e6   : > { %8735 = vmatpush1.bf16.msra.mxu1 %v20509_v21  ;;  %v20581_v21 = vld [vmem:[%s23603_s17 + $0x1638] ss:$40 sps:$4 sm:$0xff]  }
 0x2e7   : > { %9079 = vmatpush1.bf16.msra.mxu0 %v20512_v22  ;;  %8736 = vmatprep.subr.bf16.mxu1 %v20517_v25  ;;  %v20584_v22 = vld [vmem:[%s23603_s17 + $0x1640] ss:$40 sps:$4 sm:$0xff]   ;;  %v20589_v25 = vld [vmem:[%s23603_s17 + $0x168c] ss:$40 sps:$4 sm:$0xff]  }
 0x2e8   : > { %9080 = vmatprep.subr.bf16.mxu0 %v20520_v26  ;;  %v20592_v26 = vld [vmem:[%s23603_s17 + $0x1694] ss:$40 sps:$4 sm:$0xff]  }
 0x2ea   : > { %8737 = vmatpush1.bf16.msra.mxu1 %v20515_v27  ;;  %v20587_v27 = vld [vmem:[%s23603_s17 + $0x1688] ss:$40 sps:$4 sm:$0xff]  }
 0x2eb   : > { %9081 = vmatpush1.bf16.msra.mxu0 %v20518_v28  ;;  %8738 = vmatprep.subr.bf16.mxu1 %v20523_v31  ;;  %v20590_v28 = vld [vmem:[%s23603_s17 + $0x1690] ss:$40 sps:$4 sm:$0xff]   ;;  %v20595_v31 = vld [vmem:[%s23603_s17 + $0x16dc] ss:$40 sps:$4 sm:$0xff]  }
 0x2ec   : > { %9082 = vmatprep.subr.bf16.mxu0 %v20526_v32  ;;  %v20598_v32 = vld [vmem:[%s23603_s17 + $0x16e4] ss:$40 sps:$4 sm:$0xff]  }
 0x2ee   : > { %8739 = vmatpush1.bf16.msra.mxu1 %v20521_v37  ;;  %v20593_v37 = vld [vmem:[%s23603_s17 + $0x16d8] ss:$40 sps:$4 sm:$0xff]  }
 0x2ef   : > { %9083 = vmatpush1.bf16.msra.mxu0 %v20524_v38  ;;  %8740 = vmatprep.subr.bf16.mxu1 %v20529_v39  ;;  %v20596_v38 = vld [vmem:[%s23603_s17 + $0x16e0] ss:$40 sps:$4 sm:$0xff]   ;;  %v20601_v39 = vld [vmem:[%s23603_s17 + $0x172c] ss:$40 sps:$4 sm:$0xff]  }
 0x2f0   : > { %9084 = vmatprep.subr.bf16.mxu0 %v20532_v40  ;;  %v20604_v40 = vld [vmem:[%s23603_s17 + $0x1734] ss:$40 sps:$4 sm:$0xff]  }
 0x2f2   : > { %8741 = vmatpush1.bf16.msra.mxu1 %v20527_v42  ;;  %v20599_v42 = vld [vmem:[%s23603_s17 + $0x1728] ss:$40 sps:$4 sm:$0xff]  }
 0x2f3   : > { %9085 = vmatpush1.bf16.msra.mxu0 %v20530_v43  ;;  %8742 = vmatprep.subr.bf16.mxu1 %v20535_v45  ;;  %v20602_v43 = vld [vmem:[%s23603_s17 + $0x1730] ss:$40 sps:$4 sm:$0xff]   ;;  %v20607_v45 = vld [vmem:[%s23603_s17 + $0x177c] ss:$40 sps:$4 sm:$0xff]  }
 0x2f4   : > { %9086 = vmatprep.subr.bf16.mxu0 %v20538_v46  ;;  %v20610_v46 = vld [vmem:[%s23603_s17 + $0x1784] ss:$40 sps:$4 sm:$0xff]  }
 0x2f6   : > { %8743 = vmatpush1.bf16.msra.mxu1 %v20533_v54  ;;  %v20605_v54 = vld [vmem:[%s23603_s17 + $0x1778] ss:$40 sps:$4 sm:$0xff]  }
 0x2f7   : > { %9087 = vmatpush1.bf16.msra.mxu0 %v20536_v55  ;;  %8755 = vmatprep.subr.bf16.mxu1 %v20541_v34  ;;  %v20608_v55 = vld [vmem:[%s23603_s17 + $0x1780] ss:$40 sps:$4 sm:$0xff]   ;;  %v20613_v34 = vld [vmem:[%s23603_s17 + $0x17cc] ss:$40 sps:$4 sm:$0xff]  }
 0x2f8   : > { %9099 = vmatprep.subr.bf16.mxu0 %v20544_v35  ;;  %v20616_v35 = vld [vmem:[%s23603_s17 + $0x17d4] ss:$40 sps:$4 sm:$0xff]  }
 0x2f9   : > { %8745 = vmatmul.mubr.bf16.vlgmr.msra.gmra.mrb[4].mxu1 %v23984_v5 }
 0x2fa   : > { %9089 = vmatmul.mubr.bf16.vlgmr.msra.gmra.mrb[4].mxu0 %v23984_v5  ;;  %8756 = vmatpush1.bf16.msra.mxu1 %v20539_v57  ;;  %v20611_v57 = vld [vmem:[%s23603_s17 + $0x17c8] ss:$40 sps:$4 sm:$0xff]  }
 0x2fb   : > { %9100 = vmatpush1.bf16.msra.mxu0 %v20542_v58  ;;  %8757 = vmatprep.subr.bf16.mxu1 %v20547_v59  ;;  %v20614_v58 = vld [vmem:[%s23603_s17 + $0x17d0] ss:$40 sps:$4 sm:$0xff]   ;;  %v20619_v59 = vld [vmem:[%s23603_s17 + $0x181c] ss:$40 sps:$4 sm:$0xff]  }
 0x2fc   : > { %9101 = vmatprep.subr.bf16.mxu0 %v20550_v60  ;;  %8787 = vmatprep.mubr.bf16.mxu1 %v23679_v56  ;;  %v20622_v60 = vld [vmem:[%s23603_s17 + $0x1824] ss:$40 sps:$4 sm:$0xff]  }
 0x2fd   : > { %9131 = vmatprep.mubr.bf16.mxu0 %v23679_v56 }
 0x2fe   : > { %8758 = vmatpush1.bf16.msra.mxu1 %v20545_v61  ;;  %v20617_v61 = vld [vmem:[%s23603_s17 + $0x1818] ss:$40 sps:$4 sm:$0xff]  }
 0x2ff   : > { %9102 = vmatpush1.bf16.msra.mxu0 %v20548_v62  ;;  %8759 = vmatprep.subr.bf16.mxu1 %v20553_v63  ;;  %v20620_v62 = vld [vmem:[%s23603_s17 + $0x1820] ss:$40 sps:$4 sm:$0xff]   ;;  %v20625_v63 = vld [vmem:[%s23603_s17 + $0x186c] ss:$40 sps:$4 sm:$0xff]  }
 0x300   : > { %9103 = vmatprep.subr.bf16.mxu0 %v20556_v0  ;;  %v20628_v0 = vld [vmem:[%s23603_s17 + $0x1874] ss:$40 sps:$4 sm:$0xff]  }
 0x302   : > { %8760 = vmatpush1.bf16.msra.mxu1 %v20551_v1  ;;  %v20623_v1 = vld [vmem:[%s23603_s17 + $0x1868] ss:$40 sps:$4 sm:$0xff]  }
 0x303   : > { %9104 = vmatpush1.bf16.msra.mxu0 %v20554_v2  ;;  %8761 = vmatprep.subr.bf16.mxu1 %v20559_v3  ;;  %v20626_v2 = vld [vmem:[%s23603_s17 + $0x1870] ss:$40 sps:$4 sm:$0xff]   ;;  %v20631_v3 = vld [vmem:[%s23603_s17 + $0x18bc] ss:$40 sps:$4 sm:$0xff]  }
 0x304   : > { %9105 = vmatprep.subr.bf16.mxu0 %v20562_v4  ;;  %v20634_v4 = vld [vmem:[%s23603_s17 + $0x18c4] ss:$40 sps:$4 sm:$0xff]  }
 0x306   : > { %8762 = vmatpush1.bf16.msra.mxu1 %v20557_v7  ;;  %v20629_v7 = vld [vmem:[%s23603_s17 + $0x18b8] ss:$40 sps:$4 sm:$0xff]  }
 0x307   : > { %9106 = vmatpush1.bf16.msra.mxu0 %v20560_v8  ;;  %8763 = vmatprep.subr.bf16.mxu1 %v20565_v9  ;;  %v20632_v8 = vld [vmem:[%s23603_s17 + $0x18c0] ss:$40 sps:$4 sm:$0xff]   ;;  %v20637_v9 = vld [vmem:[%s23603_s17 + $0x190c] ss:$40 sps:$4 sm:$0xff]  }
 0x308   : > { %9107 = vmatprep.subr.bf16.mxu0 %v20568_v10  ;;  %v20640_v10 = vld [vmem:[%s23603_s17 + $0x1914] ss:$40 sps:$4 sm:$0xff]  }
 0x30a   : > { %8764 = vmatpush1.bf16.msra.mxu1 %v20563_v47  ;;  %v20635_v47 = vld [vmem:[%s23603_s17 + $0x1908] ss:$40 sps:$4 sm:$0xff]  }
 0x30b   : > { %9108 = vmatpush1.bf16.msra.mxu0 %v20566_v48  ;;  %8765 = vmatprep.subr.bf16.mxu1 %v20571_v51  ;;  %v20638_v48 = vld [vmem:[%s23603_s17 + $0x1910] ss:$40 sps:$4 sm:$0xff]   ;;  %v20643_v51 = vld [vmem:[%s23603_s17 + $0x195c] ss:$40 sps:$4 sm:$0xff]  }
 0x30c   : > { %9109 = vmatprep.subr.bf16.mxu0 %v20574_v52  ;;  %v20646_v52 = vld [vmem:[%s23603_s17 + $0x1964] ss:$40 sps:$4 sm:$0xff]  }
 0x30e   : > { %8766 = vmatpush1.bf16.msra.mxu1 %v20569_v13  ;;  %v20641_v13 = vld [vmem:[%s23603_s17 + $0x1958] ss:$40 sps:$4 sm:$0xff]  }
 0x30f   : > { %9110 = vmatpush1.bf16.msra.mxu0 %v20572_v14  ;;  %8767 = vmatprep.subr.bf16.mxu1 %v20577_v15  ;;  %v20644_v14 = vld [vmem:[%s23603_s17 + $0x1960] ss:$40 sps:$4 sm:$0xff]   ;;  %v20649_v15 = vld [vmem:[%s23603_s17 + $0x19ac] ss:$40 sps:$4 sm:$0xff]  }
 0x310   : > { %9111 = vmatprep.subr.bf16.mxu0 %v20580_v16  ;;  %v20652_v16 = vld [vmem:[%s23603_s17 + $0x19b4] ss:$40 sps:$4 sm:$0xff]  }
 0x312   : > { %8768 = vmatpush1.bf16.msra.mxu1 %v20575_v17  ;;  %v20647_v17 = vld [vmem:[%s23603_s17 + $0x19a8] ss:$40 sps:$4 sm:$0xff]  }
 0x313   : > { %9112 = vmatpush1.bf16.msra.mxu0 %v20578_v18  ;;  %8769 = vmatprep.subr.bf16.mxu1 %v20583_v19  ;;  %v20650_v18 = vld [vmem:[%s23603_s17 + $0x19b0] ss:$40 sps:$4 sm:$0xff]   ;;  %v20655_v19 = vld [vmem:[%s23603_s17 + $0x19fc] ss:$40 sps:$4 sm:$0xff]  }
 0x314   : > { %9113 = vmatprep.subr.bf16.mxu0 %v20586_v20  ;;  %v20658_v20 = vld [vmem:[%s23603_s17 + $0x1a04] ss:$40 sps:$4 sm:$0xff]  }
 0x316   : > { %8770 = vmatpush1.bf16.msra.mxu1 %v20581_v21  ;;  %v20653_v21 = vld [vmem:[%s23603_s17 + $0x19f8] ss:$40 sps:$4 sm:$0xff]  }
 0x317   : > { %9114 = vmatpush1.bf16.msra.mxu0 %v20584_v22  ;;  %8771 = vmatprep.subr.bf16.mxu1 %v20589_v25  ;;  %v20656_v22 = vld [vmem:[%s23603_s17 + $0x1a00] ss:$40 sps:$4 sm:$0xff]   ;;  %v20661_v25 = vld [vmem:[%s23603_s17 + $0x1a4c] ss:$40 sps:$4 sm:$0xff]  }
 0x318   : > { %9115 = vmatprep.subr.bf16.mxu0 %v20592_v26  ;;  %v20664_v26 = vld [vmem:[%s23603_s17 + $0x1a54] ss:$40 sps:$4 sm:$0xff]  }
 0x31a   : > { %8772 = vmatpush1.bf16.msra.mxu1 %v20587_v27  ;;  %v20659_v27 = vld [vmem:[%s23603_s17 + $0x1a48] ss:$40 sps:$4 sm:$0xff]  }
 0x31b   : > { %9116 = vmatpush1.bf16.msra.mxu0 %v20590_v28  ;;  %8773 = vmatprep.subr.bf16.mxu1 %v20595_v31  ;;  %v20662_v28 = vld [vmem:[%s23603_s17 + $0x1a50] ss:$40 sps:$4 sm:$0xff]   ;;  %v20667_v31 = vld [vmem:[%s23603_s17 + $0x1a9c] ss:$40 sps:$4 sm:$0xff]  }
 0x31c   : > { %9117 = vmatprep.subr.bf16.mxu0 %v20598_v32  ;;  %v20670_v32 = vld [vmem:[%s23603_s17 + $0x1aa4] ss:$40 sps:$4 sm:$0xff]  }
 0x31e   : > { %8774 = vmatpush1.bf16.msra.mxu1 %v20593_v37  ;;  %v20665_v37 = vld [vmem:[%s23603_s17 + $0x1a98] ss:$40 sps:$4 sm:$0xff]  }
 0x31f   : > { %9118 = vmatpush1.bf16.msra.mxu0 %v20596_v38  ;;  %8775 = vmatprep.subr.bf16.mxu1 %v20601_v39  ;;  %v20668_v38 = vld [vmem:[%s23603_s17 + $0x1aa0] ss:$40 sps:$4 sm:$0xff]   ;;  %v20673_v39 = vld [vmem:[%s23603_s17 + $0x1aec] ss:$40 sps:$4 sm:$0xff]  }
 0x320   : > { %9119 = vmatprep.subr.bf16.mxu0 %v20604_v40  ;;  %v20676_v40 = vld [vmem:[%s23603_s17 + $0x1af4] ss:$40 sps:$4 sm:$0xff]  }
 0x322   : > { %8776 = vmatpush1.bf16.msra.mxu1 %v20599_v42  ;;  %v20671_v42 = vld [vmem:[%s23603_s17 + $0x1ae8] ss:$40 sps:$4 sm:$0xff]  }
 0x323   : > { %9120 = vmatpush1.bf16.msra.mxu0 %v20602_v43  ;;  %8777 = vmatprep.subr.bf16.mxu1 %v20607_v45  ;;  %v20674_v43 = vld [vmem:[%s23603_s17 + $0x1af0] ss:$40 sps:$4 sm:$0xff]   ;;  %v20679_v45 = vld [vmem:[%s23603_s17 + $0x1b3c] ss:$40 sps:$4 sm:$0xff]  }
 0x324   : > { %9121 = vmatprep.subr.bf16.mxu0 %v20610_v46  ;;  %v20682_v46 = vld [vmem:[%s23603_s17 + $0x1b44] ss:$40 sps:$4 sm:$0xff]  }
 0x326   : > { %8778 = vmatpush1.bf16.msra.mxu1 %v20605_v54  ;;  %v20677_v54 = vld [vmem:[%s23603_s17 + $0x1b38] ss:$40 sps:$4 sm:$0xff]  }
 0x327   : > { %9122 = vmatpush1.bf16.msra.mxu0 %v20608_v55  ;;  %8779 = vmatprep.subr.bf16.mxu1 %v20613_v34  ;;  %v20680_v55 = vld [vmem:[%s23603_s17 + $0x1b40] ss:$40 sps:$4 sm:$0xff]   ;;  %v20685_v34 = vld [vmem:[%s23603_s17 + $0x1b8c] ss:$40 sps:$4 sm:$0xff]  }
 0x328   : > { %9123 = vmatprep.subr.bf16.mxu0 %v20616_v35  ;;  %v20688_v35 = vld [vmem:[%s23603_s17 + $0x1b94] ss:$40 sps:$4 sm:$0xff]  }
 0x32a   : > { %8780 = vmatpush1.bf16.msra.mxu1 %v20611_v57  ;;  %v20683_v57 = vld [vmem:[%s23603_s17 + $0x1b88] ss:$40 sps:$4 sm:$0xff]  }
 0x32b   : > { %9124 = vmatpush1.bf16.msra.mxu0 %v20614_v58  ;;  %8781 = vmatprep.subr.bf16.mxu1 %v20619_v59  ;;  %v20686_v58 = vld [vmem:[%s23603_s17 + $0x1b90] ss:$40 sps:$4 sm:$0xff]   ;;  %v20691_v59 = vld [vmem:[%s23603_s17 + $0x1bdc] ss:$40 sps:$4 sm:$0xff]  }
 0x32c   : > { %9125 = vmatprep.subr.bf16.mxu0 %v20622_v60  ;;  %v20694_v60 = vld [vmem:[%s23603_s17 + $0x1be4] ss:$40 sps:$4 sm:$0xff]  }
 0x32e   : > { %8782 = vmatpush1.bf16.msra.mxu1 %v20617_v61  ;;  %v20689_v61 = vld [vmem:[%s23603_s17 + $0x1bd8] ss:$40 sps:$4 sm:$0xff]  }
 0x32f   : > { %9126 = vmatpush1.bf16.msra.mxu0 %v20620_v62  ;;  %8783 = vmatprep.subr.bf16.mxu1 %v20625_v63  ;;  %v20692_v62 = vld [vmem:[%s23603_s17 + $0x1be0] ss:$40 sps:$4 sm:$0xff]   ;;  %v20697_v63 = vld [vmem:[%s23603_s17 + $0x1c2c] ss:$40 sps:$4 sm:$0xff]  }
 0x330   : > { %9127 = vmatprep.subr.bf16.mxu0 %v20628_v0  ;;  %v20700_v0 = vld [vmem:[%s23603_s17 + $0x1c34] ss:$40 sps:$4 sm:$0xff]  }
 0x332   : > { %8784 = vmatpush1.bf16.msra.mxu1 %v20623_v1  ;;  %v20695_v1 = vld [vmem:[%s23603_s17 + $0x1c28] ss:$40 sps:$4 sm:$0xff]  }
 0x333   : > { %9128 = vmatpush1.bf16.msra.mxu0 %v20626_v2  ;;  %8785 = vmatprep.subr.bf16.mxu1 %v20631_v3  ;;  %v20698_v2 = vld [vmem:[%s23603_s17 + $0x1c30] ss:$40 sps:$4 sm:$0xff]   ;;  %v20703_v3 = vld [vmem:[%s23603_s17 + $0x1c7c] ss:$40 sps:$4 sm:$0xff]  }
 0x334   : > { %9129 = vmatprep.subr.bf16.mxu0 %v20634_v4  ;;  %v20706_v4 = vld [vmem:[%s23603_s17 + $0x1c84] ss:$40 sps:$4 sm:$0xff]  }
 0x336   : > { %8786 = vmatpush1.bf16.msra.mxu1 %v20629_v7  ;;  %v20701_v7 = vld [vmem:[%s23603_s17 + $0x1c78] ss:$40 sps:$4 sm:$0xff]  }
 0x337   : > { %9130 = vmatpush1.bf16.msra.mxu0 %v20632_v8  ;;  %8798 = vmatprep.subr.bf16.mxu1 %v20637_v9  ;;  %v20704_v8 = vld [vmem:[%s23603_s17 + $0x1c80] ss:$40 sps:$4 sm:$0xff]   ;;  %v20709_v9 = vld [vmem:[%s23603_s17 + $0x1ccc] ss:$40 sps:$4 sm:$0xff]  }
 0x338   : > { %9142 = vmatprep.subr.bf16.mxu0 %v20640_v10  ;;  %v20712_v10 = vld [vmem:[%s23603_s17 + $0x1cd4] ss:$40 sps:$4 sm:$0xff]  }
 0x339   : > { %8788 = vmatmul.mubr.bf16.vlgmr.msra.gmra.mrb[4].mxu1 %v23702_v12 }
 0x33a   : > { %9132 = vmatmul.mubr.bf16.vlgmr.msra.gmra.mrb[4].mxu0 %v23702_v12  ;;  %8799 = vmatpush1.bf16.msra.mxu1 %v20635_v47  ;;  %v20707_v47 = vld [vmem:[%s23603_s17 + $0x1cc8] ss:$40 sps:$4 sm:$0xff]  }
 0x33b   : > { %9143 = vmatpush1.bf16.msra.mxu0 %v20638_v48  ;;  %8800 = vmatprep.subr.bf16.mxu1 %v20643_v51  ;;  %v20710_v48 = vld [vmem:[%s23603_s17 + $0x1cd0] ss:$40 sps:$4 sm:$0xff]   ;;  %v20715_v51 = vld [vmem:[%s23603_s17 + $0x1d1c] ss:$40 sps:$4 sm:$0xff]  }
 0x33c   : > { %9144 = vmatprep.subr.bf16.mxu0 %v20646_v52  ;;  %8830 = vmatprep.mubr.bf16.mxu1 %v23751_v44  ;;  %v20718_v52 = vld [vmem:[%s23603_s17 + $0x1d24] ss:$40 sps:$4 sm:$0xff]  }
 0x33d   : > { %9174 = vmatprep.mubr.bf16.mxu0 %v23751_v44 }
 0x33e   : > { %8801 = vmatpush1.bf16.msra.mxu1 %v20641_v13  ;;  %v20713_v13 = vld [vmem:[%s23603_s17 + $0x1d18] ss:$40 sps:$4 sm:$0xff]  }
 0x33f   : > { %9145 = vmatpush1.bf16.msra.mxu0 %v20644_v14  ;;  %8802 = vmatprep.subr.bf16.mxu1 %v20649_v15  ;;  %v20716_v14 = vld [vmem:[%s23603_s17 + $0x1d20] ss:$40 sps:$4 sm:$0xff]   ;;  %v20721_v15 = vld [vmem:[%s23603_s17 + $0x1d6c] ss:$40 sps:$4 sm:$0xff]  }
 0x340   : > { %9146 = vmatprep.subr.bf16.mxu0 %v20652_v16  ;;  %v20724_v16 = vld [vmem:[%s23603_s17 + $0x1d74] ss:$40 sps:$4 sm:$0xff]  }
 0x342   : > { %8803 = vmatpush1.bf16.msra.mxu1 %v20647_v17  ;;  %v20719_v17 = vld [vmem:[%s23603_s17 + $0x1d68] ss:$40 sps:$4 sm:$0xff]  }
 0x343   : > { %9147 = vmatpush1.bf16.msra.mxu0 %v20650_v18  ;;  %8804 = vmatprep.subr.bf16.mxu1 %v20655_v19  ;;  %v20722_v18 = vld [vmem:[%s23603_s17 + $0x1d70] ss:$40 sps:$4 sm:$0xff]   ;;  %v20727_v19 = vld [vmem:[%s23603_s17 + $0x1dbc] ss:$40 sps:$4 sm:$0xff]  }
 0x344   : > { %9148 = vmatprep.subr.bf16.mxu0 %v20658_v20  ;;  %v20730_v20 = vld [vmem:[%s23603_s17 + $0x1dc4] ss:$40 sps:$4 sm:$0xff]  }
 0x346   : > { %8805 = vmatpush1.bf16.msra.mxu1 %v20653_v21  ;;  %v20725_v21 = vld [vmem:[%s23603_s17 + $0x1db8] ss:$40 sps:$4 sm:$0xff]  }
 0x347   : > { %9149 = vmatpush1.bf16.msra.mxu0 %v20656_v22  ;;  %8806 = vmatprep.subr.bf16.mxu1 %v20661_v25  ;;  %v20728_v22 = vld [vmem:[%s23603_s17 + $0x1dc0] ss:$40 sps:$4 sm:$0xff]   ;;  %v20733_v25 = vld [vmem:[%s23603_s17 + $0x1e0c] ss:$40 sps:$4 sm:$0xff]  }
 0x348   : > { %9150 = vmatprep.subr.bf16.mxu0 %v20664_v26  ;;  %v20736_v26 = vld [vmem:[%s23603_s17 + $0x1e14] ss:$40 sps:$4 sm:$0xff]  }
 0x34a   : > { %8807 = vmatpush1.bf16.msra.mxu1 %v20659_v27  ;;  %v20731_v27 = vld [vmem:[%s23603_s17 + $0x1e08] ss:$40 sps:$4 sm:$0xff]  }
 0x34b   : > { %9151 = vmatpush1.bf16.msra.mxu0 %v20662_v28  ;;  %8808 = vmatprep.subr.bf16.mxu1 %v20667_v31  ;;  %v20734_v28 = vld [vmem:[%s23603_s17 + $0x1e10] ss:$40 sps:$4 sm:$0xff]   ;;  %v20739_v31 = vld [vmem:[%s23603_s17 + $0x1e5c] ss:$40 sps:$4 sm:$0xff]  }
 0x34c   : > { %9152 = vmatprep.subr.bf16.mxu0 %v20670_v32  ;;  %v20742_v32 = vld [vmem:[%s23603_s17 + $0x1e64] ss:$40 sps:$4 sm:$0xff]  }
 0x34e   : > { %8809 = vmatpush1.bf16.msra.mxu1 %v20665_v37  ;;  %v20737_v37 = vld [vmem:[%s23603_s17 + $0x1e58] ss:$40 sps:$4 sm:$0xff]  }
 0x34f   : > { %9153 = vmatpush1.bf16.msra.mxu0 %v20668_v38  ;;  %8810 = vmatprep.subr.bf16.mxu1 %v20673_v39  ;;  %v20740_v38 = vld [vmem:[%s23603_s17 + $0x1e60] ss:$40 sps:$4 sm:$0xff]   ;;  %v20745_v39 = vld [vmem:[%s23603_s17 + $0x1eac] ss:$40 sps:$4 sm:$0xff]  }
 0x350   : > { %9154 = vmatprep.subr.bf16.mxu0 %v20676_v40  ;;  %v20748_v40 = vld [vmem:[%s23603_s17 + $0x1eb4] ss:$40 sps:$4 sm:$0xff]  }
 0x352   : > { %8811 = vmatpush1.bf16.msra.mxu1 %v20671_v42  ;;  %v20743_v42 = vld [vmem:[%s23603_s17 + $0x1ea8] ss:$40 sps:$4 sm:$0xff]  }
 0x353   : > { %9155 = vmatpush1.bf16.msra.mxu0 %v20674_v43  ;;  %8812 = vmatprep.subr.bf16.mxu1 %v20679_v45  ;;  %v20746_v43 = vld [vmem:[%s23603_s17 + $0x1eb0] ss:$40 sps:$4 sm:$0xff]   ;;  %v20751_v45 = vld [vmem:[%s23603_s17 + $0x1efc] ss:$40 sps:$4 sm:$0xff]  }
 0x354   : > { %9156 = vmatprep.subr.bf16.mxu0 %v20682_v46  ;;  %v20754_v46 = vld [vmem:[%s23603_s17 + $0x1f04] ss:$40 sps:$4 sm:$0xff]  }
 0x356   : > { %8813 = vmatpush1.bf16.msra.mxu1 %v20677_v54  ;;  %v20749_v54 = vld [vmem:[%s23603_s17 + $0x1ef8] ss:$40 sps:$4 sm:$0xff]  }
 0x357   : > { %9157 = vmatpush1.bf16.msra.mxu0 %v20680_v55  ;;  %8814 = vmatprep.subr.bf16.mxu1 %v20685_v34  ;;  %v20752_v55 = vld [vmem:[%s23603_s17 + $0x1f00] ss:$40 sps:$4 sm:$0xff]   ;;  %v20757_v34 = vld [vmem:[%s23603_s17 + $0x1f4c] ss:$40 sps:$4 sm:$0xff]  }
 0x358   : > { %9158 = vmatprep.subr.bf16.mxu0 %v20688_v35  ;;  %v20760_v35 = vld [vmem:[%s23603_s17 + $0x1f54] ss:$40 sps:$4 sm:$0xff]  }
 0x35a   : > { %8815 = vmatpush1.bf16.msra.mxu1 %v20683_v57  ;;  %v20755_v57 = vld [vmem:[%s23603_s17 + $0x1f48] ss:$40 sps:$4 sm:$0xff]  }
 0x35b   : > { %9159 = vmatpush1.bf16.msra.mxu0 %v20686_v58  ;;  %8816 = vmatprep.subr.bf16.mxu1 %v20691_v59  ;;  %v20758_v58 = vld [vmem:[%s23603_s17 + $0x1f50] ss:$40 sps:$4 sm:$0xff]   ;;  %v20763_v59 = vld [vmem:[%s23603_s17 + $0x1f9c] ss:$40 sps:$4 sm:$0xff]  }
 0x35c   : > { %9160 = vmatprep.subr.bf16.mxu0 %v20694_v60  ;;  %v20766_v60 = vld [vmem:[%s23603_s17 + $0x1fa4] ss:$40 sps:$4 sm:$0xff]  }
 0x35e   : > { %8817 = vmatpush1.bf16.msra.mxu1 %v20689_v61  ;;  %v20761_v61 = vld [vmem:[%s23603_s17 + $0x1f98] ss:$40 sps:$4 sm:$0xff]  }
 0x35f   : > { %9161 = vmatpush1.bf16.msra.mxu0 %v20692_v62  ;;  %8818 = vmatprep.subr.bf16.mxu1 %v20697_v63  ;;  %v20764_v62 = vld [vmem:[%s23603_s17 + $0x1fa0] ss:$40 sps:$4 sm:$0xff]   ;;  %v20769_v63 = vld [vmem:[%s23603_s17 + $0x1fec] ss:$40 sps:$4 sm:$0xff]  }
 0x360   : > { %9162 = vmatprep.subr.bf16.mxu0 %v20700_v0  ;;  %v20772_v0 = vld [vmem:[%s23603_s17 + $0x1ff4] ss:$40 sps:$4 sm:$0xff]  }
 0x362   : > { %8819 = vmatpush1.bf16.msra.mxu1 %v20695_v1  ;;  %v20767_v1 = vld [vmem:[%s23603_s17 + $0x1fe8] ss:$40 sps:$4 sm:$0xff]  }
 0x363   : > { %9163 = vmatpush1.bf16.msra.mxu0 %v20698_v2  ;;  %8820 = vmatprep.subr.bf16.mxu1 %v20703_v3  ;;  %v20770_v2 = vld [vmem:[%s23603_s17 + $0x1ff0] ss:$40 sps:$4 sm:$0xff]   ;;  %v20775_v3 = vld [vmem:[%s23603_s17 + $0x203c] ss:$40 sps:$4 sm:$0xff]  }
 0x364   : > { %9164 = vmatprep.subr.bf16.mxu0 %v20706_v4  ;;  %v20778_v4 = vld [vmem:[%s23603_s17 + $0x2044] ss:$40 sps:$4 sm:$0xff]  }
 0x366   : > { %8821 = vmatpush1.bf16.msra.mxu1 %v20701_v7  ;;  %v20773_v7 = vld [vmem:[%s23603_s17 + $0x2038] ss:$40 sps:$4 sm:$0xff]  }
 0x367   : > { %9165 = vmatpush1.bf16.msra.mxu0 %v20704_v8  ;;  %8822 = vmatprep.subr.bf16.mxu1 %v20709_v9  ;;  %v20776_v8 = vld [vmem:[%s23603_s17 + $0x2040] ss:$40 sps:$4 sm:$0xff]   ;;  %v20781_v9 = vld [vmem:[%s23603_s17 + $0x208c] ss:$40 sps:$4 sm:$0xff]  }
 0x368   : > { %9166 = vmatprep.subr.bf16.mxu0 %v20712_v10  ;;  %v20784_v10 = vld [vmem:[%s23603_s17 + $0x2094] ss:$40 sps:$4 sm:$0xff]  }
 0x36a   : > { %8823 = vmatpush1.bf16.msra.mxu1 %v20707_v47  ;;  %v20779_v47 = vld [vmem:[%s23603_s17 + $0x2088] ss:$40 sps:$4 sm:$0xff]  }
 0x36b   : > { %9167 = vmatpush1.bf16.msra.mxu0 %v20710_v48  ;;  %8824 = vmatprep.subr.bf16.mxu1 %v20715_v51  ;;  %v20782_v48 = vld [vmem:[%s23603_s17 + $0x2090] ss:$40 sps:$4 sm:$0xff]   ;;  %v20787_v51 = vld [vmem:[%s23603_s17 + $0x20dc] ss:$40 sps:$4 sm:$0xff]  }
 0x36c   : > { %9168 = vmatprep.subr.bf16.mxu0 %v20718_v52  ;;  %v20790_v52 = vld [vmem:[%s23603_s17 + $0x20e4] ss:$40 sps:$4 sm:$0xff]  }
 0x36e   : > { %8825 = vmatpush1.bf16.msra.mxu1 %v20713_v13  ;;  %v20785_v13 = vld [vmem:[%s23603_s17 + $0x20d8] ss:$40 sps:$4 sm:$0xff]  }
 0x36f   : > { %9169 = vmatpush1.bf16.msra.mxu0 %v20716_v14  ;;  %8826 = vmatprep.subr.bf16.mxu1 %v20721_v15  ;;  %v20788_v14 = vld [vmem:[%s23603_s17 + $0x20e0] ss:$40 sps:$4 sm:$0xff]   ;;  %v20793_v15 = vld [vmem:[%s23603_s17 + $0x212c] ss:$40 sps:$4 sm:$0xff]  }
 0x370   : > { %9170 = vmatprep.subr.bf16.mxu0 %v20724_v16  ;;  %v20796_v16 = vld [vmem:[%s23603_s17 + $0x2134] ss:$40 sps:$4 sm:$0xff]  }
 0x372   : > { %8827 = vmatpush1.bf16.msra.mxu1 %v20719_v17  ;;  %v20791_v17 = vld [vmem:[%s23603_s17 + $0x2128] ss:$40 sps:$4 sm:$0xff]  }
 0x373   : > { %9171 = vmatpush1.bf16.msra.mxu0 %v20722_v18  ;;  %8828 = vmatprep.subr.bf16.mxu1 %v20727_v19  ;;  %v20794_v18 = vld [vmem:[%s23603_s17 + $0x2130] ss:$40 sps:$4 sm:$0xff]   ;;  %v20799_v19 = vld [vmem:[%s23603_s17 + $0x217c] ss:$40 sps:$4 sm:$0xff]  }
 0x374   : > { %9172 = vmatprep.subr.bf16.mxu0 %v20730_v20  ;;  %v20802_v20 = vld [vmem:[%s23603_s17 + $0x2184] ss:$40 sps:$4 sm:$0xff]  }
 0x376   : > { %8829 = vmatpush1.bf16.msra.mxu1 %v20725_v21  ;;  %v20797_v21 = vld [vmem:[%s23603_s17 + $0x2178] ss:$40 sps:$4 sm:$0xff]  }
 0x377   : > { %9173 = vmatpush1.bf16.msra.mxu0 %v20728_v22  ;;  %8841 = vmatprep.subr.bf16.mxu1 %v20733_v25  ;;  %v20800_v22 = vld [vmem:[%s23603_s17 + $0x2180] ss:$40 sps:$4 sm:$0xff]   ;;  %v20805_v25 = vld [vmem:[%s23603_s17 + $0x21cc] ss:$40 sps:$4 sm:$0xff]  }
 0x378   : > { %9185 = vmatprep.subr.bf16.mxu0 %v20736_v26  ;;  %v20808_v26 = vld [vmem:[%s23603_s17 + $0x21d4] ss:$40 sps:$4 sm:$0xff]  }
 0x379   : > { %8831 = vmatmul.mubr.bf16.vlgmr.msra.gmra.mrb[4].mxu1 %v23798_v24 }
 0x37a   : > { %9175 = vmatmul.mubr.bf16.vlgmr.msra.gmra.mrb[4].mxu0 %v23798_v24  ;;  %8842 = vmatpush1.bf16.msra.mxu1 %v20731_v27  ;;  %v20803_v27 = vld [vmem:[%s23603_s17 + $0x21c8] ss:$40 sps:$4 sm:$0xff]  }
 0x37b   : > { %9186 = vmatpush1.bf16.msra.mxu0 %v20734_v28  ;;  %8843 = vmatprep.subr.bf16.mxu1 %v20739_v31  ;;  %v20806_v28 = vld [vmem:[%s23603_s17 + $0x21d0] ss:$40 sps:$4 sm:$0xff]   ;;  %v20811_v31 = vld [vmem:[%s23603_s17 + $0x221c] ss:$40 sps:$4 sm:$0xff]  }
 0x37c   : > { %9187 = vmatprep.subr.bf16.mxu0 %v20742_v32  ;;  %8873 = vmatprep.mubr.bf16.mxu1 %v23827_v36  ;;  %v20814_v32 = vld [vmem:[%s23603_s17 + $0x2224] ss:$40 sps:$4 sm:$0xff]  }
 0x37d   : > { %9217 = vmatprep.mubr.bf16.mxu0 %v23827_v36 }
 0x37e   : > { %8844 = vmatpush1.bf16.msra.mxu1 %v20737_v37  ;;  %v20809_v37 = vld [vmem:[%s23603_s17 + $0x2218] ss:$40 sps:$4 sm:$0xff]  }
 0x37f   : > { %9188 = vmatpush1.bf16.msra.mxu0 %v20740_v38  ;;  %8845 = vmatprep.subr.bf16.mxu1 %v20745_v39  ;;  %v20812_v38 = vld [vmem:[%s23603_s17 + $0x2220] ss:$40 sps:$4 sm:$0xff]   ;;  %v20817_v39 = vld [vmem:[%s23603_s17 + $0x226c] ss:$40 sps:$4 sm:$0xff]  }
 0x380   : > { %9189 = vmatprep.subr.bf16.mxu0 %v20748_v40  ;;  %v20820_v40 = vld [vmem:[%s23603_s17 + $0x2274] ss:$40 sps:$4 sm:$0xff]  }
 0x382   : > { %8846 = vmatpush1.bf16.msra.mxu1 %v20743_v42  ;;  %v20815_v42 = vld [vmem:[%s23603_s17 + $0x2268] ss:$40 sps:$4 sm:$0xff]  }
 0x383   : > { %9190 = vmatpush1.bf16.msra.mxu0 %v20746_v43  ;;  %8847 = vmatprep.subr.bf16.mxu1 %v20751_v45  ;;  %v20818_v43 = vld [vmem:[%s23603_s17 + $0x2270] ss:$40 sps:$4 sm:$0xff]   ;;  %v20823_v45 = vld [vmem:[%s23603_s17 + $0x22bc] ss:$40 sps:$4 sm:$0xff]  }
 0x384   : > { %9191 = vmatprep.subr.bf16.mxu0 %v20754_v46  ;;  %v20826_v46 = vld [vmem:[%s23603_s17 + $0x22c4] ss:$40 sps:$4 sm:$0xff]  }
 0x386   : > { %8848 = vmatpush1.bf16.msra.mxu1 %v20749_v54  ;;  %v20821_v54 = vld [vmem:[%s23603_s17 + $0x22b8] ss:$40 sps:$4 sm:$0xff]  }
 0x387   : > { %9192 = vmatpush1.bf16.msra.mxu0 %v20752_v55  ;;  %8849 = vmatprep.subr.bf16.mxu1 %v20757_v34  ;;  %v20824_v55 = vld [vmem:[%s23603_s17 + $0x22c0] ss:$40 sps:$4 sm:$0xff]   ;;  %v20829_v34 = vld [vmem:[%s23603_s17 + $0x230c] ss:$40 sps:$4 sm:$0xff]  }
 0x388   : > { %9193 = vmatprep.subr.bf16.mxu0 %v20760_v35  ;;  %v20832_v35 = vld [vmem:[%s23603_s17 + $0x2314] ss:$40 sps:$4 sm:$0xff]  }
 0x38a   : > { %8850 = vmatpush1.bf16.msra.mxu1 %v20755_v57  ;;  %v20827_v57 = vld [vmem:[%s23603_s17 + $0x2308] ss:$40 sps:$4 sm:$0xff]  }
 0x38b   : > { %9194 = vmatpush1.bf16.msra.mxu0 %v20758_v58  ;;  %8851 = vmatprep.subr.bf16.mxu1 %v20763_v59  ;;  %v20830_v58 = vld [vmem:[%s23603_s17 + $0x2310] ss:$40 sps:$4 sm:$0xff]   ;;  %v20835_v59 = vld [vmem:[%s23603_s17 + $0x235c] ss:$40 sps:$4 sm:$0xff]  }
 0x38c   : > { %9195 = vmatprep.subr.bf16.mxu0 %v20766_v60  ;;  %v20838_v60 = vld [vmem:[%s23603_s17 + $0x2364] ss:$40 sps:$4 sm:$0xff]  }
 0x38e   : > { %8852 = vmatpush1.bf16.msra.mxu1 %v20761_v61  ;;  %v20833_v61 = vld [vmem:[%s23603_s17 + $0x2358] ss:$40 sps:$4 sm:$0xff]  }
 0x38f   : > { %9196 = vmatpush1.bf16.msra.mxu0 %v20764_v62  ;;  %8853 = vmatprep.subr.bf16.mxu1 %v20769_v63  ;;  %v20836_v62 = vld [vmem:[%s23603_s17 + $0x2360] ss:$40 sps:$4 sm:$0xff]   ;;  %v20841_v63 = vld [vmem:[%s23603_s17 + $0x23ac] ss:$40 sps:$4 sm:$0xff]  }
 0x390   : > { %9197 = vmatprep.subr.bf16.mxu0 %v20772_v0  ;;  %v20844_v0 = vld [vmem:[%s23603_s17 + $0x23b4] ss:$40 sps:$4 sm:$0xff]  }
 0x392   : > { %8854 = vmatpush1.bf16.msra.mxu1 %v20767_v1  ;;  %v20839_v1 = vld [vmem:[%s23603_s17 + $0x23a8] ss:$40 sps:$4 sm:$0xff]  }
 0x393   : > { %9198 = vmatpush1.bf16.msra.mxu0 %v20770_v2  ;;  %8855 = vmatprep.subr.bf16.mxu1 %v20775_v3  ;;  %v20842_v2 = vld [vmem:[%s23603_s17 + $0x23b0] ss:$40 sps:$4 sm:$0xff]   ;;  %v20847_v3 = vld [vmem:[%s23603_s17 + $0x23fc] ss:$40 sps:$4 sm:$0xff]  }
 0x394   : > { %9199 = vmatprep.subr.bf16.mxu0 %v20778_v4  ;;  %v20850_v4 = vld [vmem:[%s23603_s17 + $0x2404] ss:$40 sps:$4 sm:$0xff]  }
 0x396   : > { %8856 = vmatpush1.bf16.msra.mxu1 %v20773_v7  ;;  %v20845_v7 = vld [vmem:[%s23603_s17 + $0x23f8] ss:$40 sps:$4 sm:$0xff]  }
 0x397   : > { %9200 = vmatpush1.bf16.msra.mxu0 %v20776_v8  ;;  %8857 = vmatprep.subr.bf16.mxu1 %v20781_v9  ;;  %v20848_v8 = vld [vmem:[%s23603_s17 + $0x2400] ss:$40 sps:$4 sm:$0xff]   ;;  %v20853_v9 = vld [vmem:[%s23603_s17 + $0x244c] ss:$40 sps:$4 sm:$0xff]  }
 0x398   : > { %9201 = vmatprep.subr.bf16.mxu0 %v20784_v10  ;;  %v20856_v10 = vld [vmem:[%s23603_s17 + $0x2454] ss:$40 sps:$4 sm:$0xff]  }
 0x39a   : > { %8858 = vmatpush1.bf16.msra.mxu1 %v20779_v47  ;;  %v20851_v47 = vld [vmem:[%s23603_s17 + $0x2448] ss:$40 sps:$4 sm:$0xff]  }
 0x39b   : > { %9202 = vmatpush1.bf16.msra.mxu0 %v20782_v48  ;;  %8859 = vmatprep.subr.bf16.mxu1 %v20787_v51  ;;  %v20854_v48 = vld [vmem:[%s23603_s17 + $0x2450] ss:$40 sps:$4 sm:$0xff]   ;;  %v20859_v51 = vld [vmem:[%s23603_s17 + $0x249c] ss:$40 sps:$4 sm:$0xff]  }
 0x39c   : > { %9203 = vmatprep.subr.bf16.mxu0 %v20790_v52  ;;  %v20862_v52 = vld [vmem:[%s23603_s17 + $0x24a4] ss:$40 sps:$4 sm:$0xff]  }
 0x39e   : > { %8860 = vmatpush1.bf16.msra.mxu1 %v20785_v13  ;;  %v20857_v13 = vld [vmem:[%s23603_s17 + $0x2498] ss:$40 sps:$4 sm:$0xff]  }
 0x39f   : > { %9204 = vmatpush1.bf16.msra.mxu0 %v20788_v14  ;;  %8861 = vmatprep.subr.bf16.mxu1 %v20793_v15  ;;  %v20860_v14 = vld [vmem:[%s23603_s17 + $0x24a0] ss:$40 sps:$4 sm:$0xff]   ;;  %v20865_v15 = vld [vmem:[%s23603_s17 + $0x24ec] ss:$40 sps:$4 sm:$0xff]  }
 0x3a0   : > { %9205 = vmatprep.subr.bf16.mxu0 %v20796_v16  ;;  %v20868_v16 = vld [vmem:[%s23603_s17 + $0x24f4] ss:$40 sps:$4 sm:$0xff]  }
 0x3a2   : > { %8862 = vmatpush1.bf16.msra.mxu1 %v20791_v17  ;;  %v20863_v17 = vld [vmem:[%s23603_s17 + $0x24e8] ss:$40 sps:$4 sm:$0xff]  }
 0x3a3   : > { %9206 = vmatpush1.bf16.msra.mxu0 %v20794_v18  ;;  %8863 = vmatprep.subr.bf16.mxu1 %v20799_v19  ;;  %v20866_v18 = vld [vmem:[%s23603_s17 + $0x24f0] ss:$40 sps:$4 sm:$0xff]   ;;  %v20871_v19 = vld [vmem:[%s23603_s17 + $0x253c] ss:$40 sps:$4 sm:$0xff]  }
 0x3a4   : > { %9207 = vmatprep.subr.bf16.mxu0 %v20802_v20  ;;  %v20874_v20 = vld [vmem:[%s23603_s17 + $0x2544] ss:$40 sps:$4 sm:$0xff]  }
 0x3a6   : > { %8864 = vmatpush1.bf16.msra.mxu1 %v20797_v21  ;;  %v20869_v21 = vld [vmem:[%s23603_s17 + $0x2538] ss:$40 sps:$4 sm:$0xff]  }
 0x3a7   : > { %9208 = vmatpush1.bf16.msra.mxu0 %v20800_v22  ;;  %8865 = vmatprep.subr.bf16.mxu1 %v20805_v25  ;;  %v20872_v22 = vld [vmem:[%s23603_s17 + $0x2540] ss:$40 sps:$4 sm:$0xff]   ;;  %v20877_v25 = vld [vmem:[%s23603_s17 + $0x258c] ss:$40 sps:$4 sm:$0xff]  }
 0x3a8   : > { %9209 = vmatprep.subr.bf16.mxu0 %v20808_v26  ;;  %v20880_v26 = vld [vmem:[%s23603_s17 + $0x2594] ss:$40 sps:$4 sm:$0xff]  }
 0x3aa   : > { %8866 = vmatpush1.bf16.msra.mxu1 %v20803_v27  ;;  %v20875_v27 = vld [vmem:[%s23603_s17 + $0x2588] ss:$40 sps:$4 sm:$0xff]  }
 0x3ab   : > { %9210 = vmatpush1.bf16.msra.mxu0 %v20806_v28  ;;  %8867 = vmatprep.subr.bf16.mxu1 %v20811_v31  ;;  %v20878_v28 = vld [vmem:[%s23603_s17 + $0x2590] ss:$40 sps:$4 sm:$0xff]   ;;  %v20883_v31 = vld [vmem:[%s23603_s17 + $0x25dc] ss:$40 sps:$4 sm:$0xff]  }
 0x3ac   : > { %9211 = vmatprep.subr.bf16.mxu0 %v20814_v32  ;;  %v20886_v32 = vld [vmem:[%s23603_s17 + $0x25e4] ss:$40 sps:$4 sm:$0xff]  }
 0x3ae   : > { %8868 = vmatpush1.bf16.msra.mxu1 %v20809_v37  ;;  %v20881_v37 = vld [vmem:[%s23603_s17 + $0x25d8] ss:$40 sps:$4 sm:$0xff]  }
 0x3af   : > { %9212 = vmatpush1.bf16.msra.mxu0 %v20812_v38  ;;  %8869 = vmatprep.subr.bf16.mxu1 %v20817_v39  ;;  %v20884_v38 = vld [vmem:[%s23603_s17 + $0x25e0] ss:$40 sps:$4 sm:$0xff]   ;;  %v20889_v39 = vld [vmem:[%s23603_s17 + $0x262c] ss:$40 sps:$4 sm:$0xff]  }
 0x3b0   : > { %9213 = vmatprep.subr.bf16.mxu0 %v20820_v40  ;;  %v20892_v40 = vld [vmem:[%s23603_s17 + $0x2634] ss:$40 sps:$4 sm:$0xff]  }
 0x3b2   : > { %8870 = vmatpush1.bf16.msra.mxu1 %v20815_v42  ;;  %v20887_v42 = vld [vmem:[%s23603_s17 + $0x2628] ss:$40 sps:$4 sm:$0xff]  }
 0x3b3   : > { %9214 = vmatpush1.bf16.msra.mxu0 %v20818_v43  ;;  %8871 = vmatprep.subr.bf16.mxu1 %v20823_v45  ;;  %v20890_v43 = vld [vmem:[%s23603_s17 + $0x2630] ss:$40 sps:$4 sm:$0xff]   ;;  %v20895_v45 = vld [vmem:[%s23603_s17 + $0x267c] ss:$40 sps:$4 sm:$0xff]  }
 0x3b4   : > { %9215 = vmatprep.subr.bf16.mxu0 %v20826_v46  ;;  %v20898_v46 = vld [vmem:[%s23603_s17 + $0x2684] ss:$40 sps:$4 sm:$0xff]  }
 0x3b6   : > { %8872 = vmatpush1.bf16.msra.mxu1 %v20821_v54  ;;  %v20893_v54 = vld [vmem:[%s23603_s17 + $0x2678] ss:$40 sps:$4 sm:$0xff]  }
 0x3b7   : > { %9216 = vmatpush1.bf16.msra.mxu0 %v20824_v55  ;;  %8884 = vmatprep.subr.bf16.mxu1 %v20829_v34  ;;  %v20896_v55 = vld [vmem:[%s23603_s17 + $0x2680] ss:$40 sps:$4 sm:$0xff]   ;;  %v20901_v34 = vld [vmem:[%s23603_s17 + $0x26cc] ss:$40 sps:$4 sm:$0xff]  }
 0x3b8   : > { %9228 = vmatprep.subr.bf16.mxu0 %v20832_v35  ;;  %v20904_v35 = vld [vmem:[%s23603_s17 + $0x26d4] ss:$40 sps:$4 sm:$0xff]  }
 0x3b9   : > { %8874 = vmatmul.mubr.bf16.vlgmr.msra.gmra.mrb[4].mxu1 %v23900_v50 }
 0x3ba   : > { %9218 = vmatmul.mubr.bf16.vlgmr.msra.gmra.mrb[4].mxu0 %v23900_v50  ;;  %8885 = vmatpush1.bf16.msra.mxu1 %v20827_v57  ;;  %v20899_v57 = vld [vmem:[%s23603_s17 + $0x26c8] ss:$40 sps:$4 sm:$0xff]  }
 0x3bb   : > { %9229 = vmatpush1.bf16.msra.mxu0 %v20830_v58  ;;  %8886 = vmatprep.subr.bf16.mxu1 %v20835_v59  ;;  %v20902_v58 = vld [vmem:[%s23603_s17 + $0x26d0] ss:$40 sps:$4 sm:$0xff]   ;;  %v20907_v59 = vld [vmem:[%s23603_s17 + $0x271c] ss:$40 sps:$4 sm:$0xff]  }
 0x3bc   : > { %9230 = vmatprep.subr.bf16.mxu0 %v20838_v60  ;;  %8916 = vmatprep.mubr.bf16.mxu1 %v23916_v30  ;;  %v20910_v60 = vld [vmem:[%s23603_s17 + $0x2724] ss:$40 sps:$4 sm:$0xff]  }
 0x3bd   : > { %9260 = vmatprep.mubr.bf16.mxu0 %v23916_v30 }
 0x3be   : > { %8887 = vmatpush1.bf16.msra.mxu1 %v20833_v61  ;;  %v20905_v61 = vld [vmem:[%s23603_s17 + $0x2718] ss:$40 sps:$4 sm:$0xff]  }
 0x3bf   : > { %9231 = vmatpush1.bf16.msra.mxu0 %v20836_v62  ;;  %8888 = vmatprep.subr.bf16.mxu1 %v20841_v63  ;;  %v20908_v62 = vld [vmem:[%s23603_s17 + $0x2720] ss:$40 sps:$4 sm:$0xff]   ;;  %v20913_v63 = vld [vmem:[%s23603_s17 + $0x276c] ss:$40 sps:$4 sm:$0xff]  }
 0x3c0   : > { %9232 = vmatprep.subr.bf16.mxu0 %v20844_v0  ;;  %v20916_v0 = vld [vmem:[%s23603_s17 + $0x2774] ss:$40 sps:$4 sm:$0xff]  }
 0x3c2   : > { %8889 = vmatpush1.bf16.msra.mxu1 %v20839_v1  ;;  %v20911_v1 = vld [vmem:[%s23603_s17 + $0x2768] ss:$40 sps:$4 sm:$0xff]  }
 0x3c3   : > { %9233 = vmatpush1.bf16.msra.mxu0 %v20842_v2  ;;  %8890 = vmatprep.subr.bf16.mxu1 %v20847_v3  ;;  %v20914_v2 = vld [vmem:[%s23603_s17 + $0x2770] ss:$40 sps:$4 sm:$0xff]   ;;  %v20919_v3 = vld [vmem:[%s23603_s17 + $0x27bc] ss:$40 sps:$4 sm:$0xff]  }
 0x3c4   : > { %9234 = vmatprep.subr.bf16.mxu0 %v20850_v4  ;;  %v20922_v4 = vld [vmem:[%s23603_s17 + $0x27c4] ss:$40 sps:$4 sm:$0xff]  }
 0x3c6   : > { %8891 = vmatpush1.bf16.msra.mxu1 %v20845_v7  ;;  %v20917_v7 = vld [vmem:[%s23603_s17 + $0x27b8] ss:$40 sps:$4 sm:$0xff]  }
 0x3c7   : > { %9235 = vmatpush1.bf16.msra.mxu0 %v20848_v8  ;;  %8892 = vmatprep.subr.bf16.mxu1 %v20853_v9  ;;  %v20920_v8 = vld [vmem:[%s23603_s17 + $0x27c0] ss:$40 sps:$4 sm:$0xff]   ;;  %v20925_v9 = vld [vmem:[%s23603_s17 + $0x1c] ss:$40 sps:$4 sm:$0xff]  }
 0x3c8   : > { %9236 = vmatprep.subr.bf16.mxu0 %v20856_v10  ;;  %v20928_v10 = vld [vmem:[%s23603_s17 + $0x24] ss:$40 sps:$4 sm:$0xff]  }
 0x3ca   : > { %8893 = vmatpush1.bf16.msra.mxu1 %v20851_v47  ;;  %v20923_v47 = vld [vmem:[%s23603_s17 + $0x18] ss:$40 sps:$4 sm:$0xff]  }
 0x3cb   : > { %9237 = vmatpush1.bf16.msra.mxu0 %v20854_v48  ;;  %8894 = vmatprep.subr.bf16.mxu1 %v20859_v51  ;;  %v20926_v48 = vld [vmem:[%s23603_s17 + $0x20] ss:$40 sps:$4 sm:$0xff]   ;;  %v20931_v51 = vld [vmem:[%s23603_s17 + $0x6c] ss:$40 sps:$4 sm:$0xff]  }
 0x3cc   : > { %9238 = vmatprep.subr.bf16.mxu0 %v20862_v52  ;;  %v20934_v52 = vld [vmem:[%s23603_s17 + $0x74] ss:$40 sps:$4 sm:$0xff]  }
 0x3ce   : > { %8895 = vmatpush1.bf16.msra.mxu1 %v20857_v13  ;;  %v20929_v13 = vld [vmem:[%s23603_s17 + $0x68] ss:$40 sps:$4 sm:$0xff]  }
 0x3cf   : > { %9239 = vmatpush1.bf16.msra.mxu0 %v20860_v14  ;;  %8896 = vmatprep.subr.bf16.mxu1 %v20865_v15  ;;  %v20932_v14 = vld [vmem:[%s23603_s17 + $0x70] ss:$40 sps:$4 sm:$0xff]   ;;  %v20937_v15 = vld [vmem:[%s23603_s17 + $0xbc] ss:$40 sps:$4 sm:$0xff]  }
 0x3d0   : > { %9240 = vmatprep.subr.bf16.mxu0 %v20868_v16  ;;  %v20940_v16 = vld [vmem:[%s23603_s17 + $0xc4] ss:$40 sps:$4 sm:$0xff]  }
 0x3d2   : > { %8897 = vmatpush1.bf16.msra.mxu1 %v20863_v17  ;;  %v20935_v17 = vld [vmem:[%s23603_s17 + $0xb8] ss:$40 sps:$4 sm:$0xff]  }
 0x3d3   : > { %9241 = vmatpush1.bf16.msra.mxu0 %v20866_v18  ;;  %8898 = vmatprep.subr.bf16.mxu1 %v20871_v19  ;;  %v20938_v18 = vld [vmem:[%s23603_s17 + $0xc0] ss:$40 sps:$4 sm:$0xff]   ;;  %v20943_v19 = vld [vmem:[%s23603_s17 + $0x10c] ss:$40 sps:$4 sm:$0xff]  }
 0x3d4   : > { %9242 = vmatprep.subr.bf16.mxu0 %v20874_v20  ;;  %v20946_v20 = vld [vmem:[%s23603_s17 + $0x114] ss:$40 sps:$4 sm:$0xff]  }
 0x3d6   : > { %8899 = vmatpush1.bf16.msra.mxu1 %v20869_v21  ;;  %v20941_v21 = vld [vmem:[%s23603_s17 + $0x108] ss:$40 sps:$4 sm:$0xff]  }
 0x3d7   : > { %9243 = vmatpush1.bf16.msra.mxu0 %v20872_v22  ;;  %8900 = vmatprep.subr.bf16.mxu1 %v20877_v25  ;;  %v20944_v22 = vld [vmem:[%s23603_s17 + $0x110] ss:$40 sps:$4 sm:$0xff]   ;;  %v20952_v25 = vld [vmem:[%s23603_s17 + $0x164] ss:$40 sps:$4 sm:$0xff]  }
 0x3d8   : > { %9244 = vmatprep.subr.bf16.mxu0 %v20880_v26  ;;  %v20947_v26 = vld [vmem:[%s23603_s17 + $0x158] ss:$40 sps:$4 sm:$0xff]  }
 0x3da   : > { %8901 = vmatpush1.bf16.msra.mxu1 %v20875_v27  ;;  %v20950_v27 = vld [vmem:[%s23603_s17 + $0x160] ss:$40 sps:$4 sm:$0xff]  }
 0x3db   : > { %9245 = vmatpush1.bf16.msra.mxu0 %v20878_v28  ;;  %8902 = vmatprep.subr.bf16.mxu1 %v20883_v31  ;;  %v20955_v28 = vld [vmem:[%s23603_s17 + $0x1ac] ss:$40 sps:$4 sm:$0xff]  }
 0x3dc   : > { %9246 = vmatprep.subr.bf16.mxu0 %v20886_v32  ;;  %v20958_v31 = vld [vmem:[%s23603_s17 + $0x1b4] ss:$40 sps:$4 sm:$0xff]   ;;  %v20953_v32 = vld [vmem:[%s23603_s17 + $0x1a8] ss:$40 sps:$4 sm:$0xff]  }
 0x3de   : > { %8903 = vmatpush1.bf16.msra.mxu1 %v20881_v37  ;;  %v20956_v37 = vld [vmem:[%s23603_s17 + $0x1b0] ss:$40 sps:$4 sm:$0xff]  }
 0x3df   : > { %9247 = vmatpush1.bf16.msra.mxu0 %v20884_v38  ;;  %8904 = vmatprep.subr.bf16.mxu1 %v20889_v39  ;;  %v20961_v38 = vld [vmem:[%s23603_s17 + $0x1fc] ss:$40 sps:$4 sm:$0xff]  }
 0x3e0   : > { %9248 = vmatprep.subr.bf16.mxu0 %v20892_v40  ;;  %v20964_v39 = vld [vmem:[%s23603_s17 + $0x204] ss:$40 sps:$4 sm:$0xff]   ;;  %v20959_v40 = vld [vmem:[%s23603_s17 + $0x1f8] ss:$40 sps:$4 sm:$0xff]  }
 0x3e2   : > { %8905 = vmatpush1.bf16.msra.mxu1 %v20887_v42  ;;  %v20962_v42 = vld [vmem:[%s23603_s17 + $0x200] ss:$40 sps:$4 sm:$0xff]  }
 0x3e3   : > { %9249 = vmatpush1.bf16.msra.mxu0 %v20890_v43  ;;  %8906 = vmatprep.subr.bf16.mxu1 %v20895_v45  ;;  %v20967_v43 = vld [vmem:[%s23603_s17 + $0x24c] ss:$40 sps:$4 sm:$0xff]  }
 0x3e4   : > { %9250 = vmatprep.subr.bf16.mxu0 %v20898_v46  ;;  %v20970_v45 = vld [vmem:[%s23603_s17 + $0x254] ss:$40 sps:$4 sm:$0xff]   ;;  %v20965_v46 = vld [vmem:[%s23603_s17 + $0x248] ss:$40 sps:$4 sm:$0xff]  }
 0x3e6   : > { %8907 = vmatpush1.bf16.msra.mxu1 %v20893_v54  ;;  %v20968_v54 = vld [vmem:[%s23603_s17 + $0x250] ss:$40 sps:$4 sm:$0xff]  }
 0x3e7   : > { %9251 = vmatpush1.bf16.msra.mxu0 %v20896_v55  ;;  %8908 = vmatprep.subr.bf16.mxu1 %v20901_v34  ;;  %v20973_v55 = vld [vmem:[%s23603_s17 + $0x29c] ss:$40 sps:$4 sm:$0xff]  }
 0x3e8   : > { %9252 = vmatprep.subr.bf16.mxu0 %v20904_v35  ;;  %v20976_v34 = vld [vmem:[%s23603_s17 + $0x2a4] ss:$40 sps:$4 sm:$0xff]   ;;  %v20971_v35 = vld [vmem:[%s23603_s17 + $0x298] ss:$40 sps:$4 sm:$0xff]  }
 0x3ea   : > { %8909 = vmatpush1.bf16.msra.mxu1 %v20899_v57  ;;  %v20974_v57 = vld [vmem:[%s23603_s17 + $0x2a0] ss:$40 sps:$4 sm:$0xff]  }
 0x3eb   : > { %9253 = vmatpush1.bf16.msra.mxu0 %v20902_v58  ;;  %8910 = vmatprep.subr.bf16.mxu1 %v20907_v59  ;;  %v20979_v58 = vld [vmem:[%s23603_s17 + $0x2ec] ss:$40 sps:$4 sm:$0xff]  }
 0x3ec   : > { %9254 = vmatprep.subr.bf16.mxu0 %v20910_v60  ;;  %v20982_v59 = vld [vmem:[%s23603_s17 + $0x2f4] ss:$40 sps:$4 sm:$0xff]   ;;  %v20977_v60 = vld [vmem:[%s23603_s17 + $0x2e8] ss:$40 sps:$4 sm:$0xff]  }
 0x3ee   : > { %8911 = vmatpush1.bf16.msra.mxu1 %v20905_v61  ;;  %v20980_v61 = vld [vmem:[%s23603_s17 + $0x2f0] ss:$40 sps:$4 sm:$0xff]  }
 0x3ef   : > { %9255 = vmatpush1.bf16.msra.mxu0 %v20908_v62  ;;  %8912 = vmatprep.subr.bf16.mxu1 %v20913_v63  ;;  %v20985_v62 = vld [vmem:[%s23603_s17 + $0x33c] ss:$40 sps:$4 sm:$0xff]  }
 0x3f0   : > { %9256 = vmatprep.subr.bf16.mxu0 %v20916_v0  ;;  %v20988_v63 = vld [vmem:[%s23603_s17 + $0x344] ss:$40 sps:$4 sm:$0xff]   ;;  %v20983_v0 = vld [vmem:[%s23603_s17 + $0x338] ss:$40 sps:$4 sm:$0xff]  }
 0x3f2   : > { %8913 = vmatpush1.bf16.msra.mxu1 %v20911_v1  ;;  %v20986_v1 = vld [vmem:[%s23603_s17 + $0x340] ss:$40 sps:$4 sm:$0xff]  }
 0x3f3   : > { %9257 = vmatpush1.bf16.msra.mxu0 %v20914_v2  ;;  %8914 = vmatprep.subr.bf16.mxu1 %v20919_v3  ;;  %v20991_v2 = vld [vmem:[%s23603_s17 + $0x38c] ss:$40 sps:$4 sm:$0xff]  }
 0x3f4   : > { %9258 = vmatprep.subr.bf16.mxu0 %v20922_v4  ;;  %v20994_v3 = vld [vmem:[%s23603_s17 + $0x394] ss:$40 sps:$4 sm:$0xff]   ;;  %v20989_v4 = vld [vmem:[%s23603_s17 + $0x388] ss:$40 sps:$4 sm:$0xff]  }
 0x3f6   : > { %8915 = vmatpush1.bf16.msra.mxu1 %v20917_v7  ;;  %v20992_v7 = vld [vmem:[%s23603_s17 + $0x390] ss:$40 sps:$4 sm:$0xff]  }
 0x3f7   : > { %9259 = vmatpush1.bf16.msra.mxu0 %v20920_v8  ;;  %9271 = vmatprep.subr.bf16.mxu1 %v20925_v9  ;;  %v20997_v8 = vld [vmem:[%s23603_s17 + $0x3dc] ss:$40 sps:$4 sm:$0xff]  }
 0x3f8   : > { %9615 = vmatprep.subr.bf16.mxu0 %v20928_v10  ;;  %v21000_v9 = vld [vmem:[%s23603_s17 + $0x3e4] ss:$40 sps:$4 sm:$0xff]   ;;  %v20995_v10 = vld [vmem:[%s23603_s17 + $0x3d8] ss:$40 sps:$4 sm:$0xff]  }
 0x3f9   : > { %8917 = vmatmul.mubr.bf16.vlgmr.msra.gmra.mrb[4].mxu1 %v23988_v6 }
 0x3fa   : > { %9261 = vmatmul.mubr.bf16.vlgmr.msra.gmra.mrb[4].mxu0 %v23988_v6  ;;  %9272 = vmatpush1.bf16.msra.mxu1 %v20923_v47  ;;  %v20998_v47 = vld [vmem:[%s23603_s17 + $0x3e0] ss:$40 sps:$4 sm:$0xff]  }
 0x3fb   : > { %9616 = vmatpush1.bf16.msra.mxu0 %v20926_v48  ;;  %9273 = vmatprep.subr.bf16.mxu1 %v20931_v51  ;;  %v21003_v48 = vld [vmem:[%s23603_s17 + $0x42c] ss:$40 sps:$4 sm:$0xff]  }
 0x3fc   : > { %9617 = vmatprep.subr.bf16.mxu0 %v20934_v52  ;;  %9303 = vmatprep.mubr.bf16.mxu1 %v23674_v53  ;;  %v21006_v51 = vld [vmem:[%s23603_s17 + $0x434] ss:$40 sps:$4 sm:$0xff]   ;;  %v21001_v52 = vld [vmem:[%s23603_s17 + $0x428] ss:$40 sps:$4 sm:$0xff]  }
 0x3fd   : > { %9647 = vmatprep.mubr.bf16.mxu0 %v23674_v53  ;;  %v20949_v53 = vld [vmem:[%s23603_s17 + $0x15c] ss:$40 sps:$4 sm:$0xff]  }
 0x3fe   : > { %9274 = vmatpush1.bf16.msra.mxu1 %v20929_v13  ;;  %v21004_v13 = vld [vmem:[%s23603_s17 + $0x430] ss:$40 sps:$4 sm:$0xff]  }
 0x3ff   : > { %9618 = vmatpush1.bf16.msra.mxu0 %v20932_v14  ;;  %9275 = vmatprep.subr.bf16.mxu1 %v20937_v15  ;;  %v21009_v14 = vld [vmem:[%s23603_s17 + $0x47c] ss:$40 sps:$4 sm:$0xff]  }
 0x400   : > { %9619 = vmatprep.subr.bf16.mxu0 %v20940_v16  ;;  %v21012_v15 = vld [vmem:[%s23603_s17 + $0x484] ss:$40 sps:$4 sm:$0xff]   ;;  %v21007_v16 = vld [vmem:[%s23603_s17 + $0x478] ss:$40 sps:$4 sm:$0xff]  }
 0x402   : > { %9276 = vmatpush1.bf16.msra.mxu1 %v20935_v17  ;;  %v21010_v17 = vld [vmem:[%s23603_s17 + $0x480] ss:$40 sps:$4 sm:$0xff]  }
 0x403   : > { %9620 = vmatpush1.bf16.msra.mxu0 %v20938_v18  ;;  %9277 = vmatprep.subr.bf16.mxu1 %v20943_v19  ;;  %v21015_v18 = vld [vmem:[%s23603_s17 + $0x4cc] ss:$40 sps:$4 sm:$0xff]  }
 0x404   : > { %9621 = vmatprep.subr.bf16.mxu0 %v20946_v20  ;;  %v21018_v19 = vld [vmem:[%s23603_s17 + $0x4d4] ss:$40 sps:$4 sm:$0xff]   ;;  %v21013_v20 = vld [vmem:[%s23603_s17 + $0x4c8] ss:$40 sps:$4 sm:$0xff]  }
 0x406   : > { %9278 = vmatpush1.bf16.msra.mxu1 %v20941_v21  ;;  %v21016_v21 = vld [vmem:[%s23603_s17 + $0x4d0] ss:$40 sps:$4 sm:$0xff]  }
 0x407   : > { %9622 = vmatpush1.bf16.msra.mxu0 %v20944_v22  ;;  %9279 = vmatprep.subr.bf16.mxu1 %v20949_v53  ;;  %v21021_v22 = vld [vmem:[%s23603_s17 + $0x51c] ss:$40 sps:$4 sm:$0xff]  }
 0x408   : > { %9623 = vmatprep.subr.bf16.mxu0 %v20952_v25  ;;  %v21024_v53 = vld [vmem:[%s23603_s17 + $0x524] ss:$40 sps:$4 sm:$0xff]   ;;  %v21019_v25 = vld [vmem:[%s23603_s17 + $0x518] ss:$40 sps:$4 sm:$0xff]  }
 0x40a   : > { %9280 = vmatpush1.bf16.msra.mxu1 %v20947_v26  ;;  %v21022_v26 = vld [vmem:[%s23603_s17 + $0x520] ss:$40 sps:$4 sm:$0xff]  }
 0x40b   : > { %9624 = vmatpush1.bf16.msra.mxu0 %v20950_v27  ;;  %9281 = vmatprep.subr.bf16.mxu1 %v20955_v28  ;;  %v21027_v27 = vld [vmem:[%s23603_s17 + $0x56c] ss:$40 sps:$4 sm:$0xff]  }
 0x40c   : > { %9625 = vmatprep.subr.bf16.mxu0 %v20958_v31  ;;  %v21030_v28 = vld [vmem:[%s23603_s17 + $0x574] ss:$40 sps:$4 sm:$0xff]   ;;  %v21025_v31 = vld [vmem:[%s23603_s17 + $0x568] ss:$40 sps:$4 sm:$0xff]  }
 0x40e   : > { %9282 = vmatpush1.bf16.msra.mxu1 %v20953_v32  ;;  %v21028_v32 = vld [vmem:[%s23603_s17 + $0x570] ss:$40 sps:$4 sm:$0xff]  }
 0x40f   : > { %9626 = vmatpush1.bf16.msra.mxu0 %v20956_v37  ;;  %9283 = vmatprep.subr.bf16.mxu1 %v20961_v38  ;;  %v21033_v37 = vld [vmem:[%s23603_s17 + $0x5bc] ss:$40 sps:$4 sm:$0xff]  }
 0x410   : > { %9627 = vmatprep.subr.bf16.mxu0 %v20964_v39  ;;  %v21036_v38 = vld [vmem:[%s23603_s17 + $0x5c4] ss:$40 sps:$4 sm:$0xff]   ;;  %v21034_v39 = vld [vmem:[%s23603_s17 + $0x5c0] ss:$40 sps:$4 sm:$0xff]  }
 0x412   : > { %9284 = vmatpush1.bf16.msra.mxu1 %v20959_v40  ;;  %v21039_v40 = vld [vmem:[%s23603_s17 + $0x60c] ss:$40 sps:$4 sm:$0xff]  }
 0x413   : > { %9628 = vmatpush1.bf16.msra.mxu0 %v20962_v42  ;;  %9285 = vmatprep.subr.bf16.mxu1 %v20967_v43  ;;  %v21042_v42 = vld [vmem:[%s23603_s17 + $0x614] ss:$40 sps:$4 sm:$0xff]   ;;  %v21037_v43 = vld [vmem:[%s23603_s17 + $0x608] ss:$40 sps:$4 sm:$0xff]  }
 0x414   : > { %9629 = vmatprep.subr.bf16.mxu0 %v20970_v45  ;;  %v21040_v45 = vld [vmem:[%s23603_s17 + $0x610] ss:$40 sps:$4 sm:$0xff]  }
 0x416   : > { %9286 = vmatpush1.bf16.msra.mxu1 %v20965_v46  ;;  %v21048_v46 = vld [vmem:[%s23603_s17 + $0x664] ss:$40 sps:$4 sm:$0xff]  }
 0x417   : > { %9630 = vmatpush1.bf16.msra.mxu0 %v20968_v54  ;;  %9287 = vmatprep.subr.bf16.mxu1 %v20973_v55  ;;  %v21043_v54 = vld [vmem:[%s23603_s17 + $0x658] ss:$40 sps:$4 sm:$0xff]  }
 0x418   : > { %9631 = vmatprep.subr.bf16.mxu0 %v20976_v34  ;;  %v21046_v55 = vld [vmem:[%s23603_s17 + $0x660] ss:$40 sps:$4 sm:$0xff]   ;;  %v21051_v34 = vld [vmem:[%s23603_s17 + $0x6ac] ss:$40 sps:$4 sm:$0xff]  }
 0x41a   : > { %9288 = vmatpush1.bf16.msra.mxu1 %v20971_v35  ;;  %v21054_v35 = vld [vmem:[%s23603_s17 + $0x6b4] ss:$40 sps:$4 sm:$0xff]  }
 0x41b   : > { %9632 = vmatpush1.bf16.msra.mxu0 %v20974_v57  ;;  %9289 = vmatprep.subr.bf16.mxu1 %v20979_v58  ;;  %v21049_v57 = vld [vmem:[%s23603_s17 + $0x6a8] ss:$40 sps:$4 sm:$0xff]  }
 0x41c   : > { %9633 = vmatprep.subr.bf16.mxu0 %v20982_v59  ;;  %v21052_v58 = vld [vmem:[%s23603_s17 + $0x6b0] ss:$40 sps:$4 sm:$0xff]   ;;  %v21057_v59 = vld [vmem:[%s23603_s17 + $0x6fc] ss:$40 sps:$4 sm:$0xff]  }
 0x41e   : > { %9290 = vmatpush1.bf16.msra.mxu1 %v20977_v60  ;;  %v21060_v60 = vld [vmem:[%s23603_s17 + $0x704] ss:$40 sps:$4 sm:$0xff]  }
 0x41f   : > { %9634 = vmatpush1.bf16.msra.mxu0 %v20980_v61  ;;  %9291 = vmatprep.subr.bf16.mxu1 %v20985_v62  ;;  %v21055_v61 = vld [vmem:[%s23603_s17 + $0x6f8] ss:$40 sps:$4 sm:$0xff]  }
 0x420   : > { %9635 = vmatprep.subr.bf16.mxu0 %v20988_v63  ;;  %v21058_v62 = vld [vmem:[%s23603_s17 + $0x700] ss:$40 sps:$4 sm:$0xff]   ;;  %v21063_v63 = vld [vmem:[%s23603_s17 + $0x74c] ss:$40 sps:$4 sm:$0xff]  }
 0x422   : > { %9292 = vmatpush1.bf16.msra.mxu1 %v20983_v0  ;;  %v21066_v0 = vld [vmem:[%s23603_s17 + $0x754] ss:$40 sps:$4 sm:$0xff]  }
 0x423   : > { %9636 = vmatpush1.bf16.msra.mxu0 %v20986_v1  ;;  %9293 = vmatprep.subr.bf16.mxu1 %v20991_v2  ;;  %v21061_v1 = vld [vmem:[%s23603_s17 + $0x748] ss:$40 sps:$4 sm:$0xff]  }
 0x424   : > { %9637 = vmatprep.subr.bf16.mxu0 %v20994_v3  ;;  %v21064_v2 = vld [vmem:[%s23603_s17 + $0x750] ss:$40 sps:$4 sm:$0xff]   ;;  %v21069_v3 = vld [vmem:[%s23603_s17 + $0x79c] ss:$40 sps:$4 sm:$0xff]  }
 0x426   : > { %9294 = vmatpush1.bf16.msra.mxu1 %v20989_v4  ;;  %v21072_v4 = vld [vmem:[%s23603_s17 + $0x7a4] ss:$40 sps:$4 sm:$0xff]  }
 0x427   : > { %9638 = vmatpush1.bf16.msra.mxu0 %v20992_v7  ;;  %9295 = vmatprep.subr.bf16.mxu1 %v20997_v8  ;;  %v21067_v7 = vld [vmem:[%s23603_s17 + $0x798] ss:$40 sps:$4 sm:$0xff]  }
 0x428   : > { %9639 = vmatprep.subr.bf16.mxu0 %v21000_v9  ;;  %v21070_v8 = vld [vmem:[%s23603_s17 + $0x7a0] ss:$40 sps:$4 sm:$0xff]   ;;  %v21075_v9 = vld [vmem:[%s23603_s17 + $0x7ec] ss:$40 sps:$4 sm:$0xff]  }
 0x42a   : > { %9296 = vmatpush1.bf16.msra.mxu1 %v20995_v10  ;;  %v21078_v10 = vld [vmem:[%s23603_s17 + $0x7f4] ss:$40 sps:$4 sm:$0xff]  }
 0x42b   : > { %9640 = vmatpush1.bf16.msra.mxu0 %v20998_v47  ;;  %9297 = vmatprep.subr.bf16.mxu1 %v21003_v48  ;;  %v21073_v47 = vld [vmem:[%s23603_s17 + $0x7e8] ss:$40 sps:$4 sm:$0xff]  }
 0x42c   : > { %9641 = vmatprep.subr.bf16.mxu0 %v21006_v51  ;;  %v21076_v48 = vld [vmem:[%s23603_s17 + $0x7f0] ss:$40 sps:$4 sm:$0xff]   ;;  %v21081_v51 = vld [vmem:[%s23603_s17 + $0x83c] ss:$40 sps:$4 sm:$0xff]  }
 0x42e   : > { %9298 = vmatpush1.bf16.msra.mxu1 %v21001_v52  ;;  %v21084_v52 = vld [vmem:[%s23603_s17 + $0x844] ss:$40 sps:$4 sm:$0xff]  }
 0x42f   : > { %9642 = vmatpush1.bf16.msra.mxu0 %v21004_v13  ;;  %9299 = vmatprep.subr.bf16.mxu1 %v21009_v14  ;;  %v21079_v13 = vld [vmem:[%s23603_s17 + $0x838] ss:$40 sps:$4 sm:$0xff]  }
 0x430   : > { %9643 = vmatprep.subr.bf16.mxu0 %v21012_v15  ;;  %v21082_v14 = vld [vmem:[%s23603_s17 + $0x840] ss:$40 sps:$4 sm:$0xff]   ;;  %v21087_v15 = vld [vmem:[%s23603_s17 + $0x88c] ss:$40 sps:$4 sm:$0xff]  }
 0x432   : > { %9300 = vmatpush1.bf16.msra.mxu1 %v21007_v16  ;;  %v21090_v16 = vld [vmem:[%s23603_s17 + $0x894] ss:$40 sps:$4 sm:$0xff]  }
 0x433   : > { %9644 = vmatpush1.bf16.msra.mxu0 %v21010_v17  ;;  %9301 = vmatprep.subr.bf16.mxu1 %v21015_v18  ;;  %v21085_v17 = vld [vmem:[%s23603_s17 + $0x888] ss:$40 sps:$4 sm:$0xff]  }
 0x434   : > { %9645 = vmatprep.subr.bf16.mxu0 %v21018_v19  ;;  %v21088_v18 = vld [vmem:[%s23603_s17 + $0x890] ss:$40 sps:$4 sm:$0xff]   ;;  %v21093_v19 = vld [vmem:[%s23603_s17 + $0x8dc] ss:$40 sps:$4 sm:$0xff]  }
 0x436   : > { %9302 = vmatpush1.bf16.msra.mxu1 %v21013_v20  ;;  %v21096_v20 = vld [vmem:[%s23603_s17 + $0x8e4] ss:$40 sps:$4 sm:$0xff]  }
 0x437   : > { %9646 = vmatpush1.bf16.msra.mxu0 %v21016_v21  ;;  %9314 = vmatprep.subr.bf16.mxu1 %v21021_v22  ;;  %v21091_v21 = vld [vmem:[%s23603_s17 + $0x8d8] ss:$40 sps:$4 sm:$0xff]  }
 0x438   : > { %9658 = vmatprep.subr.bf16.mxu0 %v21024_v53  ;;  %v21094_v22 = vld [vmem:[%s23603_s17 + $0x8e0] ss:$40 sps:$4 sm:$0xff]   ;;  %v21099_v53 = vld [vmem:[%s23603_s17 + $0x92c] ss:$40 sps:$4 sm:$0xff]  }
 0x439   : > { %9304 = vmatmul.mubr.bf16.vlgmr.msra.gmra.mrb[8].mxu1 %v23700_v11 }
 0x43a   : > { %9648 = vmatmul.mubr.bf16.vlgmr.msra.gmra.mrb[8].mxu0 %v23700_v11  ;;  %9315 = vmatpush1.bf16.msra.mxu1 %v21019_v25  ;;  %v21031_v11 = vld [vmem:[%s23603_s17 + $0x5b8] ss:$40 sps:$4 sm:$0xff]   ;;  %v21102_v25 = vld [vmem:[%s23603_s17 + $0x934] ss:$40 sps:$4 sm:$0xff]  }
 0x43b   : > { %9659 = vmatpush1.bf16.msra.mxu0 %v21022_v26  ;;  %9316 = vmatprep.subr.bf16.mxu1 %v21027_v27  ;;  %v21097_v26 = vld [vmem:[%s23603_s17 + $0x928] ss:$40 sps:$4 sm:$0xff]  }
 0x43c   : > { %9660 = vmatprep.subr.bf16.mxu0 %v21030_v28  ;;  %9346 = vmatprep.mubr.bf16.mxu1 %v23740_v41  ;;  %v21100_v27 = vld [vmem:[%s23603_s17 + $0x930] ss:$40 sps:$4 sm:$0xff]   ;;  %v21105_v28 = vld [vmem:[%s23603_s17 + $0x97c] ss:$40 sps:$4 sm:$0xff]  }
 0x43d   : > { %9690 = vmatprep.mubr.bf16.mxu0 %v23740_v41  ;;  %v21045_v41 = vld [vmem:[%s23603_s17 + $0x65c] ss:$40 sps:$4 sm:$0xff]  }
 0x43e   : > { %9317 = vmatpush1.bf16.msra.mxu1 %v21025_v31  ;;  %v21108_v31 = vld [vmem:[%s23603_s17 + $0x984] ss:$40 sps:$4 sm:$0xff]  }
 0x43f   : > { %9661 = vmatpush1.bf16.msra.mxu0 %v21028_v32  ;;  %9318 = vmatprep.subr.bf16.mxu1 %v21033_v37  ;;  %v21103_v32 = vld [vmem:[%s23603_s17 + $0x978] ss:$40 sps:$4 sm:$0xff]  }
 0x440   : > { %9662 = vmatprep.subr.bf16.mxu0 %v21036_v38  ;;  %v21106_v37 = vld [vmem:[%s23603_s17 + $0x980] ss:$40 sps:$4 sm:$0xff]   ;;  %v21111_v38 = vld [vmem:[%s23603_s17 + $0x9cc] ss:$40 sps:$4 sm:$0xff]  }
 0x442   : > { %9319 = vmatpush1.bf16.msra.mxu1 %v21031_v11  ;;  %v21114_v11 = vld [vmem:[%s23603_s17 + $0x9d4] ss:$40 sps:$4 sm:$0xff]  }
 0x443   : > { %9663 = vmatpush1.bf16.msra.mxu0 %v21034_v39  ;;  %9320 = vmatprep.subr.bf16.mxu1 %v21039_v40  ;;  %v21109_v39 = vld [vmem:[%s23603_s17 + $0x9c8] ss:$40 sps:$4 sm:$0xff]  }
 0x444   : > { %9664 = vmatprep.subr.bf16.mxu0 %v21042_v42  ;;  %v21112_v40 = vld [vmem:[%s23603_s17 + $0x9d0] ss:$40 sps:$4 sm:$0xff]   ;;  %v21117_v42 = vld [vmem:[%s23603_s17 + $0xa1c] ss:$40 sps:$4 sm:$0xff]  }
 0x446   : > { %9321 = vmatpush1.bf16.msra.mxu1 %v21037_v43  ;;  %v21120_v43 = vld [vmem:[%s23603_s17 + $0xa24] ss:$40 sps:$4 sm:$0xff]  }
 0x447   : > { %9665 = vmatpush1.bf16.msra.mxu0 %v21040_v45  ;;  %9322 = vmatprep.subr.bf16.mxu1 %v21045_v41  ;;  %v21115_v45 = vld [vmem:[%s23603_s17 + $0xa18] ss:$40 sps:$4 sm:$0xff]  }
 0x448   : > { %9666 = vmatprep.subr.bf16.mxu0 %v21048_v46  ;;  %v21118_v41 = vld [vmem:[%s23603_s17 + $0xa20] ss:$40 sps:$4 sm:$0xff]   ;;  %v21123_v46 = vld [vmem:[%s23603_s17 + $0xa6c] ss:$40 sps:$4 sm:$0xff]  }
 0x44a   : > { %9323 = vmatpush1.bf16.msra.mxu1 %v21043_v54  ;;  %v21126_v54 = vld [vmem:[%s23603_s17 + $0xa74] ss:$40 sps:$4 sm:$0xff]  }
 0x44b   : > { %9667 = vmatpush1.bf16.msra.mxu0 %v21046_v55  ;;  %9324 = vmatprep.subr.bf16.mxu1 %v21051_v34  ;;  %v21121_v55 = vld [vmem:[%s23603_s17 + $0xa68] ss:$40 sps:$4 sm:$0xff]  }
 0x44c   : > { %9668 = vmatprep.subr.bf16.mxu0 %v21054_v35  ;;  %v21124_v34 = vld [vmem:[%s23603_s17 + $0xa70] ss:$40 sps:$4 sm:$0xff]   ;;  %v21129_v35 = vld [vmem:[%s23603_s17 + $0xabc] ss:$40 sps:$4 sm:$0xff]  }
 0x44e   : > { %9325 = vmatpush1.bf16.msra.mxu1 %v21049_v57  ;;  %v21132_v57 = vld [vmem:[%s23603_s17 + $0xac4] ss:$40 sps:$4 sm:$0xff]  }
 0x44f   : > { %9669 = vmatpush1.bf16.msra.mxu0 %v21052_v58  ;;  %9326 = vmatprep.subr.bf16.mxu1 %v21057_v59  ;;  %v21130_v58 = vld [vmem:[%s23603_s17 + $0xac0] ss:$40 sps:$4 sm:$0xff]   ;;  %v21135_v59 = vld [vmem:[%s23603_s17 + $0xb0c] ss:$40 sps:$4 sm:$0xff]  }
 0x450   : > { %9670 = vmatprep.subr.bf16.mxu0 %v21060_v60  ;;  %v21138_v60 = vld [vmem:[%s23603_s17 + $0xb14] ss:$40 sps:$4 sm:$0xff]  }
 0x452   : > { %9327 = vmatpush1.bf16.msra.mxu1 %v21055_v61  ;;  %v21133_v61 = vld [vmem:[%s23603_s17 + $0xb08] ss:$40 sps:$4 sm:$0xff]  }
 0x453   : > { %9671 = vmatpush1.bf16.msra.mxu0 %v21058_v62  ;;  %9328 = vmatprep.subr.bf16.mxu1 %v21063_v63  ;;  %v21136_v62 = vld [vmem:[%s23603_s17 + $0xb10] ss:$40 sps:$4 sm:$0xff]   ;;  %v21144_v63 = vld [vmem:[%s23603_s17 + $0xb64] ss:$40 sps:$4 sm:$0xff]  }
 0x454   : > { %9672 = vmatprep.subr.bf16.mxu0 %v21066_v0  ;;  %v21139_v0 = vld [vmem:[%s23603_s17 + $0xb58] ss:$40 sps:$4 sm:$0xff]  }
 0x456   : > { %9329 = vmatpush1.bf16.msra.mxu1 %v21061_v1  ;;  %v21142_v1 = vld [vmem:[%s23603_s17 + $0xb60] ss:$40 sps:$4 sm:$0xff]  }
 0x457   : > { %9673 = vmatpush1.bf16.msra.mxu0 %v21064_v2  ;;  %9330 = vmatprep.subr.bf16.mxu1 %v21069_v3  ;;  %v21147_v2 = vld [vmem:[%s23603_s17 + $0xbac] ss:$40 sps:$4 sm:$0xff]  }
 0x458   : > { %9674 = vmatprep.subr.bf16.mxu0 %v21072_v4  ;;  %v21150_v3 = vld [vmem:[%s23603_s17 + $0xbb4] ss:$40 sps:$4 sm:$0xff]   ;;  %v21145_v4 = vld [vmem:[%s23603_s17 + $0xba8] ss:$40 sps:$4 sm:$0xff]  }
 0x45a   : > { %9331 = vmatpush1.bf16.msra.mxu1 %v21067_v7  ;;  %v21148_v7 = vld [vmem:[%s23603_s17 + $0xbb0] ss:$40 sps:$4 sm:$0xff]  }
 0x45b   : > { %9675 = vmatpush1.bf16.msra.mxu0 %v21070_v8  ;;  %9332 = vmatprep.subr.bf16.mxu1 %v21075_v9  ;;  %v21153_v8 = vld [vmem:[%s23603_s17 + $0xbfc] ss:$40 sps:$4 sm:$0xff]  }
 0x45c   : > { %9676 = vmatprep.subr.bf16.mxu0 %v21078_v10  ;;  %v21156_v9 = vld [vmem:[%s23603_s17 + $0xc04] ss:$40 sps:$4 sm:$0xff]   ;;  %v21151_v10 = vld [vmem:[%s23603_s17 + $0xbf8] ss:$40 sps:$4 sm:$0xff]  }
 0x45e   : > { %9333 = vmatpush1.bf16.msra.mxu1 %v21073_v47  ;;  %v21154_v47 = vld [vmem:[%s23603_s17 + $0xc00] ss:$40 sps:$4 sm:$0xff]  }
 0x45f   : > { %9677 = vmatpush1.bf16.msra.mxu0 %v21076_v48  ;;  %9334 = vmatprep.subr.bf16.mxu1 %v21081_v51  ;;  %v21159_v48 = vld [vmem:[%s23603_s17 + $0xc4c] ss:$40 sps:$4 sm:$0xff]  }
 0x460   : > { %9678 = vmatprep.subr.bf16.mxu0 %v21084_v52  ;;  %v21162_v51 = vld [vmem:[%s23603_s17 + $0xc54] ss:$40 sps:$4 sm:$0xff]   ;;  %v21157_v52 = vld [vmem:[%s23603_s17 + $0xc48] ss:$40 sps:$4 sm:$0xff]  }
 0x462   : > { %9335 = vmatpush1.bf16.msra.mxu1 %v21079_v13  ;;  %v21160_v13 = vld [vmem:[%s23603_s17 + $0xc50] ss:$40 sps:$4 sm:$0xff]  }
 0x463   : > { %9679 = vmatpush1.bf16.msra.mxu0 %v21082_v14  ;;  %9336 = vmatprep.subr.bf16.mxu1 %v21087_v15  ;;  %v21165_v14 = vld [vmem:[%s23603_s17 + $0xc9c] ss:$40 sps:$4 sm:$0xff]  }
 0x464   : > { %9680 = vmatprep.subr.bf16.mxu0 %v21090_v16  ;;  %v21168_v15 = vld [vmem:[%s23603_s17 + $0xca4] ss:$40 sps:$4 sm:$0xff]   ;;  %v21163_v16 = vld [vmem:[%s23603_s17 + $0xc98] ss:$40 sps:$4 sm:$0xff]  }
 0x466   : > { %9337 = vmatpush1.bf16.msra.mxu1 %v21085_v17  ;;  %v21166_v17 = vld [vmem:[%s23603_s17 + $0xca0] ss:$40 sps:$4 sm:$0xff]  }
 0x467   : > { %9681 = vmatpush1.bf16.msra.mxu0 %v21088_v18  ;;  %9338 = vmatprep.subr.bf16.mxu1 %v21093_v19  ;;  %v21171_v18 = vld [vmem:[%s23603_s17 + $0xcec] ss:$40 sps:$4 sm:$0xff]  }
 0x468   : > { %9682 = vmatprep.subr.bf16.mxu0 %v21096_v20  ;;  %v21174_v19 = vld [vmem:[%s23603_s17 + $0xcf4] ss:$40 sps:$4 sm:$0xff]   ;;  %v21169_v20 = vld [vmem:[%s23603_s17 + $0xce8] ss:$40 sps:$4 sm:$0xff]  }
 0x46a   : > { %9339 = vmatpush1.bf16.msra.mxu1 %v21091_v21  ;;  %v21172_v21 = vld [vmem:[%s23603_s17 + $0xcf0] ss:$40 sps:$4 sm:$0xff]  }
 0x46b   : > { %9683 = vmatpush1.bf16.msra.mxu0 %v21094_v22  ;;  %9340 = vmatprep.subr.bf16.mxu1 %v21099_v53  ;;  %v21177_v22 = vld [vmem:[%s23603_s17 + $0xd3c] ss:$40 sps:$4 sm:$0xff]  }
 0x46c   : > { %9684 = vmatprep.subr.bf16.mxu0 %v21102_v25  ;;  %v21180_v53 = vld [vmem:[%s23603_s17 + $0xd44] ss:$40 sps:$4 sm:$0xff]   ;;  %v21175_v25 = vld [vmem:[%s23603_s17 + $0xd38] ss:$40 sps:$4 sm:$0xff]  }
 0x46e   : > { %9341 = vmatpush1.bf16.msra.mxu1 %v21097_v26  ;;  %v21178_v26 = vld [vmem:[%s23603_s17 + $0xd40] ss:$40 sps:$4 sm:$0xff]  }
 0x46f   : > { %9685 = vmatpush1.bf16.msra.mxu0 %v21100_v27  ;;  %9342 = vmatprep.subr.bf16.mxu1 %v21105_v28  ;;  %v21183_v27 = vld [vmem:[%s23603_s17 + $0xd8c] ss:$40 sps:$4 sm:$0xff]  }
 0x470   : > { %9686 = vmatprep.subr.bf16.mxu0 %v21108_v31  ;;  %v21186_v28 = vld [vmem:[%s23603_s17 + $0xd94] ss:$40 sps:$4 sm:$0xff]   ;;  %v21181_v31 = vld [vmem:[%s23603_s17 + $0xd88] ss:$40 sps:$4 sm:$0xff]  }
 0x472   : > { %9343 = vmatpush1.bf16.msra.mxu1 %v21103_v32  ;;  %v21184_v32 = vld [vmem:[%s23603_s17 + $0xd90] ss:$40 sps:$4 sm:$0xff]  }
 0x473   : > { %9687 = vmatpush1.bf16.msra.mxu0 %v21106_v37  ;;  %9344 = vmatprep.subr.bf16.mxu1 %v21111_v38  ;;  %v21189_v37 = vld [vmem:[%s23603_s17 + $0xddc] ss:$40 sps:$4 sm:$0xff]  }
 0x474   : > { %9688 = vmatprep.subr.bf16.mxu0 %v21114_v11  ;;  %v21192_v38 = vld [vmem:[%s23603_s17 + $0xde4] ss:$40 sps:$4 sm:$0xff]   ;;  %v21187_v11 = vld [vmem:[%s23603_s17 + $0xdd8] ss:$40 sps:$4 sm:$0xff]  }
 0x476   : > { %9345 = vmatpush1.bf16.msra.mxu1 %v21109_v39  ;;  %v21190_v39 = vld [vmem:[%s23603_s17 + $0xde0] ss:$40 sps:$4 sm:$0xff]  }
 0x477   : > { %9689 = vmatpush1.bf16.msra.mxu0 %v21112_v40  ;;  %9357 = vmatprep.subr.bf16.mxu1 %v21117_v42  ;;  %v21195_v40 = vld [vmem:[%s23603_s17 + $0xe2c] ss:$40 sps:$4 sm:$0xff]  }
 0x478   : > { %9701 = vmatprep.subr.bf16.mxu0 %v21120_v43  ;;  %v21198_v42 = vld [vmem:[%s23603_s17 + $0xe34] ss:$40 sps:$4 sm:$0xff]   ;;  %v21193_v43 = vld [vmem:[%s23603_s17 + $0xe28] ss:$40 sps:$4 sm:$0xff]  }
 0x479   : > { %9347 = vmatmul.mubr.bf16.vlgmr.msra.gmra.mrb[8].mxu1 %v23794_v23 }
 0x47a   : > { %9691 = vmatmul.mubr.bf16.vlgmr.msra.gmra.mrb[8].mxu0 %v23794_v23  ;;  %9358 = vmatpush1.bf16.msra.mxu1 %v21115_v45  ;;  %v21127_v23 = vld [vmem:[%s23603_s17 + $0xab8] ss:$40 sps:$4 sm:$0xff]  }
 0x47b   : > { %9702 = vmatpush1.bf16.msra.mxu0 %v21118_v41  ;;  %9359 = vmatprep.subr.bf16.mxu1 %v21123_v46  ;;  %v21196_v45 = vld [vmem:[%s23603_s17 + $0xe30] ss:$40 sps:$4 sm:$0xff]   ;;  %v21201_v41 = vld [vmem:[%s23603_s17 + $0xe7c] ss:$40 sps:$4 sm:$0xff]  }
 0x47c   : > { %9703 = vmatprep.subr.bf16.mxu0 %v21126_v54  ;;  %9389 = vmatprep.mubr.bf16.mxu1 %v23816_v33  ;;  %v21204_v46 = vld [vmem:[%s23603_s17 + $0xe84] ss:$40 sps:$4 sm:$0xff]   ;;  %v21199_v54 = vld [vmem:[%s23603_s17 + $0xe78] ss:$40 sps:$4 sm:$0xff]  }
 0x47d   : > { %9733 = vmatprep.mubr.bf16.mxu0 %v23816_v33  ;;  %v21141_v33 = vld [vmem:[%s23603_s17 + $0xb5c] ss:$40 sps:$4 sm:$0xff]  }
 0x47e   : > { %9360 = vmatpush1.bf16.msra.mxu1 %v21121_v55  ;;  %v21202_v55 = vld [vmem:[%s23603_s17 + $0xe80] ss:$40 sps:$4 sm:$0xff]  }
 0x47f   : > { %9704 = vmatpush1.bf16.msra.mxu0 %v21124_v34  ;;  %9361 = vmatprep.subr.bf16.mxu1 %v21129_v35  ;;  %v21207_v34 = vld [vmem:[%s23603_s17 + $0xecc] ss:$40 sps:$4 sm:$0xff]  }
 0x480   : > { %9705 = vmatprep.subr.bf16.mxu0 %v21132_v57  ;;  %v21210_v35 = vld [vmem:[%s23603_s17 + $0xed4] ss:$40 sps:$4 sm:$0xff]   ;;  %v21205_v57 = vld [vmem:[%s23603_s17 + $0xec8] ss:$40 sps:$4 sm:$0xff]  }
 0x482   : > { %9362 = vmatpush1.bf16.msra.mxu1 %v21127_v23  ;;  %v21208_v23 = vld [vmem:[%s23603_s17 + $0xed0] ss:$40 sps:$4 sm:$0xff]  }
 0x483   : > { %9706 = vmatpush1.bf16.msra.mxu0 %v21130_v58  ;;  %9363 = vmatprep.subr.bf16.mxu1 %v21135_v59  ;;  %v21213_v58 = vld [vmem:[%s23603_s17 + $0xf1c] ss:$40 sps:$4 sm:$0xff]  }
 0x484   : > { %9707 = vmatprep.subr.bf16.mxu0 %v21138_v60  ;;  %v21216_v59 = vld [vmem:[%s23603_s17 + $0xf24] ss:$40 sps:$4 sm:$0xff]   ;;  %v21211_v60 = vld [vmem:[%s23603_s17 + $0xf18] ss:$40 sps:$4 sm:$0xff]  }
 0x486   : > { %9364 = vmatpush1.bf16.msra.mxu1 %v21133_v61  ;;  %v21214_v61 = vld [vmem:[%s23603_s17 + $0xf20] ss:$40 sps:$4 sm:$0xff]  }
 0x487   : > { %9708 = vmatpush1.bf16.msra.mxu0 %v21136_v62  ;;  %9365 = vmatprep.subr.bf16.mxu1 %v21141_v33  ;;  %v21219_v62 = vld [vmem:[%s23603_s17 + $0xf6c] ss:$40 sps:$4 sm:$0xff]  }
 0x488   : > { %9709 = vmatprep.subr.bf16.mxu0 %v21144_v63  ;;  %v21222_v33 = vld [vmem:[%s23603_s17 + $0xf74] ss:$40 sps:$4 sm:$0xff]   ;;  %v21217_v63 = vld [vmem:[%s23603_s17 + $0xf68] ss:$40 sps:$4 sm:$0xff]  }
 0x48a   : > { %9366 = vmatpush1.bf16.msra.mxu1 %v21139_v0  ;;  %v21220_v0 = vld [vmem:[%s23603_s17 + $0xf70] ss:$40 sps:$4 sm:$0xff]  }
 0x48b   : > { %9710 = vmatpush1.bf16.msra.mxu0 %v21142_v1  ;;  %9367 = vmatprep.subr.bf16.mxu1 %v21147_v2  ;;  %v21225_v1 = vld [vmem:[%s23603_s17 + $0xfbc] ss:$40 sps:$4 sm:$0xff]  }
 0x48c   : > { %9711 = vmatprep.subr.bf16.mxu0 %v21150_v3  ;;  %v21228_v2 = vld [vmem:[%s23603_s17 + $0xfc4] ss:$40 sps:$4 sm:$0xff]   ;;  %v21226_v3 = vld [vmem:[%s23603_s17 + $0xfc0] ss:$40 sps:$4 sm:$0xff]  }
 0x48e   : > { %9368 = vmatpush1.bf16.msra.mxu1 %v21145_v4  ;;  %v21231_v4 = vld [vmem:[%s23603_s17 + $0x100c] ss:$40 sps:$4 sm:$0xff]  }
 0x48f   : > { %9712 = vmatpush1.bf16.msra.mxu0 %v21148_v7  ;;  %9369 = vmatprep.subr.bf16.mxu1 %v21153_v8  ;;  %v21234_v7 = vld [vmem:[%s23603_s17 + $0x1014] ss:$40 sps:$4 sm:$0xff]   ;;  %v21229_v8 = vld [vmem:[%s23603_s17 + $0x1008] ss:$40 sps:$4 sm:$0xff]  }
 0x490   : > { %9713 = vmatprep.subr.bf16.mxu0 %v21156_v9  ;;  %v21232_v9 = vld [vmem:[%s23603_s17 + $0x1010] ss:$40 sps:$4 sm:$0xff]  }
 0x492   : > { %9370 = vmatpush1.bf16.msra.mxu1 %v21151_v10  ;;  %v21240_v10 = vld [vmem:[%s23603_s17 + $0x1064] ss:$40 sps:$4 sm:$0xff]  }
 0x493   : > { %9714 = vmatpush1.bf16.msra.mxu0 %v21154_v47  ;;  %9371 = vmatprep.subr.bf16.mxu1 %v21159_v48  ;;  %v21235_v47 = vld [vmem:[%s23603_s17 + $0x1058] ss:$40 sps:$4 sm:$0xff]  }
 0x494   : > { %9715 = vmatprep.subr.bf16.mxu0 %v21162_v51  ;;  %v21238_v48 = vld [vmem:[%s23603_s17 + $0x1060] ss:$40 sps:$4 sm:$0xff]   ;;  %v21243_v51 = vld [vmem:[%s23603_s17 + $0x10ac] ss:$40 sps:$4 sm:$0xff]  }
 0x496   : > { %9372 = vmatpush1.bf16.msra.mxu1 %v21157_v52  ;;  %v21246_v52 = vld [vmem:[%s23603_s17 + $0x10b4] ss:$40 sps:$4 sm:$0xff]  }
 0x497   : > { %9716 = vmatpush1.bf16.msra.mxu0 %v21160_v13  ;;  %9373 = vmatprep.subr.bf16.mxu1 %v21165_v14  ;;  %v445_v13 = vld [vmem:[#allocation2 + $0x10] sm:$0xff]  ;;  %v447_v14 = vld [vmem:[#allocation2 + $0x20] sm:$0xff] }
 0x498   : > { %9717 = vmatprep.subr.bf16.mxu0 %v21168_v15  ;;  %v446_v15 = vld [vmem:[#allocation2 + $0x18] sm:$0xff] }
 0x49a   : > { %9374 = vmatpush1.bf16.msra.mxu1 %v21163_v16  ;;  %v21241_v16 = vld [vmem:[%s23603_s17 + $0x10a8] ss:$40 sps:$4 sm:$0xff]  }
 0x49b   : > { %9718 = vmatpush1.bf16.msra.mxu0 %v21166_v17  ;;  %9375 = vmatprep.subr.bf16.mxu1 %v21171_v18  ;;  %v21244_v17 = vld [vmem:[%s23603_s17 + $0x10b0] ss:$40 sps:$4 sm:$0xff]   ;;  %v448_v18 = vld [vmem:[#allocation2 + $0x28] sm:$0xff] }
 0x49c   : > { %9719 = vmatprep.subr.bf16.mxu0 %v21174_v19  ;;  %v21249_v19 = vld [vmem:[%s23603_s17 + $0x10fc] ss:$40 sps:$4 sm:$0xff]  }
 0x49e   : > { %9376 = vmatpush1.bf16.msra.mxu1 %v21169_v20  ;;  %v21252_v20 = vld [vmem:[%s23603_s17 + $0x1104] ss:$40 sps:$4 sm:$0xff]  }
 0x49f   : > { %9720 = vmatpush1.bf16.msra.mxu0 %v21172_v21  ;;  %9377 = vmatprep.subr.bf16.mxu1 %v21177_v22 }
 0x4a0   : > { %9721 = vmatprep.subr.bf16.mxu0 %v21180_v53  ;;  %v455_v53 = vld [vmem:[#allocation2 + $0x60] sm:$0xff] }
 0x4a2   : > { %9378 = vmatpush1.bf16.msra.mxu1 %v21175_v25  ;;  %v457_v25 = vld [vmem:[#allocation2 + $0x70] sm:$0xff] }
 0x4a3   : > { %9722 = vmatpush1.bf16.msra.mxu0 %v21178_v26  ;;  %9379 = vmatprep.subr.bf16.mxu1 %v21183_v27 }
 0x4a4   : > { %9723 = vmatprep.subr.bf16.mxu0 %v21186_v28 }
 0x4a6   : > { %9380 = vmatpush1.bf16.msra.mxu1 %v21181_v31 }
 0x4a7   : > { %9724 = vmatpush1.bf16.msra.mxu0 %v21184_v32  ;;  %9381 = vmatprep.subr.bf16.mxu1 %v21189_v37  ;;  %v456_v32 = vld [vmem:[#allocation2 + $0x68] sm:$0xff]  ;;  %v458_v37 = vld [vmem:[#allocation2 + $0x78] sm:$0xff] }
 0x4a8   : > { %9725 = vmatprep.subr.bf16.mxu0 %v21192_v38 }
 0x4aa   : > { %9382 = vmatpush1.bf16.msra.mxu1 %v21187_v11 }
 0x4ab   : > { %9726 = vmatpush1.bf16.msra.mxu0 %v21190_v39  ;;  %9383 = vmatprep.subr.bf16.mxu1 %v21195_v40 }
 0x4ac   : > { %9727 = vmatprep.subr.bf16.mxu0 %v21198_v42  ;;  %v21247_v42 = vld [vmem:[%s23603_s17 + $0x10f8] ss:$40 sps:$4 sm:$0xff]  }
 0x4ae   : > { %9384 = vmatpush1.bf16.msra.mxu1 %v21193_v43  ;;  %v21250_v43 = vld [vmem:[%s23603_s17 + $0x1100] ss:$40 sps:$4 sm:$0xff]  }
 0x4af   : > { %9728 = vmatpush1.bf16.msra.mxu0 %v21196_v45  ;;  %9385 = vmatprep.subr.bf16.mxu1 %v21201_v41 }
 0x4b0   : > { %9729 = vmatprep.subr.bf16.mxu0 %v21204_v46 }
 0x4b2   : > { %9386 = vmatpush1.bf16.msra.mxu1 %v21199_v54 }
 0x4b3   : > { %9730 = vmatpush1.bf16.msra.mxu0 %v21202_v55  ;;  %9387 = vmatprep.subr.bf16.mxu1 %v21207_v34  ;;  %v21255_v55 = vld [vmem:[%s23603_s17 + $0x114c] ss:$40 sps:$4 sm:$0xff]  }
 0x4b4   : > { %9731 = vmatprep.subr.bf16.mxu0 %v21210_v35  ;;  %v21258_v34 = vld [vmem:[%s23603_s17 + $0x1154] ss:$40 sps:$4 sm:$0xff]  }
 0x4b6   : > { %9388 = vmatpush1.bf16.msra.mxu1 %v21205_v57 }
 0x4b7   : > { %9732 = vmatpush1.bf16.msra.mxu0 %v21208_v23  ;;  %9400 = vmatprep.subr.bf16.mxu1 %v21213_v58  ;;  %v21253_v23 = vld [vmem:[%s23603_s17 + $0x1148] ss:$40 sps:$4 sm:$0xff]  }
 0x4b8   : > { %9744 = vmatprep.subr.bf16.mxu0 %v21216_v59  ;;  %v21256_v58 = vld [vmem:[%s23603_s17 + $0x1150] ss:$40 sps:$4 sm:$0xff]   ;;  %v21261_v59 = vld [vmem:[%s23603_s17 + $0x119c] ss:$40 sps:$4 sm:$0xff]  }
 0x4b9   : > { %9390 = vmatmul.mubr.bf16.vlgmr.msra.gmra.mrb[8].mxu1 %v23896_v49 }
 0x4ba   : > { %9734 = vmatmul.mubr.bf16.vlgmr.msra.gmra.mrb[8].mxu0 %v23896_v49  ;;  %9401 = vmatpush1.bf16.msra.mxu1 %v21211_v60  ;;  %v21223_v49 = vld [vmem:[%s23603_s17 + $0xfb8] ss:$40 sps:$4 sm:$0xff]   ;;  %v21264_v60 = vld [vmem:[%s23603_s17 + $0x11a4] ss:$40 sps:$4 sm:$0xff]  }
 0x4bb   : > { %9745 = vmatpush1.bf16.msra.mxu0 %v21214_v61  ;;  %9402 = vmatprep.subr.bf16.mxu1 %v21219_v62  ;;  %v21259_v61 = vld [vmem:[%s23603_s17 + $0x1198] ss:$40 sps:$4 sm:$0xff]  }
 0x4bc   : > { %9746 = vmatprep.subr.bf16.mxu0 %v21222_v33  ;;  %9432 = vmatprep.mubr.bf16.mxu1 %v23912_v29  ;;  %v21262_v62 = vld [vmem:[%s23603_s17 + $0x11a0] ss:$40 sps:$4 sm:$0xff]   ;;  %v21267_v33 = vld [vmem:[%s23603_s17 + $0x11ec] ss:$40 sps:$4 sm:$0xff]  }
 0x4bd   : > { %9776 = vmatprep.mubr.bf16.mxu0 %v23912_v29  ;;  %v21237_v29 = vld [vmem:[%s23603_s17 + $0x105c] ss:$40 sps:$4 sm:$0xff]  }
 0x4be   : > { %9403 = vmatpush1.bf16.msra.mxu1 %v21217_v63  ;;  %v21270_v63 = vld [vmem:[%s23603_s17 + $0x11f4] ss:$40 sps:$4 sm:$0xff]  }
 0x4bf   : > { %9747 = vmatpush1.bf16.msra.mxu0 %v21220_v0  ;;  %9404 = vmatprep.subr.bf16.mxu1 %v21225_v1  ;;  %v21265_v0 = vld [vmem:[%s23603_s17 + $0x11e8] ss:$40 sps:$4 sm:$0xff]  }
 0x4c0   : > { %9748 = vmatprep.subr.bf16.mxu0 %v21228_v2  ;;  %v21268_v1 = vld [vmem:[%s23603_s17 + $0x11f0] ss:$40 sps:$4 sm:$0xff]   ;;  %v21273_v2 = vld [vmem:[%s23603_s17 + $0x123c] ss:$40 sps:$4 sm:$0xff]  }
 0x4c2   : > { %9405 = vmatpush1.bf16.msra.mxu1 %v21223_v49  ;;  %v21276_v49 = vld [vmem:[%s23603_s17 + $0x1244] ss:$40 sps:$4 sm:$0xff]  }
 0x4c3   : > { %9749 = vmatpush1.bf16.msra.mxu0 %v21226_v3  ;;  %9406 = vmatprep.subr.bf16.mxu1 %v21231_v4  ;;  %v21271_v3 = vld [vmem:[%s23603_s17 + $0x1238] ss:$40 sps:$4 sm:$0xff]  }
 0x4c4   : > { %9750 = vmatprep.subr.bf16.mxu0 %v21234_v7  ;;  %v21274_v4 = vld [vmem:[%s23603_s17 + $0x1240] ss:$40 sps:$4 sm:$0xff]   ;;  %v21279_v7 = vld [vmem:[%s23603_s17 + $0x128c] ss:$40 sps:$4 sm:$0xff]  }
 0x4c6   : > { %9407 = vmatpush1.bf16.msra.mxu1 %v21229_v8  ;;  %v21282_v8 = vld [vmem:[%s23603_s17 + $0x1294] ss:$40 sps:$4 sm:$0xff]  }
 0x4c7   : > { %9751 = vmatpush1.bf16.msra.mxu0 %v21232_v9  ;;  %9408 = vmatprep.subr.bf16.mxu1 %v21237_v29  ;;  %v21277_v9 = vld [vmem:[%s23603_s17 + $0x1288] ss:$40 sps:$4 sm:$0xff]  }
 0x4c8   : > { %9752 = vmatprep.subr.bf16.mxu0 %v21240_v10  ;;  %v21280_v29 = vld [vmem:[%s23603_s17 + $0x1290] ss:$40 sps:$4 sm:$0xff]   ;;  %v21285_v10 = vld [vmem:[%s23603_s17 + $0x12dc] ss:$40 sps:$4 sm:$0xff]  }
 0x4ca   : > { %9409 = vmatpush1.bf16.msra.mxu1 %v21235_v47  ;;  %v21288_v47 = vld [vmem:[%s23603_s17 + $0x12e4] ss:$40 sps:$4 sm:$0xff]  }
 0x4cb   : > { %9753 = vmatpush1.bf16.msra.mxu0 %v21238_v48  ;;  %9410 = vmatprep.subr.bf16.mxu1 %v21243_v51  ;;  %v21283_v48 = vld [vmem:[%s23603_s17 + $0x12d8] ss:$40 sps:$4 sm:$0xff]  }
 0x4cc   : > { %9754 = vmatprep.subr.bf16.mxu0 %v21246_v52  ;;  %v8918_v21 = vpop.f32.mrb[4].mxu1  ;;  %v21286_v51 = vld [vmem:[%s23603_s17 + $0x12e0] ss:$40 sps:$4 sm:$0xff]   ;;  %v21291_v52 = vld [vmem:[%s23603_s17 + $0x132c] ss:$40 sps:$4 sm:$0xff]  }
 0x4cd   : > { %v9262_v22 = vpop.f32.mrb[4].mxu0  ;;  %v9961_v26 = vadd.f32 %v8918_v21, %v445_v13  ;;  %v8920_v28 = vpop.f32.mrb[5].mxu1  ;;  %v21294_v13 = vld [vmem:[%s23603_s17 + $0x1334] ss:$40 sps:$4 sm:$0xff]  }
 0x4ce   : > { %v9963_v27 = vadd.f32 %v9262_v22, %v447_v14  ;;  %v9264_v31 = vpop.f32.mrb[5].mxu0  ;;  %v9962_v38 = vadd.f32 %v8920_v28, %v446_v15  ;;  %v8922_v39 = vpop.f32.mrb[6].mxu1  ;;  %9411 = vmatpush1.bf16.msra.mxu1 %v21241_v16  ;;  %v21289_v14 = vld [vmem:[%s23603_s17 + $0x1328] ss:$40 sps:$4 sm:$0xff]   ;;  %v21297_v16 = vld [vmem:[%s23603_s17 + $0x137c] ss:$40 sps:$4 sm:$0xff]  }
 0x4cf   : > { %v9964_v11 = vadd.f32 %v9264_v31, %v448_v18  ;;  %v9266_v40 = vpop.f32.mrb[6].mxu0  ;;  %9755 = vmatpush1.bf16.msra.mxu0 %v21244_v17  ;;  %9981 = vst [vmem:[#allocation2 + $0x10] sm:$0xff] %v9961_v26  ;;  %v9971_v45 = vadd.f32 %v8922_v39, %v455_v53  ;;  %v8924_v46 = vpop.f32.mrb[7].mxu1  ;;  %9412 = vmatprep.subr.bf16.mxu1 %v21249_v19  ;;  %v21292_v15 = vld [vmem:[%s23603_s17 + $0x1330] ss:$40 sps:$4 sm:$0xff]  }
 0x4d0   : > { %9983 = vst [vmem:[#allocation2 + $0x20] sm:$0xff] %v9963_v27  ;;  %v9973_v41 = vadd.f32 %v9266_v40, %v457_v25  ;;  %v9268_v54 = vpop.f32.mrb[7].mxu0  ;;  %9756 = vmatprep.subr.bf16.mxu0 %v21252_v20  ;;  %9982 = vst [vmem:[#allocation2 + $0x18] sm:$0xff] %v9962_v38  ;;  %v9972_v35 = vadd.f32 %v8924_v46, %v456_v32  ;;  %v21300_v17 = vld [vmem:[%s23603_s17 + $0x1384] ss:$40 sps:$4 sm:$0xff]  }
 0x4d1   : > { %9984 = vst [vmem:[#allocation2 + $0x28] sm:$0xff] %v9964_v11  ;;  %v9974_v57 = vadd.f32 %v9268_v54, %v458_v37  ;;  %9991 = vst [vmem:[#allocation2 + $0x60] sm:$0xff] %v9971_v45  ;;  %v21295_v18 = vld [vmem:[%s23603_s17 + $0x1378] ss:$40 sps:$4 sm:$0xff]   ;;  %v21303_v20 = vld [vmem:[%s23603_s17 + $0x13cc] ss:$40 sps:$4 sm:$0xff]  }
 0x4d2   : > { %9993 = vst [vmem:[#allocation2 + $0x70] sm:$0xff] %v9973_v41  ;;  %9992 = vst [vmem:[#allocation2 + $0x68] sm:$0xff] %v9972_v35  ;;  %9413 = vmatpush1.bf16.msra.mxu1 %v21247_v42  ;;  %v21298_v19 = vld [vmem:[%s23603_s17 + $0x1380] ss:$40 sps:$4 sm:$0xff]   ;;  %v21306_v21 = vld [vmem:[%s23603_s17 + $0x13d4] ss:$40 sps:$4 sm:$0xff]  }
 0x4d3   : > { %9994 = vst [vmem:[#allocation2 + $0x78] sm:$0xff] %v9974_v57  ;;  %9757 = vmatpush1.bf16.msra.mxu0 %v21250_v43  ;;  %9414 = vmatprep.subr.bf16.mxu1 %v21255_v55  ;;  %v21301_v22 = vld [vmem:[%s23603_s17 + $0x13c8] ss:$40 sps:$4 sm:$0xff]   ;;  %v21309_v25 = vld [vmem:[%s23603_s17 + $0x141c] ss:$40 sps:$4 sm:$0xff]  }
 0x4d4   : > { %9758 = vmatprep.subr.bf16.mxu0 %v21258_v34  ;;  %v21304_v53 = vld [vmem:[%s23603_s17 + $0x13d0] ss:$40 sps:$4 sm:$0xff]   ;;  %v21312_v26 = vld [vmem:[%s23603_s17 + $0x1424] ss:$40 sps:$4 sm:$0xff]   ;;  %v21310_v28 = vld [vmem:[%s23603_s17 + $0x1420] ss:$40 sps:$4 sm:$0xff]  }
 0x4d5   : > { %v21307_v27 = vld [vmem:[%s23603_s17 + $0x1418] ss:$40 sps:$4 sm:$0xff]   ;;  %v21315_v31 = vld [vmem:[%s23603_s17 + $0x146c] ss:$40 sps:$4 sm:$0xff]   ;;  %v21313_v37 = vld [vmem:[%s23603_s17 + $0x1468] ss:$40 sps:$4 sm:$0xff]  }
 0x4d6   : > { %9415 = vmatpush1.bf16.msra.mxu1 %v21253_v23  ;;  %v21318_v32 = vld [vmem:[%s23603_s17 + $0x1474] ss:$40 sps:$4 sm:$0xff]   ;;  %v21316_v38 = vld [vmem:[%s23603_s17 + $0x1470] ss:$40 sps:$4 sm:$0xff]   ;;  %v21324_v39 = vld [vmem:[%s23603_s17 + $0x14c4] ss:$40 sps:$4 sm:$0xff]  }
 0x4d7   : > { %9759 = vmatpush1.bf16.msra.mxu0 %v21256_v58  ;;  %9416 = vmatprep.subr.bf16.mxu1 %v21261_v59  ;;  %v21321_v11 = vld [vmem:[%s23603_s17 + $0x14bc] ss:$40 sps:$4 sm:$0xff]   ;;  %v21322_v40 = vld [vmem:[%s23603_s17 + $0x14c0] ss:$40 sps:$4 sm:$0xff]   ;;  %v21327_v42 = vld [vmem:[%s23603_s17 + $0x150c] ss:$40 sps:$4 sm:$0xff]  }
 0x4d8   : > { %9760 = vmatprep.subr.bf16.mxu0 %v21264_v60  ;;  %v21330_v43 = vld [vmem:[%s23603_s17 + $0x1514] ss:$40 sps:$4 sm:$0xff]   ;;  %v21325_v45 = vld [vmem:[%s23603_s17 + $0x1508] ss:$40 sps:$4 sm:$0xff]   ;;  %v21336_v46 = vld [vmem:[%s23603_s17 + $0x1564] ss:$40 sps:$4 sm:$0xff]  }
 0x4d9   : > { %v21328_v41 = vld [vmem:[%s23603_s17 + $0x1510] ss:$40 sps:$4 sm:$0xff]   ;;  %v21334_v55 = vld [vmem:[%s23603_s17 + $0x1560] ss:$40 sps:$4 sm:$0xff]   ;;  %v21339_v34 = vld [vmem:[%s23603_s17 + $0x15ac] ss:$40 sps:$4 sm:$0xff]  }
 0x4da   : > { %9417 = vmatpush1.bf16.msra.mxu1 %v21259_v61  ;;  %v21331_v54 = vld [vmem:[%s23603_s17 + $0x1558] ss:$40 sps:$4 sm:$0xff]   ;;  %v21342_v35 = vld [vmem:[%s23603_s17 + $0x15b4] ss:$40 sps:$4 sm:$0xff]   ;;  %v21337_v57 = vld [vmem:[%s23603_s17 + $0x15a8] ss:$40 sps:$4 sm:$0xff]  }
 0x4db   : > { %9761 = vmatpush1.bf16.msra.mxu0 %v21262_v62  ;;  %9418 = vmatprep.subr.bf16.mxu1 %v21267_v33  ;;  %v21340_v23 = vld [vmem:[%s23603_s17 + $0x15b0] ss:$40 sps:$4 sm:$0xff]   ;;  %v21345_v58 = vld [vmem:[%s23603_s17 + $0x15fc] ss:$40 sps:$4 sm:$0xff]   ;;  %v21346_v61 = vld [vmem:[%s23603_s17 + $0x1600] ss:$40 sps:$4 sm:$0xff]  }
 0x4dc   : > { %9762 = vmatprep.subr.bf16.mxu0 %v21270_v63  ;;  %v21348_v59 = vld [vmem:[%s23603_s17 + $0x1604] ss:$40 sps:$4 sm:$0xff]   ;;  %v21343_v60 = vld [vmem:[%s23603_s17 + $0x15f8] ss:$40 sps:$4 sm:$0xff]   ;;  %v21354_v33 = vld [vmem:[%s23603_s17 + $0x1654] ss:$40 sps:$4 sm:$0xff]  }
 0x4dd   : > { %v21351_v62 = vld [vmem:[%s23603_s17 + $0x164c] ss:$40 sps:$4 sm:$0xff]   ;;  %v21349_v63 = vld [vmem:[%s23603_s17 + $0x1648] ss:$40 sps:$4 sm:$0xff]  }
 0x4de   : > { %9419 = vmatpush1.bf16.msra.mxu1 %v21265_v0  ;;  %v21352_v0 = vld [vmem:[%s23603_s17 + $0x1650] ss:$40 sps:$4 sm:$0xff]  }
 0x4df   : > { %9763 = vmatpush1.bf16.msra.mxu0 %v21268_v1  ;;  %9420 = vmatprep.subr.bf16.mxu1 %v21273_v2  ;;  %v21357_v1 = vld [vmem:[%s23603_s17 + $0x169c] ss:$40 sps:$4 sm:$0xff]  }
 0x4e0   : > { %9764 = vmatprep.subr.bf16.mxu0 %v21276_v49  ;;  %v21360_v2 = vld [vmem:[%s23603_s17 + $0x16a4] ss:$40 sps:$4 sm:$0xff]   ;;  %v21355_v49 = vld [vmem:[%s23603_s17 + $0x1698] ss:$40 sps:$4 sm:$0xff]  }
 0x4e2   : > { %9421 = vmatpush1.bf16.msra.mxu1 %v21271_v3  ;;  %v21358_v3 = vld [vmem:[%s23603_s17 + $0x16a0] ss:$40 sps:$4 sm:$0xff]  }
 0x4e3   : > { %9765 = vmatpush1.bf16.msra.mxu0 %v21274_v4  ;;  %9422 = vmatprep.subr.bf16.mxu1 %v21279_v7  ;;  %v21363_v4 = vld [vmem:[%s23603_s17 + $0x16ec] ss:$40 sps:$4 sm:$0xff]  }
 0x4e4   : > { %9766 = vmatprep.subr.bf16.mxu0 %v21282_v8  ;;  %v21366_v7 = vld [vmem:[%s23603_s17 + $0x16f4] ss:$40 sps:$4 sm:$0xff]   ;;  %v21361_v8 = vld [vmem:[%s23603_s17 + $0x16e8] ss:$40 sps:$4 sm:$0xff]  }
 0x4e6   : > { %9423 = vmatpush1.bf16.msra.mxu1 %v21277_v9  ;;  %v21364_v9 = vld [vmem:[%s23603_s17 + $0x16f0] ss:$40 sps:$4 sm:$0xff]  }
 0x4e7   : > { %9767 = vmatpush1.bf16.msra.mxu0 %v21280_v29  ;;  %9424 = vmatprep.subr.bf16.mxu1 %v21285_v10  ;;  %v21369_v29 = vld [vmem:[%s23603_s17 + $0x173c] ss:$40 sps:$4 sm:$0xff]  }
 0x4e8   : > { %9768 = vmatprep.subr.bf16.mxu0 %v21288_v47  ;;  %v21372_v10 = vld [vmem:[%s23603_s17 + $0x1744] ss:$40 sps:$4 sm:$0xff]   ;;  %v21367_v47 = vld [vmem:[%s23603_s17 + $0x1738] ss:$40 sps:$4 sm:$0xff]  }
 0x4ea   : > { %9425 = vmatpush1.bf16.msra.mxu1 %v21283_v48  ;;  %v21370_v48 = vld [vmem:[%s23603_s17 + $0x1740] ss:$40 sps:$4 sm:$0xff]  }
 0x4eb   : > { %9769 = vmatpush1.bf16.msra.mxu0 %v21286_v51  ;;  %9426 = vmatprep.subr.bf16.mxu1 %v21291_v52  ;;  %v21375_v51 = vld [vmem:[%s23603_s17 + $0x178c] ss:$40 sps:$4 sm:$0xff]  }
 0x4ec   : > { %9770 = vmatprep.subr.bf16.mxu0 %v21294_v13  ;;  %v21378_v52 = vld [vmem:[%s23603_s17 + $0x1794] ss:$40 sps:$4 sm:$0xff]   ;;  %v21373_v13 = vld [vmem:[%s23603_s17 + $0x1788] ss:$40 sps:$4 sm:$0xff]  }
 0x4ee   : > { %9427 = vmatpush1.bf16.msra.mxu1 %v21289_v14  ;;  %v21376_v14 = vld [vmem:[%s23603_s17 + $0x1790] ss:$40 sps:$4 sm:$0xff]  }
 0x4ef   : > { %9771 = vmatpush1.bf16.msra.mxu0 %v21292_v15  ;;  %9428 = vmatprep.subr.bf16.mxu1 %v21297_v16  ;;  %v21381_v15 = vld [vmem:[%s23603_s17 + $0x17dc] ss:$40 sps:$4 sm:$0xff]  }
 0x4f0   : > { %9772 = vmatprep.subr.bf16.mxu0 %v21300_v17  ;;  %v21384_v16 = vld [vmem:[%s23603_s17 + $0x17e4] ss:$40 sps:$4 sm:$0xff]   ;;  %v21379_v17 = vld [vmem:[%s23603_s17 + $0x17d8] ss:$40 sps:$4 sm:$0xff]  }
 0x4f2   : > { %9429 = vmatpush1.bf16.msra.mxu1 %v21295_v18  ;;  %v21382_v18 = vld [vmem:[%s23603_s17 + $0x17e0] ss:$40 sps:$4 sm:$0xff]  }
 0x4f3   : > { %9773 = vmatpush1.bf16.msra.mxu0 %v21298_v19  ;;  %9430 = vmatprep.subr.bf16.mxu1 %v21303_v20  ;;  %v21387_v19 = vld [vmem:[%s23603_s17 + $0x182c] ss:$40 sps:$4 sm:$0xff]  }
 0x4f4   : > { %9774 = vmatprep.subr.bf16.mxu0 %v21306_v21  ;;  %v21390_v20 = vld [vmem:[%s23603_s17 + $0x1834] ss:$40 sps:$4 sm:$0xff]   ;;  %v21385_v21 = vld [vmem:[%s23603_s17 + $0x1828] ss:$40 sps:$4 sm:$0xff]  }
 0x4f6   : > { %9431 = vmatpush1.bf16.msra.mxu1 %v21301_v22  ;;  %v21388_v22 = vld [vmem:[%s23603_s17 + $0x1830] ss:$40 sps:$4 sm:$0xff]  }
 0x4f7   : > { %9775 = vmatpush1.bf16.msra.mxu0 %v21304_v53  ;;  %9443 = vmatprep.subr.bf16.mxu1 %v21309_v25  ;;  %v21393_v53 = vld [vmem:[%s23603_s17 + $0x187c] ss:$40 sps:$4 sm:$0xff]  }
 0x4f8   : > { %9787 = vmatprep.subr.bf16.mxu0 %v21312_v26  ;;  %v21396_v25 = vld [vmem:[%s23603_s17 + $0x1884] ss:$40 sps:$4 sm:$0xff]   ;;  %v21391_v26 = vld [vmem:[%s23603_s17 + $0x1878] ss:$40 sps:$4 sm:$0xff]  }
 0x4f9   : > { %9433 = vmatmul.mubr.bf16.vlgmr.msra.gmra.mrb[8].mxu1 %v23984_v5 }
 0x4fa   : > { %9777 = vmatmul.mubr.bf16.vlgmr.msra.gmra.mrb[8].mxu0 %v23984_v5  ;;  %9444 = vmatpush1.bf16.msra.mxu1 %v21307_v27  ;;  %v21319_v5 = vld [vmem:[%s23603_s17 + $0x14b8] ss:$40 sps:$4 sm:$0xff]  }
 0x4fb   : > { %9788 = vmatpush1.bf16.msra.mxu0 %v21310_v28  ;;  %9445 = vmatprep.subr.bf16.mxu1 %v21315_v31  ;;  %v21394_v27 = vld [vmem:[%s23603_s17 + $0x1880] ss:$40 sps:$4 sm:$0xff]   ;;  %v21399_v28 = vld [vmem:[%s23603_s17 + $0x18cc] ss:$40 sps:$4 sm:$0xff]  }
 0x4fc   : > { %9789 = vmatprep.subr.bf16.mxu0 %v21318_v32  ;;  %9475 = vmatprep.mubr.bf16.mxu1 %v23679_v56  ;;  %v21402_v31 = vld [vmem:[%s23603_s17 + $0x18d4] ss:$40 sps:$4 sm:$0xff]   ;;  %v21397_v32 = vld [vmem:[%s23603_s17 + $0x18c8] ss:$40 sps:$4 sm:$0xff]  }
 0x4fd   : > { %9819 = vmatprep.mubr.bf16.mxu0 %v23679_v56  ;;  %v21333_v56 = vld [vmem:[%s23603_s17 + $0x155c] ss:$40 sps:$4 sm:$0xff]  }
 0x4fe   : > { %9446 = vmatpush1.bf16.msra.mxu1 %v21313_v37  ;;  %v21400_v37 = vld [vmem:[%s23603_s17 + $0x18d0] ss:$40 sps:$4 sm:$0xff]  }
 0x4ff   : > { %9790 = vmatpush1.bf16.msra.mxu0 %v21316_v38  ;;  %9447 = vmatprep.subr.bf16.mxu1 %v21321_v11  ;;  %v21405_v38 = vld [vmem:[%s23603_s17 + $0x191c] ss:$40 sps:$4 sm:$0xff]  }
 0x500   : > { %9791 = vmatprep.subr.bf16.mxu0 %v21324_v39  ;;  %v21408_v11 = vld [vmem:[%s23603_s17 + $0x1924] ss:$40 sps:$4 sm:$0xff]   ;;  %v21403_v39 = vld [vmem:[%s23603_s17 + $0x1918] ss:$40 sps:$4 sm:$0xff]  }
 0x502   : > { %9448 = vmatpush1.bf16.msra.mxu1 %v21319_v5  ;;  %v21406_v5 = vld [vmem:[%s23603_s17 + $0x1920] ss:$40 sps:$4 sm:$0xff]  }
 0x503   : > { %9792 = vmatpush1.bf16.msra.mxu0 %v21322_v40  ;;  %9449 = vmatprep.subr.bf16.mxu1 %v21327_v42  ;;  %v21411_v40 = vld [vmem:[%s23603_s17 + $0x196c] ss:$40 sps:$4 sm:$0xff]  }
 0x504   : > { %9793 = vmatprep.subr.bf16.mxu0 %v21330_v43  ;;  %v21414_v42 = vld [vmem:[%s23603_s17 + $0x1974] ss:$40 sps:$4 sm:$0xff]   ;;  %v21409_v43 = vld [vmem:[%s23603_s17 + $0x1968] ss:$40 sps:$4 sm:$0xff]  }
 0x506   : > { %9450 = vmatpush1.bf16.msra.mxu1 %v21325_v45  ;;  %v21412_v45 = vld [vmem:[%s23603_s17 + $0x1970] ss:$40 sps:$4 sm:$0xff]  }
 0x507   : > { %9794 = vmatpush1.bf16.msra.mxu0 %v21328_v41  ;;  %9451 = vmatprep.subr.bf16.mxu1 %v21333_v56  ;;  %v21417_v41 = vld [vmem:[%s23603_s17 + $0x19bc] ss:$40 sps:$4 sm:$0xff]  }
 0x508   : > { %9795 = vmatprep.subr.bf16.mxu0 %v21336_v46  ;;  %v21420_v56 = vld [vmem:[%s23603_s17 + $0x19c4] ss:$40 sps:$4 sm:$0xff]   ;;  %v21418_v46 = vld [vmem:[%s23603_s17 + $0x19c0] ss:$40 sps:$4 sm:$0xff]  }
 0x50a   : > { %9452 = vmatpush1.bf16.msra.mxu1 %v21331_v54  ;;  %v21423_v54 = vld [vmem:[%s23603_s17 + $0x1a0c] ss:$40 sps:$4 sm:$0xff]  }
 0x50b   : > { %9796 = vmatpush1.bf16.msra.mxu0 %v21334_v55  ;;  %9453 = vmatprep.subr.bf16.mxu1 %v21339_v34  ;;  %v21426_v55 = vld [vmem:[%s23603_s17 + $0x1a14] ss:$40 sps:$4 sm:$0xff]   ;;  %v21421_v34 = vld [vmem:[%s23603_s17 + $0x1a08] ss:$40 sps:$4 sm:$0xff]  }
 0x50c   : > { %9797 = vmatprep.subr.bf16.mxu0 %v21342_v35  ;;  %v21424_v35 = vld [vmem:[%s23603_s17 + $0x1a10] ss:$40 sps:$4 sm:$0xff]  }
 0x50e   : > { %9454 = vmatpush1.bf16.msra.mxu1 %v21337_v57  ;;  %v21432_v57 = vld [vmem:[%s23603_s17 + $0x1a64] ss:$40 sps:$4 sm:$0xff]  }
 0x50f   : > { %9798 = vmatpush1.bf16.msra.mxu0 %v21340_v23  ;;  %9455 = vmatprep.subr.bf16.mxu1 %v21345_v58  ;;  %v21427_v23 = vld [vmem:[%s23603_s17 + $0x1a58] ss:$40 sps:$4 sm:$0xff]  }
 0x510   : > { %9799 = vmatprep.subr.bf16.mxu0 %v21348_v59  ;;  %v21430_v58 = vld [vmem:[%s23603_s17 + $0x1a60] ss:$40 sps:$4 sm:$0xff]   ;;  %v21435_v59 = vld [vmem:[%s23603_s17 + $0x1aac] ss:$40 sps:$4 sm:$0xff]  }
 0x512   : > { %9456 = vmatpush1.bf16.msra.mxu1 %v21343_v60  ;;  %v21438_v60 = vld [vmem:[%s23603_s17 + $0x1ab4] ss:$40 sps:$4 sm:$0xff]  }
 0x513   : > { %9800 = vmatpush1.bf16.msra.mxu0 %v21346_v61  ;;  %9457 = vmatprep.subr.bf16.mxu1 %v21351_v62  ;;  %v21433_v61 = vld [vmem:[%s23603_s17 + $0x1aa8] ss:$40 sps:$4 sm:$0xff]  }
 0x514   : > { %9801 = vmatprep.subr.bf16.mxu0 %v21354_v33  ;;  %v21436_v62 = vld [vmem:[%s23603_s17 + $0x1ab0] ss:$40 sps:$4 sm:$0xff]   ;;  %v21441_v33 = vld [vmem:[%s23603_s17 + $0x1afc] ss:$40 sps:$4 sm:$0xff]  }
 0x516   : > { %9458 = vmatpush1.bf16.msra.mxu1 %v21349_v63  ;;  %v21444_v63 = vld [vmem:[%s23603_s17 + $0x1b04] ss:$40 sps:$4 sm:$0xff]  }
 0x517   : > { %9802 = vmatpush1.bf16.msra.mxu0 %v21352_v0  ;;  %9459 = vmatprep.subr.bf16.mxu1 %v21357_v1  ;;  %v21439_v0 = vld [vmem:[%s23603_s17 + $0x1af8] ss:$40 sps:$4 sm:$0xff]  }
 0x518   : > { %9803 = vmatprep.subr.bf16.mxu0 %v21360_v2  ;;  %v21442_v1 = vld [vmem:[%s23603_s17 + $0x1b00] ss:$40 sps:$4 sm:$0xff]   ;;  %v21447_v2 = vld [vmem:[%s23603_s17 + $0x1b4c] ss:$40 sps:$4 sm:$0xff]  }
 0x51a   : > { %9460 = vmatpush1.bf16.msra.mxu1 %v21355_v49  ;;  %v21450_v49 = vld [vmem:[%s23603_s17 + $0x1b54] ss:$40 sps:$4 sm:$0xff]  }
 0x51b   : > { %9804 = vmatpush1.bf16.msra.mxu0 %v21358_v3  ;;  %9461 = vmatprep.subr.bf16.mxu1 %v21363_v4  ;;  %v21445_v3 = vld [vmem:[%s23603_s17 + $0x1b48] ss:$40 sps:$4 sm:$0xff]  }
 0x51c   : > { %9805 = vmatprep.subr.bf16.mxu0 %v21366_v7  ;;  %v21448_v4 = vld [vmem:[%s23603_s17 + $0x1b50] ss:$40 sps:$4 sm:$0xff]   ;;  %v21453_v7 = vld [vmem:[%s23603_s17 + $0x1b9c] ss:$40 sps:$4 sm:$0xff]  }
 0x51e   : > { %9462 = vmatpush1.bf16.msra.mxu1 %v21361_v8  ;;  %v21456_v8 = vld [vmem:[%s23603_s17 + $0x1ba4] ss:$40 sps:$4 sm:$0xff]  }
 0x51f   : > { %9806 = vmatpush1.bf16.msra.mxu0 %v21364_v9  ;;  %9463 = vmatprep.subr.bf16.mxu1 %v21369_v29  ;;  %v21451_v9 = vld [vmem:[%s23603_s17 + $0x1b98] ss:$40 sps:$4 sm:$0xff]  }
 0x520   : > { %9807 = vmatprep.subr.bf16.mxu0 %v21372_v10  ;;  %v21454_v29 = vld [vmem:[%s23603_s17 + $0x1ba0] ss:$40 sps:$4 sm:$0xff]   ;;  %v21459_v10 = vld [vmem:[%s23603_s17 + $0x1bec] ss:$40 sps:$4 sm:$0xff]  }
 0x522   : > { %9464 = vmatpush1.bf16.msra.mxu1 %v21367_v47  ;;  %v21462_v47 = vld [vmem:[%s23603_s17 + $0x1bf4] ss:$40 sps:$4 sm:$0xff]  }
 0x523   : > { %9808 = vmatpush1.bf16.msra.mxu0 %v21370_v48  ;;  %9465 = vmatprep.subr.bf16.mxu1 %v21375_v51  ;;  %v21457_v48 = vld [vmem:[%s23603_s17 + $0x1be8] ss:$40 sps:$4 sm:$0xff]  }
 0x524   : > { %9809 = vmatprep.subr.bf16.mxu0 %v21378_v52  ;;  %v21460_v51 = vld [vmem:[%s23603_s17 + $0x1bf0] ss:$40 sps:$4 sm:$0xff]   ;;  %v21465_v52 = vld [vmem:[%s23603_s17 + $0x1c3c] ss:$40 sps:$4 sm:$0xff]  }
 0x526   : > { %9466 = vmatpush1.bf16.msra.mxu1 %v21373_v13  ;;  %v21468_v13 = vld [vmem:[%s23603_s17 + $0x1c44] ss:$40 sps:$4 sm:$0xff]  }
 0x527   : > { %9810 = vmatpush1.bf16.msra.mxu0 %v21376_v14  ;;  %9467 = vmatprep.subr.bf16.mxu1 %v21381_v15  ;;  %v21463_v14 = vld [vmem:[%s23603_s17 + $0x1c38] ss:$40 sps:$4 sm:$0xff]  }
 0x528   : > { %9811 = vmatprep.subr.bf16.mxu0 %v21384_v16  ;;  %v21466_v15 = vld [vmem:[%s23603_s17 + $0x1c40] ss:$40 sps:$4 sm:$0xff]   ;;  %v21471_v16 = vld [vmem:[%s23603_s17 + $0x1c8c] ss:$40 sps:$4 sm:$0xff]  }
 0x52a   : > { %9468 = vmatpush1.bf16.msra.mxu1 %v21379_v17  ;;  %v21474_v17 = vld [vmem:[%s23603_s17 + $0x1c94] ss:$40 sps:$4 sm:$0xff]  }
 0x52b   : > { %9812 = vmatpush1.bf16.msra.mxu0 %v21382_v18  ;;  %9469 = vmatprep.subr.bf16.mxu1 %v21387_v19  ;;  %v21469_v18 = vld [vmem:[%s23603_s17 + $0x1c88] ss:$40 sps:$4 sm:$0xff]  }
 0x52c   : > { %9813 = vmatprep.subr.bf16.mxu0 %v21390_v20  ;;  %v21472_v19 = vld [vmem:[%s23603_s17 + $0x1c90] ss:$40 sps:$4 sm:$0xff]   ;;  %v21477_v20 = vld [vmem:[%s23603_s17 + $0x1cdc] ss:$40 sps:$4 sm:$0xff]  }
 0x52e   : > { %9470 = vmatpush1.bf16.msra.mxu1 %v21385_v21  ;;  %v21480_v21 = vld [vmem:[%s23603_s17 + $0x1ce4] ss:$40 sps:$4 sm:$0xff]  }
 0x52f   : > { %9814 = vmatpush1.bf16.msra.mxu0 %v21388_v22  ;;  %9471 = vmatprep.subr.bf16.mxu1 %v21393_v53  ;;  %v21475_v22 = vld [vmem:[%s23603_s17 + $0x1cd8] ss:$40 sps:$4 sm:$0xff]  }
 0x530   : > { %9815 = vmatprep.subr.bf16.mxu0 %v21396_v25  ;;  %v21478_v53 = vld [vmem:[%s23603_s17 + $0x1ce0] ss:$40 sps:$4 sm:$0xff]   ;;  %v21483_v25 = vld [vmem:[%s23603_s17 + $0x1d2c] ss:$40 sps:$4 sm:$0xff]  }
 0x532   : > { %9472 = vmatpush1.bf16.msra.mxu1 %v21391_v26  ;;  %v21486_v26 = vld [vmem:[%s23603_s17 + $0x1d34] ss:$40 sps:$4 sm:$0xff]  }
 0x533   : > { %9816 = vmatpush1.bf16.msra.mxu0 %v21394_v27  ;;  %9473 = vmatprep.subr.bf16.mxu1 %v21399_v28  ;;  %v21481_v27 = vld [vmem:[%s23603_s17 + $0x1d28] ss:$40 sps:$4 sm:$0xff]  }
 0x534   : > { %9817 = vmatprep.subr.bf16.mxu0 %v21402_v31  ;;  %v21484_v28 = vld [vmem:[%s23603_s17 + $0x1d30] ss:$40 sps:$4 sm:$0xff]   ;;  %v21489_v31 = vld [vmem:[%s23603_s17 + $0x1d7c] ss:$40 sps:$4 sm:$0xff]  }
 0x536   : > { %9474 = vmatpush1.bf16.msra.mxu1 %v21397_v32  ;;  %v21492_v32 = vld [vmem:[%s23603_s17 + $0x1d84] ss:$40 sps:$4 sm:$0xff]  }
 0x537   : > { %9818 = vmatpush1.bf16.msra.mxu0 %v21400_v37  ;;  %9486 = vmatprep.subr.bf16.mxu1 %v21405_v38  ;;  %v21487_v37 = vld [vmem:[%s23603_s17 + $0x1d78] ss:$40 sps:$4 sm:$0xff]  }
 0x538   : > { %9830 = vmatprep.subr.bf16.mxu0 %v21408_v11  ;;  %v21490_v38 = vld [vmem:[%s23603_s17 + $0x1d80] ss:$40 sps:$4 sm:$0xff]   ;;  %v21495_v11 = vld [vmem:[%s23603_s17 + $0x1dcc] ss:$40 sps:$4 sm:$0xff]  }
 0x539   : > { %9476 = vmatmul.mubr.bf16.vlgmr.msra.gmra.mrb[8].mxu1 %v23702_v12 }
 0x53a   : > { %9820 = vmatmul.mubr.bf16.vlgmr.msra.gmra.mrb[8].mxu0 %v23702_v12  ;;  %9487 = vmatpush1.bf16.msra.mxu1 %v21403_v39  ;;  %v21415_v12 = vld [vmem:[%s23603_s17 + $0x19b8] ss:$40 sps:$4 sm:$0xff]   ;;  %v21498_v39 = vld [vmem:[%s23603_s17 + $0x1dd4] ss:$40 sps:$4 sm:$0xff]  }
 0x53b   : > { %9831 = vmatpush1.bf16.msra.mxu0 %v21406_v5  ;;  %9488 = vmatprep.subr.bf16.mxu1 %v21411_v40  ;;  %v21493_v5 = vld [vmem:[%s23603_s17 + $0x1dc8] ss:$40 sps:$4 sm:$0xff]  }
 0x53c   : > { %9832 = vmatprep.subr.bf16.mxu0 %v21414_v42  ;;  %9518 = vmatprep.mubr.bf16.mxu1 %v23751_v44  ;;  %v21496_v40 = vld [vmem:[%s23603_s17 + $0x1dd0] ss:$40 sps:$4 sm:$0xff]   ;;  %v21501_v42 = vld [vmem:[%s23603_s17 + $0x1e1c] ss:$40 sps:$4 sm:$0xff]  }
 0x53d   : > { %9862 = vmatprep.mubr.bf16.mxu0 %v23751_v44  ;;  %v21429_v44 = vld [vmem:[%s23603_s17 + $0x1a5c] ss:$40 sps:$4 sm:$0xff]  }
 0x53e   : > { %9489 = vmatpush1.bf16.msra.mxu1 %v21409_v43  ;;  %v21504_v43 = vld [vmem:[%s23603_s17 + $0x1e24] ss:$40 sps:$4 sm:$0xff]  }
 0x53f   : > { %9833 = vmatpush1.bf16.msra.mxu0 %v21412_v45  ;;  %9490 = vmatprep.subr.bf16.mxu1 %v21417_v41  ;;  %v21499_v45 = vld [vmem:[%s23603_s17 + $0x1e18] ss:$40 sps:$4 sm:$0xff]  }
 0x540   : > { %9834 = vmatprep.subr.bf16.mxu0 %v21420_v56  ;;  %v21502_v41 = vld [vmem:[%s23603_s17 + $0x1e20] ss:$40 sps:$4 sm:$0xff]   ;;  %v21507_v56 = vld [vmem:[%s23603_s17 + $0x1e6c] ss:$40 sps:$4 sm:$0xff]  }
 0x542   : > { %9491 = vmatpush1.bf16.msra.mxu1 %v21415_v12  ;;  %v21510_v12 = vld [vmem:[%s23603_s17 + $0x1e74] ss:$40 sps:$4 sm:$0xff]  }
 0x543   : > { %9835 = vmatpush1.bf16.msra.mxu0 %v21418_v46  ;;  %9492 = vmatprep.subr.bf16.mxu1 %v21423_v54  ;;  %v21505_v46 = vld [vmem:[%s23603_s17 + $0x1e68] ss:$40 sps:$4 sm:$0xff]  }
 0x544   : > { %9836 = vmatprep.subr.bf16.mxu0 %v21426_v55  ;;  %v21508_v54 = vld [vmem:[%s23603_s17 + $0x1e70] ss:$40 sps:$4 sm:$0xff]   ;;  %v21513_v55 = vld [vmem:[%s23603_s17 + $0x1ebc] ss:$40 sps:$4 sm:$0xff]  }
 0x546   : > { %9493 = vmatpush1.bf16.msra.mxu1 %v21421_v34  ;;  %v21516_v34 = vld [vmem:[%s23603_s17 + $0x1ec4] ss:$40 sps:$4 sm:$0xff]  }
 0x547   : > { %9837 = vmatpush1.bf16.msra.mxu0 %v21424_v35  ;;  %9494 = vmatprep.subr.bf16.mxu1 %v21429_v44  ;;  %v21514_v35 = vld [vmem:[%s23603_s17 + $0x1ec0] ss:$40 sps:$4 sm:$0xff]   ;;  %v21519_v44 = vld [vmem:[%s23603_s17 + $0x1f0c] ss:$40 sps:$4 sm:$0xff]  }
 0x548   : > { %9838 = vmatprep.subr.bf16.mxu0 %v21432_v57  ;;  %v21522_v57 = vld [vmem:[%s23603_s17 + $0x1f14] ss:$40 sps:$4 sm:$0xff]  }
 0x54a   : > { %9495 = vmatpush1.bf16.msra.mxu1 %v21427_v23  ;;  %v21517_v23 = vld [vmem:[%s23603_s17 + $0x1f08] ss:$40 sps:$4 sm:$0xff]  }
 0x54b   : > { %9839 = vmatpush1.bf16.msra.mxu0 %v21430_v58  ;;  %9496 = vmatprep.subr.bf16.mxu1 %v21435_v59  ;;  %v21520_v58 = vld [vmem:[%s23603_s17 + $0x1f10] ss:$40 sps:$4 sm:$0xff]   ;;  %v21528_v59 = vld [vmem:[%s23603_s17 + $0x1f64] ss:$40 sps:$4 sm:$0xff]  }
 0x54c   : > { %9840 = vmatprep.subr.bf16.mxu0 %v21438_v60  ;;  %v21523_v60 = vld [vmem:[%s23603_s17 + $0x1f58] ss:$40 sps:$4 sm:$0xff]  }
 0x54e   : > { %9497 = vmatpush1.bf16.msra.mxu1 %v21433_v61  ;;  %v21526_v61 = vld [vmem:[%s23603_s17 + $0x1f60] ss:$40 sps:$4 sm:$0xff]  }
 0x54f   : > { %9841 = vmatpush1.bf16.msra.mxu0 %v21436_v62  ;;  %9498 = vmatprep.subr.bf16.mxu1 %v21441_v33  ;;  %v21531_v62 = vld [vmem:[%s23603_s17 + $0x1fac] ss:$40 sps:$4 sm:$0xff]  }
 0x550   : > { %9842 = vmatprep.subr.bf16.mxu0 %v21444_v63  ;;  %v21534_v33 = vld [vmem:[%s23603_s17 + $0x1fb4] ss:$40 sps:$4 sm:$0xff]   ;;  %v21529_v63 = vld [vmem:[%s23603_s17 + $0x1fa8] ss:$40 sps:$4 sm:$0xff]  }
 0x552   : > { %9499 = vmatpush1.bf16.msra.mxu1 %v21439_v0  ;;  %v21532_v0 = vld [vmem:[%s23603_s17 + $0x1fb0] ss:$40 sps:$4 sm:$0xff]  }
 0x553   : > { %9843 = vmatpush1.bf16.msra.mxu0 %v21442_v1  ;;  %9500 = vmatprep.subr.bf16.mxu1 %v21447_v2  ;;  %v21537_v1 = vld [vmem:[%s23603_s17 + $0x1ffc] ss:$40 sps:$4 sm:$0xff]  }
 0x554   : > { %9844 = vmatprep.subr.bf16.mxu0 %v21450_v49  ;;  %v21540_v2 = vld [vmem:[%s23603_s17 + $0x2004] ss:$40 sps:$4 sm:$0xff]   ;;  %v21535_v49 = vld [vmem:[%s23603_s17 + $0x1ff8] ss:$40 sps:$4 sm:$0xff]  }
 0x556   : > { %9501 = vmatpush1.bf16.msra.mxu1 %v21445_v3  ;;  %v21538_v3 = vld [vmem:[%s23603_s17 + $0x2000] ss:$40 sps:$4 sm:$0xff]  }
 0x557   : > { %9845 = vmatpush1.bf16.msra.mxu0 %v21448_v4  ;;  %9502 = vmatprep.subr.bf16.mxu1 %v21453_v7  ;;  %v21543_v4 = vld [vmem:[%s23603_s17 + $0x204c] ss:$40 sps:$4 sm:$0xff]  }
 0x558   : > { %9846 = vmatprep.subr.bf16.mxu0 %v21456_v8  ;;  %v21546_v7 = vld [vmem:[%s23603_s17 + $0x2054] ss:$40 sps:$4 sm:$0xff]   ;;  %v21541_v8 = vld [vmem:[%s23603_s17 + $0x2048] ss:$40 sps:$4 sm:$0xff]  }
 0x55a   : > { %9503 = vmatpush1.bf16.msra.mxu1 %v21451_v9  ;;  %v21544_v9 = vld [vmem:[%s23603_s17 + $0x2050] ss:$40 sps:$4 sm:$0xff]  }
 0x55b   : > { %9847 = vmatpush1.bf16.msra.mxu0 %v21454_v29  ;;  %9504 = vmatprep.subr.bf16.mxu1 %v21459_v10  ;;  %v21549_v29 = vld [vmem:[%s23603_s17 + $0x209c] ss:$40 sps:$4 sm:$0xff]  }
 0x55c   : > { %9848 = vmatprep.subr.bf16.mxu0 %v21462_v47  ;;  %v21552_v10 = vld [vmem:[%s23603_s17 + $0x20a4] ss:$40 sps:$4 sm:$0xff]   ;;  %v21547_v47 = vld [vmem:[%s23603_s17 + $0x2098] ss:$40 sps:$4 sm:$0xff]  }
 0x55e   : > { %9505 = vmatpush1.bf16.msra.mxu1 %v21457_v48  ;;  %v21550_v48 = vld [vmem:[%s23603_s17 + $0x20a0] ss:$40 sps:$4 sm:$0xff]  }
 0x55f   : > { %9849 = vmatpush1.bf16.msra.mxu0 %v21460_v51  ;;  %9506 = vmatprep.subr.bf16.mxu1 %v21465_v52  ;;  %v21555_v51 = vld [vmem:[%s23603_s17 + $0x20ec] ss:$40 sps:$4 sm:$0xff]  }
 0x560   : > { %9850 = vmatprep.subr.bf16.mxu0 %v21468_v13  ;;  %v21558_v52 = vld [vmem:[%s23603_s17 + $0x20f4] ss:$40 sps:$4 sm:$0xff]   ;;  %v21553_v13 = vld [vmem:[%s23603_s17 + $0x20e8] ss:$40 sps:$4 sm:$0xff]  }
 0x562   : > { %9507 = vmatpush1.bf16.msra.mxu1 %v21463_v14  ;;  %v21556_v14 = vld [vmem:[%s23603_s17 + $0x20f0] ss:$40 sps:$4 sm:$0xff]  }
 0x563   : > { %9851 = vmatpush1.bf16.msra.mxu0 %v21466_v15  ;;  %9508 = vmatprep.subr.bf16.mxu1 %v21471_v16  ;;  %v21561_v15 = vld [vmem:[%s23603_s17 + $0x213c] ss:$40 sps:$4 sm:$0xff]  }
 0x564   : > { %9852 = vmatprep.subr.bf16.mxu0 %v21474_v17  ;;  %v21564_v16 = vld [vmem:[%s23603_s17 + $0x2144] ss:$40 sps:$4 sm:$0xff]   ;;  %v21559_v17 = vld [vmem:[%s23603_s17 + $0x2138] ss:$40 sps:$4 sm:$0xff]  }
 0x566   : > { %9509 = vmatpush1.bf16.msra.mxu1 %v21469_v18  ;;  %v21562_v18 = vld [vmem:[%s23603_s17 + $0x2140] ss:$40 sps:$4 sm:$0xff]  }
 0x567   : > { %9853 = vmatpush1.bf16.msra.mxu0 %v21472_v19  ;;  %9510 = vmatprep.subr.bf16.mxu1 %v21477_v20  ;;  %v21567_v19 = vld [vmem:[%s23603_s17 + $0x218c] ss:$40 sps:$4 sm:$0xff]  }
 0x568   : > { %9854 = vmatprep.subr.bf16.mxu0 %v21480_v21  ;;  %v21570_v20 = vld [vmem:[%s23603_s17 + $0x2194] ss:$40 sps:$4 sm:$0xff]   ;;  %v21565_v21 = vld [vmem:[%s23603_s17 + $0x2188] ss:$40 sps:$4 sm:$0xff]  }
 0x56a   : > { %9511 = vmatpush1.bf16.msra.mxu1 %v21475_v22  ;;  %v21568_v22 = vld [vmem:[%s23603_s17 + $0x2190] ss:$40 sps:$4 sm:$0xff]  }
 0x56b   : > { %9855 = vmatpush1.bf16.msra.mxu0 %v21478_v53  ;;  %9512 = vmatprep.subr.bf16.mxu1 %v21483_v25  ;;  %v21573_v53 = vld [vmem:[%s23603_s17 + $0x21dc] ss:$40 sps:$4 sm:$0xff]  }
 0x56c   : > { %9856 = vmatprep.subr.bf16.mxu0 %v21486_v26  ;;  %v21576_v25 = vld [vmem:[%s23603_s17 + $0x21e4] ss:$40 sps:$4 sm:$0xff]   ;;  %v21571_v26 = vld [vmem:[%s23603_s17 + $0x21d8] ss:$40 sps:$4 sm:$0xff]  }
 0x56e   : > { %9513 = vmatpush1.bf16.msra.mxu1 %v21481_v27  ;;  %v21574_v27 = vld [vmem:[%s23603_s17 + $0x21e0] ss:$40 sps:$4 sm:$0xff]  }
 0x56f   : > { %9857 = vmatpush1.bf16.msra.mxu0 %v21484_v28  ;;  %9514 = vmatprep.subr.bf16.mxu1 %v21489_v31  ;;  %v21579_v28 = vld [vmem:[%s23603_s17 + $0x222c] ss:$40 sps:$4 sm:$0xff]  }
 0x570   : > { %9858 = vmatprep.subr.bf16.mxu0 %v21492_v32  ;;  %v21582_v31 = vld [vmem:[%s23603_s17 + $0x2234] ss:$40 sps:$4 sm:$0xff]   ;;  %v21577_v32 = vld [vmem:[%s23603_s17 + $0x2228] ss:$40 sps:$4 sm:$0xff]  }
 0x572   : > { %9515 = vmatpush1.bf16.msra.mxu1 %v21487_v37  ;;  %v21580_v37 = vld [vmem:[%s23603_s17 + $0x2230] ss:$40 sps:$4 sm:$0xff]  }
 0x573   : > { %9859 = vmatpush1.bf16.msra.mxu0 %v21490_v38  ;;  %9516 = vmatprep.subr.bf16.mxu1 %v21495_v11  ;;  %v21585_v38 = vld [vmem:[%s23603_s17 + $0x227c] ss:$40 sps:$4 sm:$0xff]  }
 0x574   : > { %9860 = vmatprep.subr.bf16.mxu0 %v21498_v39  ;;  %v21588_v11 = vld [vmem:[%s23603_s17 + $0x2284] ss:$40 sps:$4 sm:$0xff]   ;;  %v21583_v39 = vld [vmem:[%s23603_s17 + $0x2278] ss:$40 sps:$4 sm:$0xff]  }
 0x576   : > { %9517 = vmatpush1.bf16.msra.mxu1 %v21493_v5  ;;  %v21586_v5 = vld [vmem:[%s23603_s17 + $0x2280] ss:$40 sps:$4 sm:$0xff]  }
 0x577   : > { %9861 = vmatpush1.bf16.msra.mxu0 %v21496_v40  ;;  %9529 = vmatprep.subr.bf16.mxu1 %v21501_v42  ;;  %v21591_v40 = vld [vmem:[%s23603_s17 + $0x22cc] ss:$40 sps:$4 sm:$0xff]  }
 0x578   : > { %9873 = vmatprep.subr.bf16.mxu0 %v21504_v43  ;;  %v21594_v42 = vld [vmem:[%s23603_s17 + $0x22d4] ss:$40 sps:$4 sm:$0xff]   ;;  %v21589_v43 = vld [vmem:[%s23603_s17 + $0x22c8] ss:$40 sps:$4 sm:$0xff]  }
 0x579   : > { %9519 = vmatmul.mubr.bf16.vlgmr.msra.gmra.mrb[8].mxu1 %v23798_v24 }
 0x57a   : > { %9863 = vmatmul.mubr.bf16.vlgmr.msra.gmra.mrb[8].mxu0 %v23798_v24  ;;  %9530 = vmatpush1.bf16.msra.mxu1 %v21499_v45  ;;  %v21511_v24 = vld [vmem:[%s23603_s17 + $0x1eb8] ss:$40 sps:$4 sm:$0xff]  }
 0x57b   : > { %9874 = vmatpush1.bf16.msra.mxu0 %v21502_v41  ;;  %9531 = vmatprep.subr.bf16.mxu1 %v21507_v56  ;;  %v21592_v45 = vld [vmem:[%s23603_s17 + $0x22d0] ss:$40 sps:$4 sm:$0xff]   ;;  %v21597_v41 = vld [vmem:[%s23603_s17 + $0x231c] ss:$40 sps:$4 sm:$0xff]  }
 0x57c   : > { %9875 = vmatprep.subr.bf16.mxu0 %v21510_v12  ;;  %9561 = vmatprep.mubr.bf16.mxu1 %v23827_v36  ;;  %v21600_v56 = vld [vmem:[%s23603_s17 + $0x2324] ss:$40 sps:$4 sm:$0xff]   ;;  %v21595_v12 = vld [vmem:[%s23603_s17 + $0x2318] ss:$40 sps:$4 sm:$0xff]  }
 0x57d   : > { %9905 = vmatprep.mubr.bf16.mxu0 %v23827_v36  ;;  %v21525_v36 = vld [vmem:[%s23603_s17 + $0x1f5c] ss:$40 sps:$4 sm:$0xff]  }
 0x57e   : > { %9532 = vmatpush1.bf16.msra.mxu1 %v21505_v46  ;;  %v21598_v46 = vld [vmem:[%s23603_s17 + $0x2320] ss:$40 sps:$4 sm:$0xff]  }
 0x57f   : > { %9876 = vmatpush1.bf16.msra.mxu0 %v21508_v54  ;;  %9533 = vmatprep.subr.bf16.mxu1 %v21513_v55  ;;  %v21603_v54 = vld [vmem:[%s23603_s17 + $0x236c] ss:$40 sps:$4 sm:$0xff]  }
 0x580   : > { %9877 = vmatprep.subr.bf16.mxu0 %v21516_v34  ;;  %v21606_v55 = vld [vmem:[%s23603_s17 + $0x2374] ss:$40 sps:$4 sm:$0xff]   ;;  %v21601_v34 = vld [vmem:[%s23603_s17 + $0x2368] ss:$40 sps:$4 sm:$0xff]  }
 0x582   : > { %9534 = vmatpush1.bf16.msra.mxu1 %v21511_v24  ;;  %v21604_v24 = vld [vmem:[%s23603_s17 + $0x2370] ss:$40 sps:$4 sm:$0xff]  }
 0x583   : > { %9878 = vmatpush1.bf16.msra.mxu0 %v21514_v35  ;;  %9535 = vmatprep.subr.bf16.mxu1 %v21519_v44  ;;  %v21609_v35 = vld [vmem:[%s23603_s17 + $0x23bc] ss:$40 sps:$4 sm:$0xff]  }
 0x584   : > { %9879 = vmatprep.subr.bf16.mxu0 %v21522_v57  ;;  %v21612_v44 = vld [vmem:[%s23603_s17 + $0x23c4] ss:$40 sps:$4 sm:$0xff]   ;;  %v21610_v57 = vld [vmem:[%s23603_s17 + $0x23c0] ss:$40 sps:$4 sm:$0xff]  }
 0x586   : > { %9536 = vmatpush1.bf16.msra.mxu1 %v21517_v23  ;;  %v21615_v23 = vld [vmem:[%s23603_s17 + $0x240c] ss:$40 sps:$4 sm:$0xff]  }
 0x587   : > { %9880 = vmatpush1.bf16.msra.mxu0 %v21520_v58  ;;  %9537 = vmatprep.subr.bf16.mxu1 %v21525_v36  ;;  %v21618_v58 = vld [vmem:[%s23603_s17 + $0x2414] ss:$40 sps:$4 sm:$0xff]   ;;  %v21613_v36 = vld [vmem:[%s23603_s17 + $0x2408] ss:$40 sps:$4 sm:$0xff]  }
 0x588   : > { %9881 = vmatprep.subr.bf16.mxu0 %v21528_v59  ;;  %v21616_v59 = vld [vmem:[%s23603_s17 + $0x2410] ss:$40 sps:$4 sm:$0xff]  }
 0x58a   : > { %9538 = vmatpush1.bf16.msra.mxu1 %v21523_v60  ;;  %v21624_v60 = vld [vmem:[%s23603_s17 + $0x2464] ss:$40 sps:$4 sm:$0xff]  }
 0x58b   : > { %9882 = vmatpush1.bf16.msra.mxu0 %v21526_v61  ;;  %9539 = vmatprep.subr.bf16.mxu1 %v21531_v62  ;;  %v21619_v61 = vld [vmem:[%s23603_s17 + $0x2458] ss:$40 sps:$4 sm:$0xff]  }
 0x58c   : > { %9883 = vmatprep.subr.bf16.mxu0 %v21534_v33  ;;  %v21622_v62 = vld [vmem:[%s23603_s17 + $0x2460] ss:$40 sps:$4 sm:$0xff]   ;;  %v21627_v33 = vld [vmem:[%s23603_s17 + $0x24ac] ss:$40 sps:$4 sm:$0xff]  }
 0x58e   : > { %9540 = vmatpush1.bf16.msra.mxu1 %v21529_v63  ;;  %v21630_v63 = vld [vmem:[%s23603_s17 + $0x24b4] ss:$40 sps:$4 sm:$0xff]  }
 0x58f   : > { %9884 = vmatpush1.bf16.msra.mxu0 %v21532_v0  ;;  %9541 = vmatprep.subr.bf16.mxu1 %v21537_v1  ;;  %v21625_v0 = vld [vmem:[%s23603_s17 + $0x24a8] ss:$40 sps:$4 sm:$0xff]  }
 0x590   : > { %9885 = vmatprep.subr.bf16.mxu0 %v21540_v2  ;;  %v21628_v1 = vld [vmem:[%s23603_s17 + $0x24b0] ss:$40 sps:$4 sm:$0xff]   ;;  %v21633_v2 = vld [vmem:[%s23603_s17 + $0x24fc] ss:$40 sps:$4 sm:$0xff]  }
 0x592   : > { %9542 = vmatpush1.bf16.msra.mxu1 %v21535_v49  ;;  %v21636_v49 = vld [vmem:[%s23603_s17 + $0x2504] ss:$40 sps:$4 sm:$0xff]  }
 0x593   : > { %9886 = vmatpush1.bf16.msra.mxu0 %v21538_v3  ;;  %9543 = vmatprep.subr.bf16.mxu1 %v21543_v4  ;;  %v21631_v3 = vld [vmem:[%s23603_s17 + $0x24f8] ss:$40 sps:$4 sm:$0xff]  }
 0x594   : > { %9887 = vmatprep.subr.bf16.mxu0 %v21546_v7  ;;  %v21634_v4 = vld [vmem:[%s23603_s17 + $0x2500] ss:$40 sps:$4 sm:$0xff]   ;;  %v21639_v7 = vld [vmem:[%s23603_s17 + $0x254c] ss:$40 sps:$4 sm:$0xff]  }
 0x596   : > { %9544 = vmatpush1.bf16.msra.mxu1 %v21541_v8  ;;  %v21642_v8 = vld [vmem:[%s23603_s17 + $0x2554] ss:$40 sps:$4 sm:$0xff]  }
 0x597   : > { %9888 = vmatpush1.bf16.msra.mxu0 %v21544_v9  ;;  %9545 = vmatprep.subr.bf16.mxu1 %v21549_v29  ;;  %v21637_v9 = vld [vmem:[%s23603_s17 + $0x2548] ss:$40 sps:$4 sm:$0xff]  }
 0x598   : > { %9889 = vmatprep.subr.bf16.mxu0 %v21552_v10  ;;  %v21640_v29 = vld [vmem:[%s23603_s17 + $0x2550] ss:$40 sps:$4 sm:$0xff]   ;;  %v21645_v10 = vld [vmem:[%s23603_s17 + $0x259c] ss:$40 sps:$4 sm:$0xff]  }
 0x59a   : > { %9546 = vmatpush1.bf16.msra.mxu1 %v21547_v47  ;;  %v21648_v47 = vld [vmem:[%s23603_s17 + $0x25a4] ss:$40 sps:$4 sm:$0xff]  }
 0x59b   : > { %9890 = vmatpush1.bf16.msra.mxu0 %v21550_v48  ;;  %9547 = vmatprep.subr.bf16.mxu1 %v21555_v51  ;;  %v21643_v48 = vld [vmem:[%s23603_s17 + $0x2598] ss:$40 sps:$4 sm:$0xff]  }
 0x59c   : > { %9891 = vmatprep.subr.bf16.mxu0 %v21558_v52  ;;  %v21646_v51 = vld [vmem:[%s23603_s17 + $0x25a0] ss:$40 sps:$4 sm:$0xff]   ;;  %v21651_v52 = vld [vmem:[%s23603_s17 + $0x25ec] ss:$40 sps:$4 sm:$0xff]  }
 0x59e   : > { %9548 = vmatpush1.bf16.msra.mxu1 %v21553_v13  ;;  %v21654_v13 = vld [vmem:[%s23603_s17 + $0x25f4] ss:$40 sps:$4 sm:$0xff]  }
 0x59f   : > { %9892 = vmatpush1.bf16.msra.mxu0 %v21556_v14  ;;  %9549 = vmatprep.subr.bf16.mxu1 %v21561_v15  ;;  %v21649_v14 = vld [vmem:[%s23603_s17 + $0x25e8] ss:$40 sps:$4 sm:$0xff]  }
 0x5a0   : > { %9893 = vmatprep.subr.bf16.mxu0 %v21564_v16  ;;  %v21652_v15 = vld [vmem:[%s23603_s17 + $0x25f0] ss:$40 sps:$4 sm:$0xff]   ;;  %v21657_v16 = vld [vmem:[%s23603_s17 + $0x263c] ss:$40 sps:$4 sm:$0xff]  }
 0x5a2   : > { %9550 = vmatpush1.bf16.msra.mxu1 %v21559_v17  ;;  %v21660_v17 = vld [vmem:[%s23603_s17 + $0x2644] ss:$40 sps:$4 sm:$0xff]  }
 0x5a3   : > { %9894 = vmatpush1.bf16.msra.mxu0 %v21562_v18  ;;  %9551 = vmatprep.subr.bf16.mxu1 %v21567_v19  ;;  %v21655_v18 = vld [vmem:[%s23603_s17 + $0x2638] ss:$40 sps:$4 sm:$0xff]  }
 0x5a4   : > { %9895 = vmatprep.subr.bf16.mxu0 %v21570_v20  ;;  %v21658_v19 = vld [vmem:[%s23603_s17 + $0x2640] ss:$40 sps:$4 sm:$0xff]   ;;  %v21663_v20 = vld [vmem:[%s23603_s17 + $0x268c] ss:$40 sps:$4 sm:$0xff]  }
 0x5a6   : > { %9552 = vmatpush1.bf16.msra.mxu1 %v21565_v21  ;;  %v21666_v21 = vld [vmem:[%s23603_s17 + $0x2694] ss:$40 sps:$4 sm:$0xff]  }
 0x5a7   : > { %9896 = vmatpush1.bf16.msra.mxu0 %v21568_v22  ;;  %9553 = vmatprep.subr.bf16.mxu1 %v21573_v53  ;;  %v21661_v22 = vld [vmem:[%s23603_s17 + $0x2688] ss:$40 sps:$4 sm:$0xff]  }
 0x5a8   : > { %9897 = vmatprep.subr.bf16.mxu0 %v21576_v25  ;;  %v21664_v53 = vld [vmem:[%s23603_s17 + $0x2690] ss:$40 sps:$4 sm:$0xff]   ;;  %v21669_v25 = vld [vmem:[%s23603_s17 + $0x26dc] ss:$40 sps:$4 sm:$0xff]  }
 0x5aa   : > { %9554 = vmatpush1.bf16.msra.mxu1 %v21571_v26  ;;  %v21672_v26 = vld [vmem:[%s23603_s17 + $0x26e4] ss:$40 sps:$4 sm:$0xff]  }
 0x5ab   : > { %9898 = vmatpush1.bf16.msra.mxu0 %v21574_v27  ;;  %9555 = vmatprep.subr.bf16.mxu1 %v21579_v28  ;;  %v21667_v27 = vld [vmem:[%s23603_s17 + $0x26d8] ss:$40 sps:$4 sm:$0xff]  }
 0x5ac   : > { %9899 = vmatprep.subr.bf16.mxu0 %v21582_v31  ;;  %v21670_v28 = vld [vmem:[%s23603_s17 + $0x26e0] ss:$40 sps:$4 sm:$0xff]   ;;  %v21675_v31 = vld [vmem:[%s23603_s17 + $0x272c] ss:$40 sps:$4 sm:$0xff]  }
 0x5ae   : > { %9556 = vmatpush1.bf16.msra.mxu1 %v21577_v32  ;;  %v21678_v32 = vld [vmem:[%s23603_s17 + $0x2734] ss:$40 sps:$4 sm:$0xff]  }
 0x5af   : > { %9900 = vmatpush1.bf16.msra.mxu0 %v21580_v37  ;;  %9557 = vmatprep.subr.bf16.mxu1 %v21585_v38  ;;  %v21673_v37 = vld [vmem:[%s23603_s17 + $0x2728] ss:$40 sps:$4 sm:$0xff]  }
 0x5b0   : > { %9901 = vmatprep.subr.bf16.mxu0 %v21588_v11  ;;  %v21676_v38 = vld [vmem:[%s23603_s17 + $0x2730] ss:$40 sps:$4 sm:$0xff]   ;;  %v21681_v11 = vld [vmem:[%s23603_s17 + $0x277c] ss:$40 sps:$4 sm:$0xff]  }
 0x5b2   : > { %9558 = vmatpush1.bf16.msra.mxu1 %v21583_v39  ;;  %v21684_v39 = vld [vmem:[%s23603_s17 + $0x2784] ss:$40 sps:$4 sm:$0xff]  }
 0x5b3   : > { %9902 = vmatpush1.bf16.msra.mxu0 %v21586_v5  ;;  %9559 = vmatprep.subr.bf16.mxu1 %v21591_v40  ;;  %v21679_v5 = vld [vmem:[%s23603_s17 + $0x2778] ss:$40 sps:$4 sm:$0xff]  }
 0x5b4   : > { %9903 = vmatprep.subr.bf16.mxu0 %v21594_v42  ;;  %v21682_v40 = vld [vmem:[%s23603_s17 + $0x2780] ss:$40 sps:$4 sm:$0xff]   ;;  %v21687_v42 = vld [vmem:[%s23603_s17 + $0x27cc] ss:$40 sps:$4 sm:$0xff]  }
 0x5b6   : > { %9560 = vmatpush1.bf16.msra.mxu1 %v21589_v43  ;;  %v21690_v43 = vld [vmem:[%s23603_s17 + $0x27d4] ss:$40 sps:$4 sm:$0xff]  }
 0x5b7   : > { %9904 = vmatpush1.bf16.msra.mxu0 %v21592_v45  ;;  %9572 = vmatprep.subr.bf16.mxu1 %v21597_v41  ;;  %v21685_v45 = vld [vmem:[%s23603_s17 + $0x27c8] ss:$40 sps:$4 sm:$0xff]  }
 0x5b8   : > { %9916 = vmatprep.subr.bf16.mxu0 %v21600_v56  ;;  %v21688_v41 = vld [vmem:[%s23603_s17 + $0x27d0] ss:$40 sps:$4 sm:$0xff]  }
 0x5b9   : > { %9562 = vmatmul.mubr.bf16.vlgmr.msra.gmra.mrb[8].mxu1 %v23900_v50  ;;  %v449_v56 = vld [vmem:[#allocation2 + $0x30] sm:$0xff] }
 0x5ba   : > { %9906 = vmatmul.mubr.bf16.vlgmr.msra.gmra.mrb[8].mxu0 %v23900_v50  ;;  %9573 = vmatpush1.bf16.msra.mxu1 %v21595_v12  ;;  %v21607_v50 = vld [vmem:[%s23603_s17 + $0x23b8] ss:$40 sps:$4 sm:$0xff]  }
 0x5bb   : > { %9917 = vmatpush1.bf16.msra.mxu0 %v21598_v46  ;;  %9574 = vmatprep.subr.bf16.mxu1 %v21603_v54  ;;  %v451_v12 = vld [vmem:[#allocation2 + $0x40] sm:$0xff]  ;;  %v450_v46 = vld [vmem:[#allocation2 + $0x38] sm:$0xff]  ;;  %v452_v54 = vld [vmem:[#allocation2 + $0x48] sm:$0xff] }
 0x5bc   : > { %9918 = vmatprep.subr.bf16.mxu0 %v21606_v55  ;;  %9604 = vmatprep.mubr.bf16.mxu1 %v23916_v30 }
 0x5bd   : > { %9948 = vmatprep.mubr.bf16.mxu0 %v23916_v30  ;;  %v21621_v30 = vld [vmem:[%s23603_s17 + $0x245c] ss:$40 sps:$4 sm:$0xff]  }
 0x5be   : > { %9575 = vmatpush1.bf16.msra.mxu1 %v21601_v34 }
 0x5bf   : > { %9919 = vmatpush1.bf16.msra.mxu0 %v21604_v24  ;;  %9576 = vmatprep.subr.bf16.mxu1 %v21609_v35  ;;  %v459_v24 = vld [vmem:[#allocation2 + $0x80] sm:$0xff]  ;;  %v461_v35 = vld [vmem:[#allocation2 + $0x90] sm:$0xff] }
 0x5c0   : > { %9920 = vmatprep.subr.bf16.mxu0 %v21612_v44 }
 0x5c2   : > { %9577 = vmatpush1.bf16.msra.mxu1 %v21607_v50 }
 0x5c3   : > { %9921 = vmatpush1.bf16.msra.mxu0 %v21610_v57  ;;  %9578 = vmatprep.subr.bf16.mxu1 %v21615_v23 }
 0x5c4   : > { %9922 = vmatprep.subr.bf16.mxu0 %v21618_v58  ;;  %v460_v58 = vld [vmem:[#allocation2 + $0x88] sm:$0xff] }
 0x5c6   : > { %9579 = vmatpush1.bf16.msra.mxu1 %v21613_v36  ;;  %v462_v36 = vld [vmem:[#allocation2 + $0x98] sm:$0xff] }
 0x5c7   : > { %9923 = vmatpush1.bf16.msra.mxu0 %v21616_v59  ;;  %9580 = vmatprep.subr.bf16.mxu1 %v21621_v30 }
 0x5c8   : > { %9924 = vmatprep.subr.bf16.mxu0 %v21624_v60 }
 0x5ca   : > { %9581 = vmatpush1.bf16.msra.mxu1 %v21619_v61 }
 0x5cb   : > { %9925 = vmatpush1.bf16.msra.mxu0 %v21622_v62  ;;  %9582 = vmatprep.subr.bf16.mxu1 %v21627_v33 }
 0x5cc   : > { %9926 = vmatprep.subr.bf16.mxu0 %v21630_v63 }
 0x5ce   : > { %9583 = vmatpush1.bf16.msra.mxu1 %v21625_v0 }
 0x5cf   : > { %9927 = vmatpush1.bf16.msra.mxu0 %v21628_v1  ;;  %9584 = vmatprep.subr.bf16.mxu1 %v21633_v2  ;;  %v21691_v2 = vld [vmem:[#allocation9 + $0x4] ss:$40 sps:$4 sm:$0xff] (!%p18404_p3)  }
 0x5d0   : > { %9928 = vmatprep.subr.bf16.mxu0 %v21636_v49  ;;  %v21693_v49 = vld [vmem:[#allocation9 + $0x504] ss:$40 sps:$4 sm:$0xff] (!%p18404_p3)  }
 0x5d2   : > { %9585 = vmatpush1.bf16.msra.mxu1 %v21631_v3  ;;  %v21695_v3 = vld [vmem:[#allocation9] ss:$40 sps:$4 sm:$0xff] (!%p18404_p3)  }
 0x5d3   : > { %9929 = vmatpush1.bf16.msra.mxu0 %v21634_v4  ;;  %9586 = vmatprep.subr.bf16.mxu1 %v21639_v7  ;;  %v21696_v4 = vld [vmem:[#allocation9 + $0x500] ss:$40 sps:$4 sm:$0xff] (!%p18404_p3)   ;;  %v21697_v7 = vld [vmem:[#allocation9 + $0x54] ss:$40 sps:$4 sm:$0xff] (!%p18404_p3)  }
 0x5d4   : > { %9930 = vmatprep.subr.bf16.mxu0 %v21642_v8  ;;  %v21699_v8 = vld [vmem:[#allocation9 + $0x554] ss:$40 sps:$4 sm:$0xff] (!%p18404_p3)  }
 0x5d6   : > { %9587 = vmatpush1.bf16.msra.mxu1 %v21637_v9  ;;  %v21701_v9 = vld [vmem:[#allocation9 + $0x50] ss:$40 sps:$4 sm:$0xff] (!%p18404_p3)  }
 0x5d7   : > { %9931 = vmatpush1.bf16.msra.mxu0 %v21640_v29  ;;  %9588 = vmatprep.subr.bf16.mxu1 %v21645_v10  ;;  %v21702_v29 = vld [vmem:[#allocation9 + $0x550] ss:$40 sps:$4 sm:$0xff] (!%p18404_p3)   ;;  %v21703_v10 = vld [vmem:[#allocation9 + $0xa4] ss:$40 sps:$4 sm:$0xff] (!%p18404_p3)  }
 0x5d8   : > { %9932 = vmatprep.subr.bf16.mxu0 %v21648_v47  ;;  %v21705_v47 = vld [vmem:[#allocation9 + $0x5a4] ss:$40 sps:$4 sm:$0xff] (!%p18404_p3)  }
 0x5da   : > { %9589 = vmatpush1.bf16.msra.mxu1 %v21643_v48  ;;  %v21707_v48 = vld [vmem:[#allocation9 + $0xa0] ss:$40 sps:$4 sm:$0xff] (!%p18404_p3)  }
 0x5db   : > { %9933 = vmatpush1.bf16.msra.mxu0 %v21646_v51  ;;  %9590 = vmatprep.subr.bf16.mxu1 %v21651_v52  ;;  %v21708_v51 = vld [vmem:[#allocation9 + $0x5a0] ss:$40 sps:$4 sm:$0xff] (!%p18404_p3)   ;;  %v21709_v52 = vld [vmem:[#allocation9 + $0xf4] ss:$40 sps:$4 sm:$0xff] (!%p18404_p3)  }
 0x5dc   : > { %9934 = vmatprep.subr.bf16.mxu0 %v21654_v13  ;;  %v21711_v13 = vld [vmem:[#allocation9 + $0x5f4] ss:$40 sps:$4 sm:$0xff] (!%p18404_p3)  }
 0x5de   : > { %9591 = vmatpush1.bf16.msra.mxu1 %v21649_v14  ;;  %v21713_v14 = vld [vmem:[#allocation9 + $0xf0] ss:$40 sps:$4 sm:$0xff] (!%p18404_p3)  }
 0x5df   : > { %9935 = vmatpush1.bf16.msra.mxu0 %v21652_v15  ;;  %9592 = vmatprep.subr.bf16.mxu1 %v21657_v16  ;;  %v21714_v15 = vld [vmem:[#allocation9 + $0x5f0] ss:$40 sps:$4 sm:$0xff] (!%p18404_p3)   ;;  %v21715_v16 = vld [vmem:[#allocation9 + $0x144] ss:$40 sps:$4 sm:$0xff] (!%p18404_p3)  }
 0x5e0   : > { %9936 = vmatprep.subr.bf16.mxu0 %v21660_v17  ;;  %v21717_v17 = vld [vmem:[#allocation9 + $0x644] ss:$40 sps:$4 sm:$0xff] (!%p18404_p3)  }
 0x5e2   : > { %9593 = vmatpush1.bf16.msra.mxu1 %v21655_v18  ;;  %v21719_v18 = vld [vmem:[#allocation9 + $0x140] ss:$40 sps:$4 sm:$0xff] (!%p18404_p3)  }
 0x5e3   : > { %9937 = vmatpush1.bf16.msra.mxu0 %v21658_v19  ;;  %9594 = vmatprep.subr.bf16.mxu1 %v21663_v20  ;;  %v21720_v19 = vld [vmem:[#allocation9 + $0x640] ss:$40 sps:$4 sm:$0xff] (!%p18404_p3)   ;;  %v21721_v20 = vld [vmem:[#allocation9 + $0x194] ss:$40 sps:$4 sm:$0xff] (!%p18404_p3)  }
 0x5e4   : > { %9938 = vmatprep.subr.bf16.mxu0 %v21666_v21  ;;  %v21723_v21 = vld [vmem:[#allocation9 + $0x694] ss:$40 sps:$4 sm:$0xff] (!%p18404_p3)  }
 0x5e6   : > { %9595 = vmatpush1.bf16.msra.mxu1 %v21661_v22  ;;  %v21725_v22 = vld [vmem:[#allocation9 + $0x190] ss:$40 sps:$4 sm:$0xff] (!%p18404_p3)  }
 0x5e7   : > { %9939 = vmatpush1.bf16.msra.mxu0 %v21664_v53  ;;  %9596 = vmatprep.subr.bf16.mxu1 %v21669_v25  ;;  %v21726_v53 = vld [vmem:[#allocation9 + $0x690] ss:$40 sps:$4 sm:$0xff] (!%p18404_p3)   ;;  %v21727_v25 = vld [vmem:[#allocation9 + $0x1e4] ss:$40 sps:$4 sm:$0xff] (!%p18404_p3)  }
 0x5e8   : > { %9940 = vmatprep.subr.bf16.mxu0 %v21672_v26  ;;  %v21729_v26 = vld [vmem:[#allocation9 + $0x6e4] ss:$40 sps:$4 sm:$0xff] (!%p18404_p3)  }
 0x5ea   : > { %9597 = vmatpush1.bf16.msra.mxu1 %v21667_v27  ;;  %v21731_v27 = vld [vmem:[#allocation9 + $0x1e0] ss:$40 sps:$4 sm:$0xff] (!%p18404_p3)  }
 0x5eb   : > { %9941 = vmatpush1.bf16.msra.mxu0 %v21670_v28  ;;  %9598 = vmatprep.subr.bf16.mxu1 %v21675_v31  ;;  %v21732_v28 = vld [vmem:[#allocation9 + $0x6e0] ss:$40 sps:$4 sm:$0xff] (!%p18404_p3)   ;;  %v21733_v31 = vld [vmem:[#allocation9 + $0x234] ss:$40 sps:$4 sm:$0xff] (!%p18404_p3)  }
 0x5ec   : > { %9942 = vmatprep.subr.bf16.mxu0 %v21678_v32  ;;  %v21735_v32 = vld [vmem:[#allocation9 + $0x734] ss:$40 sps:$4 sm:$0xff] (!%p18404_p3)  }
 0x5ee   : > { %9599 = vmatpush1.bf16.msra.mxu1 %v21673_v37  ;;  %v21737_v37 = vld [vmem:[#allocation9 + $0x230] ss:$40 sps:$4 sm:$0xff] (!%p18404_p3)  }
 0x5ef   : > { %9943 = vmatpush1.bf16.msra.mxu0 %v21676_v38  ;;  %9600 = vmatprep.subr.bf16.mxu1 %v21681_v11  ;;  %v21738_v38 = vld [vmem:[#allocation9 + $0x730] ss:$40 sps:$4 sm:$0xff] (!%p18404_p3)   ;;  %v21739_v11 = vld [vmem:[#allocation9 + $0x284] ss:$40 sps:$4 sm:$0xff] (!%p18404_p3)  }
 0x5f0   : > { %9944 = vmatprep.subr.bf16.mxu0 %v21684_v39  ;;  %v21741_v39 = vld [vmem:[#allocation9 + $0x784] ss:$40 sps:$4 sm:$0xff] (!%p18404_p3)  }
 0x5f2   : > { %9601 = vmatpush1.bf16.msra.mxu1 %v21679_v5  ;;  %v21743_v5 = vld [vmem:[#allocation9 + $0x280] ss:$40 sps:$4 sm:$0xff] (!%p18404_p3)  }
 0x5f3   : > { %9945 = vmatpush1.bf16.msra.mxu0 %v21682_v40  ;;  %9602 = vmatprep.subr.bf16.mxu1 %v21687_v42  ;;  %v21744_v40 = vld [vmem:[#allocation9 + $0x780] ss:$40 sps:$4 sm:$0xff] (!%p18404_p3)   ;;  %v21745_v42 = vld [vmem:[#allocation9 + $0x2d4] ss:$40 sps:$4 sm:$0xff] (!%p18404_p3)  }
 0x5f4   : > { %9946 = vmatprep.subr.bf16.mxu0 %v21690_v43  ;;  %v10027_v43 = vlaneseq (!%p18404_p3) }
 0x5f6   : > { %9603 = vmatpush1.bf16.msra.mxu1 %v21685_v45  ;;  %v21747_v45 = vld [vmem:[#allocation9 + $0x7d4] ss:$40 sps:$4 sm:$0xff] (!%p18404_p3)  }
 0x5f7   : > { %9947 = vmatpush1.bf16.msra.mxu0 %v21688_v41  ;;  %14981 = vmatprep.subr.bf16.mxu1 (!%p18404_p3), %v21691_v2  ;;  %v21749_v41 = vld [vmem:[#allocation9 + $0x2d0] ss:$40 sps:$4 sm:$0xff] (!%p18404_p3)  }
 0x5f8   : > { %15024 = vmatprep.subr.bf16.mxu0 (!%p18404_p3), %v21693_v49  ;;  %v21767_v49 = vld [vmem:[#allocation9 + $0x3c0] ss:$40 sps:$4 sm:$0xff] (!%p18404_p3)  }
 0x5f9   : > { %9605 = vmatmul.mubr.bf16.vlgmr.msra.gmra.mrb[8].mxu1 %v23988_v6 }
 0x5fa   : > { %9949 = vmatmul.mubr.bf16.vlgmr.msra.gmra.mrb[8].mxu0 %v23988_v6  ;;  %14982 = vmatpush1.bf16.msra.mxu1 (!%p18404_p3), %v21695_v3  ;;  %v21768_v3 = vld [vmem:[#allocation9 + $0x8c0] ss:$40 sps:$4 sm:$0xff] (!%p18404_p3)  }
 0x5fb   : > { %15025 = vmatpush1.bf16.msra.mxu0 (!%p18404_p3), %v21696_v4  ;;  %14983 = vmatprep.subr.bf16.mxu1 (!%p18404_p3), %v21697_v7 }
 0x5fc   : > { %15026 = vmatprep.subr.bf16.mxu0 (!%p18404_p3), %v21699_v8 }
 0x5fe   : > { %14984 = vmatpush1.bf16.msra.mxu1 (!%p18404_p3), %v21701_v9 }
 0x5ff   : > { %15027 = vmatpush1.bf16.msra.mxu0 (!%p18404_p3), %v21702_v29  ;;  %14985 = vmatprep.subr.bf16.mxu1 (!%p18404_p3), %v21703_v10 }
 0x600   : > { %15028 = vmatprep.subr.bf16.mxu0 (!%p18404_p3), %v21705_v47  ;;  %v21769_v47 = vld [vmem:[#allocation9 + $0x414] ss:$40 sps:$4 sm:$0xff] (!%p18404_p3)  }
 0x602   : > { %14986 = vmatpush1.bf16.msra.mxu1 (!%p18404_p3), %v21707_v48  ;;  %v21771_v48 = vld [vmem:[#allocation9 + $0x914] ss:$40 sps:$4 sm:$0xff] (!%p18404_p3)  }
 0x603   : > { %15029 = vmatpush1.bf16.msra.mxu0 (!%p18404_p3), %v21708_v51  ;;  %14987 = vmatprep.subr.bf16.mxu1 (!%p18404_p3), %v21709_v52  ;;  %v21773_v51 = vld [vmem:[#allocation9 + $0x410] ss:$40 sps:$4 sm:$0xff] (!%p18404_p3)  }
 0x604   : > { %15030 = vmatprep.subr.bf16.mxu0 (!%p18404_p3), %v21711_v13  ;;  %v21774_v52 = vld [vmem:[#allocation9 + $0x910] ss:$40 sps:$4 sm:$0xff] (!%p18404_p3)  }
 0x606   : > { %14988 = vmatpush1.bf16.msra.mxu1 (!%p18404_p3), %v21713_v14 }
 0x607   : > { %15031 = vmatpush1.bf16.msra.mxu0 (!%p18404_p3), %v21714_v15  ;;  %14989 = vmatprep.subr.bf16.mxu1 (!%p18404_p3), %v21715_v16  ;;  %v21775_v15 = vld [vmem:[#allocation9 + $0x464] ss:$40 sps:$4 sm:$0xff] (!%p18404_p3)   ;;  %v10003_v16 = vld [vmem:[#allocation2] sm:$0xff] (!%p18404_p3) }
 0x608   : > { %15032 = vmatprep.subr.bf16.mxu0 (!%p18404_p3), %v21717_v17  ;;  %v10013_v17 = vld [vmem:[#allocation2 + $0x50] sm:$0xff] (!%p18404_p3) }
 0x60a   : > { %14990 = vmatpush1.bf16.msra.mxu1 (!%p18404_p3), %v21719_v18 }
 0x60b   : > { %15033 = vmatpush1.bf16.msra.mxu0 (!%p18404_p3), %v21720_v19  ;;  %14991 = vmatprep.subr.bf16.mxu1 (!%p18404_p3), %v21721_v20  ;;  %v10005_v20 = vld [vmem:[#allocation2 + $0x10] sm:$0xff] (!%p18404_p3) }
 0x60c   : > { %15034 = vmatprep.subr.bf16.mxu0 (!%p18404_p3), %v21723_v21  ;;  %v10015_v21 = vld [vmem:[#allocation2 + $0x60] sm:$0xff] (!%p18404_p3) }
 0x60e   : > { %14992 = vmatpush1.bf16.msra.mxu1 (!%p18404_p3), %v21725_v22  ;;  %v21777_v22 = vld [vmem:[#allocation9 + $0x964] ss:$40 sps:$4 sm:$0xff] (!%p18404_p3)  }
 0x60f   : > { %15035 = vmatpush1.bf16.msra.mxu0 (!%p18404_p3), %v21726_v53  ;;  %14993 = vmatprep.subr.bf16.mxu1 (!%p18404_p3), %v21727_v25  ;;  %v21779_v53 = vld [vmem:[#allocation9 + $0x460] ss:$40 sps:$4 sm:$0xff] (!%p18404_p3)  }
 0x610   : > { %15036 = vmatprep.subr.bf16.mxu0 (!%p18404_p3), %v21729_v26 }
 0x612   : > { %14994 = vmatpush1.bf16.msra.mxu1 (!%p18404_p3), %v21731_v27 }
 0x613   : > { %15037 = vmatpush1.bf16.msra.mxu0 (!%p18404_p3), %v21732_v28  ;;  %14995 = vmatprep.subr.bf16.mxu1 (!%p18404_p3), %v21733_v31  ;;  %v21780_v31 = vld [vmem:[#allocation9 + $0x960] ss:$40 sps:$4 sm:$0xff] (!%p18404_p3)  }
 0x614   : > { %15038 = vmatprep.subr.bf16.mxu0 (!%p18404_p3), %v21735_v32  ;;  %v21781_v32 = vld [vmem:[#allocation9 + $0x4b4] ss:$40 sps:$4 sm:$0xff] (!%p18404_p3)  }
 0x616   : > { %14996 = vmatpush1.bf16.msra.mxu1 (!%p18404_p3), %v21737_v37  ;;  %v21783_v37 = vld [vmem:[#allocation9 + $0x9b4] ss:$40 sps:$4 sm:$0xff] (!%p18404_p3)  }
 0x617   : > { %15039 = vmatpush1.bf16.msra.mxu0 (!%p18404_p3), %v21738_v38  ;;  %14997 = vmatprep.subr.bf16.mxu1 (!%p18404_p3), %v21739_v11  ;;  %v21785_v38 = vld [vmem:[#allocation9 + $0x4b0] ss:$40 sps:$4 sm:$0xff] (!%p18404_p3)  }
 0x618   : > { %15040 = vmatprep.subr.bf16.mxu0 (!%p18404_p3), %v21741_v39 }
 0x61a   : > { %14998 = vmatpush1.bf16.msra.mxu1 (!%p18404_p3), %v21743_v5 }
 0x61b   : > { %15041 = vmatpush1.bf16.msra.mxu0 (!%p18404_p3), %v21744_v40  ;;  %14999 = vmatprep.subr.bf16.mxu1 (!%p18404_p3), %v21745_v42  ;;  %v21786_v42 = vld [vmem:[#allocation9 + $0x9b0] ss:$40 sps:$4 sm:$0xff] (!%p18404_p3)  }
 0x61c   : > { %15042 = vmatprep.subr.bf16.mxu0 (!%p18404_p3), %v21747_v45  ;;  %v21792_v45 = vld [vmem:[#allocation9 + $0xc] ss:$40 sps:$4 sm:$0xff] (!%p18404_p3)  }
 0x61e   : > { %15000 = vmatpush1.bf16.msra.mxu1 (!%p18404_p3), %v21749_v41  ;;  %v21787_v41 = vld [vmem:[#allocation9 + $0xa00] ss:$40 sps:$4 sm:$0xff] (!%p18404_p3)  }
 0x6cc   : > { %v9606_v55 = vpop.f32.mrb[8].mxu1 }
 0x6cd   : > { %v9950_v34 = vpop.f32.mrb[8].mxu0  ;;  %v9965_v44 = vadd.f32 %v9606_v55, %v449_v56  ;;  %v9608_v57 = vpop.f32.mrb[9].mxu1  ;;  %10002 = sbr.rel (%p18404_p3) target bundleno = 3044 (0xbe4), region = 84  ;;  %v21750_v56 = vld [vmem:[#allocation9 + $0x7d0] ss:$40 sps:$4 sm:$0xff] (!%p18404_p3)  }
 0x6ce   : > { %v9967_v50 = vadd.f32 %v9950_v34, %v451_v12  ;;  %v9952_v23 = vpop.f32.mrb[9].mxu0  ;;  %v9966_v59 = vadd.f32 %v9608_v57, %v450_v46  ;;  %v9610_v60 = vpop.f32.mrb[10].mxu1  ;;  %v21751_v12 = vld [vmem:[#allocation9 + $0x324] ss:$40 sps:$4 sm:$0xff] (!%p18404_p3)   ;;  %v25079_v46 = vshrl.u32 (!%p18404_p3), %v10027_v43, 7  ;;  %15043 = vmatpush1.bf16.msra.mxu0 (!%p18404_p3), %v21750_v56 }
 0x6cf   : > { %v9968_v30 = vadd.f32 %v9952_v23, %v452_v54  ;;  %v9954_v61 = vpop.f32.mrb[10].mxu0  ;;  %9985 = vst [vmem:[#allocation2 + $0x30] sm:$0xff] %v9965_v44  ;;  %v9975_v6 = vadd.f32 %v9610_v60, %v459_v24  ;;  %v9612_v33 = vpop.f32.mrb[11].mxu1  ;;  %v21753_v54 = vld [vmem:[#allocation9 + $0x824] ss:$40 sps:$4 sm:$0xff] (!%p18404_p3)   ;;  %15001 = vmatprep.subr.bf16.mxu1 (!%p18404_p3), %v21751_v12 }
 0x6d0   : > { %9987 = vst [vmem:[#allocation2 + $0x40] sm:$0xff] %v9967_v50  ;;  %v9977_v62 = vadd.f32 %v9954_v61, %v461_v35  ;;  %v9956_v63 = vpop.f32.mrb[11].mxu0  ;;  %9986 = vst [vmem:[#allocation2 + $0x38] sm:$0xff] %v9966_v59  ;;  %v9976_v0 = vadd.f32 %v9612_v33, %v460_v58  ;;  %v21755_v55 = vld [vmem:[#allocation9 + $0x320] ss:$40 sps:$4 sm:$0xff] (!%p18404_p3)   ;;  %v25082_v35 = vsub.s32 (!%p18404_p3), 1, %v25079_v46  ;;  %15044 = vmatprep.subr.bf16.mxu0 (!%p18404_p3), %v21753_v54 }
 0x6d1   : > { %9988 = vst [vmem:[#allocation2 + $0x48] sm:$0xff] %v9968_v30  ;;  %v9978_v1 = vadd.f32 %v9956_v63, %v462_v36  ;;  %9995 = vst [vmem:[#allocation2 + $0x80] sm:$0xff] %v9975_v6  ;;  %v21756_v34 = vld [vmem:[#allocation9 + $0x820] ss:$40 sps:$4 sm:$0xff] (!%p18404_p3)   ;;  %v21757_v24 = vld [vmem:[#allocation9 + $0x374] ss:$40 sps:$4 sm:$0xff] (!%p18404_p3)   ;;  %15002 = vmatpush1.bf16.msra.mxu1 (!%p18404_p3), %v21755_v55 }
 0x6d2   : > { %9997 = vst [vmem:[#allocation2 + $0x90] sm:$0xff] %v9977_v62  ;;  %9996 = vst [vmem:[#allocation2 + $0x88] sm:$0xff] %v9976_v0  ;;  %v10041_v44 = vsub.s32 (!%p18404_p3), 3, %v25079_v46  ;;  %v21759_v50 = vld [vmem:[#allocation9 + $0x874] ss:$40 sps:$4 sm:$0xff] (!%p18404_p3)   ;;  %15045 = vmatpush1.bf16.msra.mxu0 (!%p18404_p3), %v21756_v34  ;;  %15003 = vmatprep.subr.bf16.mxu1 (!%p18404_p3), %v21757_v24  ;;  %v25093_v4 = vsub.s32 (!%p18404_p3), 0, %v25079_v46 }
 0x6d3   : > { %9998 = vst [vmem:[#allocation2 + $0x98] sm:$0xff] %v9978_v1  ;;  %v21761_v57 = vld [vmem:[#allocation9 + $0x370] ss:$40 sps:$4 sm:$0xff] (!%p18404_p3)   ;;  %v10004_v58 = vld [vmem:[#allocation2 + $0x8] sm:$0xff] (!%p18404_p3)  ;;  %15046 = vmatprep.subr.bf16.mxu0 (!%p18404_p3), %v21759_v50  ;;  %v10037_v7 = vsub.s32 (!%p18404_p3), 2, %v25079_v46 }
 0x6d4   : > { %v21762_v23 = vld [vmem:[#allocation9 + $0x870] ss:$40 sps:$4 sm:$0xff]   ;;  %v10016_v61 = vld [vmem:[#allocation2 + $0x68] sm:$0xff] }
 0x6d5   : > { %v10014_v36 = vld [vmem:[#allocation2 + $0x58] sm:$0xff]  ;;  %v25085_v59 = vld [vmem:[#allocation8] sm:$0xff]  ;;  %15004 = vmatpush1.bf16.msra.mxu1 %v21761_v57 }
 0x6d6   : > { %v10006_v30 = vld [vmem:[#allocation2 + $0x18] sm:$0xff]  ;;  %v10034_v60 = vrot.slane %v25085_v59, %v25082_v35  ;;  %v10042_v6 = vrot.slane %v25085_v59, %v10041_v44  ;;  %15047 = vmatpush1.bf16.msra.mxu0 %v21762_v23  ;;  %v10030_v18 = vrot.slane %v25085_v59, %v25093_v4  ;;  %v10038_v19 = vrot.slane %v25085_v59, %v10037_v7  ;;  %v21798_v34 = vld [vmem:[#allocation9 + $0x5c] ss:$40 sps:$4 sm:$0xff]   ;;  %v21796_v50 = vld [vmem:[#allocation9 + $0x58] ss:$40 sps:$4 sm:$0xff]  }
 0x6d7   : > { %v21763_v62 = vld [vmem:[#allocation9 + $0x3c4] ss:$40 sps:$4 sm:$0xff]   ;;  %v21790_v54 = vld [vmem:[#allocation9 + $0x8] ss:$40 sps:$4 sm:$0xff]   ;;  %v21795_v55 = vld [vmem:[#allocation9 + $0xa54] ss:$40 sps:$4 sm:$0xff]  }
 0x6d8   : > { %v21765_v33 = vld [vmem:[#allocation9 + $0x8c4] ss:$40 sps:$4 sm:$0xff]   ;;  %v10078_v63 = vadd.f32 %v10034_v60, %v10004_v58  ;;  %v10088_v0 = vadd.f32 %v10034_v60, %v10014_v36  ;;  %v10080_v1 = vadd.f32 %v10042_v6, %v10006_v30  ;;  %v10090_v2 = vadd.f32 %v10042_v6, %v10016_v61  ;;  %15005 = vmatprep.subr.bf16.mxu1 %v21763_v62  ;;  %v21793_v24 = vld [vmem:[#allocation9 + $0xa50] ss:$40 sps:$4 sm:$0xff]   ;;  %v21799_v58 = vld [vmem:[#allocation9 + $0xaa0] ss:$40 sps:$4 sm:$0xff]  }
 0x6d9   : > { %15048 = vmatprep.subr.bf16.mxu0 %v21765_v33  ;;  %15006 = vmatpush1.bf16.msra.mxu1 %v21767_v49  ;;  %v10077_v25 = vadd.f32 %v10030_v18, %v10003_v16  ;;  %v10087_v26 = vadd.f32 %v10030_v18, %v10013_v17  ;;  %v10079_v27 = vadd.f32 %v10038_v19, %v10005_v20  ;;  %v21789_v43 = vld [vmem:[#allocation9 + $0xa04] ss:$40 sps:$4 sm:$0xff]   ;;  %v21802_v36 = vld [vmem:[#allocation9 + $0xa8] ss:$40 sps:$4 sm:$0xff]   ;;  %v21807_v30 = vld [vmem:[#allocation9 + $0xaf4] ss:$40 sps:$4 sm:$0xff]  }
 0x6da   : > { %v10098_v8 = vmax.f32 %v10078_v63, 0.0  ;;  %v10108_v9 = vmax.f32 %v10088_v0, 0.0  ;;  %v10100_v29 = vmax.f32 %v10080_v1, 0.0  ;;  %v10110_v10 = vmax.f32 %v10090_v2, 0.0  ;;  %15049 = vmatpush1.bf16.msra.mxu0 %v21768_v3  ;;  %15007 = vmatprep.subr.bf16.mxu1 %v21769_v47  ;;  %v21801_v57 = vld [vmem:[#allocation9 + $0xaa4] ss:$40 sps:$4 sm:$0xff]  }
 0x6db   : > { %15050 = vmatprep.subr.bf16.mxu0 %v21771_v48  ;;  %v10089_v28 = vadd.f32 %v10038_v19, %v10015_v21  ;;  %v10097_v11 = vmax.f32 %v10077_v25, 0.0  ;;  %v10107_v39 = vmax.f32 %v10087_v26, 0.0  ;;  %v10099_v5 = vmax.f32 %v10079_v27, 0.0  ;;  %v21804_v23 = vld [vmem:[#allocation9 + $0xac] ss:$40 sps:$4 sm:$0xff]  }
 0x6dc   : > { %v25096_v13 = vpack.c.bf16 %v10108_v9, %v10098_v8  ;;  %v25098_v14 = vpack.c.bf16 %v10110_v10, %v10100_v29  ;;  %v21810_v60 = vld [vmem:[#allocation9 + $0xfc] ss:$40 sps:$4 sm:$0xff]   ;;  %v21805_v61 = vld [vmem:[#allocation9 + $0xaf0] ss:$40 sps:$4 sm:$0xff]   ;;  %v21816_v33 = vld [vmem:[#allocation9 + $0x14c] ss:$40 sps:$4 sm:$0xff]  }
 0x6dd   : > { %15008 = vmatpush1.bf16.msra.mxu1 %v21773_v51  ;;  %v10109_v40 = vmax.f32 %v10089_v28, 0.0  ;;  %v25107_v56 = vpack.c.bf16 %v10107_v39, %v10097_v11  ;;  %v21808_v6 = vld [vmem:[#allocation9 + $0xf8] ss:$40 sps:$4 sm:$0xff]   ;;  %v21813_v62 = vld [vmem:[#allocation9 + $0xb44] ss:$40 sps:$4 sm:$0xff]   ;;  %v10049_v49 = vsub.s32 5, %v25079_v46 }
 0x6de   : > { %15013 = vmatprep.mubr.bf16.mxu1 %v25096_v13  ;;  %15056 = vmatprep.mubr.bf16.mxu0 %v25098_v14  ;;  %v21811_v63 = vld [vmem:[#allocation9 + $0xb40] ss:$40 sps:$4 sm:$0xff]   ;;  %v21819_v1 = vld [vmem:[#allocation9 + $0xb94] ss:$40 sps:$4 sm:$0xff]   ;;  %v21817_v3 = vld [vmem:[#allocation9 + $0xb90] ss:$40 sps:$4 sm:$0xff]  }
 0x6df   : > { %15051 = vmatpush1.bf16.msra.mxu0 %v21774_v52  ;;  %15009 = vmatprep.subr.bf16.mxu1 %v21775_v15  ;;  %v25109_v12 = vpack.c.bf16 %v10109_v40, %v10099_v5  ;;  %v21814_v0 = vld [vmem:[#allocation9 + $0x148] ss:$40 sps:$4 sm:$0xff]   ;;  %v21822_v2 = vld [vmem:[#allocation9 + $0x19c] ss:$40 sps:$4 sm:$0xff]   ;;  %v21820_v8 = vld [vmem:[#allocation9 + $0x198] ss:$40 sps:$4 sm:$0xff]   ;;  %v10050_v10 = vrot.slane %v25085_v59, %v10049_v49 }
 0x6e0   : > { %15052 = vmatprep.subr.bf16.mxu0 %v21777_v22  ;;  %v21825_v9 = vld [vmem:[#allocation9 + $0xbe4] ss:$40 sps:$4 sm:$0xff]   ;;  %v21823_v47 = vld [vmem:[#allocation9 + $0xbe0] ss:$40 sps:$4 sm:$0xff]   ;;  %v21831_v51 = vld [vmem:[#allocation9 + $0xc34] ss:$40 sps:$4 sm:$0xff]  }
 0x6e1   : > { %15010 = vmatpush1.bf16.msra.mxu1 %v21779_v53  ;;  %v21828_v29 = vld [vmem:[#allocation9 + $0x1ec] ss:$40 sps:$4 sm:$0xff]   ;;  %v21826_v48 = vld [vmem:[#allocation9 + $0x1e8] ss:$40 sps:$4 sm:$0xff]   ;;  %v21834_v52 = vld [vmem:[#allocation9 + $0x23c] ss:$40 sps:$4 sm:$0xff]  }
 0x6e2   : > { %15011 = vmatprep.subr.bf16.mxu1 %v21781_v32  ;;  %v10008_v15 = vld [vmem:[#allocation2 + $0x28] sm:$0xff]  ;;  %v10018_v16 = vld [vmem:[#allocation2 + $0x78] sm:$0xff] }
 0x6e3   : > { %15053 = vmatpush1.bf16.msra.mxu0 %v21780_v31  ;;  %v10082_v17 = vadd.f32 %v10050_v10, %v10008_v15  ;;  %v10092_v18 = vadd.f32 %v10050_v10, %v10018_v16  ;;  %v21829_v19 = vld [vmem:[#allocation9 + $0xc30] ss:$40 sps:$4 sm:$0xff]   ;;  %v21837_v21 = vld [vmem:[#allocation9 + $0xc84] ss:$40 sps:$4 sm:$0xff]   ;;  %v21835_v27 = vld [vmem:[#allocation9 + $0xc80] ss:$40 sps:$4 sm:$0xff]  }
 0x6e4   : > { %15054 = vmatprep.subr.bf16.mxu0 %v21783_v37  ;;  %v21832_v20 = vld [vmem:[#allocation9 + $0x238] ss:$40 sps:$4 sm:$0xff]   ;;  %v21840_v25 = vld [vmem:[#allocation9 + $0x28c] ss:$40 sps:$4 sm:$0xff]   ;;  %v21838_v28 = vld [vmem:[#allocation9 + $0x288] ss:$40 sps:$4 sm:$0xff]  }
 0x6e5   : > { %15012 = vmatpush1.bf16.msra.mxu1 %v21785_v38  ;;  %v10102_v22 = vmax.f32 %v10082_v17, 0.0  ;;  %v10112_v53 = vmax.f32 %v10092_v18, 0.0  ;;  %v21843_v31 = vld [vmem:[#allocation9 + $0xcd4] ss:$40 sps:$4 sm:$0xff]   ;;  %v21841_v37 = vld [vmem:[#allocation9 + $0xcd0] ss:$40 sps:$4 sm:$0xff]  }
 0x6e6   : > { %15196 = vmatprep.subr.bf16.mxu1 %v21792_v45  ;;  %v21846_v32 = vld [vmem:[#allocation9 + $0x2dc] ss:$40 sps:$4 sm:$0xff]   ;;  %v21844_v38 = vld [vmem:[#allocation9 + $0x2d8] ss:$40 sps:$4 sm:$0xff]   ;;  %v21852_v39 = vld [vmem:[#allocation9 + $0x32c] ss:$40 sps:$4 sm:$0xff]  }
 0x6e7   : > { %15055 = vmatpush1.bf16.msra.mxu0 %v21786_v42  ;;  %v25118_v26 = vpack.c.bf16 %v10112_v53, %v10102_v22  ;;  %v21849_v11 = vld [vmem:[#allocation9 + $0xd24] ss:$40 sps:$4 sm:$0xff]   ;;  %v21847_v5 = vld [vmem:[#allocation9 + $0xd20] ss:$40 sps:$4 sm:$0xff]   ;;  %v21855_v42 = vld [vmem:[#allocation9 + $0xd74] ss:$40 sps:$4 sm:$0xff]  }
 0x6e8   : > { %15067 = vmatprep.subr.bf16.mxu0 %v21789_v43  ;;  %15014 = vmatmul.mubr.bf16.vlgmr.msra.gmra.mrb[0].mxu1 %v25107_v56  ;;  %v21850_v40 = vld [vmem:[#allocation9 + $0x328] ss:$40 sps:$4 sm:$0xff]   ;;  %v21858_v43 = vld [vmem:[#allocation9 + $0x37c] ss:$40 sps:$4 sm:$0xff]   ;;  %v21900_v53 = vld [vmem:[#allocation9 + $0x5ac] ss:$40 sps:$4 sm:$0xff]  }
 0x6e9   : > { %15197 = vmatpush1.bf16.msra.mxu1 %v21790_v54  ;;  %15228 = vmatprep.mubr.bf16.mxu1 %v25096_v13  ;;  %v21853_v45 = vld [vmem:[#allocation9 + $0xd70] ss:$40 sps:$4 sm:$0xff]   ;;  %v21861_v54 = vld [vmem:[#allocation9 + $0xdc4] ss:$40 sps:$4 sm:$0xff]   ;;  %v21891_v17 = vld [vmem:[#allocation9 + $0xf54] ss:$40 sps:$4 sm:$0xff]  }
 0x6ea   : > { %15057 = vmatmul.mubr.bf16.vlgmr.msra.gmra.mrb[0].mxu0 %v25109_v12  ;;  %15198 = vmatprep.subr.bf16.mxu1 %v21798_v34  ;;  %v21859_v34 = vld [vmem:[#allocation9 + $0xdc0] ss:$40 sps:$4 sm:$0xff]   ;;  %v21894_v18 = vld [vmem:[#allocation9 + $0x55c] ss:$40 sps:$4 sm:$0xff]  }
 0x6eb   : > { %15068 = vmatpush1.bf16.msra.mxu0 %v21787_v41  ;;  %15099 = vmatprep.mubr.bf16.mxu0 %v25118_v26  ;;  %v21856_v41 = vld [vmem:[#allocation9 + $0x378] ss:$40 sps:$4 sm:$0xff]   ;;  %v21886_v15 = vld [vmem:[#allocation9 + $0x508] ss:$40 sps:$4 sm:$0xff]   ;;  %v21897_v22 = vld [vmem:[#allocation9 + $0xfa4] ss:$40 sps:$4 sm:$0xff]  }
 0x6ec   : > { %15069 = vmatprep.subr.bf16.mxu0 %v21795_v55  ;;  %v21864_v55 = vld [vmem:[#allocation9 + $0x3cc] ss:$40 sps:$4 sm:$0xff]  }
 0x6ed   : > { %15199 = vmatpush1.bf16.msra.mxu1 %v21796_v50  ;;  %v10045_v50 = vsub.s32 4, %v25079_v46 }
 0x6ee   : > { %15200 = vmatprep.subr.bf16.mxu1 %v21804_v23  ;;  %v21870_v23 = vld [vmem:[#allocation9 + $0x41c] ss:$40 sps:$4 sm:$0xff]  }
 0x6ef   : > { %15070 = vmatpush1.bf16.msra.mxu0 %v21793_v24  ;;  %v21862_v24 = vld [vmem:[#allocation9 + $0x3c8] ss:$40 sps:$4 sm:$0xff]  }
 0x6f0   : > { %15071 = vmatprep.subr.bf16.mxu0 %v21801_v57  ;;  %v21867_v57 = vld [vmem:[#allocation9 + $0xe14] ss:$40 sps:$4 sm:$0xff]  }
 0x6f1   : > { %15201 = vmatpush1.bf16.msra.mxu1 %v21802_v36  ;;  %v21868_v36 = vld [vmem:[#allocation9 + $0x418] ss:$40 sps:$4 sm:$0xff]  }
 0x6f2   : > { %15202 = vmatprep.subr.bf16.mxu1 %v21810_v60  ;;  %v10007_v60 = vld [vmem:[#allocation2 + $0x20] sm:$0xff] }
 0x6f3   : > { %15072 = vmatpush1.bf16.msra.mxu0 %v21799_v58  ;;  %v21865_v58 = vld [vmem:[#allocation9 + $0xe10] ss:$40 sps:$4 sm:$0xff]  }
 0x6f4   : > { %15073 = vmatprep.subr.bf16.mxu0 %v21807_v30  ;;  %v21873_v30 = vld [vmem:[#allocation9 + $0xe64] ss:$40 sps:$4 sm:$0xff]  }
 0x6f5   : > { %15203 = vmatpush1.bf16.msra.mxu1 %v21808_v6  ;;  %v10017_v6 = vld [vmem:[#allocation2 + $0x70] sm:$0xff] }
 0x6f6   : > { %15204 = vmatprep.subr.bf16.mxu1 %v21816_v33  ;;  %v21871_v33 = vld [vmem:[#allocation9 + $0xe60] ss:$40 sps:$4 sm:$0xff]  }
 0x6f7   : > { %15074 = vmatpush1.bf16.msra.mxu0 %v21805_v61  ;;  %v10046_v61 = vrot.slane %v25085_v59, %v10045_v50 }
 0x6f8   : > { %15075 = vmatprep.subr.bf16.mxu0 %v21813_v62  ;;  %v21876_v62 = vld [vmem:[#allocation9 + $0x46c] ss:$40 sps:$4 sm:$0xff]  }
 0x6f9   : > { %15205 = vmatpush1.bf16.msra.mxu1 %v21814_v0  ;;  %v10081_v0 = vadd.f32 %v10046_v61, %v10007_v60  ;;  %v21927_v60 = vld [vmem:[#allocation9 + $0x1134] ss:$40 sps:$4 sm:$0xff]  }
 0x6fa   : > { %15206 = vmatprep.subr.bf16.mxu1 %v21822_v2  ;;  %v21879_v2 = vld [vmem:[#allocation9 + $0xeb4] ss:$40 sps:$4 sm:$0xff]  }
 0x6fb   : > { %15076 = vmatpush1.bf16.msra.mxu0 %v21811_v63  ;;  %v21874_v63 = vld [vmem:[#allocation9 + $0x468] ss:$40 sps:$4 sm:$0xff]  }
 0x6fc   : > { %15077 = vmatprep.subr.bf16.mxu0 %v21819_v1  ;;  %v10091_v1 = vadd.f32 %v10046_v61, %v10017_v6  ;;  %v21930_v61 = vld [vmem:[#allocation9 + $0x73c] ss:$40 sps:$4 sm:$0xff]   ;;  %v21925_v6 = vld [vmem:[#allocation9 + $0x1130] ss:$40 sps:$4 sm:$0xff]  }
 0x6fd   : > { %15207 = vmatpush1.bf16.msra.mxu1 %v21820_v8  ;;  %v21877_v8 = vld [vmem:[#allocation9 + $0xeb0] ss:$40 sps:$4 sm:$0xff]  }
 0x6fe   : > { %15208 = vmatprep.subr.bf16.mxu1 %v21828_v29  ;;  %v10101_v29 = vmax.f32 %v10081_v0, 0.0  ;;  %v10111_v10 = vmax.f32 %v10091_v1, 0.0  ;;  %v21931_v0 = vld [vmem:[#allocation9 + $0x1180] ss:$40 sps:$4 sm:$0xff]  }
 0x6ff   : > { %15078 = vmatpush1.bf16.msra.mxu0 %v21817_v3  ;;  %v21882_v3 = vld [vmem:[#allocation9 + $0x4bc] ss:$40 sps:$4 sm:$0xff]   ;;  %v21934_v1 = vld [vmem:[#allocation9 + $0x788] ss:$40 sps:$4 sm:$0xff]  }
 0x700   : > { %15079 = vmatprep.subr.bf16.mxu0 %v21825_v9  ;;  %v21880_v9 = vld [vmem:[#allocation9 + $0x4b8] ss:$40 sps:$4 sm:$0xff]   ;;  %v25126_v16 = vpack.c.bf16 %v10111_v10, %v10101_v29  ;;  %v21945_v29 = vld [vmem:[#allocation9 + $0x1224] ss:$40 sps:$4 sm:$0xff]  }
 0x701   : > { %15209 = vmatpush1.bf16.msra.mxu1 %v21826_v48  ;;  %v21888_v48 = vld [vmem:[#allocation9 + $0x50c] ss:$40 sps:$4 sm:$0xff]  }
 0x702   : > { %15210 = vmatprep.subr.bf16.mxu1 %v21834_v52  ;;  %v21883_v52 = vld [vmem:[#allocation9 + $0xf00] ss:$40 sps:$4 sm:$0xff]   ;;  %v21948_v10 = vld [vmem:[#allocation9 + $0x82c] ss:$40 sps:$4 sm:$0xff]  }
 0x703   : > { %15080 = vmatpush1.bf16.msra.mxu0 %v21823_v47  ;;  %v21885_v47 = vld [vmem:[#allocation9 + $0xf04] ss:$40 sps:$4 sm:$0xff]  }
 0x704   : > { %15081 = vmatprep.subr.bf16.mxu0 %v21831_v51  ;;  %v10057_v51 = vsub.s32 7, %v25079_v46 }
 0x705   : > { %15211 = vmatpush1.bf16.msra.mxu1 %v21832_v20  ;;  %v21889_v20 = vld [vmem:[#allocation9 + $0xf50] ss:$40 sps:$4 sm:$0xff]  }
 0x706   : > { %15212 = vmatprep.subr.bf16.mxu1 %v21840_v25  ;;  %v10010_v25 = vld [vmem:[#allocation2 + $0x38] sm:$0xff] }
 0x707   : > { %15082 = vmatpush1.bf16.msra.mxu0 %v21829_v19  ;;  %v10058_v19 = vrot.slane %v25085_v59, %v10057_v51  ;;  %v21895_v59 = vld [vmem:[#allocation9 + $0xfa0] ss:$40 sps:$4 sm:$0xff]  }
 0x708   : > { %15083 = vmatprep.subr.bf16.mxu0 %v21837_v21  ;;  %v21892_v21 = vld [vmem:[#allocation9 + $0x558] ss:$40 sps:$4 sm:$0xff]  }
 0x709   : > { %15213 = vmatpush1.bf16.msra.mxu1 %v21838_v28  ;;  %v10084_v28 = vadd.f32 %v10058_v19, %v10010_v25  ;;  %v21963_v25 = vld [vmem:[#allocation9 + $0x1314] ss:$40 sps:$4 sm:$0xff]  }
 0x70a   : > { %15214 = vmatprep.subr.bf16.mxu1 %v21846_v32  ;;  %v21898_v32 = vld [vmem:[#allocation9 + $0x5a8] ss:$40 sps:$4 sm:$0xff]  }
 0x70b   : > { %15084 = vmatpush1.bf16.msra.mxu0 %v21835_v27  ;;  %v10020_v27 = vld [vmem:[#allocation2 + $0x88] sm:$0xff] }
 0x70c   : > { %15085 = vmatprep.subr.bf16.mxu0 %v21843_v31  ;;  %v10094_v31 = vadd.f32 %v10058_v19, %v10020_v27  ;;  %v21957_v19 = vld [vmem:[#allocation9 + $0x12c4] ss:$40 sps:$4 sm:$0xff]  }
 0x70d   : > { %15215 = vmatpush1.bf16.msra.mxu1 %v21844_v38  ;;  %v21966_v27 = vld [vmem:[#allocation9 + $0x91c] ss:$40 sps:$4 sm:$0xff]  }
 0x70e   : > { %15216 = vmatprep.subr.bf16.mxu1 %v21852_v39  ;;  %v10114_v38 = vmax.f32 %v10094_v31, 0.0  ;;  %v21906_v39 = vld [vmem:[#allocation9 + $0x5fc] ss:$40 sps:$4 sm:$0xff]   ;;  %v21964_v31 = vld [vmem:[#allocation9 + $0x918] ss:$40 sps:$4 sm:$0xff]  }
 0x70f   : > { %15086 = vmatpush1.bf16.msra.mxu0 %v21841_v37  ;;  %v10104_v37 = vmax.f32 %v10084_v28, 0.0  ;;  %v21961_v28 = vld [vmem:[#allocation9 + $0x1310] ss:$40 sps:$4 sm:$0xff]  }
 0x710   : > { %15087 = vmatprep.subr.bf16.mxu0 %v21849_v11  ;;  %v21903_v11 = vld [vmem:[#allocation9 + $0xff4] ss:$40 sps:$4 sm:$0xff]  }
 0x711   : > { %15217 = vmatpush1.bf16.msra.mxu1 %v21850_v40  ;;  %v21901_v40 = vld [vmem:[#allocation9 + $0xff0] ss:$40 sps:$4 sm:$0xff]  }
 0x712   : > { %15218 = vmatprep.subr.bf16.mxu1 %v21858_v43  ;;  %v21909_v43 = vld [vmem:[#allocation9 + $0x1044] ss:$40 sps:$4 sm:$0xff]  }
 0x713   : > { %15088 = vmatpush1.bf16.msra.mxu0 %v21847_v5  ;;  %v25134_v5 = vpack.c.bf16 %v10114_v38, %v10104_v37  ;;  %v25140_v37 = vld [vmem:[#allocation8 + $0x8] sm:$0x3]  ;;  %v10009_v38 = vld [vmem:[#allocation2 + $0x30] sm:$0xff] }
 0x714   : > { %15089 = vmatprep.subr.bf16.mxu0 %v21855_v42  ;;  %v21904_v42 = vld [vmem:[#allocation9 + $0x5f8] ss:$40 sps:$4 sm:$0xff]  }
 0x715   : > { %15219 = vmatpush1.bf16.msra.mxu1 %v21856_v41  ;;  %v21907_v41 = vld [vmem:[#allocation9 + $0x1040] ss:$40 sps:$4 sm:$0xff]  }
 0x716   : > { %15220 = vmatprep.subr.bf16.mxu1 %v21864_v55  ;;  %v21915_v55 = vld [vmem:[#allocation9 + $0x1094] ss:$40 sps:$4 sm:$0xff]  }
 0x717   : > { %15090 = vmatpush1.bf16.msra.mxu0 %v21853_v45  ;;  %v21912_v45 = vld [vmem:[#allocation9 + $0x64c] ss:$40 sps:$4 sm:$0xff]  }
 0x718   : > { %15091 = vmatprep.subr.bf16.mxu0 %v21861_v54  ;;  %v21910_v54 = vld [vmem:[#allocation9 + $0x648] ss:$40 sps:$4 sm:$0xff]  }
 0x719   : > { %15221 = vmatpush1.bf16.msra.mxu1 %v21862_v24  ;;  %v21913_v24 = vld [vmem:[#allocation9 + $0x1090] ss:$40 sps:$4 sm:$0xff]  }
 0x71a   : > { %15222 = vmatprep.subr.bf16.mxu1 %v21870_v23  ;;  %v21921_v23 = vld [vmem:[#allocation9 + $0x10e4] ss:$40 sps:$4 sm:$0xff]  }
 0x71b   : > { %15092 = vmatpush1.bf16.msra.mxu0 %v21859_v34  ;;  %v21918_v34 = vld [vmem:[#allocation9 + $0x69c] ss:$40 sps:$4 sm:$0xff]  }
 0x71c   : > { %15093 = vmatprep.subr.bf16.mxu0 %v21867_v57  ;;  %v21916_v57 = vld [vmem:[#allocation9 + $0x698] ss:$40 sps:$4 sm:$0xff]  }
 0x71d   : > { %15223 = vmatpush1.bf16.msra.mxu1 %v21868_v36  ;;  %v21919_v36 = vld [vmem:[#allocation9 + $0x10e0] ss:$40 sps:$4 sm:$0xff]  }
 0x71e   : > { %15224 = vmatprep.subr.bf16.mxu1 %v21876_v62  ;;  %v21928_v62 = vld [vmem:[#allocation9 + $0x738] ss:$40 sps:$4 sm:$0xff]  }
 0x71f   : > { %15094 = vmatpush1.bf16.msra.mxu0 %v21865_v58  ;;  %v21924_v58 = vld [vmem:[#allocation9 + $0x6ec] ss:$40 sps:$4 sm:$0xff]  }
 0x720   : > { %15095 = vmatprep.subr.bf16.mxu0 %v21873_v30  ;;  %v21922_v30 = vld [vmem:[#allocation9 + $0x6e8] ss:$40 sps:$4 sm:$0xff]  }
 0x721   : > { %15225 = vmatpush1.bf16.msra.mxu1 %v21874_v63  ;;  %v21936_v63 = vld [vmem:[#allocation9 + $0x78c] ss:$40 sps:$4 sm:$0xff]  }
 0x722   : > { %15226 = vmatprep.subr.bf16.mxu1 %v21882_v3  ;;  %v21942_v3 = vld [vmem:[#allocation9 + $0x7dc] ss:$40 sps:$4 sm:$0xff]  }
 0x723   : > { %15096 = vmatpush1.bf16.msra.mxu0 %v21871_v33  ;;  %v21933_v33 = vld [vmem:[#allocation9 + $0x1184] ss:$40 sps:$4 sm:$0xff]  }
 0x724   : > { %15097 = vmatprep.subr.bf16.mxu0 %v21879_v2  ;;  %v21939_v2 = vld [vmem:[#allocation9 + $0x11d4] ss:$40 sps:$4 sm:$0xff]  }
 0x725   : > { %15227 = vmatpush1.bf16.msra.mxu1 %v21880_v9  ;;  %v21940_v9 = vld [vmem:[#allocation9 + $0x7d8] ss:$40 sps:$4 sm:$0xff]  }
 0x726   : > { %15239 = vmatprep.subr.bf16.mxu1 %v21888_v48  ;;  %v21946_v48 = vld [vmem:[#allocation9 + $0x828] ss:$40 sps:$4 sm:$0xff]  }
 0x727   : > { %15098 = vmatpush1.bf16.msra.mxu0 %v21877_v8  ;;  %v21937_v8 = vld [vmem:[#allocation9 + $0x11d0] ss:$40 sps:$4 sm:$0xff]  }
 0x728   : > { %15110 = vmatprep.subr.bf16.mxu0 %v21885_v47  ;;  %15229 = vmatmul.mubr.bf16.vlgmr.msra.gmra.mrb[4].mxu1 %v25107_v56  ;;  %v21943_v47 = vld [vmem:[#allocation9 + $0x1220] ss:$40 sps:$4 sm:$0xff]  }
 0x729   : > { %15240 = vmatpush1.bf16.msra.mxu1 %v21886_v15  ;;  %15271 = vmatprep.mubr.bf16.mxu1 %v25098_v14  ;;  %v21954_v15 = vld [vmem:[#allocation9 + $0x87c] ss:$40 sps:$4 sm:$0xff]  }
 0x72a   : > { %15100 = vmatmul.mubr.bf16.vlgmr.msra.gmra.mrb[0].mxu0 %v25126_v16  ;;  %15241 = vmatprep.subr.bf16.mxu1 %v21894_v18  ;;  %v21952_v18 = vld [vmem:[#allocation9 + $0x878] ss:$40 sps:$4 sm:$0xff]  }
 0x72b   : > { %15111 = vmatpush1.bf16.msra.mxu0 %v21883_v52  ;;  %15142 = vmatprep.mubr.bf16.mxu0 %v25134_v5  ;;  %v21951_v52 = vld [vmem:[#allocation9 + $0x1274] ss:$40 sps:$4 sm:$0xff]  }
 0x72c   : > { %15112 = vmatprep.subr.bf16.mxu0 %v21891_v17  ;;  %v21949_v17 = vld [vmem:[#allocation9 + $0x1270] ss:$40 sps:$4 sm:$0xff]  }
 0x72d   : > { %15242 = vmatpush1.bf16.msra.mxu1 %v21892_v21  ;;  %v21955_v21 = vld [vmem:[#allocation9 + $0x12c0] ss:$40 sps:$4 sm:$0xff]  }
 0x72e   : > { %15243 = vmatprep.subr.bf16.mxu1 %v21900_v53  ;;  %v21958_v53 = vld [vmem:[#allocation9 + $0x8c8] ss:$40 sps:$4 sm:$0xff]  }
 0x72f   : > { %15113 = vmatpush1.bf16.msra.mxu0 %v21889_v20  ;;  %v21960_v20 = vld [vmem:[#allocation9 + $0x8cc] ss:$40 sps:$4 sm:$0xff]  }
 0x730   : > { %15114 = vmatprep.subr.bf16.mxu0 %v21897_v22  ;;  %v10053_v22 = vsub.s32 6, %v25079_v46  ;;  %v22958_v46 = vld [vmem:[#allocation12 + $0x208] sm:$0xff]  }
 0x731   : > { %15244 = vmatpush1.bf16.msra.mxu1 %v21898_v32 }
 0x732   : > { %15245 = vmatprep.subr.bf16.mxu1 %v21906_v39  ;;  %v21969_v39 = vld [vmem:[#allocation9 + $0x1364] ss:$40 sps:$4 sm:$0xff]  }
 0x733   : > { %15115 = vmatpush1.bf16.msra.mxu0 %v21895_v59  ;;  %v22971_v59 = vld [vmem:[#allocation8] sm:$0xff] }
 0x734   : > { %15116 = vmatprep.subr.bf16.mxu0 %v21903_v11  ;;  %v10054_v32 = vrot.slane %v22971_v59, %v10053_v22  ;;  %v10019_v11 = vld [vmem:[#allocation2 + $0x80] sm:$0xff] }
 0x735   : > { %15246 = vmatpush1.bf16.msra.mxu1 %v21904_v42  ;;  %v21967_v42 = vld [vmem:[#allocation9 + $0x1360] ss:$40 sps:$4 sm:$0xff]   ;;  %v22009_v59 = vld [vmem:[#allocation9 + $0x1590] ss:$40 sps:$4 sm:$0xff]  }
 0x736   : > { %15247 = vmatprep.subr.bf16.mxu1 %v21912_v45  ;;  %v10083_v45 = vadd.f32 %v10054_v32, %v10009_v38  ;;  %v22017_v38 = vld [vmem:[#allocation9 + $0x15e4] ss:$40 sps:$4 sm:$0xff]  }
 0x737   : > { %15117 = vmatpush1.bf16.msra.mxu0 %v21901_v40  ;;  %v21972_v40 = vld [vmem:[#allocation9 + $0x96c] ss:$40 sps:$4 sm:$0xff]  }
 0x738   : > { %15118 = vmatprep.subr.bf16.mxu0 %v21909_v43  ;;  %v10066_v43 = vrot.slane %v25140_v37, %v25082_v35 }
 0x739   : > { %15248 = vmatpush1.bf16.msra.mxu1 %v21910_v54  ;;  %v10012_v54 = vld [vmem:[#allocation2 + $0x48] sm:$0xff] }
 0x73a   : > { %15249 = vmatprep.subr.bf16.mxu1 %v21918_v34  ;;  %v21970_v34 = vld [vmem:[#allocation9 + $0x968] ss:$40 sps:$4 sm:$0xff]  }
 0x73b   : > { %15119 = vmatpush1.bf16.msra.mxu0 %v21907_v41  ;;  %v10093_v41 = vadd.f32 %v10054_v32, %v10019_v11  ;;  %v22012_v32 = vld [vmem:[#allocation9 + $0xb98] ss:$40 sps:$4 sm:$0xff]   ;;  %v22020_v11 = vld [vmem:[#allocation9 + $0xbec] ss:$40 sps:$4 sm:$0xff]  }
 0x73c   : > { %15120 = vmatprep.subr.bf16.mxu0 %v21915_v55  ;;  %v10022_v55 = vld [vmem:[#allocation2 + $0x98] sm:$0xff] }
 0x73d   : > { %15250 = vmatpush1.bf16.msra.mxu1 %v21916_v57  ;;  %v21978_v57 = vld [vmem:[#allocation9 + $0x9bc] ss:$40 sps:$4 sm:$0xff]  }
 0x73e   : > { %15251 = vmatprep.subr.bf16.mxu1 %v21924_v58  ;;  %v10096_v58 = vadd.f32 %v10066_v43, %v10022_v55  ;;  %v22032_v55 = vld [vmem:[#allocation9 + $0xc8c] ss:$40 sps:$4 sm:$0xff]  }
 0x73f   : > { %15121 = vmatpush1.bf16.msra.mxu0 %v21913_v24  ;;  %v21975_v24 = vld [vmem:[#allocation9 + $0x13b4] ss:$40 sps:$4 sm:$0xff]  }
 0x740   : > { %15122 = vmatprep.subr.bf16.mxu0 %v21921_v23  ;;  %v10086_v23 = vadd.f32 %v10066_v43, %v10012_v54  ;;  %v22026_v43 = vld [vmem:[#allocation9 + $0xc3c] ss:$40 sps:$4 sm:$0xff]  }
 0x741   : > { %15252 = vmatpush1.bf16.msra.mxu1 %v21922_v30  ;;  %v10103_v30 = vmax.f32 %v10083_v45, 0.0  ;;  %v22021_v45 = vld [vmem:[#allocation9 + $0x1630] ss:$40 sps:$4 sm:$0xff]   ;;  %v22029_v54 = vld [vmem:[#allocation9 + $0x1684] ss:$40 sps:$4 sm:$0xff]  }
 0x742   : > { %15253 = vmatprep.subr.bf16.mxu1 %v21930_v61  ;;  %v21976_v61 = vld [vmem:[#allocation9 + $0x9b8] ss:$40 sps:$4 sm:$0xff]  }
 0x743   : > { %15123 = vmatpush1.bf16.msra.mxu0 %v21919_v36  ;;  %v21973_v36 = vld [vmem:[#allocation9 + $0x13b0] ss:$40 sps:$4 sm:$0xff]  }
 0x744   : > { %15124 = vmatprep.subr.bf16.mxu0 %v21927_v60  ;;  %v10113_v60 = vmax.f32 %v10093_v41, 0.0  ;;  %v22024_v41 = vld [vmem:[#allocation9 + $0xc38] ss:$40 sps:$4 sm:$0xff]  }
 0x745   : > { %15254 = vmatpush1.bf16.msra.mxu1 %v21928_v62  ;;  %v21984_v62 = vld [vmem:[#allocation9 + $0xa0c] ss:$40 sps:$4 sm:$0xff]  }
 0x746   : > { %15255 = vmatprep.subr.bf16.mxu1 %v21936_v63  ;;  %v10116_v63 = vmax.f32 %v10096_v58, 0.0  ;;  %v22033_v58 = vld [vmem:[#allocation9 + $0x16d0] ss:$40 sps:$4 sm:$0xff]  }
 0x747   : > { %15125 = vmatpush1.bf16.msra.mxu0 %v21925_v6  ;;  %v21981_v6 = vld [vmem:[#allocation9 + $0x1404] ss:$40 sps:$4 sm:$0xff]  }
 0x748   : > { %15126 = vmatprep.subr.bf16.mxu0 %v21933_v33  ;;  %v10106_v33 = vmax.f32 %v10086_v23, 0.0  ;;  %v22038_v23 = vld [vmem:[#allocation9 + $0xcdc] ss:$40 sps:$4 sm:$0xff]  }
 0x749   : > { %15256 = vmatpush1.bf16.msra.mxu1 %v21934_v1  ;;  %v25144_v1 = vpack.c.bf16 %v10113_v60, %v10103_v30  ;;  %v22041_v30 = vld [vmem:[#allocation9 + $0x1724] ss:$40 sps:$4 sm:$0xff]  }
 0x74a   : > { %15257 = vmatprep.subr.bf16.mxu1 %v21942_v3  ;;  %v21987_v3 = vld [vmem:[#allocation9 + $0x1454] ss:$40 sps:$4 sm:$0xff]  }
 0x74b   : > { %15127 = vmatpush1.bf16.msra.mxu0 %v21931_v0  ;;  %v21979_v0 = vld [vmem:[#allocation9 + $0x1400] ss:$40 sps:$4 sm:$0xff]   ;;  %v22044_v60 = vld [vmem:[#allocation9 + $0xd2c] ss:$40 sps:$4 sm:$0xff]  }
 0x74c   : > { %15128 = vmatprep.subr.bf16.mxu0 %v21939_v2  ;;  %v21982_v2 = vld [vmem:[#allocation9 + $0xa08] ss:$40 sps:$4 sm:$0xff]  }
 0x74d   : > { %15258 = vmatpush1.bf16.msra.mxu1 %v21940_v9  ;;  %v25146_v9 = vpack.c.bf16 %v10116_v63, %v10106_v33  ;;  %v22050_v33 = vld [vmem:[#allocation9 + $0xd7c] ss:$40 sps:$4 sm:$0xff]   ;;  %v22045_v63 = vld [vmem:[#allocation9 + $0x1770] ss:$40 sps:$4 sm:$0xff]  }
 0x74e   : > { %15259 = vmatprep.subr.bf16.mxu1 %v21948_v10  ;;  %v21988_v10 = vld [vmem:[#allocation9 + $0xa58] ss:$40 sps:$4 sm:$0xff]  }
 0x74f   : > { %15129 = vmatpush1.bf16.msra.mxu0 %v21937_v8  ;;  %v21990_v8 = vld [vmem:[#allocation9 + $0xa5c] ss:$40 sps:$4 sm:$0xff]  }
 0x750   : > { %15130 = vmatprep.subr.bf16.mxu0 %v21945_v29  ;;  %v21985_v29 = vld [vmem:[#allocation9 + $0x1450] ss:$40 sps:$4 sm:$0xff]  }
 0x751   : > { %15260 = vmatpush1.bf16.msra.mxu1 %v21946_v48  ;;  %v21996_v48 = vld [vmem:[#allocation9 + $0xaac] ss:$40 sps:$4 sm:$0xff]  }
 0x752   : > { %15261 = vmatprep.subr.bf16.mxu1 %v21954_v15  ;;  %v21994_v15 = vld [vmem:[#allocation9 + $0xaa8] ss:$40 sps:$4 sm:$0xff]  }
 0x753   : > { %15131 = vmatpush1.bf16.msra.mxu0 %v21943_v47  ;;  %v21993_v47 = vld [vmem:[#allocation9 + $0x14a4] ss:$40 sps:$4 sm:$0xff]  }
 0x754   : > { %15132 = vmatprep.subr.bf16.mxu0 %v21951_v52  ;;  %v21991_v52 = vld [vmem:[#allocation9 + $0x14a0] ss:$40 sps:$4 sm:$0xff]  }
 0x755   : > { %15262 = vmatpush1.bf16.msra.mxu1 %v21952_v18  ;;  %v22002_v18 = vld [vmem:[#allocation9 + $0xafc] ss:$40 sps:$4 sm:$0xff]  }
 0x756   : > { %15263 = vmatprep.subr.bf16.mxu1 %v21960_v20  ;;  %v22000_v20 = vld [vmem:[#allocation9 + $0xaf8] ss:$40 sps:$4 sm:$0xff]  }
 0x757   : > { %15133 = vmatpush1.bf16.msra.mxu0 %v21949_v17  ;;  %v21999_v17 = vld [vmem:[#allocation9 + $0x14f4] ss:$40 sps:$4 sm:$0xff]  }
 0x758   : > { %15134 = vmatprep.subr.bf16.mxu0 %v21957_v19  ;;  %v21997_v19 = vld [vmem:[#allocation9 + $0x14f0] ss:$40 sps:$4 sm:$0xff]  }
 0x759   : > { %15264 = vmatpush1.bf16.msra.mxu1 %v21958_v53  ;;  %v22008_v53 = vld [vmem:[#allocation9 + $0xb4c] ss:$40 sps:$4 sm:$0xff]  }
 0x75a   : > { %15265 = vmatprep.subr.bf16.mxu1 %v21966_v27  ;;  %v22006_v27 = vld [vmem:[#allocation9 + $0xb48] ss:$40 sps:$4 sm:$0xff]  }
 0x75b   : > { %15135 = vmatpush1.bf16.msra.mxu0 %v21955_v21  ;;  %v22005_v21 = vld [vmem:[#allocation9 + $0x1544] ss:$40 sps:$4 sm:$0xff]  }
 0x75c   : > { %15136 = vmatprep.subr.bf16.mxu0 %v21963_v25  ;;  %v22003_v25 = vld [vmem:[#allocation9 + $0x1540] ss:$40 sps:$4 sm:$0xff]  }
 0x75d   : > { %15266 = vmatpush1.bf16.msra.mxu1 %v21964_v31  ;;  %v22014_v31 = vld [vmem:[#allocation9 + $0xb9c] ss:$40 sps:$4 sm:$0xff]  }
 0x75e   : > { %15267 = vmatprep.subr.bf16.mxu1 %v21972_v40  ;;  %v22018_v40 = vld [vmem:[#allocation9 + $0xbe8] ss:$40 sps:$4 sm:$0xff]  }
 0x75f   : > { %15137 = vmatpush1.bf16.msra.mxu0 %v21961_v28  ;;  %v22011_v28 = vld [vmem:[#allocation9 + $0x1594] ss:$40 sps:$4 sm:$0xff]  }
 0x760   : > { %15138 = vmatprep.subr.bf16.mxu0 %v21969_v39  ;;  %v22015_v39 = vld [vmem:[#allocation9 + $0x15e0] ss:$40 sps:$4 sm:$0xff]  }
 0x761   : > { %15268 = vmatpush1.bf16.msra.mxu1 %v21970_v34  ;;  %v22027_v34 = vld [vmem:[#allocation9 + $0x1680] ss:$40 sps:$4 sm:$0xff]  }
 0x762   : > { %15269 = vmatprep.subr.bf16.mxu1 %v21978_v57  ;;  %v22035_v57 = vld [vmem:[#allocation9 + $0x16d4] ss:$40 sps:$4 sm:$0xff]  }
 0x763   : > { %15139 = vmatpush1.bf16.msra.mxu0 %v21967_v42  ;;  %v22023_v42 = vld [vmem:[#allocation9 + $0x1634] ss:$40 sps:$4 sm:$0xff]  }
 0x764   : > { %15140 = vmatprep.subr.bf16.mxu0 %v21975_v24  ;;  %v22030_v24 = vld [vmem:[#allocation9 + $0xc88] ss:$40 sps:$4 sm:$0xff]  }
 0x765   : > { %15270 = vmatpush1.bf16.msra.mxu1 %v21976_v61  ;;  %v22039_v61 = vld [vmem:[#allocation9 + $0x1720] ss:$40 sps:$4 sm:$0xff]  }
 0x766   : > { %15282 = vmatprep.subr.bf16.mxu1 %v21984_v62  ;;  %v22047_v62 = vld [vmem:[#allocation9 + $0x1774] ss:$40 sps:$4 sm:$0xff]  }
 0x767   : > { %15141 = vmatpush1.bf16.msra.mxu0 %v21973_v36  ;;  %v22036_v36 = vld [vmem:[#allocation9 + $0xcd8] ss:$40 sps:$4 sm:$0xff]  }
 0x768   : > { %15153 = vmatprep.subr.bf16.mxu0 %v21981_v6  ;;  %15272 = vmatmul.mubr.bf16.vlgmr.msra.gmra.mrb[4].mxu1 %v25109_v12  ;;  %v22042_v6 = vld [vmem:[#allocation9 + $0xd28] ss:$40 sps:$4 sm:$0xff]  }
 0x769   : > { %15283 = vmatpush1.bf16.msra.mxu1 %v21982_v2  ;;  %15314 = vmatprep.mubr.bf16.mxu1 %v25118_v26  ;;  %v22053_v2 = vld [vmem:[#allocation9 + $0x17c4] ss:$40 sps:$4 sm:$0xff]  }
 0x76a   : > { %15143 = vmatmul.mubr.bf16.vlgmr.msra.gmra.mrb[0].mxu0 %v25144_v1  ;;  %15284 = vmatprep.subr.bf16.mxu1 %v21990_v8  ;;  %v22051_v8 = vld [vmem:[#allocation9 + $0x17c0] ss:$40 sps:$4 sm:$0xff]  }
 0x76b   : > { %15154 = vmatpush1.bf16.msra.mxu0 %v21979_v0  ;;  %15185 = vmatprep.mubr.bf16.mxu0 %v25146_v9  ;;  %v22048_v0 = vld [vmem:[#allocation9 + $0xd78] ss:$40 sps:$4 sm:$0xff]  }
 0x76c   : > { %15155 = vmatprep.subr.bf16.mxu0 %v21987_v3  ;;  %v22056_v3 = vld [vmem:[#allocation9 + $0xdcc] ss:$40 sps:$4 sm:$0xff]  }
 0x76d   : > { %15285 = vmatpush1.bf16.msra.mxu1 %v21988_v10  ;;  %v22059_v10 = vld [vmem:[#allocation9 + $0x1814] ss:$40 sps:$4 sm:$0xff]  }
 0x76e   : > { %15286 = vmatprep.subr.bf16.mxu1 %v21996_v48  ;;  %v22057_v48 = vld [vmem:[#allocation9 + $0x1810] ss:$40 sps:$4 sm:$0xff]  }
 0x76f   : > { %15156 = vmatpush1.bf16.msra.mxu0 %v21985_v29  ;;  %v22054_v29 = vld [vmem:[#allocation9 + $0xdc8] ss:$40 sps:$4 sm:$0xff]  }
 0x770   : > { %15157 = vmatprep.subr.bf16.mxu0 %v21993_v47  ;;  %v22062_v47 = vld [vmem:[#allocation9 + $0xe1c] ss:$40 sps:$4 sm:$0xff]  }
 0x771   : > { %15287 = vmatpush1.bf16.msra.mxu1 %v21994_v15  ;;  %v22065_v15 = vld [vmem:[#allocation9 + $0x1864] ss:$40 sps:$4 sm:$0xff]  }
 0x772   : > { %15288 = vmatprep.subr.bf16.mxu1 %v22002_v18  ;;  %v10011_v18 = vld [vmem:[#allocation2 + $0x40] sm:$0xff] }
 0x773   : > { %15158 = vmatpush1.bf16.msra.mxu0 %v21991_v52  ;;  %v22060_v52 = vld [vmem:[#allocation9 + $0xe18] ss:$40 sps:$4 sm:$0xff]  }
 0x774   : > { %15159 = vmatprep.subr.bf16.mxu0 %v21999_v17  ;;  %v10062_v17 = vrot.slane %v25140_v37, %v25093_v4 }
 0x775   : > { %15289 = vmatpush1.bf16.msra.mxu1 %v22000_v20  ;;  %v22068_v20 = vld [vmem:[#allocation9 + $0xe6c] ss:$40 sps:$4 sm:$0xff]  }
 0x776   : > { %15290 = vmatprep.subr.bf16.mxu1 %v22008_v53  ;;  %v10085_v53 = vadd.f32 %v10062_v17, %v10011_v18  ;;  %v22125_v18 = vld [vmem:[#allocation9 + $0x118c] ss:$40 sps:$4 sm:$0xff]  }
 0x777   : > { %15160 = vmatpush1.bf16.msra.mxu0 %v21997_v19  ;;  %v10021_v19 = vld [vmem:[#allocation2 + $0x90] sm:$0xff] }
 0x778   : > { %15161 = vmatprep.subr.bf16.mxu0 %v22005_v21  ;;  %v22063_v21 = vld [vmem:[#allocation9 + $0x1860] ss:$40 sps:$4 sm:$0xff]  }
 0x779   : > { %15291 = vmatpush1.bf16.msra.mxu1 %v22006_v27  ;;  %v22066_v27 = vld [vmem:[#allocation9 + $0xe68] ss:$40 sps:$4 sm:$0xff]  }
 0x77a   : > { %15292 = vmatprep.subr.bf16.mxu1 %v22014_v31  ;;  %v22074_v31 = vld [vmem:[#allocation9 + $0xebc] ss:$40 sps:$4 sm:$0xff]  }
 0x77b   : > { %15162 = vmatpush1.bf16.msra.mxu0 %v22003_v25  ;;  %v10095_v25 = vadd.f32 %v10062_v17, %v10021_v19  ;;  %v22120_v17 = vld [vmem:[#allocation9 + $0x240] ss:$40 sps:$4 sm:$0xff]   ;;  %v22128_v19 = vld [vmem:[#allocation9 + $0x294] ss:$40 sps:$4 sm:$0xff]  }
 0x77c   : > { %15163 = vmatprep.subr.bf16.mxu0 %v22011_v28  ;;  %v22071_v28 = vld [vmem:[#allocation9 + $0x18b4] ss:$40 sps:$4 sm:$0xff]  }
 0x77d   : > { %15293 = vmatpush1.bf16.msra.mxu1 %v22012_v32  ;;  %v10105_v32 = vmax.f32 %v10085_v53, 0.0  ;;  %v10115_v37 = vmax.f32 %v10095_v25, 0.0  ;;  %v22131_v53 = vld [vmem:[#allocation9 + $0x11dc] ss:$40 sps:$4 sm:$0xff]  }
 0x77e   : > { %15294 = vmatprep.subr.bf16.mxu1 %v22020_v11  ;;  %v22077_v11 = vld [vmem:[#allocation9 + $0xf0c] ss:$40 sps:$4 sm:$0xff]  }
 0x77f   : > { %15164 = vmatpush1.bf16.msra.mxu0 %v22009_v59  ;;  %v22069_v59 = vld [vmem:[#allocation9 + $0x18b0] ss:$40 sps:$4 sm:$0xff]   ;;  %v22134_v25 = vld [vmem:[#allocation9 + $0x2e4] ss:$40 sps:$4 sm:$0xff]  }
 0x780   : > { %15165 = vmatprep.subr.bf16.mxu0 %v22017_v38  ;;  %v22072_v38 = vld [vmem:[#allocation9 + $0xeb8] ss:$40 sps:$4 sm:$0xff]  }
 0x781   : > { %15295 = vmatpush1.bf16.msra.mxu1 %v22018_v40  ;;  %v25154_v40 = vpack.c.bf16 %v10115_v37, %v10105_v32  ;;  %v22135_v32 = vld [vmem:[#allocation9 + $0x1228] ss:$40 sps:$4 sm:$0xff]  }
 0x782   : > { %15296 = vmatprep.subr.bf16.mxu1 %v22026_v43  ;;  %v22078_v43 = vld [vmem:[#allocation9 + $0x10] ss:$40 sps:$4 sm:$0xff]  }
 0x783   : > { %15166 = vmatpush1.bf16.msra.mxu0 %v22015_v39  ;;  %v22080_v39 = vld [vmem:[#allocation9 + $0x14] ss:$40 sps:$4 sm:$0xff]   ;;  %v22138_v37 = vld [vmem:[#allocation9 + $0x330] ss:$40 sps:$4 sm:$0xff]  }
 0x784   : > { %15167 = vmatprep.subr.bf16.mxu0 %v22023_v42  ;;  %v22075_v42 = vld [vmem:[#allocation9 + $0xf08] ss:$40 sps:$4 sm:$0xff]  }
 0x785   : > { %15297 = vmatpush1.bf16.msra.mxu1 %v22024_v41  ;;  %v22086_v41 = vld [vmem:[#allocation9 + $0x64] ss:$40 sps:$4 sm:$0xff]  }
 0x786   : > { %15298 = vmatprep.subr.bf16.mxu1 %v22032_v55  ;;  %v22084_v55 = vld [vmem:[#allocation9 + $0x60] ss:$40 sps:$4 sm:$0xff]  }
 0x787   : > { %15168 = vmatpush1.bf16.msra.mxu0 %v22021_v45  ;;  %v22083_v45 = vld [vmem:[#allocation9 + $0xf5c] ss:$40 sps:$4 sm:$0xff]  }
 0x788   : > { %15169 = vmatprep.subr.bf16.mxu0 %v22029_v54  ;;  %v22081_v54 = vld [vmem:[#allocation9 + $0xf58] ss:$40 sps:$4 sm:$0xff]  }
 0x789   : > { %15299 = vmatpush1.bf16.msra.mxu1 %v22030_v24  ;;  %v22092_v24 = vld [vmem:[#allocation9 + $0xb4] ss:$40 sps:$4 sm:$0xff]  }
 0x78a   : > { %15300 = vmatprep.subr.bf16.mxu1 %v22038_v23  ;;  %v22090_v23 = vld [vmem:[#allocation9 + $0xb0] ss:$40 sps:$4 sm:$0xff]  }
 0x78b   : > { %15170 = vmatpush1.bf16.msra.mxu0 %v22027_v34  ;;  %v22089_v34 = vld [vmem:[#allocation9 + $0xfac] ss:$40 sps:$4 sm:$0xff]  }
 0x78c   : > { %15171 = vmatprep.subr.bf16.mxu0 %v22035_v57  ;;  %v22087_v57 = vld [vmem:[#allocation9 + $0xfa8] ss:$40 sps:$4 sm:$0xff]  }
 0x78d   : > { %15301 = vmatpush1.bf16.msra.mxu1 %v22036_v36  ;;  %v22098_v36 = vld [vmem:[#allocation9 + $0x104] ss:$40 sps:$4 sm:$0xff]  }
 0x78e   : > { %15302 = vmatprep.subr.bf16.mxu1 %v22044_v60  ;;  %v22096_v60 = vld [vmem:[#allocation9 + $0x100] ss:$40 sps:$4 sm:$0xff]  }
 0x78f   : > { %15172 = vmatpush1.bf16.msra.mxu0 %v22033_v58  ;;  %v22095_v58 = vld [vmem:[#allocation9 + $0xffc] ss:$40 sps:$4 sm:$0xff]  }
 0x790   : > { %15173 = vmatprep.subr.bf16.mxu0 %v22041_v30  ;;  %v22093_v30 = vld [vmem:[#allocation9 + $0xff8] ss:$40 sps:$4 sm:$0xff]  }
 0x791   : > { %15303 = vmatpush1.bf16.msra.mxu1 %v22042_v6  ;;  %v22104_v6 = vld [vmem:[#allocation9 + $0x154] ss:$40 sps:$4 sm:$0xff]  }
 0x792   : > { %15304 = vmatprep.subr.bf16.mxu1 %v22050_v33  ;;  %v22102_v33 = vld [vmem:[#allocation9 + $0x150] ss:$40 sps:$4 sm:$0xff]  }
 0x793   : > { %15174 = vmatpush1.bf16.msra.mxu0 %v22039_v61  ;;  %v22101_v61 = vld [vmem:[#allocation9 + $0x104c] ss:$40 sps:$4 sm:$0xff]  }
 0x794   : > { %15175 = vmatprep.subr.bf16.mxu0 %v22047_v62  ;;  %v22099_v62 = vld [vmem:[#allocation9 + $0x1048] ss:$40 sps:$4 sm:$0xff]  }
 0x795   : > { %15305 = vmatpush1.bf16.msra.mxu1 %v22048_v0  ;;  %v22110_v0 = vld [vmem:[#allocation9 + $0x1a4] ss:$40 sps:$4 sm:$0xff]  }
 0x796   : > { %15306 = vmatprep.subr.bf16.mxu1 %v22056_v3  ;;  %v22108_v3 = vld [vmem:[#allocation9 + $0x1a0] ss:$40 sps:$4 sm:$0xff]  }
 0x797   : > { %15176 = vmatpush1.bf16.msra.mxu0 %v22045_v63  ;;  %v22107_v63 = vld [vmem:[#allocation9 + $0x109c] ss:$40 sps:$4 sm:$0xff]  }
 0x798   : > { %15177 = vmatprep.subr.bf16.mxu0 %v22053_v2  ;;  %v22105_v2 = vld [vmem:[#allocation9 + $0x1098] ss:$40 sps:$4 sm:$0xff]  }
 0x799   : > { %15307 = vmatpush1.bf16.msra.mxu1 %v22054_v29  ;;  %v22116_v29 = vld [vmem:[#allocation9 + $0x1f4] ss:$40 sps:$4 sm:$0xff]  }
 0x79a   : > { %15308 = vmatprep.subr.bf16.mxu1 %v22062_v47  ;;  %v22114_v47 = vld [vmem:[#allocation9 + $0x1f0] ss:$40 sps:$4 sm:$0xff]  }
 0x79b   : > { %15178 = vmatpush1.bf16.msra.mxu0 %v22051_v8  ;;  %v22113_v8 = vld [vmem:[#allocation9 + $0x10ec] ss:$40 sps:$4 sm:$0xff]  }
 0x79c   : > { %15179 = vmatprep.subr.bf16.mxu0 %v22059_v10  ;;  %v22111_v10 = vld [vmem:[#allocation9 + $0x10e8] ss:$40 sps:$4 sm:$0xff]  }
 0x79d   : > { %15309 = vmatpush1.bf16.msra.mxu1 %v22060_v52  ;;  %v22122_v52 = vld [vmem:[#allocation9 + $0x244] ss:$40 sps:$4 sm:$0xff]  }
 0x79e   : > { %15310 = vmatprep.subr.bf16.mxu1 %v22068_v20  ;;  %v22123_v20 = vld [vmem:[#allocation9 + $0x1188] ss:$40 sps:$4 sm:$0xff]  }
 0x79f   : > { %15180 = vmatpush1.bf16.msra.mxu0 %v22057_v48  ;;  %v22119_v48 = vld [vmem:[#allocation9 + $0x113c] ss:$40 sps:$4 sm:$0xff]  }
 0x7a0   : > { %15181 = vmatprep.subr.bf16.mxu0 %v22065_v15  ;;  %v22117_v15 = vld [vmem:[#allocation9 + $0x1138] ss:$40 sps:$4 sm:$0xff]  }
 0x7a1   : > { %15311 = vmatpush1.bf16.msra.mxu1 %v22066_v27  ;;  %v22129_v27 = vld [vmem:[#allocation9 + $0x11d8] ss:$40 sps:$4 sm:$0xff]  }
 0x7a2   : > { %15312 = vmatprep.subr.bf16.mxu1 %v22074_v31  ;;  %v22137_v31 = vld [vmem:[#allocation9 + $0x122c] ss:$40 sps:$4 sm:$0xff]  }
 0x7a3   : > { %15182 = vmatpush1.bf16.msra.mxu0 %v22063_v21  ;;  %v22126_v21 = vld [vmem:[#allocation9 + $0x290] ss:$40 sps:$4 sm:$0xff]  }
 0x7a4   : > { %15183 = vmatprep.subr.bf16.mxu0 %v22071_v28  ;;  %v22132_v28 = vld [vmem:[#allocation9 + $0x2e0] ss:$40 sps:$4 sm:$0xff]  }
 0x7a5   : > { %15313 = vmatpush1.bf16.msra.mxu1 %v22072_v38  ;;  %v22143_v38 = vld [vmem:[#allocation9 + $0x127c] ss:$40 sps:$4 sm:$0xff]  }
 0x7a6   : > { %15325 = vmatprep.subr.bf16.mxu1 %v22077_v11  ;;  %v22146_v11 = vld [vmem:[#allocation9 + $0x384] ss:$40 sps:$4 sm:$0xff]  }
 0x7a7   : > { %15184 = vmatpush1.bf16.msra.mxu0 %v22069_v59  ;;  %v22140_v59 = vld [vmem:[#allocation9 + $0x334] ss:$40 sps:$4 sm:$0xff]  }
 0x7a8   : > { %15411 = vmatprep.subr.bf16.mxu0 %v22080_v39  ;;  %15315 = vmatmul.mubr.bf16.vlgmr.msra.gmra.mrb[4].mxu1 %v25126_v16  ;;  %v22141_v39 = vld [vmem:[#allocation9 + $0x1278] ss:$40 sps:$4 sm:$0xff]  }
 0x7a9   : > { %15326 = vmatpush1.bf16.msra.mxu1 %v22075_v42  ;;  %15357 = vmatprep.mubr.bf16.mxu1 %v25134_v5  ;;  %v22144_v42 = vld [vmem:[#allocation9 + $0x380] ss:$40 sps:$4 sm:$0xff]  }
 0x7aa   : > { %15186 = vmatmul.mubr.bf16.vlgmr.msra.gmra.mrb[0].mxu0 %v25154_v40  ;;  %15327 = vmatprep.subr.bf16.mxu1 %v22083_v45  ;;  %v22152_v45 = vld [vmem:[#allocation9 + $0x3d4] ss:$40 sps:$4 sm:$0xff]  }
 0x7ab   : > { %15412 = vmatpush1.bf16.msra.mxu0 %v22078_v43  ;;  %15443 = vmatprep.mubr.bf16.mxu0 %v25096_v13  ;;  %v22149_v43 = vld [vmem:[#allocation9 + $0x12cc] ss:$40 sps:$4 sm:$0xff]  }
 0x7ac   : > { %15413 = vmatprep.subr.bf16.mxu0 %v22086_v41  ;;  %v22147_v41 = vld [vmem:[#allocation9 + $0x12c8] ss:$40 sps:$4 sm:$0xff]  }
 0x7ad   : > { %15328 = vmatpush1.bf16.msra.mxu1 %v22081_v54  ;;  %v22150_v54 = vld [vmem:[#allocation9 + $0x3d0] ss:$40 sps:$4 sm:$0xff]  }
 0x7ae   : > { %15329 = vmatprep.subr.bf16.mxu1 %v22089_v34  ;;  %v22158_v34 = vld [vmem:[#allocation9 + $0x424] ss:$40 sps:$4 sm:$0xff]  }
 0x7af   : > { %15414 = vmatpush1.bf16.msra.mxu0 %v22084_v55  ;;  %v22155_v55 = vld [vmem:[#allocation9 + $0x131c] ss:$40 sps:$4 sm:$0xff]  }
 0x7b0   : > { %15415 = vmatprep.subr.bf16.mxu0 %v22092_v24  ;;  %v22153_v24 = vld [vmem:[#allocation9 + $0x1318] ss:$40 sps:$4 sm:$0xff]  }
 0x7b1   : > { %15330 = vmatpush1.bf16.msra.mxu1 %v22087_v57  ;;  %v22156_v57 = vld [vmem:[#allocation9 + $0x420] ss:$40 sps:$4 sm:$0xff]  }
 0x7b2   : > { %15331 = vmatprep.subr.bf16.mxu1 %v22095_v58  ;;  %v22161_v58 = vld [vmem:[#allocation9 + $0x136c] ss:$40 sps:$4 sm:$0xff]  }
 0x7b3   : > { %15416 = vmatpush1.bf16.msra.mxu0 %v22090_v23 }
 0x7b4   : > { %15417 = vmatprep.subr.bf16.mxu0 %v22098_v36  ;;  %v22164_v36 = vld [vmem:[#allocation9 + $0x474] ss:$40 sps:$4 sm:$0xff]  }
 0x7b5   : > { %15332 = vmatpush1.bf16.msra.mxu1 %v22093_v30 }
 0x7b6   : > { %15333 = vmatprep.subr.bf16.mxu1 %v22101_v61 }
 0x7b7   : > { %15418 = vmatpush1.bf16.msra.mxu0 %v22096_v60 }
 0x7b8   : > { %15419 = vmatprep.subr.bf16.mxu0 %v22104_v6  ;;  %v22159_v6 = vld [vmem:[#allocation9 + $0x1368] ss:$40 sps:$4 sm:$0xff]  }
 0x7b9   : > { %15334 = vmatpush1.bf16.msra.mxu1 %v22099_v62  ;;  %v22162_v62 = vld [vmem:[#allocation9 + $0x470] ss:$40 sps:$4 sm:$0xff]  }
 0x7ba   : > { %15335 = vmatprep.subr.bf16.mxu1 %v22107_v63  ;;  %v22170_v63 = vld [vmem:[#allocation9 + $0x4c4] ss:$40 sps:$4 sm:$0xff]  }
 0x7bb   : > { %15420 = vmatpush1.bf16.msra.mxu0 %v22102_v33  ;;  %v25160_v23 = vpop.f32.mrb[0].mxu1  ;;  %v22167_v33 = vld [vmem:[#allocation9 + $0x13bc] ss:$40 sps:$4 sm:$0xff]  }
 0x7bc   : > { %15421 = vmatprep.subr.bf16.mxu0 %v22110_v0  ;;  %v25162_v30 = vpop.f32.mrb[1].mxu1  ;;  %v22165_v0 = vld [vmem:[#allocation9 + $0x13b8] ss:$40 sps:$4 sm:$0xff]  }
 0x7bd   : > { %15336 = vmatpush1.bf16.msra.mxu1 %v22105_v2  ;;  %v25164_v60 = vpop.f32.mrb[2].mxu1  ;;  %v22168_v2 = vld [vmem:[#allocation9 + $0x4c0] ss:$40 sps:$4 sm:$0xff]  }
 0x7be   : > { %15337 = vmatprep.subr.bf16.mxu1 %v22113_v8  ;;  %v25166_v61 = vpop.f32.mrb[3].mxu1  ;;  %v22176_v8 = vld [vmem:[#allocation9 + $0x514] ss:$40 sps:$4 sm:$0xff]  }
 0x7bf   : > { %15422 = vmatpush1.bf16.msra.mxu0 %v22108_v3  ;;  %v22173_v3 = vld [vmem:[#allocation9 + $0x140c] ss:$40 sps:$4 sm:$0xff]  }
 0x7c0   : > { %15423 = vmatprep.subr.bf16.mxu0 %v22116_v29  ;;  %v22171_v29 = vld [vmem:[#allocation9 + $0x1408] ss:$40 sps:$4 sm:$0xff]  }
 0x7c1   : > { %15338 = vmatpush1.bf16.msra.mxu1 %v22111_v10  ;;  %v22174_v10 = vld [vmem:[#allocation9 + $0x510] ss:$40 sps:$4 sm:$0xff]  }
 0x7c2   : > { %15339 = vmatprep.subr.bf16.mxu1 %v22119_v48  ;;  %v22182_v48 = vld [vmem:[#allocation9 + $0x564] ss:$40 sps:$4 sm:$0xff]  }
 0x7c3   : > { %15424 = vmatpush1.bf16.msra.mxu0 %v22114_v47  ;;  %v22179_v47 = vld [vmem:[#allocation9 + $0x145c] ss:$40 sps:$4 sm:$0xff]  }
 0x7c4   : > { %15425 = vmatprep.subr.bf16.mxu0 %v22122_v52  ;;  %v22177_v52 = vld [vmem:[#allocation9 + $0x1458] ss:$40 sps:$4 sm:$0xff]  }
 0x7c5   : > { %15340 = vmatpush1.bf16.msra.mxu1 %v22117_v15  ;;  %v22180_v15 = vld [vmem:[#allocation9 + $0x560] ss:$40 sps:$4 sm:$0xff]  }
 0x7c6   : > { %15341 = vmatprep.subr.bf16.mxu1 %v22125_v18  ;;  %v22188_v18 = vld [vmem:[#allocation9 + $0x5b4] ss:$40 sps:$4 sm:$0xff]  }
 0x7c7   : > { %15426 = vmatpush1.bf16.msra.mxu0 %v22120_v17  ;;  %v22185_v17 = vld [vmem:[#allocation9 + $0x14ac] ss:$40 sps:$4 sm:$0xff]  }
 0x7c8   : > { %15427 = vmatprep.subr.bf16.mxu0 %v22128_v19  ;;  %v22183_v19 = vld [vmem:[#allocation9 + $0x14a8] ss:$40 sps:$4 sm:$0xff]  }
 0x7c9   : > { %15342 = vmatpush1.bf16.msra.mxu1 %v22123_v20  ;;  %v22186_v20 = vld [vmem:[#allocation9 + $0x5b0] ss:$40 sps:$4 sm:$0xff]  }
 0x7ca   : > { %15343 = vmatprep.subr.bf16.mxu1 %v22131_v53  ;;  %v22194_v53 = vld [vmem:[#allocation9 + $0x604] ss:$40 sps:$4 sm:$0xff]  }
 0x7cb   : > { %15428 = vmatpush1.bf16.msra.mxu0 %v22126_v21  ;;  %v22191_v21 = vld [vmem:[#allocation9 + $0x14fc] ss:$40 sps:$4 sm:$0xff]  }
 0x7cc   : > { %15429 = vmatprep.subr.bf16.mxu0 %v22134_v25  ;;  %v22189_v25 = vld [vmem:[#allocation9 + $0x14f8] ss:$40 sps:$4 sm:$0xff]  }
 0x7cd   : > { %15344 = vmatpush1.bf16.msra.mxu1 %v22129_v27  ;;  %v22192_v27 = vld [vmem:[#allocation9 + $0x600] ss:$40 sps:$4 sm:$0xff]  }
 0x7ce   : > { %15345 = vmatprep.subr.bf16.mxu1 %v22137_v31  ;;  %v22200_v31 = vld [vmem:[#allocation9 + $0x654] ss:$40 sps:$4 sm:$0xff]  }
 0x7cf   : > { %15430 = vmatpush1.bf16.msra.mxu0 %v22132_v28  ;;  %v22197_v28 = vld [vmem:[#allocation9 + $0x154c] ss:$40 sps:$4 sm:$0xff]  }
 0x7d0   : > { %15431 = vmatprep.subr.bf16.mxu0 %v22140_v59  ;;  %v22195_v59 = vld [vmem:[#allocation9 + $0x1548] ss:$40 sps:$4 sm:$0xff]  }
 0x7d1   : > { %15346 = vmatpush1.bf16.msra.mxu1 %v22135_v32  ;;  %v22198_v32 = vld [vmem:[#allocation9 + $0x650] ss:$40 sps:$4 sm:$0xff]  }
 0x7d2   : > { %15347 = vmatprep.subr.bf16.mxu1 %v22143_v38  ;;  %v22206_v38 = vld [vmem:[#allocation9 + $0x6a4] ss:$40 sps:$4 sm:$0xff]  }
 0x7d3   : > { %15432 = vmatpush1.bf16.msra.mxu0 %v22138_v37  ;;  %v22203_v37 = vld [vmem:[#allocation9 + $0x159c] ss:$40 sps:$4 sm:$0xff]  }
 0x7d4   : > { %15433 = vmatprep.subr.bf16.mxu0 %v22146_v11  ;;  %v22201_v11 = vld [vmem:[#allocation9 + $0x1598] ss:$40 sps:$4 sm:$0xff]  }
 0x7d5   : > { %15348 = vmatpush1.bf16.msra.mxu1 %v22141_v39  ;;  %v22204_v39 = vld [vmem:[#allocation9 + $0x6a0] ss:$40 sps:$4 sm:$0xff]  }
 0x7d6   : > { %15349 = vmatprep.subr.bf16.mxu1 %v22149_v43  ;;  %v22212_v43 = vld [vmem:[#allocation9 + $0x6f4] ss:$40 sps:$4 sm:$0xff]  }
 0x7d7   : > { %15434 = vmatpush1.bf16.msra.mxu0 %v22144_v42  ;;  %v22209_v42 = vld [vmem:[#allocation9 + $0x15ec] ss:$40 sps:$4 sm:$0xff]  }
 0x7d8   : > { %15435 = vmatprep.subr.bf16.mxu0 %v22152_v45  ;;  %v22207_v45 = vld [vmem:[#allocation9 + $0x15e8] ss:$40 sps:$4 sm:$0xff]  }
 0x7d9   : > { %15350 = vmatpush1.bf16.msra.mxu1 %v22147_v41  ;;  %v22210_v41 = vld [vmem:[#allocation9 + $0x6f0] ss:$40 sps:$4 sm:$0xff]  }
 0x7da   : > { %15351 = vmatprep.subr.bf16.mxu1 %v22155_v55  ;;  %v22218_v55 = vld [vmem:[#allocation9 + $0x744] ss:$40 sps:$4 sm:$0xff]  }
 0x7db   : > { %15436 = vmatpush1.bf16.msra.mxu0 %v22150_v54  ;;  %v22215_v54 = vld [vmem:[#allocation9 + $0x163c] ss:$40 sps:$4 sm:$0xff]  }
 0x7dc   : > { %15437 = vmatprep.subr.bf16.mxu0 %v22158_v34  ;;  %v22213_v34 = vld [vmem:[#allocation9 + $0x1638] ss:$40 sps:$4 sm:$0xff]  }
 0x7dd   : > { %15352 = vmatpush1.bf16.msra.mxu1 %v22153_v24  ;;  %v22216_v24 = vld [vmem:[#allocation9 + $0x740] ss:$40 sps:$4 sm:$0xff]  }
 0x7de   : > { %15353 = vmatprep.subr.bf16.mxu1 %v22161_v58  ;;  %v22224_v58 = vld [vmem:[#allocation9 + $0x794] ss:$40 sps:$4 sm:$0xff]  }
 0x7df   : > { %15438 = vmatpush1.bf16.msra.mxu0 %v22156_v57  ;;  %v22221_v57 = vld [vmem:[#allocation9 + $0x168c] ss:$40 sps:$4 sm:$0xff]  }
 0x7e0   : > { %15439 = vmatprep.subr.bf16.mxu0 %v22164_v36  ;;  %v22219_v36 = vld [vmem:[#allocation9 + $0x1688] ss:$40 sps:$4 sm:$0xff]  }
 0x7e1   : > { %15354 = vmatpush1.bf16.msra.mxu1 %v22159_v6  ;;  %v22222_v6 = vld [vmem:[#allocation9 + $0x790] ss:$40 sps:$4 sm:$0xff]  }
 0x7e2   : > { %15355 = vmatprep.subr.bf16.mxu1 %v22167_v33  ;;  %v22230_v33 = vld [vmem:[#allocation9 + $0x7e4] ss:$40 sps:$4 sm:$0xff]  }
 0x7e3   : > { %15440 = vmatpush1.bf16.msra.mxu0 %v22162_v62  ;;  %v22227_v62 = vld [vmem:[#allocation9 + $0x16dc] ss:$40 sps:$4 sm:$0xff]  }
 0x7e4   : > { %15441 = vmatprep.subr.bf16.mxu0 %v22170_v63  ;;  %v22225_v63 = vld [vmem:[#allocation9 + $0x16d8] ss:$40 sps:$4 sm:$0xff]  }
 0x7e5   : > { %15356 = vmatpush1.bf16.msra.mxu1 %v22165_v0  ;;  %v22228_v0 = vld [vmem:[#allocation9 + $0x7e0] ss:$40 sps:$4 sm:$0xff]  }
 0x7e6   : > { %15368 = vmatprep.subr.bf16.mxu1 %v22173_v3  ;;  %v22236_v3 = vld [vmem:[#allocation9 + $0x834] ss:$40 sps:$4 sm:$0xff]  }
 0x7e7   : > { %15442 = vmatpush1.bf16.msra.mxu0 %v22168_v2  ;;  %v22233_v2 = vld [vmem:[#allocation9 + $0x172c] ss:$40 sps:$4 sm:$0xff]  }
 0x7e8   : > { %15454 = vmatprep.subr.bf16.mxu0 %v22176_v8  ;;  %15358 = vmatmul.mubr.bf16.vlgmr.msra.gmra.mrb[4].mxu1 %v25144_v1  ;;  %v22231_v8 = vld [vmem:[#allocation9 + $0x1728] ss:$40 sps:$4 sm:$0xff]  }
 0x7e9   : > { %15369 = vmatpush1.bf16.msra.mxu1 %v22171_v29  ;;  %15400 = vmatprep.mubr.bf16.mxu1 %v25146_v9  ;;  %v22234_v29 = vld [vmem:[#allocation9 + $0x830] ss:$40 sps:$4 sm:$0xff]  }
 0x7ea   : > { %15444 = vmatmul.mubr.bf16.vlgmr.msra.gmra.mrb[4].mxu0 %v25107_v56  ;;  %15370 = vmatprep.subr.bf16.mxu1 %v22179_v47  ;;  %v22242_v47 = vld [vmem:[#allocation9 + $0x884] ss:$40 sps:$4 sm:$0xff]  }
 0x7eb   : > { %15455 = vmatpush1.bf16.msra.mxu0 %v22174_v10  ;;  %15486 = vmatprep.mubr.bf16.mxu0 %v25098_v14  ;;  %v22239_v10 = vld [vmem:[#allocation9 + $0x177c] ss:$40 sps:$4 sm:$0xff]  }
 0x7ec   : > { %15456 = vmatprep.subr.bf16.mxu0 %v22182_v48  ;;  %v22237_v48 = vld [vmem:[#allocation9 + $0x1778] ss:$40 sps:$4 sm:$0xff]  }
 0x7ed   : > { %15371 = vmatpush1.bf16.msra.mxu1 %v22177_v52  ;;  %v22240_v52 = vld [vmem:[#allocation9 + $0x880] ss:$40 sps:$4 sm:$0xff]  }
 0x7ee   : > { %15372 = vmatprep.subr.bf16.mxu1 %v22185_v17  ;;  %v22248_v17 = vld [vmem:[#allocation9 + $0x8d4] ss:$40 sps:$4 sm:$0xff]  }
 0x7ef   : > { %15457 = vmatpush1.bf16.msra.mxu0 %v22180_v15  ;;  %v22245_v15 = vld [vmem:[#allocation9 + $0x17cc] ss:$40 sps:$4 sm:$0xff]  }
 0x7f0   : > { %15458 = vmatprep.subr.bf16.mxu0 %v22188_v18  ;;  %v22243_v18 = vld [vmem:[#allocation9 + $0x17c8] ss:$40 sps:$4 sm:$0xff]  }
 0x7f1   : > { %15373 = vmatpush1.bf16.msra.mxu1 %v22183_v19  ;;  %v22246_v19 = vld [vmem:[#allocation9 + $0x8d0] ss:$40 sps:$4 sm:$0xff]  }
 0x7f2   : > { %15374 = vmatprep.subr.bf16.mxu1 %v22191_v21  ;;  %v22254_v21 = vld [vmem:[#allocation9 + $0x924] ss:$40 sps:$4 sm:$0xff]  }
 0x7f3   : > { %15459 = vmatpush1.bf16.msra.mxu0 %v22186_v20  ;;  %v22251_v20 = vld [vmem:[#allocation9 + $0x181c] ss:$40 sps:$4 sm:$0xff]  }
 0x7f4   : > { %15460 = vmatprep.subr.bf16.mxu0 %v22194_v53  ;;  %v22249_v53 = vld [vmem:[#allocation9 + $0x1818] ss:$40 sps:$4 sm:$0xff]  }
 0x7f5   : > { %15375 = vmatpush1.bf16.msra.mxu1 %v22189_v25  ;;  %v22252_v25 = vld [vmem:[#allocation9 + $0x920] ss:$40 sps:$4 sm:$0xff]  }
 0x7f6   : > { %15376 = vmatprep.subr.bf16.mxu1 %v22197_v28  ;;  %v22260_v28 = vld [vmem:[#allocation9 + $0x974] ss:$40 sps:$4 sm:$0xff]  }
 0x7f7   : > { %15461 = vmatpush1.bf16.msra.mxu0 %v22192_v27  ;;  %v22257_v27 = vld [vmem:[#allocation9 + $0x186c] ss:$40 sps:$4 sm:$0xff]  }
 0x7f8   : > { %15462 = vmatprep.subr.bf16.mxu0 %v22200_v31  ;;  %v22255_v31 = vld [vmem:[#allocation9 + $0x1868] ss:$40 sps:$4 sm:$0xff]  }
 0x7f9   : > { %15377 = vmatpush1.bf16.msra.mxu1 %v22195_v59  ;;  %v22258_v59 = vld [vmem:[#allocation9 + $0x970] ss:$40 sps:$4 sm:$0xff]  }
 0x7fa   : > { %15378 = vmatprep.subr.bf16.mxu1 %v22203_v37  ;;  %v22266_v37 = vld [vmem:[#allocation9 + $0x9c4] ss:$40 sps:$4 sm:$0xff]  }
 0x7fb   : > { %15463 = vmatpush1.bf16.msra.mxu0 %v22198_v32  ;;  %v22263_v32 = vld [vmem:[#allocation9 + $0x18bc] ss:$40 sps:$4 sm:$0xff]  }
 0x7fc   : > { %15464 = vmatprep.subr.bf16.mxu0 %v22206_v38  ;;  %v22261_v38 = vld [vmem:[#allocation9 + $0x18b8] ss:$40 sps:$4 sm:$0xff]  }
 0x7fd   : > { %15379 = vmatpush1.bf16.msra.mxu1 %v22201_v11  ;;  %v22264_v11 = vld [vmem:[#allocation9 + $0x9c0] ss:$40 sps:$4 sm:$0xff]  }
 0x7fe   : > { %15380 = vmatprep.subr.bf16.mxu1 %v22209_v42  ;;  %v22272_v42 = vld [vmem:[#allocation9 + $0x1c] ss:$40 sps:$4 sm:$0xff]  }
 0x7ff   : > { %15465 = vmatpush1.bf16.msra.mxu0 %v22204_v39  ;;  %v22269_v39 = vld [vmem:[#allocation9 + $0xa14] ss:$40 sps:$4 sm:$0xff]  }
 0x800   : > { %15466 = vmatprep.subr.bf16.mxu0 %v22212_v43  ;;  %v22267_v43 = vld [vmem:[#allocation9 + $0xa10] ss:$40 sps:$4 sm:$0xff]  }
 0x801   : > { %15381 = vmatpush1.bf16.msra.mxu1 %v22207_v45  ;;  %v22270_v45 = vld [vmem:[#allocation9 + $0x18] ss:$40 sps:$4 sm:$0xff]  }
 0x802   : > { %15382 = vmatprep.subr.bf16.mxu1 %v22215_v54  ;;  %v22278_v54 = vld [vmem:[#allocation9 + $0x6c] ss:$40 sps:$4 sm:$0xff]  }
 0x803   : > { %15467 = vmatpush1.bf16.msra.mxu0 %v22210_v41  ;;  %v22275_v41 = vld [vmem:[#allocation9 + $0xa64] ss:$40 sps:$4 sm:$0xff]  }
 0x804   : > { %15468 = vmatprep.subr.bf16.mxu0 %v22218_v55  ;;  %v22273_v55 = vld [vmem:[#allocation9 + $0xa60] ss:$40 sps:$4 sm:$0xff]  }
 0x805   : > { %15383 = vmatpush1.bf16.msra.mxu1 %v22213_v34  ;;  %v22276_v34 = vld [vmem:[#allocation9 + $0x68] ss:$40 sps:$4 sm:$0xff]  }
 0x806   : > { %15384 = vmatprep.subr.bf16.mxu1 %v22221_v57  ;;  %v22284_v57 = vld [vmem:[#allocation9 + $0xbc] ss:$40 sps:$4 sm:$0xff]  }
 0x807   : > { %15469 = vmatpush1.bf16.msra.mxu0 %v22216_v24  ;;  %v22281_v24 = vld [vmem:[#allocation9 + $0xab4] ss:$40 sps:$4 sm:$0xff]  }
 0x808   : > { %15470 = vmatprep.subr.bf16.mxu0 %v22224_v58  ;;  %v22279_v58 = vld [vmem:[#allocation9 + $0xab0] ss:$40 sps:$4 sm:$0xff]  }
 0x809   : > { %15385 = vmatpush1.bf16.msra.mxu1 %v22219_v36  ;;  %v22282_v36 = vld [vmem:[#allocation9 + $0xb8] ss:$40 sps:$4 sm:$0xff]  }
 0x80a   : > { %15386 = vmatprep.subr.bf16.mxu1 %v22227_v62  ;;  %v22290_v62 = vld [vmem:[#allocation9 + $0x10c] ss:$40 sps:$4 sm:$0xff]  }
 0x80b   : > { %15471 = vmatpush1.bf16.msra.mxu0 %v22222_v6  ;;  %v22287_v6 = vld [vmem:[#allocation9 + $0xb04] ss:$40 sps:$4 sm:$0xff]  }
 0x80c   : > { %15472 = vmatprep.subr.bf16.mxu0 %v22230_v33  ;;  %v22285_v33 = vld [vmem:[#allocation9 + $0xb00] ss:$40 sps:$4 sm:$0xff]  }
 0x80d   : > { %15387 = vmatpush1.bf16.msra.mxu1 %v22225_v63  ;;  %v22288_v63 = vld [vmem:[#allocation9 + $0x108] ss:$40 sps:$4 sm:$0xff]  }
 0x80e   : > { %15388 = vmatprep.subr.bf16.mxu1 %v22233_v2  ;;  %v22296_v2 = vld [vmem:[#allocation9 + $0x15c] ss:$40 sps:$4 sm:$0xff]  }
 0x80f   : > { %15473 = vmatpush1.bf16.msra.mxu0 %v22228_v0  ;;  %v22293_v0 = vld [vmem:[#allocation9 + $0xb54] ss:$40 sps:$4 sm:$0xff]  }
 0x810   : > { %15474 = vmatprep.subr.bf16.mxu0 %v22236_v3  ;;  %v22291_v3 = vld [vmem:[#allocation9 + $0xb50] ss:$40 sps:$4 sm:$0xff]  }
 0x811   : > { %15389 = vmatpush1.bf16.msra.mxu1 %v22231_v8  ;;  %v22294_v8 = vld [vmem:[#allocation9 + $0x158] ss:$40 sps:$4 sm:$0xff]  }
 0x812   : > { %15390 = vmatprep.subr.bf16.mxu1 %v22239_v10  ;;  %v22302_v10 = vld [vmem:[#allocation9 + $0x1ac] ss:$40 sps:$4 sm:$0xff]  }
 0x813   : > { %15475 = vmatpush1.bf16.msra.mxu0 %v22234_v29  ;;  %v22299_v29 = vld [vmem:[#allocation9 + $0xba4] ss:$40 sps:$4 sm:$0xff]  }
 0x814   : > { %15476 = vmatprep.subr.bf16.mxu0 %v22242_v47  ;;  %v22297_v47 = vld [vmem:[#allocation9 + $0xba0] ss:$40 sps:$4 sm:$0xff]  }
 0x815   : > { %15391 = vmatpush1.bf16.msra.mxu1 %v22237_v48  ;;  %v22300_v48 = vld [vmem:[#allocation9 + $0x1a8] ss:$40 sps:$4 sm:$0xff]  }
 0x816   : > { %15392 = vmatprep.subr.bf16.mxu1 %v22245_v15  ;;  %v22308_v15 = vld [vmem:[#allocation9 + $0x1fc] ss:$40 sps:$4 sm:$0xff]  }
 0x817   : > { %15477 = vmatpush1.bf16.msra.mxu0 %v22240_v52  ;;  %v22305_v52 = vld [vmem:[#allocation9 + $0xbf4] ss:$40 sps:$4 sm:$0xff]  }
 0x818   : > { %15478 = vmatprep.subr.bf16.mxu0 %v22248_v17  ;;  %v22303_v17 = vld [vmem:[#allocation9 + $0xbf0] ss:$40 sps:$4 sm:$0xff]  }
 0x819   : > { %15393 = vmatpush1.bf16.msra.mxu1 %v22243_v18  ;;  %v22306_v18 = vld [vmem:[#allocation9 + $0x1f8] ss:$40 sps:$4 sm:$0xff]  }
 0x81a   : > { %15394 = vmatprep.subr.bf16.mxu1 %v22251_v20  ;;  %v22314_v20 = vld [vmem:[#allocation9 + $0x24c] ss:$40 sps:$4 sm:$0xff]  }
 0x81b   : > { %15479 = vmatpush1.bf16.msra.mxu0 %v22246_v19  ;;  %v22311_v19 = vld [vmem:[#allocation9 + $0xc44] ss:$40 sps:$4 sm:$0xff]  }
 0x81c   : > { %15480 = vmatprep.subr.bf16.mxu0 %v22254_v21  ;;  %v22309_v21 = vld [vmem:[#allocation9 + $0xc40] ss:$40 sps:$4 sm:$0xff]  }
 0x81d   : > { %15395 = vmatpush1.bf16.msra.mxu1 %v22249_v53  ;;  %v22312_v53 = vld [vmem:[#allocation9 + $0x248] ss:$40 sps:$4 sm:$0xff]  }
 0x81e   : > { %15396 = vmatprep.subr.bf16.mxu1 %v22257_v27  ;;  %v22320_v27 = vld [vmem:[#allocation9 + $0x29c] ss:$40 sps:$4 sm:$0xff]  }
 0x81f   : > { %15481 = vmatpush1.bf16.msra.mxu0 %v22252_v25  ;;  %v22317_v25 = vld [vmem:[#allocation9 + $0xc94] ss:$40 sps:$4 sm:$0xff]  }
 0x820   : > { %15482 = vmatprep.subr.bf16.mxu0 %v22260_v28  ;;  %v22315_v28 = vld [vmem:[#allocation9 + $0xc90] ss:$40 sps:$4 sm:$0xff]  }
 0x821   : > { %15397 = vmatpush1.bf16.msra.mxu1 %v22255_v31  ;;  %v22318_v31 = vld [vmem:[#allocation9 + $0x298] ss:$40 sps:$4 sm:$0xff]  }
 0x822   : > { %15398 = vmatprep.subr.bf16.mxu1 %v22263_v32  ;;  %v22326_v32 = vld [vmem:[#allocation9 + $0x2ec] ss:$40 sps:$4 sm:$0xff]  }
 0x823   : > { %15483 = vmatpush1.bf16.msra.mxu0 %v22258_v59  ;;  %v22323_v59 = vld [vmem:[#allocation9 + $0xce4] ss:$40 sps:$4 sm:$0xff]  }
 0x824   : > { %15484 = vmatprep.subr.bf16.mxu0 %v22266_v37  ;;  %v22321_v37 = vld [vmem:[#allocation9 + $0xce0] ss:$40 sps:$4 sm:$0xff]  }
 0x825   : > { %15399 = vmatpush1.bf16.msra.mxu1 %v22261_v38  ;;  %v22324_v38 = vld [vmem:[#allocation9 + $0x2e8] ss:$40 sps:$4 sm:$0xff]  }
 0x826   : > { %15626 = vmatprep.subr.bf16.mxu1 %v22272_v42  ;;  %v22327_v42 = vld [vmem:[#allocation9 + $0xd30] ss:$40 sps:$4 sm:$0xff]  }
 0x827   : > { %15485 = vmatpush1.bf16.msra.mxu0 %v22264_v11  ;;  %v22329_v11 = vld [vmem:[#allocation9 + $0xd34] ss:$40 sps:$4 sm:$0xff]  }
 0x828   : > { %15497 = vmatprep.subr.bf16.mxu0 %v22269_v39  ;;  %15401 = vmatmul.mubr.bf16.vlgmr.msra.gmra.mrb[4].mxu1 %v25154_v40  ;;  %v22332_v39 = vld [vmem:[#allocation9 + $0x33c] ss:$40 sps:$4 sm:$0xff]  }
 0x829   : > { %15627 = vmatpush1.bf16.msra.mxu1 %v22270_v45  ;;  %15658 = vmatprep.mubr.bf16.mxu1 %v25096_v13  ;;  %v22335_v45 = vld [vmem:[#allocation9 + $0xd84] ss:$40 sps:$4 sm:$0xff]  }
 0x82a   : > { %15487 = vmatmul.mubr.bf16.vlgmr.msra.gmra.mrb[4].mxu0 %v25109_v12  ;;  %15628 = vmatprep.subr.bf16.mxu1 %v22278_v54  ;;  %v22333_v54 = vld [vmem:[#allocation9 + $0xd80] ss:$40 sps:$4 sm:$0xff]  }
 0x82b   : > { %15498 = vmatpush1.bf16.msra.mxu0 %v22267_v43  ;;  %15529 = vmatprep.mubr.bf16.mxu0 %v25118_v26  ;;  %v22330_v43 = vld [vmem:[#allocation9 + $0x338] ss:$40 sps:$4 sm:$0xff]  }
 0x82c   : > { %15499 = vmatprep.subr.bf16.mxu0 %v22275_v41  ;;  %v22338_v41 = vld [vmem:[#allocation9 + $0x38c] ss:$40 sps:$4 sm:$0xff]  }
 0x82d   : > { %15629 = vmatpush1.bf16.msra.mxu1 %v22276_v34  ;;  %v22341_v34 = vld [vmem:[#allocation9 + $0xdd4] ss:$40 sps:$4 sm:$0xff]  }
 0x82e   : > { %15630 = vmatprep.subr.bf16.mxu1 %v22284_v57  ;;  %v22339_v57 = vld [vmem:[#allocation9 + $0xdd0] ss:$40 sps:$4 sm:$0xff]  }
 0x82f   : > { %15500 = vmatpush1.bf16.msra.mxu0 %v22273_v55  ;;  %v22336_v55 = vld [vmem:[#allocation9 + $0x388] ss:$40 sps:$4 sm:$0xff]  }
 0x830   : > { %15501 = vmatprep.subr.bf16.mxu0 %v22281_v24  ;;  %v22344_v24 = vld [vmem:[#allocation9 + $0x3dc] ss:$40 sps:$4 sm:$0xff]  }
 0x831   : > { %15631 = vmatpush1.bf16.msra.mxu1 %v22282_v36  ;;  %v22347_v36 = vld [vmem:[#allocation9 + $0xe24] ss:$40 sps:$4 sm:$0xff]  }
 0x832   : > { %15632 = vmatprep.subr.bf16.mxu1 %v22290_v62  ;;  %v22345_v62 = vld [vmem:[#allocation9 + $0xe20] ss:$40 sps:$4 sm:$0xff]  }
 0x833   : > { %15502 = vmatpush1.bf16.msra.mxu0 %v22279_v58  ;;  %v22342_v58 = vld [vmem:[#allocation9 + $0x3d8] ss:$40 sps:$4 sm:$0xff]  }
 0x834   : > { %15503 = vmatprep.subr.bf16.mxu0 %v22287_v6  ;;  %v22350_v6 = vld [vmem:[#allocation9 + $0x42c] ss:$40 sps:$4 sm:$0xff]  }
 0x835   : > { %15633 = vmatpush1.bf16.msra.mxu1 %v22288_v63  ;;  %v22353_v63 = vld [vmem:[#allocation9 + $0xe74] ss:$40 sps:$4 sm:$0xff]  }
 0x836   : > { %15634 = vmatprep.subr.bf16.mxu1 %v22296_v2  ;;  %v22351_v2 = vld [vmem:[#allocation9 + $0xe70] ss:$40 sps:$4 sm:$0xff]  }
 0x837   : > { %15504 = vmatpush1.bf16.msra.mxu0 %v22285_v33  ;;  %v22348_v33 = vld [vmem:[#allocation9 + $0x428] ss:$40 sps:$4 sm:$0xff]  }
 0x838   : > { %15505 = vmatprep.subr.bf16.mxu0 %v22293_v0  ;;  %v22356_v0 = vld [vmem:[#allocation9 + $0x47c] ss:$40 sps:$4 sm:$0xff]  }
 0x839   : > { %15635 = vmatpush1.bf16.msra.mxu1 %v22294_v8  ;;  %v22359_v8 = vld [vmem:[#allocation9 + $0xec4] ss:$40 sps:$4 sm:$0xff]  }
 0x83a   : > { %15636 = vmatprep.subr.bf16.mxu1 %v22302_v10  ;;  %v22357_v10 = vld [vmem:[#allocation9 + $0xec0] ss:$40 sps:$4 sm:$0xff]  }
 0x83b   : > { %15506 = vmatpush1.bf16.msra.mxu0 %v22291_v3  ;;  %v22354_v3 = vld [vmem:[#allocation9 + $0x478] ss:$40 sps:$4 sm:$0xff]  }
 0x83c   : > { %15507 = vmatprep.subr.bf16.mxu0 %v22299_v29  ;;  %v22362_v29 = vld [vmem:[#allocation9 + $0x4cc] ss:$40 sps:$4 sm:$0xff]  }
 0x83d   : > { %15637 = vmatpush1.bf16.msra.mxu1 %v22300_v48  ;;  %v22365_v48 = vld [vmem:[#allocation9 + $0xf14] ss:$40 sps:$4 sm:$0xff]  }
 0x83e   : > { %15638 = vmatprep.subr.bf16.mxu1 %v22308_v15  ;;  %v22363_v15 = vld [vmem:[#allocation9 + $0xf10] ss:$40 sps:$4 sm:$0xff]  }
 0x83f   : > { %15508 = vmatpush1.bf16.msra.mxu0 %v22297_v47  ;;  %v22360_v47 = vld [vmem:[#allocation9 + $0x4c8] ss:$40 sps:$4 sm:$0xff]  }
 0x840   : > { %15509 = vmatprep.subr.bf16.mxu0 %v22305_v52  ;;  %v22368_v52 = vld [vmem:[#allocation9 + $0x51c] ss:$40 sps:$4 sm:$0xff]  }
 0x841   : > { %15639 = vmatpush1.bf16.msra.mxu1 %v22306_v18  ;;  %v22371_v18 = vld [vmem:[#allocation9 + $0xf64] ss:$40 sps:$4 sm:$0xff]  }
 0x842   : > { %15640 = vmatprep.subr.bf16.mxu1 %v22314_v20  ;;  %v22369_v20 = vld [vmem:[#allocation9 + $0xf60] ss:$40 sps:$4 sm:$0xff]  }
 0x843   : > { %15510 = vmatpush1.bf16.msra.mxu0 %v22303_v17  ;;  %v22366_v17 = vld [vmem:[#allocation9 + $0x518] ss:$40 sps:$4 sm:$0xff]  }
 0x844   : > { %15511 = vmatprep.subr.bf16.mxu0 %v22311_v19  ;;  %v22374_v19 = vld [vmem:[#allocation9 + $0x56c] ss:$40 sps:$4 sm:$0xff]  }
 0x845   : > { %15641 = vmatpush1.bf16.msra.mxu1 %v22312_v53  ;;  %v22377_v53 = vld [vmem:[#allocation9 + $0xfb4] ss:$40 sps:$4 sm:$0xff]  }
 0x846   : > { %15642 = vmatprep.subr.bf16.mxu1 %v22320_v27  ;;  %v22375_v27 = vld [vmem:[#allocation9 + $0xfb0] ss:$40 sps:$4 sm:$0xff]  }
 0x847   : > { %15512 = vmatpush1.bf16.msra.mxu0 %v22309_v21  ;;  %v22372_v21 = vld [vmem:[#allocation9 + $0x568] ss:$40 sps:$4 sm:$0xff]  }
 0x848   : > { %15513 = vmatprep.subr.bf16.mxu0 %v22317_v25  ;;  %v22380_v25 = vld [vmem:[#allocation9 + $0x5bc] ss:$40 sps:$4 sm:$0xff]  }
 0x849   : > { %15643 = vmatpush1.bf16.msra.mxu1 %v22318_v31  ;;  %v22383_v31 = vld [vmem:[#allocation9 + $0x1004] ss:$40 sps:$4 sm:$0xff]  }
 0x84a   : > { %15644 = vmatprep.subr.bf16.mxu1 %v22326_v32  ;;  %v25180_v32 = vld [vmem:[#allocation11] sm:$0xff] }
 0x84b   : > { %15514 = vmatpush1.bf16.msra.mxu0 %v22315_v28  ;;  %v22378_v28 = vld [vmem:[#allocation9 + $0x5b8] ss:$40 sps:$4 sm:$0xff]  }
 0x84c   : > { %15515 = vmatprep.subr.bf16.mxu0 %v22323_v59  ;;  %v22386_v59 = vld [vmem:[#allocation9 + $0x60c] ss:$40 sps:$4 sm:$0xff]  }
 0x84d   : > { %15645 = vmatpush1.bf16.msra.mxu1 %v22324_v38  ;;  %v22384_v38 = vld [vmem:[#allocation9 + $0x608] ss:$40 sps:$4 sm:$0xff]  }
 0x84e   : > { %15646 = vmatprep.subr.bf16.mxu1 %v22332_v39  ;;  %v22392_v39 = vld [vmem:[#allocation9 + $0x65c] ss:$40 sps:$4 sm:$0xff]  }
 0x84f   : > { %15516 = vmatpush1.bf16.msra.mxu0 %v22321_v37  ;;  %v22381_v37 = vld [vmem:[#allocation9 + $0x1000] ss:$40 sps:$4 sm:$0xff]  }
 0x850   : > { %15517 = vmatprep.subr.bf16.mxu0 %v22329_v11  ;;  %v22389_v11 = vld [vmem:[#allocation9 + $0x1054] ss:$40 sps:$4 sm:$0xff]  }
 0x851   : > { %15647 = vmatpush1.bf16.msra.mxu1 %v22330_v43  ;;  %v22390_v43 = vld [vmem:[#allocation9 + $0x658] ss:$40 sps:$4 sm:$0xff]  }
 0x852   : > { %15648 = vmatprep.subr.bf16.mxu1 %v22338_v41  ;;  %v22395_v41 = vld [vmem:[#allocation9 + $0x10a4] ss:$40 sps:$4 sm:$0xff]  }
 0x853   : > { %15518 = vmatpush1.bf16.msra.mxu0 %v22327_v42  ;;  %v22387_v42 = vld [vmem:[#allocation9 + $0x1050] ss:$40 sps:$4 sm:$0xff]  }
 0x854   : > { %15519 = vmatprep.subr.bf16.mxu0 %v22335_v45  ;;  %v10934_v45 = vrot.slane %v25180_v32, %v25093_v4 }
 0x855   : > { %15649 = vmatpush1.bf16.msra.mxu1 %v22336_v55  ;;  %v10938_v55 = vrot.slane %v25180_v32, %v25082_v35 }
 0x856   : > { %15650 = vmatprep.subr.bf16.mxu1 %v22344_v24  ;;  %v22396_v24 = vld [vmem:[#allocation9 + $0x6a8] ss:$40 sps:$4 sm:$0xff]  }
 0x857   : > { %15520 = vmatpush1.bf16.msra.mxu0 %v22333_v54  ;;  %v22398_v54 = vld [vmem:[#allocation9 + $0x6ac] ss:$40 sps:$4 sm:$0xff]  }
 0x858   : > { %15521 = vmatprep.subr.bf16.mxu0 %v22341_v34  ;;  %v22393_v34 = vld [vmem:[#allocation9 + $0x10a0] ss:$40 sps:$4 sm:$0xff]  }
 0x859   : > { %15651 = vmatpush1.bf16.msra.mxu1 %v22342_v58  ;;  %v22401_v58 = vld [vmem:[#allocation9 + $0x10f4] ss:$40 sps:$4 sm:$0xff]  }
 0x85a   : > { %15652 = vmatprep.subr.bf16.mxu1 %v22350_v6  ;;  %v15018_v6 = vadd.f32 %v25162_v30, %v10938_v55 }
 0x85b   : > { %15522 = vmatpush1.bf16.msra.mxu0 %v22339_v57  ;;  %v15016_v57 = vadd.f32 %v25160_v23, %v10934_v45 }
 0x85c   : > { %15523 = vmatprep.subr.bf16.mxu0 %v22347_v36  ;;  %v22404_v36 = vld [vmem:[#allocation9 + $0x6fc] ss:$40 sps:$4 sm:$0xff]  }
 0x85d   : > { %15653 = vmatpush1.bf16.msra.mxu1 %v22348_v33  ;;  %v22399_v33 = vld [vmem:[#allocation9 + $0x10f0] ss:$40 sps:$4 sm:$0xff]  }
 0x85e   : > { %15654 = vmatprep.subr.bf16.mxu1 %v22356_v0  ;;  %v15020_v0 = vadd.f32 %v25164_v60, %v10934_v45  ;;  %v22431_v45 = vld [vmem:[#allocation9 + $0x1284] ss:$40 sps:$4 sm:$0xff]  }
 0x85f   : > { %15524 = vmatpush1.bf16.msra.mxu0 %v22345_v62 }
 0x860   : > { %15525 = vmatprep.subr.bf16.mxu0 %v22353_v63  ;;  %v22402_v63 = vld [vmem:[#allocation9 + $0x6f8] ss:$40 sps:$4 sm:$0xff]  }
 0x861   : > { %15655 = vmatpush1.bf16.msra.mxu1 %v22354_v3 }
 0x862   : > { %15656 = vmatprep.subr.bf16.mxu1 %v22362_v29 }
 0x863   : > { %15526 = vmatpush1.bf16.msra.mxu0 %v22351_v2 }
 0x864   : > { %15527 = vmatprep.subr.bf16.mxu0 %v22359_v8  ;;  %v15022_v8 = vadd.f32 %v25166_v61, %v10938_v55  ;;  %v22432_v55 = vld [vmem:[#allocation9 + $0x888] ss:$40 sps:$4 sm:$0xff]  }
 0x865   : > { %15657 = vmatpush1.bf16.msra.mxu1 %v22360_v47 }
 0x866   : > { %15669 = vmatprep.subr.bf16.mxu1 %v22368_v52  ;;  %v22410_v52 = vld [vmem:[#allocation9 + $0x74c] ss:$40 sps:$4 sm:$0xff]  }
 0x867   : > { %15528 = vmatpush1.bf16.msra.mxu0 %v22357_v10 }
 0x868   : > { %15540 = vmatprep.subr.bf16.mxu0 %v22365_v48  ;;  %15659 = vmatmul.mubr.bf16.vlgmr.msra.gmra.mrb[8].mxu1 %v25107_v56  ;;  %v22407_v48 = vld [vmem:[#allocation9 + $0x1144] ss:$40 sps:$4 sm:$0xff]  }
 0x869   : > { %15670 = vmatpush1.bf16.msra.mxu1 %v22366_v17  ;;  %15701 = vmatprep.mubr.bf16.mxu1 %v25098_v14 }
 0x86a   : > { %15530 = vmatmul.mubr.bf16.vlgmr.msra.gmra.mrb[4].mxu0 %v25126_v16  ;;  %15671 = vmatprep.subr.bf16.mxu1 %v22374_v19  ;;  %v22408_v19 = vld [vmem:[#allocation9 + $0x748] ss:$40 sps:$4 sm:$0xff]  }
 0x86b   : > { %15541 = vmatpush1.bf16.msra.mxu0 %v22363_v15  ;;  %15572 = vmatprep.mubr.bf16.mxu0 %v25134_v5 }
 0x86c   : > { %15542 = vmatprep.subr.bf16.mxu0 %v22371_v18  ;;  %v22405_v18 = vld [vmem:[#allocation9 + $0x1140] ss:$40 sps:$4 sm:$0xff]  }
 0x86d   : > { %15672 = vmatpush1.bf16.msra.mxu1 %v22372_v21  ;;  %v22413_v21 = vld [vmem:[#allocation9 + $0x1194] ss:$40 sps:$4 sm:$0xff]  }
 0x86e   : > { %15673 = vmatprep.subr.bf16.mxu1 %v22380_v25 }
 0x86f   : > { %15543 = vmatpush1.bf16.msra.mxu0 %v22369_v20 }
 0x870   : > { %15544 = vmatprep.subr.bf16.mxu0 %v22377_v53  ;;  %v22416_v53 = vld [vmem:[#allocation9 + $0x79c] ss:$40 sps:$4 sm:$0xff]  }
 0x871   : > { %15674 = vmatpush1.bf16.msra.mxu1 %v22378_v28  ;;  %v22414_v28 = vld [vmem:[#allocation9 + $0x798] ss:$40 sps:$4 sm:$0xff]  }
 0x872   : > { %15675 = vmatprep.subr.bf16.mxu1 %v22386_v59  ;;  %v22422_v59 = vld [vmem:[#allocation9 + $0x7ec] ss:$40 sps:$4 sm:$0xff]  }
 0x873   : > { %15545 = vmatpush1.bf16.msra.mxu0 %v22375_v27  ;;  %v22411_v27 = vld [vmem:[#allocation9 + $0x1190] ss:$40 sps:$4 sm:$0xff]  }
 0x874   : > { %15546 = vmatprep.subr.bf16.mxu0 %v22383_v31  ;;  %v22419_v31 = vld [vmem:[#allocation9 + $0x11e4] ss:$40 sps:$4 sm:$0xff]  }
 0x875   : > { %15676 = vmatpush1.bf16.msra.mxu1 %v22384_v38  ;;  %v22420_v38 = vld [vmem:[#allocation9 + $0x7e8] ss:$40 sps:$4 sm:$0xff]  }
 0x876   : > { %15677 = vmatprep.subr.bf16.mxu1 %v22392_v39  ;;  %v22428_v39 = vld [vmem:[#allocation9 + $0x83c] ss:$40 sps:$4 sm:$0xff]  }
 0x877   : > { %15547 = vmatpush1.bf16.msra.mxu0 %v22381_v37  ;;  %v22417_v37 = vld [vmem:[#allocation9 + $0x11e0] ss:$40 sps:$4 sm:$0xff]  }
 0x878   : > { %15548 = vmatprep.subr.bf16.mxu0 %v22389_v11  ;;  %v22425_v11 = vld [vmem:[#allocation9 + $0x1234] ss:$40 sps:$4 sm:$0xff]  }
 0x879   : > { %15678 = vmatpush1.bf16.msra.mxu1 %v22390_v43  ;;  %v22426_v43 = vld [vmem:[#allocation9 + $0x838] ss:$40 sps:$4 sm:$0xff]  }
 0x87a   : > { %15679 = vmatprep.subr.bf16.mxu1 %v22398_v54  ;;  %v22429_v54 = vld [vmem:[#allocation9 + $0x1280] ss:$40 sps:$4 sm:$0xff]  }
 0x87b   : > { %15549 = vmatpush1.bf16.msra.mxu0 %v22387_v42  ;;  %v22423_v42 = vld [vmem:[#allocation9 + $0x1230] ss:$40 sps:$4 sm:$0xff]  }
 0x87c   : > { %15550 = vmatprep.subr.bf16.mxu0 %v22395_v41  ;;  %v22434_v41 = vld [vmem:[#allocation9 + $0x88c] ss:$40 sps:$4 sm:$0xff]  }
 0x87d   : > { %v15187_v62 = vpop.f32.mrb[0].mxu0  ;;  %15680 = vmatpush1.bf16.msra.mxu1 %v22396_v24  ;;  %v22440_v24 = vld [vmem:[#allocation9 + $0x8dc] ss:$40 sps:$4 sm:$0xff]  }
 0x87e   : > { %v19542_v2 = vadd.f32 %v15187_v62, %v15016_v57  ;;  %v15189_v3 = vpop.f32.mrb[1].mxu0  ;;  %15681 = vmatprep.subr.bf16.mxu1 %v22404_v36  ;;  %v22435_v57 = vld [vmem:[#allocation9 + $0x12d0] ss:$40 sps:$4 sm:$0xff]   ;;  %v22443_v36 = vld [vmem:[#allocation9 + $0x1324] ss:$40 sps:$4 sm:$0xff]  }
 0x87f   : > { %v19544_v29 = vadd.f32 %v15189_v3, %v15018_v6  ;;  %v15191_v10 = vpop.f32.mrb[2].mxu0  ;;  %15551 = vmatpush1.bf16.msra.mxu0 %v22393_v34  ;;  %v22437_v34 = vld [vmem:[#allocation9 + $0x12d4] ss:$40 sps:$4 sm:$0xff]   ;;  %v22441_v62 = vld [vmem:[#allocation9 + $0x1320] ss:$40 sps:$4 sm:$0xff]  }
 0x880   : > { %v19546_v23 = vadd.f32 %v15191_v10, %v15020_v0  ;;  %v15193_v47 = vpop.f32.mrb[3].mxu0  ;;  %15552 = vmatprep.subr.bf16.mxu0 %v22401_v58  ;;  %v16056_v30 = vmax.f32 %v19542_v2, 0.0  ;;  %v22438_v58 = vld [vmem:[#allocation9 + $0x8d8] ss:$40 sps:$4 sm:$0xff]   ;;  %v22446_v6 = vld [vmem:[#allocation9 + $0x92c] ss:$40 sps:$4 sm:$0xff]  }
 0x881   : > { %v16057_v15 = vmax.f32 %v19544_v29, 0.0  ;;  %v19548_v17 = vadd.f32 %v15193_v47, %v15022_v8  ;;  %15682 = vmatpush1.bf16.msra.mxu1 %v22402_v63  ;;  %v22449_v63 = vld [vmem:[#allocation9 + $0x1374] ss:$40 sps:$4 sm:$0xff]   ;;  %v22447_v2 = vld [vmem:[#allocation9 + $0x1370] ss:$40 sps:$4 sm:$0xff]  }
 0x882   : > { %v16066_v60 = vmax.f32 %v19546_v23, 0.0  ;;  %15683 = vmatprep.subr.bf16.mxu1 %v22410_v52  ;;  %v22452_v0 = vld [vmem:[#allocation9 + $0x97c] ss:$40 sps:$4 sm:$0xff]   ;;  %v22450_v3 = vld [vmem:[#allocation9 + $0x978] ss:$40 sps:$4 sm:$0xff]  }
 0x883   : > { %v16067_v20 = vmax.f32 %v19548_v17, 0.0  ;;  %15553 = vmatpush1.bf16.msra.mxu0 %v22399_v33  ;;  %v22444_v33 = vld [vmem:[#allocation9 + $0x928] ss:$40 sps:$4 sm:$0xff]   ;;  %v22455_v8 = vld [vmem:[#allocation9 + $0x13c4] ss:$40 sps:$4 sm:$0xff]  }
 0x884   : > { %v25190_v61 = vpack.c.bf16 %v16066_v60, %v16056_v30  ;;  %15554 = vmatprep.subr.bf16.mxu0 %v22407_v48  ;;  %v22458_v29 = vld [vmem:[#allocation9 + $0x9cc] ss:$40 sps:$4 sm:$0xff]   ;;  %v22453_v10 = vld [vmem:[#allocation9 + $0x13c0] ss:$40 sps:$4 sm:$0xff]   ;;  %v22464_v48 = vld [vmem:[#allocation9 + $0xa1c] ss:$40 sps:$4 sm:$0xff]  }
 0x885   : > { %v25192_v25 = vpack.c.bf16 %v16067_v20, %v16057_v15  ;;  %15684 = vmatpush1.bf16.msra.mxu1 %v22408_v19  ;;  %v22456_v23 = vld [vmem:[#allocation9 + $0x9c8] ss:$40 sps:$4 sm:$0xff]   ;;  %v22461_v47 = vld [vmem:[#allocation9 + $0x1414] ss:$40 sps:$4 sm:$0xff]   ;;  %v22462_v30 = vld [vmem:[#allocation9 + $0xa18] ss:$40 sps:$4 sm:$0xff]  }
 0x886   : > { %15685 = vmatprep.subr.bf16.mxu1 %v22416_v53  ;;  %v22459_v52 = vld [vmem:[#allocation9 + $0x1410] ss:$40 sps:$4 sm:$0xff]   ;;  %v22467_v15 = vld [vmem:[#allocation9 + $0x1464] ss:$40 sps:$4 sm:$0xff]   ;;  %v22473_v60 = vld [vmem:[#allocation9 + $0x14b4] ss:$40 sps:$4 sm:$0xff]  }
 0x887   : > { %15555 = vmatpush1.bf16.msra.mxu0 %v22405_v18  ;;  %v22470_v17 = vld [vmem:[#allocation9 + $0xa6c] ss:$40 sps:$4 sm:$0xff]   ;;  %v22465_v18 = vld [vmem:[#allocation9 + $0x1460] ss:$40 sps:$4 sm:$0xff]   ;;  %v22476_v20 = vld [vmem:[#allocation9 + $0xabc] ss:$40 sps:$4 sm:$0xff]  }
 0x888   : > { %15556 = vmatprep.subr.bf16.mxu0 %v22413_v21  ;;  %v22468_v19 = vld [vmem:[#allocation9 + $0xa68] ss:$40 sps:$4 sm:$0xff]   ;;  %v22474_v53 = vld [vmem:[#allocation9 + $0xab8] ss:$40 sps:$4 sm:$0xff]  }
 0x889   : > { %15686 = vmatpush1.bf16.msra.mxu1 %v22414_v28  ;;  %v22471_v21 = vld [vmem:[#allocation9 + $0x14b0] ss:$40 sps:$4 sm:$0xff]   ;;  %v22482_v28 = vld [vmem:[#allocation9 + $0xb0c] ss:$40 sps:$4 sm:$0xff]  }
 0x88a   : > { %15687 = vmatprep.subr.bf16.mxu1 %v22422_v59  ;;  %v22480_v59 = vld [vmem:[#allocation9 + $0xb08] ss:$40 sps:$4 sm:$0xff]  }
 0x88b   : > { %15557 = vmatpush1.bf16.msra.mxu0 %v22411_v27  ;;  %v22479_v27 = vld [vmem:[#allocation9 + $0x1504] ss:$40 sps:$4 sm:$0xff]  }
 0x88c   : > { %15558 = vmatprep.subr.bf16.mxu0 %v22419_v31  ;;  %v22477_v31 = vld [vmem:[#allocation9 + $0x1500] ss:$40 sps:$4 sm:$0xff]  }
 0x88d   : > { %15688 = vmatpush1.bf16.msra.mxu1 %v22420_v38  ;;  %v22488_v38 = vld [vmem:[#allocation9 + $0xb5c] ss:$40 sps:$4 sm:$0xff]  }
 0x88e   : > { %15689 = vmatprep.subr.bf16.mxu1 %v22428_v39  ;;  %v22486_v39 = vld [vmem:[#allocation9 + $0xb58] ss:$40 sps:$4 sm:$0xff]  }
 0x88f   : > { %15559 = vmatpush1.bf16.msra.mxu0 %v22417_v37  ;;  %v22485_v37 = vld [vmem:[#allocation9 + $0x1554] ss:$40 sps:$4 sm:$0xff]  }
 0x890   : > { %15560 = vmatprep.subr.bf16.mxu0 %v22425_v11  ;;  %v22483_v11 = vld [vmem:[#allocation9 + $0x1550] ss:$40 sps:$4 sm:$0xff]  }
 0x891   : > { %15690 = vmatpush1.bf16.msra.mxu1 %v22426_v43  ;;  %v22494_v43 = vld [vmem:[#allocation9 + $0xbac] ss:$40 sps:$4 sm:$0xff]  }
 0x892   : > { %15691 = vmatprep.subr.bf16.mxu1 %v22434_v41  ;;  %v22492_v41 = vld [vmem:[#allocation9 + $0xba8] ss:$40 sps:$4 sm:$0xff]  }
 0x893   : > { %15561 = vmatpush1.bf16.msra.mxu0 %v22423_v42  ;;  %v22491_v42 = vld [vmem:[#allocation9 + $0x15a4] ss:$40 sps:$4 sm:$0xff]  }
 0x894   : > { %15562 = vmatprep.subr.bf16.mxu0 %v22431_v45  ;;  %v22489_v45 = vld [vmem:[#allocation9 + $0x15a0] ss:$40 sps:$4 sm:$0xff]  }
 0x895   : > { %15692 = vmatpush1.bf16.msra.mxu1 %v22432_v55  ;;  %v22500_v55 = vld [vmem:[#allocation9 + $0xbfc] ss:$40 sps:$4 sm:$0xff]  }
 0x896   : > { %15693 = vmatprep.subr.bf16.mxu1 %v22440_v24  ;;  %v22498_v24 = vld [vmem:[#allocation9 + $0xbf8] ss:$40 sps:$4 sm:$0xff]  }
 0x897   : > { %15563 = vmatpush1.bf16.msra.mxu0 %v22429_v54  ;;  %v22497_v54 = vld [vmem:[#allocation9 + $0x15f4] ss:$40 sps:$4 sm:$0xff]  }
 0x898   : > { %15564 = vmatprep.subr.bf16.mxu0 %v22437_v34  ;;  %v22495_v34 = vld [vmem:[#allocation9 + $0x15f0] ss:$40 sps:$4 sm:$0xff]  }
 0x899   : > { %15694 = vmatpush1.bf16.msra.mxu1 %v22438_v58  ;;  %v22506_v58 = vld [vmem:[#allocation9 + $0xc4c] ss:$40 sps:$4 sm:$0xff]  }
 0x89a   : > { %15695 = vmatprep.subr.bf16.mxu1 %v22446_v6  ;;  %v22504_v6 = vld [vmem:[#allocation9 + $0xc48] ss:$40 sps:$4 sm:$0xff]  }
 0x89b   : > { %15565 = vmatpush1.bf16.msra.mxu0 %v22435_v57  ;;  %v22503_v57 = vld [vmem:[#allocation9 + $0x1644] ss:$40 sps:$4 sm:$0xff]  }
 0x89c   : > { %15566 = vmatprep.subr.bf16.mxu0 %v22443_v36  ;;  %v22501_v36 = vld [vmem:[#allocation9 + $0x1640] ss:$40 sps:$4 sm:$0xff]  }
 0x89d   : > { %15696 = vmatpush1.bf16.msra.mxu1 %v22444_v33  ;;  %v22512_v33 = vld [vmem:[#allocation9 + $0xc9c] ss:$40 sps:$4 sm:$0xff]  }
 0x89e   : > { %15697 = vmatprep.subr.bf16.mxu1 %v22452_v0  ;;  %v22510_v0 = vld [vmem:[#allocation9 + $0xc98] ss:$40 sps:$4 sm:$0xff]  }
 0x89f   : > { %15567 = vmatpush1.bf16.msra.mxu0 %v22441_v62  ;;  %v22509_v62 = vld [vmem:[#allocation9 + $0x1694] ss:$40 sps:$4 sm:$0xff]  }
 0x8a0   : > { %15568 = vmatprep.subr.bf16.mxu0 %v22449_v63  ;;  %v22507_v63 = vld [vmem:[#allocation9 + $0x1690] ss:$40 sps:$4 sm:$0xff]  }
 0x8a1   : > { %15698 = vmatpush1.bf16.msra.mxu1 %v22450_v3  ;;  %v22518_v3 = vld [vmem:[#allocation9 + $0xcec] ss:$40 sps:$4 sm:$0xff]  }
 0x8a2   : > { %15699 = vmatprep.subr.bf16.mxu1 %v22458_v29  ;;  %v22516_v29 = vld [vmem:[#allocation9 + $0xce8] ss:$40 sps:$4 sm:$0xff]  }
 0x8a3   : > { %15569 = vmatpush1.bf16.msra.mxu0 %v22447_v2  ;;  %v22515_v2 = vld [vmem:[#allocation9 + $0x16e4] ss:$40 sps:$4 sm:$0xff]  }
 0x8a4   : > { %15570 = vmatprep.subr.bf16.mxu0 %v22455_v8  ;;  %v22513_v8 = vld [vmem:[#allocation9 + $0x16e0] ss:$40 sps:$4 sm:$0xff]  }
 0x8a5   : > { %15700 = vmatpush1.bf16.msra.mxu1 %v22456_v23  ;;  %v22524_v23 = vld [vmem:[#allocation9 + $0xd3c] ss:$40 sps:$4 sm:$0xff]  }
 0x8a6   : > { %15712 = vmatprep.subr.bf16.mxu1 %v22464_v48  ;;  %v22522_v48 = vld [vmem:[#allocation9 + $0xd38] ss:$40 sps:$4 sm:$0xff]  }
 0x8a7   : > { %15571 = vmatpush1.bf16.msra.mxu0 %v22453_v10  ;;  %v22521_v10 = vld [vmem:[#allocation9 + $0x1734] ss:$40 sps:$4 sm:$0xff]  }
 0x8a8   : > { %15583 = vmatprep.subr.bf16.mxu0 %v22461_v47  ;;  %15702 = vmatmul.mubr.bf16.vlgmr.msra.gmra.mrb[8].mxu1 %v25109_v12  ;;  %v22519_v47 = vld [vmem:[#allocation9 + $0x1730] ss:$40 sps:$4 sm:$0xff]  }
 0x8a9   : > { %15713 = vmatpush1.bf16.msra.mxu1 %v22462_v30  ;;  %15744 = vmatprep.mubr.bf16.mxu1 %v25118_v26  ;;  %v22530_v30 = vld [vmem:[#allocation9 + $0xd8c] ss:$40 sps:$4 sm:$0xff]  }
 0x8aa   : > { %15573 = vmatmul.mubr.bf16.vlgmr.msra.gmra.mrb[4].mxu0 %v25144_v1  ;;  %15714 = vmatprep.subr.bf16.mxu1 %v22470_v17  ;;  %v22528_v17 = vld [vmem:[#allocation9 + $0xd88] ss:$40 sps:$4 sm:$0xff]  }
 0x8ab   : > { %15584 = vmatpush1.bf16.msra.mxu0 %v22459_v52  ;;  %15615 = vmatprep.mubr.bf16.mxu0 %v25146_v9  ;;  %v22527_v52 = vld [vmem:[#allocation9 + $0x1784] ss:$40 sps:$4 sm:$0xff]  }
 0x8ac   : > { %15585 = vmatprep.subr.bf16.mxu0 %v22467_v15  ;;  %v22525_v15 = vld [vmem:[#allocation9 + $0x1780] ss:$40 sps:$4 sm:$0xff]  }
 0x8ad   : > { %15715 = vmatpush1.bf16.msra.mxu1 %v22468_v19  ;;  %v22536_v19 = vld [vmem:[#allocation9 + $0xddc] ss:$40 sps:$4 sm:$0xff]  }
 0x8ae   : > { %15716 = vmatprep.subr.bf16.mxu1 %v22476_v20  ;;  %v22534_v20 = vld [vmem:[#allocation9 + $0xdd8] ss:$40 sps:$4 sm:$0xff]  }
 0x8af   : > { %15586 = vmatpush1.bf16.msra.mxu0 %v22465_v18  ;;  %v22533_v18 = vld [vmem:[#allocation9 + $0x17d4] ss:$40 sps:$4 sm:$0xff]  }
 0x8b0   : > { %15587 = vmatprep.subr.bf16.mxu0 %v22473_v60  ;;  %v22531_v60 = vld [vmem:[#allocation9 + $0x17d0] ss:$40 sps:$4 sm:$0xff]  }
 0x8b1   : > { %15717 = vmatpush1.bf16.msra.mxu1 %v22474_v53  ;;  %v22542_v53 = vld [vmem:[#allocation9 + $0xe2c] ss:$40 sps:$4 sm:$0xff]  }
 0x8b2   : > { %15718 = vmatprep.subr.bf16.mxu1 %v22482_v28  ;;  %v22540_v28 = vld [vmem:[#allocation9 + $0xe28] ss:$40 sps:$4 sm:$0xff]  }
 0x8b3   : > { %15588 = vmatpush1.bf16.msra.mxu0 %v22471_v21  ;;  %v22539_v21 = vld [vmem:[#allocation9 + $0x1824] ss:$40 sps:$4 sm:$0xff]  }
 0x8b4   : > { %15589 = vmatprep.subr.bf16.mxu0 %v22479_v27  ;;  %v22537_v27 = vld [vmem:[#allocation9 + $0x1820] ss:$40 sps:$4 sm:$0xff]  }
 0x8b5   : > { %15719 = vmatpush1.bf16.msra.mxu1 %v22480_v59  ;;  %v22548_v59 = vld [vmem:[#allocation9 + $0xe7c] ss:$40 sps:$4 sm:$0xff]  }
 0x8b6   : > { %15720 = vmatprep.subr.bf16.mxu1 %v22488_v38  ;;  %v22546_v38 = vld [vmem:[#allocation9 + $0xe78] ss:$40 sps:$4 sm:$0xff]  }
 0x8b7   : > { %15590 = vmatpush1.bf16.msra.mxu0 %v22477_v31  ;;  %v22545_v31 = vld [vmem:[#allocation9 + $0x1874] ss:$40 sps:$4 sm:$0xff]  }
 0x8b8   : > { %15591 = vmatprep.subr.bf16.mxu0 %v22485_v37  ;;  %v22543_v37 = vld [vmem:[#allocation9 + $0x1870] ss:$40 sps:$4 sm:$0xff]  }
 0x8b9   : > { %15721 = vmatpush1.bf16.msra.mxu1 %v22486_v39  ;;  %v22554_v39 = vld [vmem:[#allocation9 + $0xecc] ss:$40 sps:$4 sm:$0xff]  }
 0x8ba   : > { %15722 = vmatprep.subr.bf16.mxu1 %v22494_v43  ;;  %v22552_v43 = vld [vmem:[#allocation9 + $0xec8] ss:$40 sps:$4 sm:$0xff]  }
 0x8bb   : > { %15592 = vmatpush1.bf16.msra.mxu0 %v22483_v11  ;;  %v22551_v11 = vld [vmem:[#allocation9 + $0x18c4] ss:$40 sps:$4 sm:$0xff]  }
 0x8bc   : > { %15593 = vmatprep.subr.bf16.mxu0 %v22491_v42  ;;  %v22549_v42 = vld [vmem:[#allocation9 + $0x18c0] ss:$40 sps:$4 sm:$0xff]  }
 0x8bd   : > { %15723 = vmatpush1.bf16.msra.mxu1 %v22492_v41  ;;  %v22560_v41 = vld [vmem:[#allocation9 + $0x24] ss:$40 sps:$4 sm:$0xff]  }
 0x8be   : > { %15724 = vmatprep.subr.bf16.mxu1 %v22500_v55  ;;  %v22558_v55 = vld [vmem:[#allocation9 + $0x20] ss:$40 sps:$4 sm:$0xff]  }
 0x8bf   : > { %15594 = vmatpush1.bf16.msra.mxu0 %v22489_v45  ;;  %v22557_v45 = vld [vmem:[#allocation9 + $0xf1c] ss:$40 sps:$4 sm:$0xff]  }
 0x8c0   : > { %15595 = vmatprep.subr.bf16.mxu0 %v22497_v54  ;;  %v22555_v54 = vld [vmem:[#allocation9 + $0xf18] ss:$40 sps:$4 sm:$0xff]  }
 0x8c1   : > { %15725 = vmatpush1.bf16.msra.mxu1 %v22498_v24  ;;  %v22566_v24 = vld [vmem:[#allocation9 + $0x74] ss:$40 sps:$4 sm:$0xff]  }
 0x8c2   : > { %15726 = vmatprep.subr.bf16.mxu1 %v22506_v58  ;;  %v22564_v58 = vld [vmem:[#allocation9 + $0x70] ss:$40 sps:$4 sm:$0xff]  }
 0x8c3   : > { %15596 = vmatpush1.bf16.msra.mxu0 %v22495_v34  ;;  %v22563_v34 = vld [vmem:[#allocation9 + $0xf6c] ss:$40 sps:$4 sm:$0xff]  }
 0x8c4   : > { %15597 = vmatprep.subr.bf16.mxu0 %v22503_v57  ;;  %v22561_v57 = vld [vmem:[#allocation9 + $0xf68] ss:$40 sps:$4 sm:$0xff]  }
 0x8c5   : > { %15727 = vmatpush1.bf16.msra.mxu1 %v22504_v6  ;;  %v22572_v6 = vld [vmem:[#allocation9 + $0xc4] ss:$40 sps:$4 sm:$0xff]  }
 0x8c6   : > { %15728 = vmatprep.subr.bf16.mxu1 %v22512_v33  ;;  %v22570_v33 = vld [vmem:[#allocation9 + $0xc0] ss:$40 sps:$4 sm:$0xff]  }
 0x8c7   : > { %15598 = vmatpush1.bf16.msra.mxu0 %v22501_v36  ;;  %v22569_v36 = vld [vmem:[#allocation9 + $0xfbc] ss:$40 sps:$4 sm:$0xff]  }
 0x8c8   : > { %15599 = vmatprep.subr.bf16.mxu0 %v22509_v62  ;;  %v22567_v62 = vld [vmem:[#allocation9 + $0xfb8] ss:$40 sps:$4 sm:$0xff]  }
 0x8c9   : > { %15729 = vmatpush1.bf16.msra.mxu1 %v22510_v0  ;;  %v22578_v0 = vld [vmem:[#allocation9 + $0x114] ss:$40 sps:$4 sm:$0xff]  }
 0x8ca   : > { %15730 = vmatprep.subr.bf16.mxu1 %v22518_v3  ;;  %v22576_v3 = vld [vmem:[#allocation9 + $0x110] ss:$40 sps:$4 sm:$0xff]  }
 0x8cb   : > { %15600 = vmatpush1.bf16.msra.mxu0 %v22507_v63  ;;  %v22575_v63 = vld [vmem:[#allocation9 + $0x100c] ss:$40 sps:$4 sm:$0xff]  }
 0x8cc   : > { %15601 = vmatprep.subr.bf16.mxu0 %v22515_v2  ;;  %v22573_v2 = vld [vmem:[#allocation9 + $0x1008] ss:$40 sps:$4 sm:$0xff]  }
 0x8cd   : > { %15731 = vmatpush1.bf16.msra.mxu1 %v22516_v29  ;;  %v22584_v29 = vld [vmem:[#allocation9 + $0x164] ss:$40 sps:$4 sm:$0xff]  }
 0x8ce   : > { %15732 = vmatprep.subr.bf16.mxu1 %v22524_v23  ;;  %v22587_v23 = vld [vmem:[#allocation9 + $0x10ac] ss:$40 sps:$4 sm:$0xff]  }
 0x8cf   : > { %15602 = vmatpush1.bf16.msra.mxu0 %v22513_v8  ;;  %v22581_v8 = vld [vmem:[#allocation9 + $0x105c] ss:$40 sps:$4 sm:$0xff]  }
 0x8d0   : > { %15603 = vmatprep.subr.bf16.mxu0 %v22521_v10  ;;  %v22579_v10 = vld [vmem:[#allocation9 + $0x1058] ss:$40 sps:$4 sm:$0xff]  }
 0x8d1   : > { %15733 = vmatpush1.bf16.msra.mxu1 %v22522_v48  ;;  %v10942_v48 = vrot.slane %v25180_v32, %v10037_v7  ;;  %v22591_v7 = vld [vmem:[#allocation9 + $0x10f8] ss:$40 sps:$4 sm:$0xff]  }
 0x8d2   : > { %15734 = vmatprep.subr.bf16.mxu1 %v22530_v30  ;;  %v22585_v30 = vld [vmem:[#allocation9 + $0x10a8] ss:$40 sps:$4 sm:$0xff]  }
 0x8d3   : > { %15604 = vmatpush1.bf16.msra.mxu0 %v22519_v47  ;;  %v22590_v47 = vld [vmem:[#allocation9 + $0x1b4] ss:$40 sps:$4 sm:$0xff]  }
 0x8d4   : > { %15605 = vmatprep.subr.bf16.mxu0 %v22527_v52  ;;  %v10946_v52 = vrot.slane %v25180_v32, %v10041_v44  ;;  %v22599_v44 = vld [vmem:[#allocation9 + $0x114c] ss:$40 sps:$4 sm:$0xff]  }
 0x8d5   : > { %15735 = vmatpush1.bf16.msra.mxu1 %v22528_v17  ;;  %v22593_v17 = vld [vmem:[#allocation9 + $0x10fc] ss:$40 sps:$4 sm:$0xff]  }
 0x8d6   : > { %15736 = vmatprep.subr.bf16.mxu1 %v22536_v19  ;;  %v22602_v32 = vld [vmem:[#allocation9 + $0x254] ss:$40 sps:$4 sm:$0xff]  }
 0x8d7   : > { %15606 = vmatpush1.bf16.msra.mxu0 %v22525_v15  ;;  %v22588_v15 = vld [vmem:[#allocation9 + $0x1b0] ss:$40 sps:$4 sm:$0xff]  }
 0x8d8   : > { %15607 = vmatprep.subr.bf16.mxu0 %v22533_v18  ;;  %v22596_v18 = vld [vmem:[#allocation9 + $0x204] ss:$40 sps:$4 sm:$0xff]  }
 0x8d9   : > { %15737 = vmatpush1.bf16.msra.mxu1 %v22534_v20 }
 0x8da   : > { %15738 = vmatprep.subr.bf16.mxu1 %v22542_v53 }
 0x8db   : > { %15608 = vmatpush1.bf16.msra.mxu0 %v22531_v60 }
 0x8dc   : > { %15609 = vmatprep.subr.bf16.mxu0 %v22539_v21 }
 0x8dd   : > { %15739 = vmatpush1.bf16.msra.mxu1 %v22540_v28 }
 0x8de   : > { %15740 = vmatprep.subr.bf16.mxu1 %v22548_v59 }
 0x8df   : > { %15610 = vmatpush1.bf16.msra.mxu0 %v22537_v27  ;;  %v22594_v27 = vld [vmem:[#allocation9 + $0x200] ss:$40 sps:$4 sm:$0xff]  }
 0x8e0   : > { %15611 = vmatprep.subr.bf16.mxu0 %v22545_v31 }
 0x8e1   : > { %15741 = vmatpush1.bf16.msra.mxu1 %v22546_v38 }
 0x8e2   : > { %15742 = vmatprep.subr.bf16.mxu1 %v22554_v39 }
 0x8e3   : > { %15612 = vmatpush1.bf16.msra.mxu0 %v22543_v37 }
 0x8e4   : > { %15613 = vmatprep.subr.bf16.mxu0 %v22551_v11 }
 0x8e5   : > { %15743 = vmatpush1.bf16.msra.mxu1 %v22552_v43  ;;  %v22600_v43 = vld [vmem:[#allocation9 + $0x250] ss:$40 sps:$4 sm:$0xff]  }
 0x8e6   : > { %15755 = vmatprep.subr.bf16.mxu1 %v22557_v45 }
 0x8e7   : > { %15614 = vmatpush1.bf16.msra.mxu0 %v22549_v42  ;;  %v22597_v42 = vld [vmem:[#allocation9 + $0x1148] ss:$40 sps:$4 sm:$0xff]  }
 0x8e8   : > { %15841 = vmatprep.subr.bf16.mxu0 %v22560_v41  ;;  %15745 = vmatmul.mubr.bf16.vlgmr.msra.gmra.mrb[8].mxu1 %v25126_v16  ;;  %v22605_v41 = vld [vmem:[#allocation9 + $0x119c] ss:$40 sps:$4 sm:$0xff]  }
 0x8e9   : > { %15756 = vmatpush1.bf16.msra.mxu1 %v22555_v54  ;;  %15787 = vmatprep.mubr.bf16.mxu1 %v25134_v5  ;;  %v22608_v54 = vld [vmem:[#allocation9 + $0x2a4] ss:$40 sps:$4 sm:$0xff]  }
 0x8ea   : > { %15616 = vmatmul.mubr.bf16.vlgmr.msra.gmra.mrb[4].mxu0 %v25154_v40  ;;  %15757 = vmatprep.subr.bf16.mxu1 %v22563_v34  ;;  %v22603_v34 = vld [vmem:[#allocation9 + $0x1198] ss:$40 sps:$4 sm:$0xff]  }
 0x8eb   : > { %15842 = vmatpush1.bf16.msra.mxu0 %v22558_v55  ;;  %15873 = vmatprep.mubr.bf16.mxu0 %v25096_v13  ;;  %v22582_v13 = vld [vmem:[#allocation9 + $0x160] ss:$40 sps:$4 sm:$0xff]  }
 0x8ec   : > { %15843 = vmatprep.subr.bf16.mxu0 %v22566_v24  ;;  %v22606_v24 = vld [vmem:[#allocation9 + $0x2a0] ss:$40 sps:$4 sm:$0xff]  }
 0x8ed   : > { %15758 = vmatpush1.bf16.msra.mxu1 %v22561_v57  ;;  %v22611_v57 = vld [vmem:[#allocation9 + $0x11ec] ss:$40 sps:$4 sm:$0xff]  }
 0x8ee   : > { %15759 = vmatprep.subr.bf16.mxu1 %v22569_v36  ;;  %v22609_v36 = vld [vmem:[#allocation9 + $0x11e8] ss:$40 sps:$4 sm:$0xff]  }
 0x8ef   : > { %15844 = vmatpush1.bf16.msra.mxu0 %v22564_v58  ;;  %v22614_v58 = vld [vmem:[#allocation9 + $0x2f4] ss:$40 sps:$4 sm:$0xff]  }
 0x8f0   : > { %15845 = vmatprep.subr.bf16.mxu0 %v22572_v6  ;;  %v22612_v6 = vld [vmem:[#allocation9 + $0x2f0] ss:$40 sps:$4 sm:$0xff]  }
 0x8f1   : > { %15760 = vmatpush1.bf16.msra.mxu1 %v22567_v62  ;;  %v22617_v62 = vld [vmem:[#allocation9 + $0x123c] ss:$40 sps:$4 sm:$0xff]  }
 0x8f2   : > { %15761 = vmatprep.subr.bf16.mxu1 %v22575_v63  ;;  %v22615_v63 = vld [vmem:[#allocation9 + $0x1238] ss:$40 sps:$4 sm:$0xff]  }
 0x8f3   : > { %15846 = vmatpush1.bf16.msra.mxu0 %v22570_v33  ;;  %v22620_v33 = vld [vmem:[#allocation9 + $0x344] ss:$40 sps:$4 sm:$0xff]  }
 0x8f4   : > { %15847 = vmatprep.subr.bf16.mxu0 %v22578_v0  ;;  %v22618_v0 = vld [vmem:[#allocation9 + $0x340] ss:$40 sps:$4 sm:$0xff]  }
 0x8f5   : > { %15762 = vmatpush1.bf16.msra.mxu1 %v22573_v2  ;;  %v22623_v2 = vld [vmem:[#allocation9 + $0x128c] ss:$40 sps:$4 sm:$0xff]  }
 0x8f6   : > { %15763 = vmatprep.subr.bf16.mxu1 %v22581_v8  ;;  %v22621_v8 = vld [vmem:[#allocation9 + $0x1288] ss:$40 sps:$4 sm:$0xff]  }
 0x8f7   : > { %15848 = vmatpush1.bf16.msra.mxu0 %v22576_v3  ;;  %v22626_v3 = vld [vmem:[#allocation9 + $0x394] ss:$40 sps:$4 sm:$0xff]  }
 0x8f8   : > { %15849 = vmatprep.subr.bf16.mxu0 %v22584_v29  ;;  %v22624_v29 = vld [vmem:[#allocation9 + $0x390] ss:$40 sps:$4 sm:$0xff]  }
 0x8f9   : > { %15764 = vmatpush1.bf16.msra.mxu1 %v22579_v10  ;;  %v22629_v10 = vld [vmem:[#allocation9 + $0x12dc] ss:$40 sps:$4 sm:$0xff]  }
 0x8fa   : > { %15765 = vmatprep.subr.bf16.mxu1 %v22587_v23  ;;  %v22627_v23 = vld [vmem:[#allocation9 + $0x12d8] ss:$40 sps:$4 sm:$0xff]  }
 0x8fb   : > { %15850 = vmatpush1.bf16.msra.mxu0 %v22582_v13  ;;  %v15402_v19 = vpop.f32.mrb[4].mxu1  ;;  %v22632_v13 = vld [vmem:[#allocation9 + $0x3e4] ss:$40 sps:$4 sm:$0xff]  }
 0x8fc   : > { %15851 = vmatprep.subr.bf16.mxu0 %v22590_v47  ;;  %v19549_v60 = vadd.f32 %v15402_v19, %v10942_v48  ;;  %v15404_v20 = vpop.f32.mrb[5].mxu1  ;;  %v22630_v47 = vld [vmem:[#allocation9 + $0x3e0] ss:$40 sps:$4 sm:$0xff]  }
 0x8fd   : > { %v19550_v21 = vadd.f32 %v15404_v20, %v10946_v52  ;;  %v15406_v53 = vpop.f32.mrb[6].mxu1  ;;  %15766 = vmatpush1.bf16.msra.mxu1 %v22585_v30  ;;  %v22633_v30 = vld [vmem:[#allocation9 + $0x1328] ss:$40 sps:$4 sm:$0xff]   ;;  %v22639_v19 = vld [vmem:[#allocation9 + $0x1378] ss:$40 sps:$4 sm:$0xff]  }
 0x8fe   : > { %v19551_v28 = vadd.f32 %v15406_v53, %v10942_v48  ;;  %v15408_v31 = vpop.f32.mrb[7].mxu1  ;;  %15767 = vmatprep.subr.bf16.mxu1 %v22593_v17  ;;  %v16058_v37 = vmax.f32 %v19549_v60, 0.0  ;;  %v22635_v48 = vld [vmem:[#allocation9 + $0x132c] ss:$40 sps:$4 sm:$0xff]   ;;  %v22641_v17 = vld [vmem:[#allocation9 + $0x137c] ss:$40 sps:$4 sm:$0xff]  }
 0x8ff   : > { %15852 = vmatpush1.bf16.msra.mxu0 %v22588_v15  ;;  %v19552_v59 = vadd.f32 %v15408_v31, %v10946_v52  ;;  %v16059_v11 = vmax.f32 %v19550_v21, 0.0  ;;  %v22638_v52 = vld [vmem:[#allocation9 + $0x434] ss:$40 sps:$4 sm:$0xff]   ;;  %v22636_v15 = vld [vmem:[#allocation9 + $0x430] ss:$40 sps:$4 sm:$0xff]  }
 0x900   : > { %15853 = vmatprep.subr.bf16.mxu0 %v22596_v18  ;;  %v16068_v38 = vmax.f32 %v19551_v28, 0.0  ;;  %v22644_v18 = vld [vmem:[#allocation9 + $0x484] ss:$40 sps:$4 sm:$0xff]   ;;  %v22642_v60 = vld [vmem:[#allocation9 + $0x480] ss:$40 sps:$4 sm:$0xff]  }
 0x901   : > { %v16069_v39 = vmax.f32 %v19552_v59, 0.0  ;;  %15768 = vmatpush1.bf16.msra.mxu1 %v22591_v7  ;;  %v22647_v20 = vld [vmem:[#allocation9 + $0x13cc] ss:$40 sps:$4 sm:$0xff]   ;;  %v22645_v53 = vld [vmem:[#allocation9 + $0x13c8] ss:$40 sps:$4 sm:$0xff]  }
 0x902   : > { %v25208_v45 = vpack.c.bf16 %v16068_v38, %v16058_v37  ;;  %15769 = vmatprep.subr.bf16.mxu1 %v22599_v44  ;;  %v22650_v21 = vld [vmem:[#allocation9 + $0x4d4] ss:$40 sps:$4 sm:$0xff]   ;;  %v22648_v7 = vld [vmem:[#allocation9 + $0x4d0] ss:$40 sps:$4 sm:$0xff]   ;;  %v22656_v28 = vld [vmem:[#allocation9 + $0x524] ss:$40 sps:$4 sm:$0xff]  }
 0x903   : > { %15854 = vmatpush1.bf16.msra.mxu0 %v22594_v27  ;;  %v25210_v55 = vpack.c.bf16 %v16069_v39, %v16059_v11  ;;  %v22653_v27 = vld [vmem:[#allocation9 + $0x141c] ss:$40 sps:$4 sm:$0xff]   ;;  %v22651_v31 = vld [vmem:[#allocation9 + $0x1418] ss:$40 sps:$4 sm:$0xff]   ;;  %v22657_v37 = vld [vmem:[#allocation9 + $0x1468] ss:$40 sps:$4 sm:$0xff]  }
 0x904   : > { %15855 = vmatprep.subr.bf16.mxu0 %v22602_v32  ;;  %v22654_v44 = vld [vmem:[#allocation9 + $0x520] ss:$40 sps:$4 sm:$0xff]   ;;  %v22659_v32 = vld [vmem:[#allocation9 + $0x146c] ss:$40 sps:$4 sm:$0xff]   ;;  %v22660_v38 = vld [vmem:[#allocation9 + $0x570] ss:$40 sps:$4 sm:$0xff]  }
 0x905   : > { %15770 = vmatpush1.bf16.msra.mxu1 %v22597_v42  ;;  %v22662_v59 = vld [vmem:[#allocation9 + $0x574] ss:$40 sps:$4 sm:$0xff]   ;;  %v22668_v39 = vld [vmem:[#allocation9 + $0x5c4] ss:$40 sps:$4 sm:$0xff]   ;;  %v22663_v42 = vld [vmem:[#allocation9 + $0x14b8] ss:$40 sps:$4 sm:$0xff]  }
 0x906   : > { %15771 = vmatprep.subr.bf16.mxu1 %v22605_v41  ;;  %v22665_v11 = vld [vmem:[#allocation9 + $0x14bc] ss:$40 sps:$4 sm:$0xff]   ;;  %v22671_v41 = vld [vmem:[#allocation9 + $0x150c] ss:$40 sps:$4 sm:$0xff]  }
 0x907   : > { %15856 = vmatpush1.bf16.msra.mxu0 %v22600_v43  ;;  %v22666_v43 = vld [vmem:[#allocation9 + $0x5c0] ss:$40 sps:$4 sm:$0xff]  }
 0x908   : > { %15857 = vmatprep.subr.bf16.mxu0 %v22608_v54  ;;  %v22669_v54 = vld [vmem:[#allocation9 + $0x1508] ss:$40 sps:$4 sm:$0xff]  }
 0x909   : > { %15772 = vmatpush1.bf16.msra.mxu1 %v22603_v34  ;;  %v22672_v34 = vld [vmem:[#allocation9 + $0x610] ss:$40 sps:$4 sm:$0xff]  }
 0x90a   : > { %15773 = vmatprep.subr.bf16.mxu1 %v22611_v57  ;;  %v22680_v57 = vld [vmem:[#allocation9 + $0x664] ss:$40 sps:$4 sm:$0xff]  }
 0x90b   : > { %15858 = vmatpush1.bf16.msra.mxu0 %v22606_v24  ;;  %v22677_v24 = vld [vmem:[#allocation9 + $0x155c] ss:$40 sps:$4 sm:$0xff]  }
 0x90c   : > { %15859 = vmatprep.subr.bf16.mxu0 %v22614_v58  ;;  %v22675_v58 = vld [vmem:[#allocation9 + $0x1558] ss:$40 sps:$4 sm:$0xff]  }
 0x90d   : > { %15774 = vmatpush1.bf16.msra.mxu1 %v22609_v36  ;;  %v22683_v36 = vld [vmem:[#allocation9 + $0x15ac] ss:$40 sps:$4 sm:$0xff]  }
 0x90e   : > { %15775 = vmatprep.subr.bf16.mxu1 %v22617_v62  ;;  %v22681_v62 = vld [vmem:[#allocation9 + $0x15a8] ss:$40 sps:$4 sm:$0xff]  }
 0x90f   : > { %15860 = vmatpush1.bf16.msra.mxu0 %v22612_v6  ;;  %v22686_v6 = vld [vmem:[#allocation9 + $0x6b4] ss:$40 sps:$4 sm:$0xff]  }
 0x910   : > { %15861 = vmatprep.subr.bf16.mxu0 %v22620_v33  ;;  %v22684_v33 = vld [vmem:[#allocation9 + $0x6b0] ss:$40 sps:$4 sm:$0xff]  }
 0x911   : > { %15776 = vmatpush1.bf16.msra.mxu1 %v22615_v63  ;;  %v22689_v63 = vld [vmem:[#allocation9 + $0x15fc] ss:$40 sps:$4 sm:$0xff]  }
 0x912   : > { %15777 = vmatprep.subr.bf16.mxu1 %v22623_v2  ;;  %v22687_v2 = vld [vmem:[#allocation9 + $0x15f8] ss:$40 sps:$4 sm:$0xff]  }
 0x913   : > { %15862 = vmatpush1.bf16.msra.mxu0 %v22618_v0  ;;  %v22692_v0 = vld [vmem:[#allocation9 + $0x704] ss:$40 sps:$4 sm:$0xff]  }
 0x914   : > { %15863 = vmatprep.subr.bf16.mxu0 %v22626_v3  ;;  %v22690_v3 = vld [vmem:[#allocation9 + $0x700] ss:$40 sps:$4 sm:$0xff]  }
 0x915   : > { %15778 = vmatpush1.bf16.msra.mxu1 %v22621_v8  ;;  %v22695_v8 = vld [vmem:[#allocation9 + $0x164c] ss:$40 sps:$4 sm:$0xff]  }
 0x916   : > { %15779 = vmatprep.subr.bf16.mxu1 %v22629_v10  ;;  %v22693_v10 = vld [vmem:[#allocation9 + $0x1648] ss:$40 sps:$4 sm:$0xff]  }
 0x917   : > { %15864 = vmatpush1.bf16.msra.mxu0 %v22624_v29  ;;  %v22698_v29 = vld [vmem:[#allocation9 + $0x754] ss:$40 sps:$4 sm:$0xff]  }
 0x918   : > { %15865 = vmatprep.subr.bf16.mxu0 %v22632_v13  ;;  %v22696_v13 = vld [vmem:[#allocation9 + $0x750] ss:$40 sps:$4 sm:$0xff]  }
 0x919   : > { %15780 = vmatpush1.bf16.msra.mxu1 %v22627_v23  ;;  %v22701_v23 = vld [vmem:[#allocation9 + $0x169c] ss:$40 sps:$4 sm:$0xff]  }
 0x91a   : > { %15781 = vmatprep.subr.bf16.mxu1 %v22635_v48  ;;  %v22699_v48 = vld [vmem:[#allocation9 + $0x1698] ss:$40 sps:$4 sm:$0xff]  }
 0x91b   : > { %15866 = vmatpush1.bf16.msra.mxu0 %v22630_v47  ;;  %v22704_v47 = vld [vmem:[#allocation9 + $0x7a4] ss:$40 sps:$4 sm:$0xff]  }
 0x91c   : > { %15867 = vmatprep.subr.bf16.mxu0 %v22638_v52  ;;  %v22702_v52 = vld [vmem:[#allocation9 + $0x7a0] ss:$40 sps:$4 sm:$0xff]  }
 0x91d   : > { %15782 = vmatpush1.bf16.msra.mxu1 %v22633_v30  ;;  %v22707_v30 = vld [vmem:[#allocation9 + $0x16ec] ss:$40 sps:$4 sm:$0xff]  }
 0x91e   : > { %15783 = vmatprep.subr.bf16.mxu1 %v22641_v17  ;;  %v22705_v17 = vld [vmem:[#allocation9 + $0x16e8] ss:$40 sps:$4 sm:$0xff]  }
 0x91f   : > { %15868 = vmatpush1.bf16.msra.mxu0 %v22636_v15  ;;  %v22710_v15 = vld [vmem:[#allocation9 + $0x7f4] ss:$40 sps:$4 sm:$0xff]  }
 0x920   : > { %15869 = vmatprep.subr.bf16.mxu0 %v22644_v18  ;;  %v22708_v18 = vld [vmem:[#allocation9 + $0x7f0] ss:$40 sps:$4 sm:$0xff]  }
 0x921   : > { %15784 = vmatpush1.bf16.msra.mxu1 %v22639_v19  ;;  %v22713_v19 = vld [vmem:[#allocation9 + $0x173c] ss:$40 sps:$4 sm:$0xff]  }
 0x922   : > { %15785 = vmatprep.subr.bf16.mxu1 %v22647_v20  ;;  %v22711_v20 = vld [vmem:[#allocation9 + $0x1738] ss:$40 sps:$4 sm:$0xff]  }
 0x923   : > { %15870 = vmatpush1.bf16.msra.mxu0 %v22642_v60  ;;  %v22716_v60 = vld [vmem:[#allocation9 + $0x844] ss:$40 sps:$4 sm:$0xff]  }
 0x924   : > { %15871 = vmatprep.subr.bf16.mxu0 %v22650_v21  ;;  %v22714_v21 = vld [vmem:[#allocation9 + $0x840] ss:$40 sps:$4 sm:$0xff]  }
 0x925   : > { %15786 = vmatpush1.bf16.msra.mxu1 %v22645_v53  ;;  %v22719_v53 = vld [vmem:[#allocation9 + $0x178c] ss:$40 sps:$4 sm:$0xff]  }
 0x926   : > { %15798 = vmatprep.subr.bf16.mxu1 %v22653_v27  ;;  %v22717_v27 = vld [vmem:[#allocation9 + $0x1788] ss:$40 sps:$4 sm:$0xff]  }
 0x927   : > { %15872 = vmatpush1.bf16.msra.mxu0 %v22648_v7  ;;  %v22722_v7 = vld [vmem:[#allocation9 + $0x894] ss:$40 sps:$4 sm:$0xff]  }
 0x928   : > { %15884 = vmatprep.subr.bf16.mxu0 %v22656_v28  ;;  %15788 = vmatmul.mubr.bf16.vlgmr.msra.gmra.mrb[8].mxu1 %v25144_v1  ;;  %v22720_v28 = vld [vmem:[#allocation9 + $0x890] ss:$40 sps:$4 sm:$0xff]  }
 0x929   : > { %15799 = vmatpush1.bf16.msra.mxu1 %v22651_v31  ;;  %15830 = vmatprep.mubr.bf16.mxu1 %v25146_v9  ;;  %v22725_v31 = vld [vmem:[#allocation9 + $0x17dc] ss:$40 sps:$4 sm:$0xff]  }
 0x92a   : > { %15874 = vmatmul.mubr.bf16.vlgmr.msra.gmra.mrb[8].mxu0 %v25107_v56  ;;  %15800 = vmatprep.subr.bf16.mxu1 %v22659_v32  ;;  %v22674_v56 = vld [vmem:[#allocation9 + $0x614] ss:$40 sps:$4 sm:$0xff]   ;;  %v22723_v32 = vld [vmem:[#allocation9 + $0x17d8] ss:$40 sps:$4 sm:$0xff]  }
 0x92b   : > { %15885 = vmatpush1.bf16.msra.mxu0 %v22654_v44  ;;  %15916 = vmatprep.mubr.bf16.mxu0 %v25098_v14  ;;  %v22678_v14 = vld [vmem:[#allocation9 + $0x660] ss:$40 sps:$4 sm:$0xff]   ;;  %v22728_v44 = vld [vmem:[#allocation9 + $0x8e4] ss:$40 sps:$4 sm:$0xff]  }
 0x92c   : > { %15886 = vmatprep.subr.bf16.mxu0 %v22662_v59  ;;  %v22726_v59 = vld [vmem:[#allocation9 + $0x8e0] ss:$40 sps:$4 sm:$0xff]  }
 0x92d   : > { %15801 = vmatpush1.bf16.msra.mxu1 %v22657_v37  ;;  %v22731_v37 = vld [vmem:[#allocation9 + $0x182c] ss:$40 sps:$4 sm:$0xff]  }
 0x92e   : > { %15802 = vmatprep.subr.bf16.mxu1 %v22665_v11  ;;  %v22729_v11 = vld [vmem:[#allocation9 + $0x1828] ss:$40 sps:$4 sm:$0xff]  }
 0x92f   : > { %15887 = vmatpush1.bf16.msra.mxu0 %v22660_v38  ;;  %v22734_v38 = vld [vmem:[#allocation9 + $0x934] ss:$40 sps:$4 sm:$0xff]  }
 0x930   : > { %15888 = vmatprep.subr.bf16.mxu0 %v22668_v39  ;;  %v22732_v39 = vld [vmem:[#allocation9 + $0x930] ss:$40 sps:$4 sm:$0xff]  }
 0x931   : > { %15803 = vmatpush1.bf16.msra.mxu1 %v22663_v42  ;;  %v22737_v42 = vld [vmem:[#allocation9 + $0x187c] ss:$40 sps:$4 sm:$0xff]  }
 0x932   : > { %15804 = vmatprep.subr.bf16.mxu1 %v22671_v41  ;;  %v22735_v41 = vld [vmem:[#allocation9 + $0x1878] ss:$40 sps:$4 sm:$0xff]  }
 0x933   : > { %15889 = vmatpush1.bf16.msra.mxu0 %v22666_v43  ;;  %v22740_v43 = vld [vmem:[#allocation9 + $0x984] ss:$40 sps:$4 sm:$0xff]  }
 0x934   : > { %15890 = vmatprep.subr.bf16.mxu0 %v22674_v56  ;;  %v22738_v56 = vld [vmem:[#allocation9 + $0x980] ss:$40 sps:$4 sm:$0xff]  }
 0x935   : > { %15805 = vmatpush1.bf16.msra.mxu1 %v22669_v54  ;;  %v22743_v54 = vld [vmem:[#allocation9 + $0x18cc] ss:$40 sps:$4 sm:$0xff]  }
 0x936   : > { %15806 = vmatprep.subr.bf16.mxu1 %v22677_v24  ;;  %v22741_v24 = vld [vmem:[#allocation9 + $0x18c8] ss:$40 sps:$4 sm:$0xff]  }
 0x937   : > { %15891 = vmatpush1.bf16.msra.mxu0 %v22672_v34  ;;  %v22746_v34 = vld [vmem:[#allocation9 + $0x9d4] ss:$40 sps:$4 sm:$0xff]  }
 0x938   : > { %15892 = vmatprep.subr.bf16.mxu0 %v22680_v57  ;;  %v22744_v57 = vld [vmem:[#allocation9 + $0x9d0] ss:$40 sps:$4 sm:$0xff]  }
 0x939   : > { %15807 = vmatpush1.bf16.msra.mxu1 %v22675_v58  ;;  %v22749_v58 = vld [vmem:[#allocation9 + $0xa24] ss:$40 sps:$4 sm:$0xff]  }
 0x93a   : > { %15808 = vmatprep.subr.bf16.mxu1 %v22683_v36  ;;  %v22747_v36 = vld [vmem:[#allocation9 + $0xa20] ss:$40 sps:$4 sm:$0xff]  }
 0x93b   : > { %15893 = vmatpush1.bf16.msra.mxu0 %v22678_v14  ;;  %v22750_v14 = vld [vmem:[#allocation12 + $0x40] sm:$0xff]  }
 0x93c   : > { %15894 = vmatprep.subr.bf16.mxu0 %v22686_v6  ;;  %v22751_v6 = vld [vmem:[#allocation12] sm:$0xff]  }
 0x93d   : > { %15809 = vmatpush1.bf16.msra.mxu1 %v22681_v62  ;;  %v22754_v62 = vld [vmem:[#allocation9 + $0xa74] ss:$40 sps:$4 sm:$0xff]  }
 0x93e   : > { %15810 = vmatprep.subr.bf16.mxu1 %v22689_v63  ;;  %v22752_v63 = vld [vmem:[#allocation9 + $0xa70] ss:$40 sps:$4 sm:$0xff]  }
 0x93f   : > { %15895 = vmatpush1.bf16.msra.mxu0 %v22684_v33  ;;  %v22755_v33 = vld [vmem:[#allocation12 + $0x48] sm:$0xff]  }
 0x940   : > { %15896 = vmatprep.subr.bf16.mxu0 %v22692_v0  ;;  %v22756_v0 = vld [vmem:[#allocation12 + $0x8] sm:$0xff]  }
 0x941   : > { %15811 = vmatpush1.bf16.msra.mxu1 %v22687_v2  ;;  %v22759_v2 = vld [vmem:[#allocation9 + $0xac4] ss:$40 sps:$4 sm:$0xff]  }
 0x942   : > { %15812 = vmatprep.subr.bf16.mxu1 %v22695_v8  ;;  %v22757_v8 = vld [vmem:[#allocation9 + $0xac0] ss:$40 sps:$4 sm:$0xff]  }
 0x943   : > { %15897 = vmatpush1.bf16.msra.mxu0 %v22690_v3  ;;  %v22760_v3 = vld [vmem:[#allocation12 + $0x50] sm:$0xff]  }
 0x944   : > { %15898 = vmatprep.subr.bf16.mxu0 %v22698_v29  ;;  %v22761_v29 = vld [vmem:[#allocation12 + $0x10] sm:$0xff]  }
 0x945   : > { %15813 = vmatpush1.bf16.msra.mxu1 %v22693_v10  ;;  %v22764_v10 = vld [vmem:[#allocation9 + $0xb14] ss:$40 sps:$4 sm:$0xff]  }
 0x946   : > { %15814 = vmatprep.subr.bf16.mxu1 %v22701_v23  ;;  %v22766_v23 = vld [vmem:[#allocation12 + $0x18] sm:$0xff]  }
 0x947   : > { %15899 = vmatpush1.bf16.msra.mxu0 %v22696_v13  ;;  %v22762_v13 = vld [vmem:[#allocation9 + $0xb10] ss:$40 sps:$4 sm:$0xff]  }
 0x948   : > { %15900 = vmatprep.subr.bf16.mxu0 %v22704_v47  ;;  %v22770_v47 = vld [vmem:[#allocation12 + $0x60] sm:$0xff]  }
 0x949   : > { %15815 = vmatpush1.bf16.msra.mxu1 %v22699_v48  ;;  %v22767_v48 = vld [vmem:[#allocation9 + $0xb60] ss:$40 sps:$4 sm:$0xff]  }
 0x94a   : > { %15816 = vmatprep.subr.bf16.mxu1 %v22707_v30  ;;  %v22775_v30 = vld [vmem:[#allocation12 + $0x68] sm:$0xff]  }
 0x94b   : > { %15901 = vmatpush1.bf16.msra.mxu0 %v22702_v52  ;;  %v22774_v52 = vld [vmem:[#allocation9 + $0xbb4] ss:$40 sps:$4 sm:$0xff]  }
 0x94c   : > { %15902 = vmatprep.subr.bf16.mxu0 %v22710_v15  ;;  %v22772_v15 = vld [vmem:[#allocation9 + $0xbb0] ss:$40 sps:$4 sm:$0xff]  }
 0x94d   : > { %15817 = vmatpush1.bf16.msra.mxu1 %v22705_v17  ;;  %v22776_v17 = vld [vmem:[#allocation12 + $0x28] sm:$0xff]  }
 0x94e   : > { %15818 = vmatprep.subr.bf16.mxu1 %v22713_v19  ;;  %v22780_v19 = vld [vmem:[#allocation12 + $0x70] sm:$0xff]  }
 0x94f   : > { %15903 = vmatpush1.bf16.msra.mxu0 %v22708_v18  ;;  %v22779_v18 = vld [vmem:[#allocation9 + $0xc04] ss:$40 sps:$4 sm:$0xff]  }
 0x950   : > { %15904 = vmatprep.subr.bf16.mxu0 %v22716_v60  ;;  %v22777_v60 = vld [vmem:[#allocation9 + $0xc00] ss:$40 sps:$4 sm:$0xff]  }
 0x951   : > { %15819 = vmatpush1.bf16.msra.mxu1 %v22711_v20  ;;  %v22781_v20 = vld [vmem:[#allocation12 + $0x30] sm:$0xff]  }
 0x952   : > { %15820 = vmatprep.subr.bf16.mxu1 %v22719_v53  ;;  %v22785_v53 = vld [vmem:[#allocation12 + $0x78] sm:$0xff]  }
 0x953   : > { %15905 = vmatpush1.bf16.msra.mxu0 %v22714_v21  ;;  %v22784_v21 = vld [vmem:[#allocation9 + $0xc54] ss:$40 sps:$4 sm:$0xff]  }
 0x954   : > { %15906 = vmatprep.subr.bf16.mxu0 %v22722_v7  ;;  %v22782_v7 = vld [vmem:[#allocation9 + $0xc50] ss:$40 sps:$4 sm:$0xff]  }
 0x955   : > { %15821 = vmatpush1.bf16.msra.mxu1 %v22717_v27  ;;  %v22786_v27 = vld [vmem:[#allocation12 + $0x38] sm:$0xff]  }
 0x956   : > { %15822 = vmatprep.subr.bf16.mxu1 %v22725_v31  ;;  %v22790_v31 = vld [vmem:[#allocation12 + $0xc0] sm:$0xff]  }
 0x957   : > { %15907 = vmatpush1.bf16.msra.mxu0 %v22720_v28  ;;  %v22789_v28 = vld [vmem:[#allocation9 + $0xca4] ss:$40 sps:$4 sm:$0xff]  }
 0x958   : > { %15908 = vmatprep.subr.bf16.mxu0 %v22728_v44  ;;  %v22787_v44 = vld [vmem:[#allocation9 + $0xca0] ss:$40 sps:$4 sm:$0xff]  }
 0x959   : > { %15823 = vmatpush1.bf16.msra.mxu1 %v22723_v32  ;;  %v22791_v32 = vld [vmem:[#allocation12 + $0x80] sm:$0xff]  }
 0x95a   : > { %15824 = vmatprep.subr.bf16.mxu1 %v22731_v37  ;;  %v22795_v37 = vld [vmem:[#allocation12 + $0xc8] sm:$0xff]  }
 0x95b   : > { %15909 = vmatpush1.bf16.msra.mxu0 %v22726_v59  ;;  %v22794_v59 = vld [vmem:[#allocation9 + $0xcf4] ss:$40 sps:$4 sm:$0xff]  }
 0x95c   : > { %15910 = vmatprep.subr.bf16.mxu0 %v22734_v38  ;;  %v22792_v38 = vld [vmem:[#allocation9 + $0xcf0] ss:$40 sps:$4 sm:$0xff]  }
 0x95d   : > { %15825 = vmatpush1.bf16.msra.mxu1 %v22729_v11  ;;  %v22796_v11 = vld [vmem:[#allocation12 + $0x88] sm:$0xff]  }
 0x95e   : > { %15826 = vmatprep.subr.bf16.mxu1 %v22737_v42  ;;  %v22800_v42 = vld [vmem:[#allocation12 + $0xd0] sm:$0xff]  }
 0x95f   : > { %15911 = vmatpush1.bf16.msra.mxu0 %v22732_v39  ;;  %v22799_v39 = vld [vmem:[#allocation9 + $0xd44] ss:$40 sps:$4 sm:$0xff]  }
 0x960   : > { %15912 = vmatprep.subr.bf16.mxu0 %v22740_v43  ;;  %v22797_v43 = vld [vmem:[#allocation9 + $0xd40] ss:$40 sps:$4 sm:$0xff]  }
 0x961   : > { %15827 = vmatpush1.bf16.msra.mxu1 %v22735_v41  ;;  %v22801_v41 = vld [vmem:[#allocation12 + $0x90] sm:$0xff]  }
 0x962   : > { %15828 = vmatprep.subr.bf16.mxu1 %v22743_v54  ;;  %v22805_v54 = vld [vmem:[#allocation12 + $0xd8] sm:$0xff]  }
 0x963   : > { %15913 = vmatpush1.bf16.msra.mxu0 %v22738_v56  ;;  %v22804_v56 = vld [vmem:[#allocation9 + $0xd94] ss:$40 sps:$4 sm:$0xff]  }
 0x964   : > { %15914 = vmatprep.subr.bf16.mxu0 %v22746_v34  ;;  %v22806_v34 = vld [vmem:[#allocation12 + $0x98] sm:$0xff]  }
 0x965   : > { %15829 = vmatpush1.bf16.msra.mxu1 %v22741_v24  ;;  %v22809_v24 = vld [vmem:[#allocation9 + $0xde4] ss:$40 sps:$4 sm:$0xff]  }
 0x966   : > { %19291 = vmatprep.subr.bf16.mxu1 %v22750_v14  ;;  %v22814_v14 = vld [vmem:[#allocation9 + $0xe34] ss:$40 sps:$4 sm:$0xff]  }
 0x967   : > { %15915 = vmatpush1.bf16.msra.mxu0 %v22744_v57  ;;  %v22807_v57 = vld [vmem:[#allocation9 + $0xde0] ss:$40 sps:$4 sm:$0xff]  }
 0x968   : > { %15927 = vmatprep.subr.bf16.mxu0 %v22749_v58  ;;  %15831 = vmatmul.mubr.bf16.vlgmr.msra.gmra.mrb[8].mxu1 %v25154_v40  ;;  %v22811_v58 = vld [vmem:[#allocation12 + $0xa0] sm:$0xff]  }
 0x969   : > { %19292 = vmatpush3.bf16.msra.mxu1 %v22751_v6  ;;  %16765 = vmatprep.mubr.bf16.mxu1 %v25192_v25  ;;  %v22769_v25 = vld [vmem:[#allocation9 + $0xb64] ss:$40 sps:$4 sm:$0xff]   ;;  %v22812_v6 = vld [vmem:[#allocation9 + $0xe30] ss:$40 sps:$4 sm:$0xff]  }
 0x96a   : > { %15917 = vmatmul.mubr.bf16.vlgmr.msra.gmra.mrb[8].mxu0 %v25109_v12  ;;  %19293 = vmatprep.subr.bf16.mxu1 %v22755_v33  ;;  %v22765_v12 = vld [vmem:[#allocation12 + $0x58] sm:$0xff]  }
 0x96b   : > { %15928 = vmatpush1.bf16.msra.mxu0 %v22747_v36  ;;  %15959 = vmatprep.mubr.bf16.mxu0 %v25118_v26  ;;  %v22771_v26 = vld [vmem:[#allocation12 + $0x20] sm:$0xff]   ;;  %v22815_v36 = vld [vmem:[#allocation12 + $0xe8] sm:$0xff]  }
 0x96c   : > { %15929 = vmatprep.subr.bf16.mxu0 %v22754_v62  ;;  %v22816_v62 = vld [vmem:[#allocation12 + $0xa8] sm:$0xff]   ;;  %v22819_v33 = vld [vmem:[#allocation9 + $0xe84] ss:$40 sps:$4 sm:$0xff]  }
 0x96d   : > { %19294 = vmatpush3.bf16.msra.mxu1 %v22756_v0  ;;  %v22817_v0 = vld [vmem:[#allocation9 + $0xe80] ss:$40 sps:$4 sm:$0xff]  }
 0x96e   : > { %19295 = vmatprep.subr.bf16.mxu1 %v22760_v3  ;;  %v22824_v3 = vld [vmem:[#allocation9 + $0xed4] ss:$40 sps:$4 sm:$0xff]  }
 0x96f   : > { %15930 = vmatpush1.bf16.msra.mxu0 %v22752_v63  ;;  %v22820_v63 = vld [vmem:[#allocation12 + $0xf0] sm:$0xff]  }
 0x970   : > { %15931 = vmatprep.subr.bf16.mxu0 %v22759_v2  ;;  %v22821_v2 = vld [vmem:[#allocation12 + $0xb0] sm:$0xff]  }
 0x971   : > { %19296 = vmatpush3.bf16.msra.mxu1 %v22761_v29  ;;  %v22822_v29 = vld [vmem:[#allocation9 + $0xed0] ss:$40 sps:$4 sm:$0xff]  }
 0x972   : > { %19297 = vmatprep.subr.bf16.mxu1 %v22765_v12  ;;  %v22829_v12 = vld [vmem:[#allocation9 + $0xf24] ss:$40 sps:$4 sm:$0xff]  }
 0x973   : > { %15932 = vmatpush1.bf16.msra.mxu0 %v22757_v8  ;;  %v22825_v8 = vld [vmem:[#allocation12 + $0xf8] sm:$0xff]  }
 0x974   : > { %15933 = vmatprep.subr.bf16.mxu0 %v22764_v10  ;;  %v22826_v10 = vld [vmem:[#allocation12 + $0xb8] sm:$0xff]  }
 0x975   : > { %19298 = vmatpush3.bf16.msra.mxu1 %v22766_v23  ;;  %v22827_v23 = vld [vmem:[#allocation9 + $0xf20] ss:$40 sps:$4 sm:$0xff]  }
 0x976   : > { %19299 = vmatprep.subr.bf16.mxu1 %v22770_v47  ;;  %v22834_v47 = vld [vmem:[#allocation9 + $0xf74] ss:$40 sps:$4 sm:$0xff]  }
 0x977   : > { %15934 = vmatpush1.bf16.msra.mxu0 %v22762_v13  ;;  %v22830_v13 = vld [vmem:[#allocation12 + $0x140] sm:$0xff]  }
 0x978   : > { %15935 = vmatprep.subr.bf16.mxu0 %v22769_v25  ;;  %v22831_v25 = vld [vmem:[#allocation12 + $0x100] sm:$0xff]  }
 0x979   : > { %19300 = vmatpush3.bf16.msra.mxu1 %v22771_v26  ;;  %v22832_v26 = vld [vmem:[#allocation9 + $0xf70] ss:$40 sps:$4 sm:$0xff]  }
 0x97a   : > { %19301 = vmatprep.subr.bf16.mxu1 %v22775_v30  ;;  %v22839_v30 = vld [vmem:[#allocation9 + $0xfc4] ss:$40 sps:$4 sm:$0xff]  }
 0x97b   : > { %15936 = vmatpush1.bf16.msra.mxu0 %v22767_v48  ;;  %v22835_v48 = vld [vmem:[#allocation12 + $0x148] sm:$0xff]  }
 0x97c   : > { %15937 = vmatprep.subr.bf16.mxu0 %v22774_v52  ;;  %v22836_v52 = vld [vmem:[#allocation12 + $0x108] sm:$0xff]  }
 0x97d   : > { %19302 = vmatpush3.bf16.msra.mxu1 %v22776_v17  ;;  %v22837_v17 = vld [vmem:[#allocation9 + $0xfc0] ss:$40 sps:$4 sm:$0xff]  }
 0x97e   : > { %19303 = vmatprep.subr.bf16.mxu1 %v22780_v19  ;;  %v22844_v19 = vld [vmem:[#allocation9 + $0x1014] ss:$40 sps:$4 sm:$0xff]  }
 0x97f   : > { %15938 = vmatpush1.bf16.msra.mxu0 %v22772_v15  ;;  %v22840_v15 = vld [vmem:[#allocation12 + $0x150] sm:$0xff]  }
 0x980   : > { %15939 = vmatprep.subr.bf16.mxu0 %v22779_v18  ;;  %v22841_v18 = vld [vmem:[#allocation12 + $0x110] sm:$0xff]  }
 0x981   : > { %19304 = vmatpush3.bf16.msra.mxu1 %v22781_v20  ;;  %v22849_v20 = vld [vmem:[#allocation9 + $0x1064] ss:$40 sps:$4 sm:$0xff]  }
 0x982   : > { %19305 = vmatprep.subr.bf16.mxu1 %v22785_v53  ;;  %v22847_v53 = vld [vmem:[#allocation9 + $0x1060] ss:$40 sps:$4 sm:$0xff]  }
 0x983   : > { %15940 = vmatpush1.bf16.msra.mxu0 %v22777_v60  ;;  %v22846_v60 = vld [vmem:[#allocation12 + $0x118] sm:$0xff]  }
 0x984   : > { %15941 = vmatprep.subr.bf16.mxu0 %v22784_v21  ;;  %v22850_v21 = vld [vmem:[#allocation12 + $0x160] sm:$0xff]  }
 0x985   : > { %19306 = vmatpush3.bf16.msra.mxu1 %v22786_v27  ;;  %v22855_v27 = vld [vmem:[#allocation12 + $0x168] sm:$0xff]  }
 0x986   : > { %19313 = vmatprep.subr.bf16.mxu1 %v22790_v31 }
 0x987   : > { %15942 = vmatpush1.bf16.msra.mxu0 %v22782_v7  ;;  %v22854_v7 = vld [vmem:[#allocation9 + $0x10b4] ss:$40 sps:$4 sm:$0xff]  }
 0x988   : > { %15943 = vmatprep.subr.bf16.mxu0 %v22789_v28  ;;  %16766 = vmatmul.mubr.bf16.vlgmr.msra.gmra.mrb[12].mxu1 %v25190_v61  ;;  %v22802_v61 = vld [vmem:[#allocation9 + $0xd90] ss:$40 sps:$4 sm:$0xff]   ;;  %v25225_v28 = vld [vmem:[#allocation11] sm:$0xff] }
 0x989   : > { %19314 = vmatpush3.bf16.msra.mxu1 %v22791_v32  ;;  %16806 = vmatprep.mubr.bf16.mxu1 %v25210_v55  ;;  %v22810_v55 = vld [vmem:[#allocation12 + $0xe0] sm:$0xff]   ;;  %v10950_v31 = vrot.slane %v25225_v28, %v10045_v50 }
 0x98a   : > { %19315 = vmatprep.subr.bf16.mxu1 %v22795_v37  ;;  %v22852_v32 = vld [vmem:[#allocation9 + $0x10b0] ss:$40 sps:$4 sm:$0xff]   ;;  %v22859_v37 = vld [vmem:[#allocation9 + $0x1104] ss:$40 sps:$4 sm:$0xff]   ;;  %v22857_v50 = vld [vmem:[#allocation9 + $0x1100] ss:$40 sps:$4 sm:$0xff]  }
 0x98b   : > { %15944 = vmatpush1.bf16.msra.mxu0 %v22787_v44  ;;  %v10954_v44 = vrot.slane %v25225_v28, %v10049_v49  ;;  %v22864_v49 = vld [vmem:[#allocation9 + $0x1154] ss:$40 sps:$4 sm:$0xff]  }
 0x98c   : > { %15945 = vmatprep.subr.bf16.mxu0 %v22794_v59  ;;  %v22856_v59 = vld [vmem:[#allocation12 + $0x128] sm:$0xff]  }
 0x98d   : > { %19316 = vmatpush3.bf16.msra.mxu1 %v22796_v11 }
 0x98e   : > { %19317 = vmatprep.subr.bf16.mxu1 %v22800_v42 }
 0x98f   : > { %15946 = vmatpush1.bf16.msra.mxu0 %v22792_v38  ;;  %v22860_v38 = vld [vmem:[#allocation12 + $0x170] sm:$0xff]  }
 0x990   : > { %15947 = vmatprep.subr.bf16.mxu0 %v22799_v39 }
 0x991   : > { %19318 = vmatpush3.bf16.msra.mxu1 %v22801_v41 }
 0x992   : > { %19319 = vmatprep.subr.bf16.mxu1 %v22805_v54 }
 0x993   : > { %15948 = vmatpush1.bf16.msra.mxu0 %v22797_v43 }
 0x994   : > { %15949 = vmatprep.subr.bf16.mxu0 %v22804_v56  ;;  %v22861_v56 = vld [vmem:[#allocation12 + $0x130] sm:$0xff]  }
 0x995   : > { %19320 = vmatpush3.bf16.msra.mxu1 %v22806_v34  ;;  %v22865_v34 = vld [vmem:[#allocation12 + $0x178] sm:$0xff]  }
 0x996   : > { %19321 = vmatprep.subr.bf16.mxu1 %v22810_v55 }
 0x997   : > { %15950 = vmatpush1.bf16.msra.mxu0 %v22802_v61 }
 0x998   : > { %15951 = vmatprep.subr.bf16.mxu0 %v22809_v24 }
 0x999   : > { %19322 = vmatpush3.bf16.msra.mxu1 %v22811_v58 }
 0x99a   : > { %19323 = vmatprep.subr.bf16.mxu1 %v22815_v36  ;;  %v22862_v36 = vld [vmem:[#allocation9 + $0x1150] ss:$40 sps:$4 sm:$0xff]  }
 0x99b   : > { %15952 = vmatpush1.bf16.msra.mxu0 %v22807_v57 }
 0x99c   : > { %15953 = vmatprep.subr.bf16.mxu0 %v22814_v14 }
 0x99d   : > { %19324 = vmatpush3.bf16.msra.mxu1 %v22816_v62 }
 0x99e   : > { %19325 = vmatprep.subr.bf16.mxu1 %v22820_v63 }
 0x99f   : > { %15954 = vmatpush1.bf16.msra.mxu0 %v22812_v6  ;;  %v22866_v6 = vld [vmem:[#allocation12 + $0x138] sm:$0xff]  }
 0x9a0   : > { %15955 = vmatprep.subr.bf16.mxu0 %v22819_v33  ;;  %v22869_v33 = vld [vmem:[#allocation9 + $0x11a4] ss:$40 sps:$4 sm:$0xff]  }
 0x9a1   : > { %19326 = vmatpush3.bf16.msra.mxu1 %v22821_v2  ;;  %v22867_v2 = vld [vmem:[#allocation9 + $0x11a0] ss:$40 sps:$4 sm:$0xff]  }
 0x9a2   : > { %19327 = vmatprep.subr.bf16.mxu1 %v22825_v8  ;;  %v22872_v8 = vld [vmem:[#allocation9 + $0x11f4] ss:$40 sps:$4 sm:$0xff]  }
 0x9a3   : > { %15956 = vmatpush1.bf16.msra.mxu0 %v22817_v0  ;;  %v22939_v0 = vld [vmem:[#allocation12 + $0x1c0] sm:$0xff]  }
 0x9a4   : > { %15957 = vmatprep.subr.bf16.mxu0 %v22824_v3  ;;  %v22940_v3 = vld [vmem:[#allocation12 + $0x180] sm:$0xff]  }
 0x9a5   : > { %19328 = vmatpush3.bf16.msra.mxu1 %v22826_v10  ;;  %v22870_v10 = vld [vmem:[#allocation9 + $0x11f0] ss:$40 sps:$4 sm:$0xff]  }
 0x9a6   : > { %19335 = vmatprep.subr.bf16.mxu1 %v22830_v13  ;;  %v22875_v13 = vld [vmem:[#allocation9 + $0x1244] ss:$40 sps:$4 sm:$0xff]  }
 0x9a7   : > { %15958 = vmatpush1.bf16.msra.mxu0 %v22822_v29  ;;  %v22941_v29 = vld [vmem:[#allocation12 + $0x1c8] sm:$0xff]  }
 0x9a8   : > { %15970 = vmatprep.subr.bf16.mxu0 %v22829_v12  ;;  %16807 = vmatmul.mubr.bf16.vlgmr.msra.gmra.mrb[16].mxu1 %v25208_v45  ;;  %v22845_v45 = vld [vmem:[#allocation12 + $0x158] sm:$0xff]   ;;  %v22942_v12 = vld [vmem:[#allocation12 + $0x188] sm:$0xff]  }
 0x9a9   : > { %19336 = vmatpush3.bf16.msra.mxu1 %v22831_v25  ;;  %v22873_v25 = vld [vmem:[#allocation9 + $0x1240] ss:$40 sps:$4 sm:$0xff]  }
 0x9aa   : > { %15960 = vmatmul.mubr.bf16.vlgmr.msra.gmra.mrb[8].mxu0 %v25126_v16  ;;  %19337 = vmatprep.subr.bf16.mxu1 %v22835_v48  ;;  %v22842_v16 = vld [vmem:[#allocation9 + $0x1010] ss:$40 sps:$4 sm:$0xff]   ;;  %v22878_v48 = vld [vmem:[#allocation9 + $0x1294] ss:$40 sps:$4 sm:$0xff]  }
 0x9ab   : > { %15971 = vmatpush1.bf16.msra.mxu0 %v22827_v23  ;;  %16002 = vmatprep.mubr.bf16.mxu0 %v25134_v5  ;;  %v22851_v5 = vld [vmem:[#allocation12 + $0x120] sm:$0xff]   ;;  %v22943_v23 = vld [vmem:[#allocation12 + $0x1d0] sm:$0xff]  }
 0x9ac   : > { %15972 = vmatprep.subr.bf16.mxu0 %v22834_v47  ;;  %v22944_v47 = vld [vmem:[#allocation12 + $0x190] sm:$0xff]  }
 0x9ad   : > { %19338 = vmatpush3.bf16.msra.mxu1 %v22836_v52  ;;  %v22876_v52 = vld [vmem:[#allocation9 + $0x1290] ss:$40 sps:$4 sm:$0xff]  }
 0x9ae   : > { %19339 = vmatprep.subr.bf16.mxu1 %v22840_v15  ;;  %v22881_v15 = vld [vmem:[#allocation9 + $0x12e4] ss:$40 sps:$4 sm:$0xff]  }
 0x9af   : > { %15973 = vmatpush1.bf16.msra.mxu0 %v22832_v26  ;;  %v22945_v26 = vld [vmem:[#allocation12 + $0x1d8] sm:$0xff]  }
 0x9b0   : > { %15974 = vmatprep.subr.bf16.mxu0 %v22839_v30  ;;  %v22946_v30 = vld [vmem:[#allocation12 + $0x198] sm:$0xff]  }
 0x9b1   : > { %19340 = vmatpush3.bf16.msra.mxu1 %v22841_v18  ;;  %v22879_v18 = vld [vmem:[#allocation9 + $0x12e0] ss:$40 sps:$4 sm:$0xff]  }
 0x9b2   : > { %19341 = vmatprep.subr.bf16.mxu1 %v22845_v45  ;;  %v22884_v45 = vld [vmem:[#allocation9 + $0x1334] ss:$40 sps:$4 sm:$0xff]  }
 0x9b3   : > { %15975 = vmatpush1.bf16.msra.mxu0 %v22837_v17  ;;  %v22947_v17 = vld [vmem:[#allocation12 + $0x1e0] sm:$0xff]  }
 0x9b4   : > { %15976 = vmatprep.subr.bf16.mxu0 %v22844_v19  ;;  %v22948_v19 = vld [vmem:[#allocation12 + $0x1a0] sm:$0xff]  }
 0x9b5   : > { %19342 = vmatpush3.bf16.msra.mxu1 %v22846_v60  ;;  %v22882_v60 = vld [vmem:[#allocation9 + $0x1330] ss:$40 sps:$4 sm:$0xff]  }
 0x9b6   : > { %19343 = vmatprep.subr.bf16.mxu1 %v22850_v21  ;;  %v22887_v21 = vld [vmem:[#allocation9 + $0x1384] ss:$40 sps:$4 sm:$0xff]  }
 0x9b7   : > { %15977 = vmatpush1.bf16.msra.mxu0 %v22842_v16  ;;  %v22949_v16 = vld [vmem:[#allocation12 + $0x1e8] sm:$0xff]  }
 0x9b8   : > { %15978 = vmatprep.subr.bf16.mxu0 %v22849_v20  ;;  %v22950_v20 = vld [vmem:[#allocation12 + $0x1a8] sm:$0xff]  }
 0x9b9   : > { %19344 = vmatpush3.bf16.msra.mxu1 %v22851_v5  ;;  %v22885_v5 = vld [vmem:[#allocation9 + $0x1380] ss:$40 sps:$4 sm:$0xff]  }
 0x9ba   : > { %19345 = vmatprep.subr.bf16.mxu1 %v22855_v27  ;;  %v22890_v27 = vld [vmem:[#allocation9 + $0x13d4] ss:$40 sps:$4 sm:$0xff]  }
 0x9bb   : > { %15979 = vmatpush1.bf16.msra.mxu0 %v22847_v53  ;;  %v22951_v53 = vld [vmem:[#allocation12 + $0x1f0] sm:$0xff]  }
 0x9bc   : > { %15980 = vmatprep.subr.bf16.mxu0 %v22854_v7  ;;  %v22952_v7 = vld [vmem:[#allocation12 + $0x1b0] sm:$0xff]  }
 0x9bd   : > { %v15617_v11 = vpop.f32.mrb[4].mxu0  ;;  %19346 = vmatpush3.bf16.msra.mxu1 %v22856_v59  ;;  %v22893_v59 = vld [vmem:[#allocation9 + $0x1424] ss:$40 sps:$4 sm:$0xff]  }
 0x9be   : > { %v19553_v39 = vadd.f32 %v15617_v11, %v10950_v31  ;;  %v15619_v42 = vpop.f32.mrb[5].mxu0  ;;  %19347 = vmatprep.subr.bf16.mxu1 %v22860_v38  ;;  %v22896_v38 = vld [vmem:[#allocation9 + $0x1474] ss:$40 sps:$4 sm:$0xff]   ;;  %v22894_v11 = vld [vmem:[#allocation9 + $0x1470] ss:$40 sps:$4 sm:$0xff]  }
 0x9bf   : > { %v19554_v43 = vadd.f32 %v15619_v42, %v10954_v44  ;;  %v15621_v41 = vpop.f32.mrb[6].mxu0  ;;  %15981 = vmatpush1.bf16.msra.mxu0 %v22852_v32  ;;  %v22954_v32 = vld [vmem:[#allocation12 + $0x1b8] sm:$0xff]  }
 0x9c0   : > { %v19555_v54 = vadd.f32 %v15621_v41, %v10950_v31  ;;  %v15623_v61 = vpop.f32.mrb[7].mxu0  ;;  %15982 = vmatprep.subr.bf16.mxu0 %v22859_v37  ;;  %v16060_v55 = vmax.f32 %v19553_v39, 0.0  ;;  %v22953_v31 = vld [vmem:[#allocation12 + $0x1f8] sm:$0xff]   ;;  %v22900_v41 = vld [vmem:[#allocation9 + $0x1510] ss:$40 sps:$4 sm:$0xff]  }
 0x9c1   : > { %v19556_v24 = vadd.f32 %v15623_v61, %v10954_v44  ;;  %v16061_v58 = vmax.f32 %v19554_v43, 0.0  ;;  %19348 = vmatpush3.bf16.msra.mxu1 %v22861_v56  ;;  %v22888_v44 = vld [vmem:[#allocation9 + $0x13d0] ss:$40 sps:$4 sm:$0xff]   ;;  %v22891_v37 = vld [vmem:[#allocation9 + $0x1420] ss:$40 sps:$4 sm:$0xff]  }
 0x9c2   : > { %v16070_v57 = vmax.f32 %v19555_v54, 0.0  ;;  %19349 = vmatprep.subr.bf16.mxu1 %v22865_v34  ;;  %v22899_v39 = vld [vmem:[#allocation9 + $0x14c4] ss:$40 sps:$4 sm:$0xff]   ;;  %v22897_v42 = vld [vmem:[#allocation9 + $0x14c0] ss:$40 sps:$4 sm:$0xff]  }
 0x9c3   : > { %v16071_v14 = vmax.f32 %v19556_v24, 0.0  ;;  %15983 = vmatpush1.bf16.msra.mxu0 %v22857_v50  ;;  %v22902_v43 = vld [vmem:[#allocation9 + $0x1514] ss:$40 sps:$4 sm:$0xff]   ;;  %v22905_v50 = vld [vmem:[#allocation9 + $0x1564] ss:$40 sps:$4 sm:$0xff]  }
 0x9c4   : > { %v16080_v62 = vpack.c.bf16 %v16070_v57, %v16060_v55  ;;  %15984 = vmatprep.subr.bf16.mxu0 %v22864_v49  ;;  %v22903_v56 = vld [vmem:[#allocation9 + $0x1560] ss:$40 sps:$4 sm:$0xff]   ;;  %v22908_v54 = vld [vmem:[#allocation9 + $0x15b4] ss:$40 sps:$4 sm:$0xff]   ;;  %v22911_v61 = vld [vmem:[#allocation9 + $0x1604] ss:$40 sps:$4 sm:$0xff]  }
 0x9c5   : > { %v16081_v63 = vpack.c.bf16 %v16071_v14, %v16061_v58  ;;  %19350 = vmatpush3.bf16.msra.mxu1 %v22866_v6  ;;  %v22914_v49 = vld [vmem:[#allocation9 + $0x1654] ss:$40 sps:$4 sm:$0xff]   ;;  %v22912_v34 = vld [vmem:[#allocation9 + $0x1650] ss:$40 sps:$4 sm:$0xff]   ;;  %v22917_v24 = vld [vmem:[#allocation9 + $0x16a4] ss:$40 sps:$4 sm:$0xff]  }
 0x9c6   : > { %19357 = vmatprep.subr.bf16.mxu1 %v22939_v0  ;;  %v22915_v55 = vld [vmem:[#allocation9 + $0x16a0] ss:$40 sps:$4 sm:$0xff]   ;;  %v22920_v57 = vld [vmem:[#allocation9 + $0x16f4] ss:$40 sps:$4 sm:$0xff]   ;;  %v22918_v58 = vld [vmem:[#allocation9 + $0x16f0] ss:$40 sps:$4 sm:$0xff]  }
 0x9c7   : > { %15985 = vmatpush1.bf16.msra.mxu0 %v22862_v36  ;;  %16847 = vmatprep.mubr.bf16.mxu1 %v16081_v63  ;;  %v22923_v14 = vld [vmem:[#allocation9 + $0x1744] ss:$40 sps:$4 sm:$0xff]   ;;  %v22921_v36 = vld [vmem:[#allocation9 + $0x1740] ss:$40 sps:$4 sm:$0xff]   ;;  %v22926_v6 = vld [vmem:[#allocation9 + $0x1794] ss:$40 sps:$4 sm:$0xff]  }
 0x9c8   : > { %15986 = vmatprep.subr.bf16.mxu0 %v22869_v33  ;;  %16848 = vmatmul.mubr.bf16.vlgmr.msra.gmra.mrb[20].mxu1 %v16080_v62  ;;  %v22924_v62 = vld [vmem:[#allocation9 + $0x1790] ss:$40 sps:$4 sm:$0xff]   ;;  %v22929_v33 = vld [vmem:[#allocation9 + $0x17e4] ss:$40 sps:$4 sm:$0xff]   ;;  %v22927_v63 = vld [vmem:[#allocation9 + $0x17e0] ss:$40 sps:$4 sm:$0xff]  }
 0x9c9   : > { %19358 = vmatpush3.bf16.msra.mxu1 %v22940_v3  ;;  %v22932_v0 = vld [vmem:[#allocation9 + $0x1834] ss:$40 sps:$4 sm:$0xff]   ;;  %v22935_v3 = vld [vmem:[#allocation9 + $0x1884] ss:$40 sps:$4 sm:$0xff]  }
 0x9ca   : > { %19359 = vmatprep.subr.bf16.mxu1 %v22941_v29  ;;  %v22938_v29 = vld [vmem:[#allocation9 + $0x18d4] ss:$40 sps:$4 sm:$0xff]  }
 0x9cb   : > { %15987 = vmatpush1.bf16.msra.mxu0 %v22867_v2  ;;  %v22930_v2 = vld [vmem:[#allocation9 + $0x1830] ss:$40 sps:$4 sm:$0xff]  }
 0x9cc   : > { %15988 = vmatprep.subr.bf16.mxu0 %v22872_v8  ;;  %v22933_v8 = vld [vmem:[#allocation9 + $0x1880] ss:$40 sps:$4 sm:$0xff]  }
 0x9cd   : > { %19360 = vmatpush3.bf16.msra.mxu1 %v22942_v12  ;;  %v22955_v12 = vld [vmem:[#allocation12 + $0x240] sm:$0xff]  }
 0x9ce   : > { %19361 = vmatprep.subr.bf16.mxu1 %v22943_v23  ;;  %v10962_v23 = vrot.slane %v25225_v28, %v10057_v51  ;;  %v22959_v51 = vld [vmem:[#allocation12 + $0x250] sm:$0xff]  }
 0x9cf   : > { %15989 = vmatpush1.bf16.msra.mxu0 %v22870_v10  ;;  %v22936_v10 = vld [vmem:[#allocation9 + $0x18d0] ss:$40 sps:$4 sm:$0xff]  }
 0x9d0   : > { %15990 = vmatprep.subr.bf16.mxu0 %v22875_v13  ;;  %v10958_v13 = vrot.slane %v25225_v28, %v10053_v22  ;;  %v22957_v22 = vld [vmem:[#allocation12 + $0x248] sm:$0xff]   ;;  %v22960_v28 = vld [vmem:[#allocation12 + $0x210] sm:$0xff]  }
 0x9d1   : > { %19362 = vmatpush3.bf16.msra.mxu1 %v22944_v47 }
 0x9d2   : > { %19363 = vmatprep.subr.bf16.mxu1 %v22945_v26 }
 0x9d3   : > { %15991 = vmatpush1.bf16.msra.mxu0 %v22873_v25 }
 0x9d4   : > { %15992 = vmatprep.subr.bf16.mxu0 %v22878_v48 }
 0x9d5   : > { %19364 = vmatpush3.bf16.msra.mxu1 %v22946_v30 }
 0x9d6   : > { %19365 = vmatprep.subr.bf16.mxu1 %v22947_v17 }
 0x9d7   : > { %15993 = vmatpush1.bf16.msra.mxu0 %v22876_v52 }
 0x9d8   : > { %15994 = vmatprep.subr.bf16.mxu0 %v22881_v15 }
 0x9d9   : > { %19366 = vmatpush3.bf16.msra.mxu1 %v22948_v19 }
 0x9da   : > { %19367 = vmatprep.subr.bf16.mxu1 %v22949_v16 }
 0x9db   : > { %15995 = vmatpush1.bf16.msra.mxu0 %v22879_v18 }
 0x9dc   : > { %15996 = vmatprep.subr.bf16.mxu0 %v22884_v45 }
 0x9dd   : > { %19368 = vmatpush3.bf16.msra.mxu1 %v22950_v20  ;;  %v22956_v20 = vld [vmem:[#allocation12 + $0x200] sm:$0xff]  }
 0x9de   : > { %19369 = vmatprep.subr.bf16.mxu1 %v22951_v53  ;;  %v22962_v53 = vld [vmem:[#allocation12 + $0x218] sm:$0xff]  }
 0x9df   : > { %15997 = vmatpush1.bf16.msra.mxu0 %v22882_v60 }
 0x9e0   : > { %15998 = vmatprep.subr.bf16.mxu0 %v22887_v21  ;;  %v22961_v21 = vld [vmem:[#allocation12 + $0x258] sm:$0xff]  }
 0x9e1   : > { %19370 = vmatpush3.bf16.msra.mxu1 %v22952_v7  ;;  %v22964_v7 = vld [vmem:[#allocation12 + $0x220] sm:$0xff]  }
 0x9e2   : > { %19371 = vmatprep.subr.bf16.mxu1 %v22953_v31 }
 0x9e3   : > { %15999 = vmatpush1.bf16.msra.mxu0 %v22885_v5  ;;  %v22963_v5 = vld [vmem:[#allocation12 + $0x260] sm:$0xff]  }
 0x9e4   : > { %16000 = vmatprep.subr.bf16.mxu0 %v22890_v27  ;;  %v22965_v27 = vld [vmem:[#allocation12 + $0x268] sm:$0xff]  }
 0x9e5   : > { %19372 = vmatpush3.bf16.msra.mxu1 %v22954_v32 }
 0x9e6   : > { %19379 = vmatprep.subr.bf16.mxu1 %v22955_v12 }
 0x9e7   : > { %16001 = vmatpush1.bf16.msra.mxu0 %v22888_v44 }
 0x9e8   : > { %16013 = vmatprep.subr.bf16.mxu0 %v22893_v59 }
 0x9ea   : > { %16003 = vmatmul.mubr.bf16.vlgmr.msra.gmra.mrb[8].mxu0 %v25144_v1  ;;  %v22906_v1 = vld [vmem:[#allocation9 + $0x15b0] ss:$40 sps:$4 sm:$0xff]  }
 0x9eb   : > { %16014 = vmatpush1.bf16.msra.mxu0 %v22891_v37  ;;  %16045 = vmatprep.mubr.bf16.mxu0 %v25146_v9  ;;  %v22909_v9 = vld [vmem:[#allocation9 + $0x1600] ss:$40 sps:$4 sm:$0xff]  }
 0x9ec   : > { %16015 = vmatprep.subr.bf16.mxu0 %v22896_v38 }
 0x9ef   : > { %16016 = vmatpush1.bf16.msra.mxu0 %v22894_v11  ;;  %v19205_v11 = vld [vmem:[#allocation14] ss:$0 sm:$0xff] }
 0x9f0   : > { %16017 = vmatprep.subr.bf16.mxu0 %v22899_v39  ;;  %v22966_v39 = vld [vmem:[#allocation12 + $0x228] sm:$0xff]  }
 0x9f3   : > { %16018 = vmatpush1.bf16.msra.mxu0 %v22897_v42 }
 0x9f4   : > { %16019 = vmatprep.subr.bf16.mxu0 %v22902_v43 }
 0x9f7   : > { %16020 = vmatpush1.bf16.msra.mxu0 %v22900_v41 }
 0x9f8   : > { %16021 = vmatprep.subr.bf16.mxu0 %v22905_v50 }
 0x9fb   : > { %16022 = vmatpush1.bf16.msra.mxu0 %v22903_v56 }
 0x9fc   : > { %16023 = vmatprep.subr.bf16.mxu0 %v22908_v54  ;;  %v22967_v54 = vld [vmem:[#allocation12 + $0x270] sm:$0xff]  }
 0x9ff   : > { %16024 = vmatpush1.bf16.msra.mxu0 %v22906_v1 }
 0xa00   : > { %16025 = vmatprep.subr.bf16.mxu0 %v22911_v61  ;;  %v22968_v61 = vld [vmem:[#allocation12 + $0x230] sm:$0xff]  }
 0xa03   : > { %16026 = vmatpush1.bf16.msra.mxu0 %v22909_v9 }
 0xa04   : > { %16027 = vmatprep.subr.bf16.mxu0 %v22914_v49 }
 0xa07   : > { %16028 = vmatpush1.bf16.msra.mxu0 %v22912_v34 }
 0xa08   : > { %16029 = vmatprep.subr.bf16.mxu0 %v22917_v24 }
 0xa0b   : > { %16030 = vmatpush1.bf16.msra.mxu0 %v22915_v55  ;;  %v22969_v55 = vld [vmem:[#allocation12 + $0x278] sm:$0xff]  }
 0xa0c   : > { %16031 = vmatprep.subr.bf16.mxu0 %v22920_v57  ;;  %v22970_v57 = vld [vmem:[#allocation12 + $0x238] sm:$0xff]  }
 0xa0f   : > { %16032 = vmatpush1.bf16.msra.mxu0 %v22918_v58 }
 0xa10   : > { %16033 = vmatprep.subr.bf16.mxu0 %v22923_v14 }
 0xa13   : > { %16034 = vmatpush1.bf16.msra.mxu0 %v22921_v36 }
 0xa14   : > { %16035 = vmatprep.subr.bf16.mxu0 %v22926_v6 }
 0xa17   : > { %16036 = vmatpush1.bf16.msra.mxu0 %v22924_v62 }
 0xa18   : > { %16037 = vmatprep.subr.bf16.mxu0 %v22929_v33 }
 0xa1b   : > { %16038 = vmatpush1.bf16.msra.mxu0 %v22927_v63 }
 0xa1c   : > { %16039 = vmatprep.subr.bf16.mxu0 %v22932_v0 }
 0xa1f   : > { %16040 = vmatpush1.bf16.msra.mxu0 %v22930_v2  ;;  %v10928_v2 = vld [vmem:[#allocation11 + $0x8] sm:$0x3] }
 0xa20   : > { %16041 = vmatprep.subr.bf16.mxu0 %v22935_v3  ;;  %v10966_v3 = vrot.slane %v10928_v2, %v25093_v4 }
 0xa23   : > { %16042 = vmatpush1.bf16.msra.mxu0 %v22933_v8  ;;  %v10970_v8 = vrot.slane %v10928_v2, %v25082_v35 }
 0xa24   : > { %16043 = vmatprep.subr.bf16.mxu0 %v22938_v29 }
 0xa27   : > { %16044 = vmatpush1.bf16.msra.mxu0 %v22936_v10 }
 0xa2a   : > { %16046 = vmatmul.mubr.bf16.vlgmr.msra.gmra.mrb[8].mxu0 %v25154_v40 }
 0xa3b   : > { %v15832_v25 = vpop.f32.mrb[8].mxu1 }
 0xa3c   : > { %v19557_v47 = vadd.f32 %v15832_v25, %v10958_v13  ;;  %v15834_v48 = vpop.f32.mrb[9].mxu1 }
 0xa3d   : > { %v19558_v26 = vadd.f32 %v15834_v48, %v10962_v23  ;;  %v15836_v52 = vpop.f32.mrb[10].mxu1 }
 0xa3e   : > { %v19559_v30 = vadd.f32 %v15836_v52, %v10958_v13  ;;  %v15838_v15 = vpop.f32.mrb[11].mxu1  ;;  %v16062_v18 = vmax.f32 %v19557_v47, 0.0 }
 0xa3f   : > { %v19560_v17 = vadd.f32 %v15838_v15, %v10962_v23  ;;  %v16063_v45 = vmax.f32 %v19558_v26, 0.0 }
 0xa40   : > { %v16072_v19 = vmax.f32 %v19559_v30, 0.0 }
 0xa41   : > { %v16073_v40 = vmax.f32 %v19560_v17, 0.0 }
 0xa42   : > { %v16082_v16 = vpack.c.bf16 %v16072_v19, %v16062_v18 }
 0xa43   : > { %v16083_v60 = vpack.c.bf16 %v16073_v40, %v16063_v45 }
 0xa45   : > { %16888 = vmatprep.mubr.bf16.mxu1 %v16083_v60 }
 0xa46   : > { %16889 = vmatmul.mubr.bf16.vlgmr.msra.gmra.mrb[24].mxu1 %v16082_v16 }
 0xa47   : > { %19380 = vmatpush3.bf16.msra.mxu1 %v22956_v20 }
 0xa48   : > { %19381 = vmatprep.subr.bf16.mxu1 %v22957_v22 }
 0xa4b   : > { %19382 = vmatpush3.bf16.msra.mxu1 %v22958_v46 }
 0xa4c   : > { %19383 = vmatprep.subr.bf16.mxu1 %v22959_v51 }
 0xa4f   : > { %19384 = vmatpush3.bf16.msra.mxu1 %v22960_v28 }
 0xa50   : > { %19385 = vmatprep.subr.bf16.mxu1 %v22961_v21 }
 0xa53   : > { %19386 = vmatpush3.bf16.msra.mxu1 %v22962_v53 }
 0xa54   : > { %19387 = vmatprep.subr.bf16.mxu1 %v22963_v5 }
 0xa57   : > { %19388 = vmatpush3.bf16.msra.mxu1 %v22964_v7 }
 0xa58   : > { %19389 = vmatprep.subr.bf16.mxu1 %v22965_v27 }
 0xa5b   : > { %v19307_v31 = vpop.f32.mrb[12].mxu1  ;;  %19390 = vmatpush3.bf16.msra.mxu1 %v22966_v39 }
 0xa5c   : > { %v19308_v44 = vpop.f32.mrb[13].mxu1  ;;  %19391 = vmatprep.subr.bf16.mxu1 %v22967_v54 }
 0xa5d   : > { %v19309_v32 = vadd.f32 %v19308_v44, %v19307_v31  ;;  %v19310_v59 = vpop.f32.mrb[14].mxu1 }
 0xa5e   : > { %v19311_v37 = vpop.f32.mrb[15].mxu1 }
 0xa5f   : > { %v19312_v38 = vadd.f32 %v19311_v37, %v19310_v59  ;;  %v16768_v41 = vadd.f32 %v19309_v32, %v19205_v11  ;;  %19392 = vmatpush3.bf16.msra.mxu1 %v22968_v61 }
 0xa60   : > { %19393 = vmatprep.subr.bf16.mxu1 %v22969_v55 }
 0xa61   : > { %v16771_v9 = vadd.f32 %v19312_v38, %v19205_v11 }
 0xa63   : > { %19394 = vmatpush3.bf16.msra.mxu1 %v22970_v57 }
 0xa7b   : > { %v19329_v42 = vpop.f32.mrb[16].mxu1 }
 0xa7c   : > { %v19330_v43 = vpop.f32.mrb[17].mxu1 }
 0xa7d   : > { %v19331_v50 = vadd.f32 %v19330_v43, %v19329_v42  ;;  %v19332_v56 = vpop.f32.mrb[18].mxu1 }
 0xa7e   : > { %v19333_v1 = vpop.f32.mrb[19].mxu1 }
 0xa7f   : > { %v16809_v49 = vadd.f32 %v19331_v50, %v16768_v41  ;;  %v19334_v34 = vadd.f32 %v19333_v1, %v19332_v56 }
 0xa81   : > { %v16812_v24 = vadd.f32 %v19334_v34, %v16771_v9 }
 0xa9b   : > { %v19351_v58 = vpop.f32.mrb[20].mxu1 }
 0xa9c   : > { %v19352_v14 = vpop.f32.mrb[21].mxu1 }
 0xa9d   : > { %v19353_v36 = vadd.f32 %v19352_v14, %v19351_v58  ;;  %v19354_v6 = vpop.f32.mrb[22].mxu1 }
 0xa9e   : > { %v19355_v62 = vpop.f32.mrb[23].mxu1 }
 0xa9f   : > { %v16850_v33 = vadd.f32 %v19353_v36, %v16809_v49  ;;  %v19356_v63 = vadd.f32 %v19355_v62, %v19354_v6 }
 0xaa1   : > { %v16853_v0 = vadd.f32 %v19356_v63, %v16812_v24 }
 0xafd   : > { %v16047_v29 = vpop.f32.mrb[8].mxu0 }
 0xafe   : > { %v19561_v10 = vadd.f32 %v16047_v29, %v10966_v3  ;;  %v16049_v12 = vpop.f32.mrb[9].mxu0 }
 0xaff   : > { %v19562_v13 = vadd.f32 %v16049_v12, %v10970_v8  ;;  %v16051_v23 = vpop.f32.mrb[10].mxu0 }
 0xb00   : > { %v19563_v25 = vadd.f32 %v16051_v23, %v10966_v3  ;;  %v16053_v47 = vpop.f32.mrb[11].mxu0  ;;  %v16064_v26 = vmax.f32 %v19561_v10, 0.0 }
 0xb01   : > { %v19564_v48 = vadd.f32 %v16053_v47, %v10970_v8  ;;  %v16065_v30 = vmax.f32 %v19562_v13, 0.0 }
 0xb02   : > { %v16074_v52 = vmax.f32 %v19563_v25, 0.0 }
 0xb03   : > { %v16075_v15 = vmax.f32 %v19564_v48, 0.0 }
 0xb04   : > { %v16084_v17 = vpack.c.bf16 %v16074_v52, %v16064_v26 }
 0xb05   : > { %v16085_v18 = vpack.c.bf16 %v16075_v15, %v16065_v30 }
 0xb07   : > { %16929 = vmatprep.mubr.bf16.mxu1 %v16085_v18 }
 0xb08   : > { %16930 = vmatmul.mubr.bf16.vlgmr.msra.gmra.mrb[28].mxu1 %v16084_v17 }
 0xb19   : > { %v19373_v19 = vpop.f32.mrb[24].mxu1 }
 0xb1a   : > { %v19374_v4 = vpop.f32.mrb[25].mxu1 }
 0xb1b   : > { %v19375_v45 = vadd.f32 %v19374_v4, %v19373_v19  ;;  %v19376_v35 = vpop.f32.mrb[26].mxu1 }
 0xb1c   : > { %v19377_v40 = vpop.f32.mrb[27].mxu1 }
 0xb1d   : > { %v16891_v16 = vadd.f32 %v19375_v45, %v16850_v33  ;;  %v19378_v60 = vadd.f32 %v19377_v40, %v19376_v35 }
 0xb1f   : > { %v16894_v20 = vadd.f32 %v19378_v60, %v16853_v0 }
 0xbdb   : > { %v19395_v22 = vpop.f32.mrb[28].mxu1 }
 0xbdc   : > { %v19396_v46 = vpop.f32.mrb[29].mxu1 }
 0xbdd   : > { %v19397_v51 = vadd.f32 %v19396_v46, %v19395_v22  ;;  %v19398_v28 = vpop.f32.mrb[30].mxu1 }
 0xbde   : > { %v19399_v21 = vpop.f32.mrb[31].mxu1 }
 0xbdf   : > { %v16932_v53 = vadd.f32 %v19397_v51, %v16891_v16  ;;  %v19400_v5 = vadd.f32 %v19399_v21, %v19398_v28 }
 0xbe1   : > { %16938 = vst [vmem:[#allocation15] sm:$0xff] %v16932_v53  ;;  %v16935_v7 = vadd.f32 %v19400_v5, %v16894_v20 }
 0xbe3   : > { %16939 = vst [vmem:[#allocation15 + $0x8] sm:$0xff] %v16935_v7 }
 0xbe4 PF: > { %p19706_p0 = scmp.eq.s32.totalorder %s23357_s30, 1  ;;  %s23285_s27 = smov [#allocation15]  }
 0xbe5   : > { %s16949_s8 = sshll.u32 %s23285_s27, 4  ;;  %s16950_s8 = int_to_ptr.vmem [resolvable:$true] %s16949_s8 }
 0xbe6   : > { %s23173_s9 = scalar_lea.vmem %s16950_s8, 256  ;;  %p23180_p12 = scmp.lt.s32.totalorder %s16950_s8, %s16950_s8 }
 0xbe7   : > { %p23174_p6 = scmp.ne.s32.totalorder %s16950_s8, %s23173_s9  ;;  %p23181_p9 = scmp.lt.s32.totalorder %s23173_s9, %s23173_s9 }
 0xbe9   : > { %p23175_p8 = pnand %p23174_p6, %p19706_p0  ;;  %p23182_p5 = por %p23181_p9, %p23180_p12 }
 0xbeb   : > { %p23176_p10 = pneg %p23175_p8 }
 0xbed   : > { %p23183_p1 = pnand %p23182_p5, %p23176_p10 }
 0xbef   : > { %23186 = shalt.err (!%p23183_p1)
}
 0xbf0   : > { %s25323_s19 = sld [smem:[#allocation26_spill]] }
 0xbf6   : > { %s23187_s21 = scalar_lea.hbm %s25323_s19, 256 }
 0xbf7   : > { %p23188_p4 = scmp.ne.s32.totalorder %s25323_s19, %s23187_s21  ;;  %p23193_p13 = scmp.lt.u32.totalorder %s23187_s21, %s25323_s19 }
 0xbf9   : > { %p23189_p7 = pnand %p23188_p4, %p19706_p0 }
 0xbfb   : > { %p23190_p11 = pneg %p23189_p7 }
 0xbfd   : > { %p23195_p2 = pnand %p23193_p13, %p23190_p11 }
 0xbff   : > { %23198 = shalt.err (!%p23195_p2)
}
 0xc00   : > { %s23286_s4 = smov 128   ;;  %s23287_s12 = smov 8  }
 0xc01   : > { %19669 = dma.vmem_to_hbm [thread:$0]  (%p19706_p0), %s16950_s8, 256, %s25323_s19, [#allocation5], %s23286_s4, %s23286_s4, %s23287_s12  }
 0xc02   : > { %23244 = dma.done.wait (%p19706_p0), [#allocation5], 256  }
 0xc03   : > { %23246 = vsyncadd (%p19706_p0), [#allocation5], 4294967040 }
 0xc04 PF: > { %s26_s29 = sadd.s32 1, %s23269_s29   ;;  %s25324_s24 = smov %s23253_s25 }
 0xc05   : > { %p23_p3 = scmp.ge.s32.totalorder %s26_s29, 4   ;;  %s25325_s25 = smov %s23257_s26 }
 0xc06   : > { %s25326_s26 = smov %s23508_s10  ;;  %s25327_s27 = smov %s23265_s28 }
 0xc07   : > { %s25328_s28 = smov %s25330_s16  ;;  %25 = sbr.rel (!%p23_p3) target bundleno = 15 (0xf), region = 127 }
 0xc0e   :  { %16965 = vsyncpa [#allocation4], 1 }
 0xc0f   :  { %16967 = vsyncpa [#allocation4 + $0x1], 1 }
 0xc10   :  { %16968 = vsyncpa [#allocation7], 1 }
 0xc11   :  { %16970 = vsyncpa [#allocation7 + $0x1], 1 }
 0xc12   :  { %16971 = vsyncpa [#allocation10], 1 }
 0xc13   :  { %16972 = vsyncpa [#allocation13], 1 }
 0xc14   :  { %16973 = vsyncpa [#allocation5], 1 }
 0xc15   :  { %16975 = vsyncpa [#allocation5 + $0x1], 1 }

</bundles_post_ra>
